<compile_context>
chip_gen: v7x
topology: tpu7x:2x2x1
jax: 0.10.0
libtpu: 0.0.40
codegen_flags: <defaults>
</compile_context>

<pallas_src>
import functools
from math import floor, ceil

import jax
import jax.numpy as jnp
from jax import lax
from jax.experimental import pallas as pl
from jax.experimental.pallas import tpu as pltpu

NEG_SLOPE = 0.01  # PyTorch nn.LeakyReLU default negative_slope


def _get_padding(kernel_size: int, dilation: int) -> int:
    assert kernel_size % 2 == 1
    return dilation * (kernel_size - 1) // 2


def _get_strided_padding(stride: int):
    half = stride / 2
    return (floor(half), ceil(half))


def _leaky(x):
    return jnp.where(x > 0, x, NEG_SLOPE * x)


# --------------------------- roll availability probe ------------------------------

@functools.lru_cache(maxsize=None)
def _roll_support():
    """Probe pltpu.roll lowering + its shift-sign convention on this backend.

    Returns (supported, sign) where passing shift=(sign*off) % n yields
    y[:, m] = x[:, (m + off) mod n].
    """
    try:
        probe = jnp.tile(jnp.arange(128, dtype=jnp.float32)[None, :], (8, 1))

        def k(x_ref, o_ref):
            o_ref[...] = pltpu.roll(x_ref[...], 1, 1)

        out = pl.pallas_call(
            k, out_shape=jax.ShapeDtypeStruct((8, 128), jnp.float32))(probe)
        out = jax.block_until_ready(out)
        o0, o1 = float(out[0, 0]), float(out[0, 1])
        if o0 == 127.0 and o1 == 0.0:      # jnp.roll convention: y[i] = x[i - shift]
            return True, -1
        if o0 == 1.0 and o1 == 2.0:        # opposite convention: y[i] = x[i + shift]
            return True, +1
        return False, -1
    except Exception:
        return False, -1


# --------------------- in-kernel helpers (operate on values) ----------------------

class _ShiftCtx:
    """Per-trace memoized lane iota, roll boundary masks, (fallback) shift mats.

    shift(x, off)[:, m] = x[:, m + off], zero-filled outside [0, n)."""

    def __init__(self, n_lanes, use_roll, roll_sign):
        self.n = n_lanes
        self.use_roll = use_roll
        self.sign = roll_sign
        self.lane = lax.broadcasted_iota(jnp.int32, (1, n_lanes), 1)
        self._masks = {}
        self._mats = {}

    def _mask(self, off):
        m = self._masks.get(off)
        if m is None:
            m = (self.lane < self.n - off) if off > 0 else (self.lane >= -off)
            self._masks[off] = m
        return m

    def _mat(self, off):  # fallback path only (roll unavailable)
        m = self._mats.get(off)
        if m is None:
            j = lax.broadcasted_iota(jnp.int32, (self.n, self.n), 0)
            k = lax.broadcasted_iota(jnp.int32, (self.n, self.n), 1)
            m = (j == k + off).astype(jnp.float32)
            self._mats[off] = m
        return m

    def shift(self, x, off):
        if off == 0:
            return x
        if abs(off) >= self.n:
            return jnp.zeros_like(x)
        if self.use_roll:
            rolled = pltpu.roll(x, (self.sign * off) % self.n, 1)  # XLU, wraps
            return jnp.where(self._mask(off), rolled, 0.0)         # zero the wrap
        # exact but O(n^2) fallback (previous version's proven path)
        return jnp.dot(x, self._mat(off), preferred_element_type=jnp.float32)


def _conv_poly(phases, wf, b, *, K, dilation, pre_leaky, sctx, vmask, dot):
    """'same'-padded Conv1d on a Q-phase signal: one (Cout, K*Cin)@(K*Cin, Lb) dot
    per output phase; taps are shared/memoized across phases."""
    Q = len(phases)
    xs = [_leaky(p) for p in phases] if pre_leaky else list(phases)
    pad = dilation * (K - 1) // 2
    taps = {}

    def tap(r):  # x[:, Q*m + r] == phase[r % Q][:, m + r // Q]
        if r not in taps:
            taps[r] = sctx.shift(xs[r % Q], r // Q)
        return taps[r]

    outs = []
    for p in range(Q):
        if K == 1:
            stack = xs[p]
        else:
            stack = jnp.concatenate(
                [tap(p + k * dilation - pad) for k in range(K)], axis=0)
        outs.append(jnp.where(vmask, dot(wf, stack) + b, 0.0))
    return outs


def _upconv_poly(phases, wp, b, *, stride, qs, sctx, vmask, dot):
    """LeakyReLU + ConvTranspose1d(Cin->Cout, K=2*stride, padding=ceil(s/2),
    output_padding=s%2) in polyphase form: Q_in phases -> stride*Q_in phases.
    No zero-stuffed array, no interleave matmul."""
    Q = len(phases)
    s = stride
    xs = [_leaky(p) for p in phases]
    taps = {}

    def tap(r):
        if r not in taps:
            taps[r] = sctx.shift(xs[r % Q], r // Q)
        return taps[r]

    outs = [None] * (s * Q)
    for j in range(Q):          # input phase (time t = Q*m + j)
        for p in range(s):      # transpose-conv sub-phase (output time s*t + p)
            q = qs[p]
            stack = jnp.concatenate([tap(j + q), tap(j + q - 1)], axis=0)
            outs[s * j + p] = jnp.where(vmask, dot(wp[p], stack) + b, 0.0)
    return outs


# ------------------------------ fused decoder kernel ------------------------------

def _decoder_kernel(*refs, plan, n_valid, use_roll, roll_sign):
    x_ref, w_refs, out_ref = refs[0], refs[1:-1], refs[-1]
    n_lanes = x_ref.shape[-1]
    sctx = _ShiftCtx(n_lanes, use_roll, roll_sign)
    vmask = sctx.lane < n_valid          # per-phase valid block count == input L

    def dot(w, x):                       # MXU dot in the folded-weight dtype (bf16/f32)
        return jnp.dot(w, x.astype(w.dtype), preferred_element_type=jnp.float32)

    it = iter(w_refs)

    def ld():
        return next(it)[...]

    phases = [x_ref[...].astype(jnp.float32)]     # Q = 1 to start
    for op in plan:
        kind = op["kind"]
        if kind == "conv":
            wf, b = ld(), ld()
            phases = _conv_poly(phases, wf, b, K=op["K"], dilation=op["dilation"],
                                pre_leaky=op["pre_leaky"], sctx=sctx, vmask=vmask,
                                dot=dot)
        elif kind == "upconv":
            wp, b = ld(), ld()
            phases = _upconv_poly(phases, wp, b, stride=op["stride"], qs=op["qs"],
                                  sctx=sctx, vmask=vmask, dot=dot)
        elif kind == "res_unit":
            wd, bd, w1, b1 = ld(), ld(), ld(), ld()
            t = _conv_poly(phases, wd, bd, K=7, dilation=op["dilation"],
                           pre_leaky=True, sctx=sctx, vmask=vmask, dot=dot)
            u = _conv_poly(t, w1, b1, K=1, dilation=1, pre_leaky=True,
                           sctx=sctx, vmask=vmask, dot=dot)
            phases = [h + r for h, r in zip(phases, u)]
        elif kind == "head_gate":
            wf, b = ld(), ld()            # single (4, 7*Cin) dot; rows 0:2 / 2:4
            wa = _conv_poly(phases, wf, b, K=op["K"], dilation=1, pre_leaky=True,
                            sctx=sctx, vmask=vmask, dot=dot)
            phases = [o[0:2] * (1.0 / (1.0 + jnp.exp(-o[2:4]))) for o in wa]
        else:
            raise ValueError(kind)

    for q, ph in enumerate(phases):       # lane-dense (C, 128-multiple) stores
        out_ref[q] = ph.astype(out_ref.dtype)


# ------------------------------- prepare / forward --------------------------------

def prepare_decoder(params, mxu_dtype=jnp.bfloat16):
    """One-time weight folding into kernel-ready operands + a static layer plan.
    MXU-feeding weights are stored in `mxu_dtype` (bf16 for v6e/v7x/v5e MXU);
    biases stay f32 and are added to the f32 accumulators."""
    plan, ops = [], []

    def fold_conv(p):
        w, b = p["w"], p["b"]                       # (Cout, Cin, K), (Cout,)
        Cout, Cin, K = w.shape
        wf = jnp.transpose(w, (0, 2, 1)).reshape(Cout, K * Cin).astype(mxu_dtype)
        return wf, b.reshape(Cout, 1).astype(jnp.float32), K

    wf, b2, K = fold_conv(params["input_conv"])
    plan.append(dict(kind="conv", K=K, dilation=1, pre_leaky=False))
    ops += [wf, b2]

    upsample = 1
    for blk in params["blocks"]:
        s = blk["stride"]
        upsample *= s
        w, b = blk["upconv"]["w"], blk["upconv"]["b"]   # (Cin, Cout, 2s), (Cout,)
        padding = _get_strided_padding(s)[1]
        wps, qs = [], []
        for p in range(s):
            k0 = (p + padding) % s
            q = (p + padding) // s
            w_a = jnp.transpose(w[:, :, k0])            # multiplies x[:, t+q]
            w_b = jnp.transpose(w[:, :, k0 + s])        # multiplies x[:, t+q-1]
            wps.append(jnp.concatenate([w_a, w_b], axis=1))    # (Cout, 2*Cin)
            qs.append(int(q))
        plan.append(dict(kind="upconv", stride=s, qs=tuple(qs)))
        ops += [jnp.stack(wps, axis=0).astype(mxu_dtype),
                b.reshape(-1, 1).astype(jnp.float32)]

        for unit in blk["units"]:
            wd, bd, _ = fold_conv(unit["conv_dil"])
            w1, b1, _ = fold_conv(unit["conv_1x1"])
            plan.append(dict(kind="res_unit", dilation=unit["dilation"]))
            ops += [wd, bd, w1, b1]

    wf, b2, K = fold_conv(params["head"])               # (4, 7*Cin): ONE head dot
    plan.append(dict(kind="head_gate", K=K))
    ops += [wf, b2]

    return dict(plan=tuple(plan), ops=tuple(ops), upsample=upsample, out_channels=2)


def decoder_forward_pallas(prepared, x, *, use_roll=None, lane_block=128):
    B, Cin, L = x.shape
    upsample = prepared["upsample"]
    Cout = prepared["out_channels"]
    ops = prepared["ops"]

    supported, roll_sign = _roll_support()
    if use_roll is None:
        use_roll = supported

    # Pad the sequence axis up to a lane-dense multiple of 128.  Inside the kernel
    # the lane dim stays at Lp for every layer (upsampling multiplies the number of
    # polyphase blocks, not the lane dim), so every dot and store is lane-dense.
    Lp = max(lane_block, int(pl.cdiv(L, lane_block)) * lane_block)
    xp = jnp.pad(x, ((0, 0), (0, 0), (0, Lp - L))) if Lp != L else x

    in_specs = [pl.BlockSpec((None, Cin, Lp), lambda i: (i, 0, 0))]
    for o in ops:  # small weights: full-array blocks, resident across grid steps
        in_specs.append(pl.BlockSpec(o.shape, (lambda i, nd=o.ndim: (0,) * nd)))
    out_specs = pl.BlockSpec((None, upsample, Cout, Lp), lambda i: (i, 0, 0, 0))

    kernel = functools.partial(_decoder_kernel, plan=prepared["plan"],
                               n_valid=L, use_roll=use_roll, roll_sign=roll_sign)
    yph = pl.pallas_call(
        kernel,
        out_shape=jax.ShapeDtypeStruct((B, upsample, Cout, Lp), x.dtype),
        grid=(B,),
        in_specs=in_specs,
        out_specs=out_specs,
        compiler_params=pltpu.CompilerParams(
            dimension_semantics=("parallel",),
            vmem_limit_bytes=48 * 1024 * 1024),
    )(xp, *ops)

    # Free de-interleave in XLA: (B, Q, C, Lp) -> (B, C, Lp, Q) -> (B, C, Lp*Q),
    # then drop the lane padding (valid output length = L * upsample).
    y = jnp.transpose(yph, (0, 2, 3, 1)).reshape(B, Cout, Lp * upsample)
    return y[:, :, : L * upsample]


# --------------------------- pure-JAX reference (check) ---------------------------

def _ref_conv1d(x, w, b, *, dilation=1, padding=0, pre_leaky=False):
    B, Cin, L = x.shape
    Cout, _, K = w.shape
    Lout = L + 2 * padding - dilation * (K - 1)
    xin = _leaky(x) if pre_leaky else x
    xp = jnp.pad(xin, ((0, 0), (0, 0), (padding, padding)))
    acc = jnp.zeros((B, Cout, Lout), jnp.float32)
    for k in range(K):
        xk = xp[:, :, k * dilation:k * dilation + Lout]
        acc = acc + jnp.einsum("oc,bcl->bol", w[:, :, k], xk,
                               precision=jax.lax.Precision.HIGHEST)
    return acc + b[None, :, None]


def _ref_conv_transpose1d(x, w, b, *, stride, padding, output_padding, pre_leaky):
    B, Cin, L = x.shape
    _, Cout, K = w.shape
    xin = _leaky(x) if pre_leaky else x
    if stride > 1:
        xu = jnp.zeros((B, Cin, (L - 1) * stride + 1), xin.dtype)
        xu = xu.at[:, :, ::stride].set(xin)
    else:
        xu = xin
    pad_l = K - 1 - padding
    pad_r = K - 1 - padding + output_padding
    xu = jnp.pad(xu, ((0, 0), (0, 0), (pad_l, pad_r)))
    wc = jnp.transpose(w[:, :, ::-1], (1, 0, 2))
    return _ref_conv1d(xu, wc, b, dilation=1, padding=0, pre_leaky=False)


def decoder_forward_ref(params, x):
    h = _ref_conv1d(x, params["input_conv"]["w"], params["input_conv"]["b"],
                    dilation=1, padding=_get_padding(3, 1), pre_leaky=False)
    for blk in params["blocks"]:
        s = blk["stride"]
        h = _ref_conv_transpose1d(h, blk["upconv"]["w"], blk["upconv"]["b"],
                                  stride=s, padding=_get_strided_padding(s)[1],
                                  output_padding=s % 2, pre_leaky=True)
        for unit in blk["units"]:
            d = unit["dilation"]
            t = _ref_conv1d(h, unit["conv_dil"]["w"], unit["conv_dil"]["b"],
                            dilation=d, padding=_get_padding(7, d), pre_leaky=True)
            h = h + _ref_conv1d(t, unit["conv_1x1"]["w"], unit["conv_1x1"]["b"],
                                dilation=1, padding=0, pre_leaky=True)
    wa = _ref_conv1d(h, params["head"]["w"], params["head"]["b"],
                     dilation=1, padding=_get_padding(7, 1), pre_leaky=True)
    waveform, amp = wa[:, :2], wa[:, 2:]
    return waveform * (1.0 / (1.0 + jnp.exp(-amp)))


# ----------------------------------- parameters -----------------------------------

def _uniform(key, shape, bound):
    return jax.random.uniform(key, shape, jnp.float32, -bound, bound)


def init_decoder_params(key, start_channels, dilations, strides, latent_size):
    assert len(dilations) == len(strides)
    keys = iter(jax.random.split(key, 256))

    def conv_p(cin, cout, k):
        bound = 1.0 / float(cin * k) ** 0.5
        return {"w": _uniform(next(keys), (cout, cin, k), bound),
                "b": _uniform(next(keys), (cout,), bound)}

    def convT_p(cin, cout, k):
        bound = 1.0 / float(cin * k) ** 0.5
        return {"w": _uniform(next(keys), (cin, cout, k), bound),
                "b": _uniform(next(keys), (cout,), bound)}

    params = {"input_conv": conv_p(latent_size, start_channels, 3), "blocks": []}
    ch = start_channels
    for block_dils, stride in zip(dilations, strides):
        assert ch % 2 == 0
        blk = {"stride": stride, "upconv": convT_p(ch, ch // 2, 2 * stride), "units": []}
        for d in block_dils:
            blk["units"].append({"dilation": d,
                                 "conv_dil": conv_p(ch // 2, ch // 2, 7),
                                 "conv_1x1": conv_p(ch // 2, ch // 2, 1)})
        params["blocks"].append(blk)
        ch //= 2
    params["head"] = conv_p(ch, 2 * 2, 7)
    return params


# -------------------------------------- main ---------------------------------------

if __name__ == "__main__":
    key = jax.random.PRNGKey(0)
    start_channels = 32
    dilations = [[1, 3], [1, 3]]
    strides = [2, 2]
    latent_size = 8
    B, L = 2, 16

    pkey, xkey = jax.random.split(key)
    params = init_decoder_params(pkey, start_channels, dilations, strides, latent_size)
    x = jax.random.normal(xkey, (B, latent_size, L), jnp.float32)
    upsample = strides[0] * strides[1]

    ref = decoder_forward_ref(params, x)

    # Exact-semantics check: f32 MXU weights vs. the f32 reference at 1e-3.
    prep_f32 = prepare_decoder(params, mxu_dtype=jnp.float32)
    out_f32 = jax.block_until_ready(decoder_forward_pallas(prep_f32, x))
    assert out_f32.shape == (B, 2, L * upsample), out_f32.shape
    err32 = float(jnp.max(jnp.abs(out_f32 - ref)))
    assert jnp.allclose(out_f32, ref, atol=1e-3, rtol=1e-3), f"f32 max_err={err32}"

    # Production path per the perf review: bf16 MXU operands, f32 accumulation and
    # f32 VPU/EUP math.  Looser tolerance reflects bf16 mantissa over ~12 layers.
    prep_bf16 = prepare_decoder(params, mxu_dtype=jnp.bfloat16)
    out_bf16 = jax.block_until_ready(decoder_forward_pallas(prep_bf16, x))
    assert out_bf16.shape == (B, 2, L * upsample), out_bf16.shape
    err16 = float(jnp.max(jnp.abs(out_bf16 - ref)))
    assert jnp.allclose(out_bf16, ref, atol=5e-2, rtol=5e-2), f"bf16 max_err={err16}"

    print("KERNEL_OK")
</pallas_src>

<mosaic_0001>
module attributes {stable_mosaic.version = 11 : i64} {
  func.func @k(%arg0: memref<8x128xf32, #tpu.memory_space<vmem>>, %arg1: memref<8x128xf32, #tpu.memory_space<vmem>>) attributes {dimension_semantics = [], scalar_prefetch = 0 : i64, scratch_operands = 0 : i64, tpu.core_type = #tpu.core_type<tc>} {
    %c0 = arith.constant 0 : index
    %c0_0 = arith.constant 0 : index
    %0 = vector.load %arg0[%c0, %c0_0] : memref<8x128xf32, #tpu.memory_space<vmem>>, vector<8x128xf32>
    %c1_i32 = arith.constant 1 : i32
    %1 = tpu.dynamic_rotate %0 by %c1_i32 dim 1 : vector<8x128xf32>, i32 -> vector<8x128xf32>
    %c0_1 = arith.constant 0 : index
    %c0_2 = arith.constant 0 : index
    %2 = vector.load %arg1[%c0_1, %c0_2] : memref<8x128xf32, #tpu.memory_space<vmem>>, vector<8x128xf32>
    tpu.vector_store %arg1[%c0_1, %c0_2], %1 {strides = array<i32>} : memref<8x128xf32, #tpu.memory_space<vmem>>, vector<8x128xf32>,
    return
  }
}

module attributes {stable_mosaic.version = 11 : i64} {
  func.func @_decoder_kernel(%arg0: i32, %arg1: memref<1x8x128xf32, #tpu.memory_space<vmem>>, %arg2: memref<32x24xf32, #tpu.memory_space<vmem>>, %arg3: memref<32x1xf32, #tpu.memory_space<vmem>>, %arg4: memref<2x16x64xf32, #tpu.memory_space<vmem>>, %arg5: memref<16x1xf32, #tpu.memory_space<vmem>>, %arg6: memref<16x112xf32, #tpu.memory_space<vmem>>, %arg7: memref<16x1xf32, #tpu.memory_space<vmem>>, %arg8: memref<16x16xf32, #tpu.memory_space<vmem>>, %arg9: memref<16x1xf32, #tpu.memory_space<vmem>>, %arg10: memref<16x112xf32, #tpu.memory_space<vmem>>, %arg11: memref<16x1xf32, #tpu.memory_space<vmem>>, %arg12: memref<16x16xf32, #tpu.memory_space<vmem>>, %arg13: memref<16x1xf32, #tpu.memory_space<vmem>>, %arg14: memref<2x8x32xf32, #tpu.memory_space<vmem>>, %arg15: memref<8x1xf32, #tpu.memory_space<vmem>>, %arg16: memref<8x56xf32, #tpu.memory_space<vmem>>, %arg17: memref<8x1xf32, #tpu.memory_space<vmem>>, %arg18: memref<8x8xf32, #tpu.memory_space<vmem>>, %arg19: memref<8x1xf32, #tpu.memory_space<vmem>>, %arg20: memref<8x56xf32, #tpu.memory_space<vmem>>, %arg21: memref<8x1xf32, #tpu.memory_space<vmem>>, %arg22: memref<8x8xf32, #tpu.memory_space<vmem>>, %arg23: memref<8x1xf32, #tpu.memory_space<vmem>>, %arg24: memref<4x56xf32, #tpu.memory_space<vmem>>, %arg25: memref<4x1xf32, #tpu.memory_space<vmem>>, %arg26: memref<1x4x2x128xf32, #tpu.memory_space<vmem>>) attributes {dimension_semantics = [#tpu.dimension_semantics<parallel>], iteration_bounds = array<i64: 2>, scalar_prefetch = 0 : i64, scratch_operands = 0 : i64, tpu.core_type = #tpu.core_type<tc>, window_params = [{transform_indices = @transform_0, window_bounds = array<i64: 1, 8, 128>}, {pipeline_mode = #tpu.pipeline_mode<synchronous>, transform_indices = @transform_1, window_bounds = array<i64: 32, 24>}, {pipeline_mode = #tpu.pipeline_mode<synchronous>, transform_indices = @transform_2, window_bounds = array<i64: 32, 1>}, {pipeline_mode = #tpu.pipeline_mode<synchronous>, transform_indices = @transform_3, window_bounds = array<i64: 2, 16, 64>}, {pipeline_mode = #tpu.pipeline_mode<synchronous>, transform_indices = @transform_4, window_bounds = array<i64: 16, 1>}, {pipeline_mode = #tpu.pipeline_mode<synchronous>, transform_indices = @transform_5, window_bounds = array<i64: 16, 112>}, {pipeline_mode = #tpu.pipeline_mode<synchronous>, transform_indices = @transform_6, window_bounds = array<i64: 16, 1>}, {pipeline_mode = #tpu.pipeline_mode<synchronous>, transform_indices = @transform_7, window_bounds = array<i64: 16, 16>}, {pipeline_mode = #tpu.pipeline_mode<synchronous>, transform_indices = @transform_8, window_bounds = array<i64: 16, 1>}, {pipeline_mode = #tpu.pipeline_mode<synchronous>, transform_indices = @transform_9, window_bounds = array<i64: 16, 112>}, {pipeline_mode = #tpu.pipeline_mode<synchronous>, transform_indices = @transform_10, window_bounds = array<i64: 16, 1>}, {pipeline_mode = #tpu.pipeline_mode<synchronous>, transform_indices = @transform_11, window_bounds = array<i64: 16, 16>}, {pipeline_mode = #tpu.pipeline_mode<synchronous>, transform_indices = @transform_12, window_bounds = array<i64: 16, 1>}, {pipeline_mode = #tpu.pipeline_mode<synchronous>, transform_indices = @transform_13, window_bounds = array<i64: 2, 8, 32>}, {pipeline_mode = #tpu.pipeline_mode<synchronous>, transform_indices = @transform_14, window_bounds = array<i64: 8, 1>}, {pipeline_mode = #tpu.pipeline_mode<synchronous>, transform_indices = @transform_15, window_bounds = array<i64: 8, 56>}, {pipeline_mode = #tpu.pipeline_mode<synchronous>, transform_indices = @transform_16, window_bounds = array<i64: 8, 1>}, {pipeline_mode = #tpu.pipeline_mode<synchronous>, transform_indices = @transform_17, window_bounds = array<i64: 8, 8>}, {pipeline_mode = #tpu.pipeline_mode<synchronous>, transform_indices = @transform_18, window_bounds = array<i64: 8, 1>}, {pipeline_mode = #tpu.pipeline_mode<synchronous>, transform_indices = @transform_19, window_bounds = array<i64: 8, 56>}, {pipeline_mode = #tpu.pipeline_mode<synchronous>, transform_indices = @transform_20, window_bounds = array<i64: 8, 1>}, {pipeline_mode = #tpu.pipeline_mode<synchronous>, transform_indices = @transform_21, window_bounds = array<i64: 8, 8>}, {pipeline_mode = #tpu.pipeline_mode<synchronous>, transform_indices = @transform_22, window_bounds = array<i64: 8, 1>}, {pipeline_mode = #tpu.pipeline_mode<synchronous>, transform_indices = @transform_23, window_bounds = array<i64: 4, 56>}, {pipeline_mode = #tpu.pipeline_mode<synchronous>, transform_indices = @transform_24, window_bounds = array<i64: 4, 1>}, {transform_indices = @transform_25, window_bounds = array<i64: 1, 4, 2, 128>}]} {
    %0 = tpu.iota {dimensions = array<i32: 1>} : vector<1x128xi32>
    %c16_i32 = arith.constant 16 : i32
    %1 = vector.broadcast %c16_i32 : i32 to vector<1x128xi32>
    %2 = arith.cmpi slt, %0, %1 : vector<1x128xi32>
    %c0 = arith.constant 0 : index
    %c0_0 = arith.constant 0 : index
    %c0_1 = arith.constant 0 : index
    %3 = vector.load %arg1[%c0, %c0_0, %c0_1] : memref<1x8x128xf32, #tpu.memory_space<vmem>>, vector<1x8x128xf32>
    %4 = vector.shape_cast %3 : vector<1x8x128xf32> to vector<8x128xf32>
    %c0_2 = arith.constant 0 : index
    %c0_3 = arith.constant 0 : index
    %5 = vector.load %arg2[%c0_2, %c0_3] : memref<32x24xf32, #tpu.memory_space<vmem>>, vector<32x24xf32>
    %c0_4 = arith.constant 0 : index
    %c0_5 = arith.constant 0 : index
    %6 = vector.load %arg3[%c0_4, %c0_5] : memref<32x1xf32, #tpu.memory_space<vmem>>, vector<32x1xf32>
    %7 = tpu.iota {dimensions = array<i32: 0>} : vector<128x128xi32>
    %8 = tpu.iota {dimensions = array<i32: 1>} : vector<128x128xi32>
    %c-1_i32 = arith.constant -1 : i32
    %9 = vector.broadcast %c-1_i32 : i32 to vector<128x128xi32>
    %10 = arith.addi %8, %9 : vector<128x128xi32>
    %11 = arith.cmpi eq, %7, %10 : vector<128x128xi32>
    %12 = arith.extui %11 : vector<128x128xi1> to vector<128x128xi32>
    %13 = arith.sitofp %12 : vector<128x128xi32> to vector<128x128xf32>
    %cst = arith.constant dense<0.000000e+00> : vector<8x128xf32>
    %14 = tpu.matmul %4, %13, %cst {dimension_numbers = #tpu.dot_dimension_numbers<[1], [0], [0], [1], [0, 0, 1, 1], [], []>} : vector<8x128xf32>, vector<128x128xf32>, vector<8x128xf32> -> vector<8x128xf32>
    %15 = tpu.iota {dimensions = array<i32: 0>} : vector<128x128xi32>
    %16 = tpu.iota {dimensions = array<i32: 1>} : vector<128x128xi32>
    %c1_i32 = arith.constant 1 : i32
    %17 = vector.broadcast %c1_i32 : i32 to vector<128x128xi32>
    %18 = arith.addi %16, %17 : vector<128x128xi32>
    %19 = arith.cmpi eq, %15, %18 : vector<128x128xi32>
    %20 = arith.extui %19 : vector<128x128xi1> to vector<128x128xi32>
    %21 = arith.sitofp %20 : vector<128x128xi32> to vector<128x128xf32>
    %cst_6 = arith.constant dense<0.000000e+00> : vector<8x128xf32>
    %22 = tpu.matmul %4, %21, %cst_6 {dimension_numbers = #tpu.dot_dimension_numbers<[1], [0], [0], [1], [0, 0, 1, 1], [], []>} : vector<8x128xf32>, vector<128x128xf32>, vector<8x128xf32> -> vector<8x128xf32>
    %23 = tpu.concatenate %14, %4, %22 in 0 : vector<8x128xf32>, vector<8x128xf32>, vector<8x128xf32> -> vector<24x128xf32>
    %cst_7 = arith.constant dense<0.000000e+00> : vector<32x128xf32>
    %24 = tpu.matmul %5, %23, %cst_7 {dimension_numbers = #tpu.dot_dimension_numbers<[1], [0], [0], [1], [0, 0, 1, 1], [], []>} : vector<32x24xf32>, vector<24x128xf32>, vector<32x128xf32> -> vector<32x128xf32>
    %25 = vector.broadcast %6 : vector<32x1xf32> to vector<32x128xf32>
    %26 = arith.addf %24, %25 : vector<32x128xf32>
    %cst_8 = arith.constant 0.000000e+00 : f32
    %27 = vector.shape_cast %2 : vector<1x128xi1> to vector<1x128xi1>
    %28 = vector.broadcast %27 : vector<1x128xi1> to vector<32x128xi1>
    %29 = vector.broadcast %cst_8 : f32 to vector<32x128xf32>
    %30 = arith.select %28, %26, %29 : vector<32x128xi1>, vector<32x128xf32>
    %c0_9 = arith.constant 0 : index
    %c0_10 = arith.constant 0 : index
    %c0_11 = arith.constant 0 : index
    %31 = vector.load %arg4[%c0_9, %c0_10, %c0_11] : memref<2x16x64xf32, #tpu.memory_space<vmem>>, vector<2x16x64xf32>
    %c0_12 = arith.constant 0 : index
    %c0_13 = arith.constant 0 : index
    %32 = vector.load %arg5[%c0_12, %c0_13] : memref<16x1xf32, #tpu.memory_space<vmem>>, vector<16x1xf32>
    %cst_14 = arith.constant 0.000000e+00 : f32
    %33 = vector.broadcast %cst_14 : f32 to vector<32x128xf32>
    %34 = arith.cmpf ogt, %30, %33 : vector<32x128xf32>
    %cst_15 = arith.constant 0.00999999977 : f32
    %35 = vector.broadcast %cst_15 : f32 to vector<32x128xf32>
    %36 = arith.mulf %35, %30 : vector<32x128xf32>
    %37 = arith.select %34, %30, %36 : vector<32x128xi1>, vector<32x128xf32>
    %cst_16 = arith.constant dense<0.000000e+00> : vector<32x128xf32>
    %38 = tpu.matmul %37, %13, %cst_16 {dimension_numbers = #tpu.dot_dimension_numbers<[1], [0], [0], [1], [0, 0, 1, 1], [], []>} : vector<32x128xf32>, vector<128x128xf32>, vector<32x128xf32> -> vector<32x128xf32>
    %39 = tpu.concatenate %37, %38 in 0 : vector<32x128xf32>, vector<32x128xf32> -> vector<64x128xf32>
    %40 = vector.extract_strided_slice %31 {offsets = [0, 0, 0], sizes = [1, 16, 64], strides = [1, 1, 1]} : vector<2x16x64xf32> to vector<1x16x64xf32>
    %41 = vector.shape_cast %40 : vector<1x16x64xf32> to vector<16x64xf32>
    %cst_17 = arith.constant dense<0.000000e+00> : vector<16x128xf32>
    %42 = tpu.matmul %41, %39, %cst_17 {dimension_numbers = #tpu.dot_dimension_numbers<[1], [0], [0], [1], [0, 0, 1, 1], [], []>} : vector<16x64xf32>, vector<64x128xf32>, vector<16x128xf32> -> vector<16x128xf32>
    %43 = vector.broadcast %32 : vector<16x1xf32> to vector<16x128xf32>
    %44 = arith.addf %42, %43 : vector<16x128xf32>
    %cst_18 = arith.constant 0.000000e+00 : f32
    %45 = vector.shape_cast %2 : vector<1x128xi1> to vector<1x128xi1>
    %46 = vector.broadcast %45 : vector<1x128xi1> to vector<16x128xi1>
    %47 = vector.broadcast %cst_18 : f32 to vector<16x128xf32>
    %48 = arith.select %46, %44, %47 : vector<16x128xi1>, vector<16x128xf32>
    %cst_19 = arith.constant dense<0.000000e+00> : vector<32x128xf32>
    %49 = tpu.matmul %37, %21, %cst_19 {dimension_numbers = #tpu.dot_dimension_numbers<[1], [0], [0], [1], [0, 0, 1, 1], [], []>} : vector<32x128xf32>, vector<128x128xf32>, vector<32x128xf32> -> vector<32x128xf32>
    %50 = tpu.concatenate %49, %37 in 0 : vector<32x128xf32>, vector<32x128xf32> -> vector<64x128xf32>
    %51 = vector.extract_strided_slice %31 {offsets = [1, 0, 0], sizes = [1, 16, 64], strides = [1, 1, 1]} : vector<2x16x64xf32> to vector<1x16x64xf32>
    %52 = vector.shape_cast %51 : vector<1x16x64xf32> to vector<16x64xf32>
    %cst_20 = arith.constant dense<0.000000e+00> : vector<16x128xf32>
    %53 = tpu.matmul %52, %50, %cst_20 {dimension_numbers = #tpu.dot_dimension_numbers<[1], [0], [0], [1], [0, 0, 1, 1], [], []>} : vector<16x64xf32>, vector<64x128xf32>, vector<16x128xf32> -> vector<16x128xf32>
    %54 = vector.broadcast %32 : vector<16x1xf32> to vector<16x128xf32>
    %55 = arith.addf %53, %54 : vector<16x128xf32>
    %cst_21 = arith.constant 0.000000e+00 : f32
    %56 = vector.shape_cast %2 : vector<1x128xi1> to vector<1x128xi1>
    %57 = vector.broadcast %56 : vector<1x128xi1> to vector<16x128xi1>
    %58 = vector.broadcast %cst_21 : f32 to vector<16x128xf32>
    %59 = arith.select %57, %55, %58 : vector<16x128xi1>, vector<16x128xf32>
    %c0_22 = arith.constant 0 : index
    %c0_23 = arith.constant 0 : index
    %60 = vector.load %arg6[%c0_22, %c0_23] : memref<16x112xf32, #tpu.memory_space<vmem>>, vector<16x112xf32>
    %c0_24 = arith.constant 0 : index
    %c0_25 = arith.constant 0 : index
    %61 = vector.load %arg7[%c0_24, %c0_25] : memref<16x1xf32, #tpu.memory_space<vmem>>, vector<16x1xf32>
    %c0_26 = arith.constant 0 : index
    %c0_27 = arith.constant 0 : index
    %62 = vector.load %arg8[%c0_26, %c0_27] : memref<16x16xf32, #tpu.memory_space<vmem>>, vector<16x16xf32>
    %c0_28 = arith.constant 0 : index
    %c0_29 = arith.constant 0 : index
    %63 = vector.load %arg9[%c0_28, %c0_29] : memref<16x1xf32, #tpu.memory_space<vmem>>, vector<16x1xf32>
    %cst_30 = arith.constant 0.000000e+00 : f32
    %64 = vector.broadcast %cst_30 : f32 to vector<16x128xf32>
    %65 = arith.cmpf ogt, %48, %64 : vector<16x128xf32>
    %cst_31 = arith.constant 0.00999999977 : f32
    %66 = vector.broadcast %cst_31 : f32 to vector<16x128xf32>
    %67 = arith.mulf %66, %48 : vector<16x128xf32>
    %68 = arith.select %65, %48, %67 : vector<16x128xi1>, vector<16x128xf32>
    %cst_32 = arith.constant 0.000000e+00 : f32
    %69 = vector.broadcast %cst_32 : f32 to vector<16x128xf32>
    %70 = arith.cmpf ogt, %59, %69 : vector<16x128xf32>
    %cst_33 = arith.constant 0.00999999977 : f32
    %71 = vector.broadcast %cst_33 : f32 to vector<16x128xf32>
    %72 = arith.mulf %71, %59 : vector<16x128xf32>
    %73 = arith.select %70, %59, %72 : vector<16x128xi1>, vector<16x128xf32>
    %74 = tpu.iota {dimensions = array<i32: 0>} : vector<128x128xi32>
    %75 = tpu.iota {dimensions = array<i32: 1>} : vector<128x128xi32>
    %c-2_i32 = arith.constant -2 : i32
    %76 = vector.broadcast %c-2_i32 : i32 to vector<128x128xi32>
    %77 = arith.addi %75, %76 : vector<128x128xi32>
    %78 = arith.cmpi eq, %74, %77 : vector<128x128xi32>
    %79 = arith.extui %78 : vector<128x128xi1> to vector<128x128xi32>
    %80 = arith.sitofp %79 : vector<128x128xi32> to vector<128x128xf32>
    %cst_34 = arith.constant dense<0.000000e+00> : vector<16x128xf32>
    %81 = tpu.matmul %73, %80, %cst_34 {dimension_numbers = #tpu.dot_dimension_numbers<[1], [0], [0], [1], [0, 0, 1, 1], [], []>} : vector<16x128xf32>, vector<128x128xf32>, vector<16x128xf32> -> vector<16x128xf32>
    %cst_35 = arith.constant dense<0.000000e+00> : vector<16x128xf32>
    %82 = tpu.matmul %68, %13, %cst_35 {dimension_numbers = #tpu.dot_dimension_numbers<[1], [0], [0], [1], [0, 0, 1, 1], [], []>} : vector<16x128xf32>, vector<128x128xf32>, vector<16x128xf32> -> vector<16x128xf32>
    %cst_36 = arith.constant dense<0.000000e+00> : vector<16x128xf32>
    %83 = tpu.matmul %73, %13, %cst_36 {dimension_numbers = #tpu.dot_dimension_numbers<[1], [0], [0], [1], [0, 0, 1, 1], [], []>} : vector<16x128xf32>, vector<128x128xf32>, vector<16x128xf32> -> vector<16x128xf32>
    %cst_37 = arith.constant dense<0.000000e+00> : vector<16x128xf32>
    %84 = tpu.matmul %68, %21, %cst_37 {dimension_numbers = #tpu.dot_dimension_numbers<[1], [0], [0], [1], [0, 0, 1, 1], [], []>} : vector<16x128xf32>, vector<128x128xf32>, vector<16x128xf32> -> vector<16x128xf32>
    %cst_38 = arith.constant dense<0.000000e+00> : vector<16x128xf32>
    %85 = tpu.matmul %73, %21, %cst_38 {dimension_numbers = #tpu.dot_dimension_numbers<[1], [0], [0], [1], [0, 0, 1, 1], [], []>} : vector<16x128xf32>, vector<128x128xf32>, vector<16x128xf32> -> vector<16x128xf32>
    %86 = tpu.concatenate %81, %82, %83, %68, %73, %84, %85 in 0 : vector<16x128xf32>, vector<16x128xf32>, vector<16x128xf32>, vector<16x128xf32>, vector<16x128xf32>, vector<16x128xf32>, vector<16x128xf32> -> vector<112x128xf32>
    %cst_39 = arith.constant dense<0.000000e+00> : vector<16x128xf32>
    %87 = tpu.matmul %60, %86, %cst_39 {dimension_numbers = #tpu.dot_dimension_numbers<[1], [0], [0], [1], [0, 0, 1, 1], [], []>} : vector<16x112xf32>, vector<112x128xf32>, vector<16x128xf32> -> vector<16x128xf32>
    %88 = vector.broadcast %61 : vector<16x1xf32> to vector<16x128xf32>
    %89 = arith.addf %87, %88 : vector<16x128xf32>
    %cst_40 = arith.constant 0.000000e+00 : f32
    %90 = vector.shape_cast %2 : vector<1x128xi1> to vector<1x128xi1>
    %91 = vector.broadcast %90 : vector<1x128xi1> to vector<16x128xi1>
    %92 = vector.broadcast %cst_40 : f32 to vector<16x128xf32>
    %93 = arith.select %91, %89, %92 : vector<16x128xi1>, vector<16x128xf32>
    %94 = tpu.iota {dimensions = array<i32: 0>} : vector<128x128xi32>
    %95 = tpu.iota {dimensions = array<i32: 1>} : vector<128x128xi32>
    %c2_i32 = arith.constant 2 : i32
    %96 = vector.broadcast %c2_i32 : i32 to vector<128x128xi32>
    %97 = arith.addi %95, %96 : vector<128x128xi32>
    %98 = arith.cmpi eq, %94, %97 : vector<128x128xi32>
    %99 = arith.extui %98 : vector<128x128xi1> to vector<128x128xi32>
    %100 = arith.sitofp %99 : vector<128x128xi32> to vector<128x128xf32>
    %cst_41 = arith.constant dense<0.000000e+00> : vector<16x128xf32>
    %101 = tpu.matmul %68, %100, %cst_41 {dimension_numbers = #tpu.dot_dimension_numbers<[1], [0], [0], [1], [0, 0, 1, 1], [], []>} : vector<16x128xf32>, vector<128x128xf32>, vector<16x128xf32> -> vector<16x128xf32>
    %102 = tpu.concatenate %82, %83, %68, %73, %84, %85, %101 in 0 : vector<16x128xf32>, vector<16x128xf32>, vector<16x128xf32>, vector<16x128xf32>, vector<16x128xf32>, vector<16x128xf32>, vector<16x128xf32> -> vector<112x128xf32>
    %cst_42 = arith.constant dense<0.000000e+00> : vector<16x128xf32>
    %103 = tpu.matmul %60, %102, %cst_42 {dimension_numbers = #tpu.dot_dimension_numbers<[1], [0], [0], [1], [0, 0, 1, 1], [], []>} : vector<16x112xf32>, vector<112x128xf32>, vector<16x128xf32> -> vector<16x128xf32>
    %104 = vector.broadcast %61 : vector<16x1xf32> to vector<16x128xf32>
    %105 = arith.addf %103, %104 : vector<16x128xf32>
    %cst_43 = arith.constant 0.000000e+00 : f32
    %106 = vector.shape_cast %2 : vector<1x128xi1> to vector<1x128xi1>
    %107 = vector.broadcast %106 : vector<1x128xi1> to vector<16x128xi1>
    %108 = vector.broadcast %cst_43 : f32 to vector<16x128xf32>
    %109 = arith.select %107, %105, %108 : vector<16x128xi1>, vector<16x128xf32>
    %cst_44 = arith.constant 0.000000e+00 : f32
    %110 = vector.broadcast %cst_44 : f32 to vector<16x128xf32>
    %111 = arith.cmpf ogt, %93, %110 : vector<16x128xf32>
    %cst_45 = arith.constant 0.00999999977 : f32
    %112 = vector.broadcast %cst_45 : f32 to vector<16x128xf32>
    %113 = arith.mulf %112, %93 : vector<16x128xf32>
    %114 = arith.select %111, %93, %113 : vector<16x128xi1>, vector<16x128xf32>
    %cst_46 = arith.constant 0.000000e+00 : f32
    %115 = vector.broadcast %cst_46 : f32 to vector<16x128xf32>
    %116 = arith.cmpf ogt, %109, %115 : vector<16x128xf32>
    %cst_47 = arith.constant 0.00999999977 : f32
    %117 = vector.broadcast %cst_47 : f32 to vector<16x128xf32>
    %118 = arith.mulf %117, %109 : vector<16x128xf32>
    %119 = arith.select %116, %109, %118 : vector<16x128xi1>, vector<16x128xf32>
    %cst_48 = arith.constant dense<0.000000e+00> : vector<16x128xf32>
    %120 = tpu.matmul %62, %114, %cst_48 {dimension_numbers = #tpu.dot_dimension_numbers<[1], [0], [0], [1], [0, 0, 1, 1], [], []>} : vector<16x16xf32>, vector<16x128xf32>, vector<16x128xf32> -> vector<16x128xf32>
    %121 = vector.broadcast %63 : vector<16x1xf32> to vector<16x128xf32>
    %122 = arith.addf %120, %121 : vector<16x128xf32>
    %cst_49 = arith.constant 0.000000e+00 : f32
    %123 = vector.shape_cast %2 : vector<1x128xi1> to vector<1x128xi1>
    %124 = vector.broadcast %123 : vector<1x128xi1> to vector<16x128xi1>
    %125 = vector.broadcast %cst_49 : f32 to vector<16x128xf32>
    %126 = arith.select %124, %122, %125 : vector<16x128xi1>, vector<16x128xf32>
    %cst_50 = arith.constant dense<0.000000e+00> : vector<16x128xf32>
    %127 = tpu.matmul %62, %119, %cst_50 {dimension_numbers = #tpu.dot_dimension_numbers<[1], [0], [0], [1], [0, 0, 1, 1], [], []>} : vector<16x16xf32>, vector<16x128xf32>, vector<16x128xf32> -> vector<16x128xf32>
    %128 = vector.broadcast %63 : vector<16x1xf32> to vector<16x128xf32>
    %129 = arith.addf %127, %128 : vector<16x128xf32>
    %cst_51 = arith.constant 0.000000e+00 : f32
    %130 = vector.shape_cast %2 : vector<1x128xi1> to vector<1x128xi1>
    %131 = vector.broadcast %130 : vector<1x128xi1> to vector<16x128xi1>
    %132 = vector.broadcast %cst_51 : f32 to vector<16x128xf32>
    %133 = arith.select %131, %129, %132 : vector<16x128xi1>, vector<16x128xf32>
    %134 = arith.addf %48, %126 : vector<16x128xf32>
    %135 = arith.addf %59, %133 : vector<16x128xf32>
    %c0_52 = arith.constant 0 : index
    %c0_53 = arith.constant 0 : index
    %136 = vector.load %arg10[%c0_52, %c0_53] : memref<16x112xf32, #tpu.memory_space<vmem>>, vector<16x112xf32>
    %c0_54 = arith.constant 0 : index
    %c0_55 = arith.constant 0 : index
    %137 = vector.load %arg11[%c0_54, %c0_55] : memref<16x1xf32, #tpu.memory_space<vmem>>, vector<16x1xf32>
    %c0_56 = arith.constant 0 : index
    %c0_57 = arith.constant 0 : index
    %138 = vector.load %arg12[%c0_56, %c0_57] : memref<16x16xf32, #tpu.memory_space<vmem>>, vector<16x16xf32>
    %c0_58 = arith.constant 0 : index
    %c0_59 = arith.constant 0 : index
    %139 = vector.load %arg13[%c0_58, %c0_59] : memref<16x1xf32, #tpu.memory_space<vmem>>, vector<16x1xf32>
    %cst_60 = arith.constant 0.000000e+00 : f32
    %140 = vector.broadcast %cst_60 : f32 to vector<16x128xf32>
    %141 = arith.cmpf ogt, %134, %140 : vector<16x128xf32>
    %cst_61 = arith.constant 0.00999999977 : f32
    %142 = vector.broadcast %cst_61 : f32 to vector<16x128xf32>
    %143 = arith.mulf %142, %134 : vector<16x128xf32>
    %144 = arith.select %141, %134, %143 : vector<16x128xi1>, vector<16x128xf32>
    %cst_62 = arith.constant 0.000000e+00 : f32
    %145 = vector.broadcast %cst_62 : f32 to vector<16x128xf32>
    %146 = arith.cmpf ogt, %135, %145 : vector<16x128xf32>
    %cst_63 = arith.constant 0.00999999977 : f32
    %147 = vector.broadcast %cst_63 : f32 to vector<16x128xf32>
    %148 = arith.mulf %147, %135 : vector<16x128xf32>
    %149 = arith.select %146, %135, %148 : vector<16x128xi1>, vector<16x128xf32>
    %150 = tpu.iota {dimensions = array<i32: 0>} : vector<128x128xi32>
    %151 = tpu.iota {dimensions = array<i32: 1>} : vector<128x128xi32>
    %c-5_i32 = arith.constant -5 : i32
    %152 = vector.broadcast %c-5_i32 : i32 to vector<128x128xi32>
    %153 = arith.addi %151, %152 : vector<128x128xi32>
    %154 = arith.cmpi eq, %150, %153 : vector<128x128xi32>
    %155 = arith.extui %154 : vector<128x128xi1> to vector<128x128xi32>
    %156 = arith.sitofp %155 : vector<128x128xi32> to vector<128x128xf32>
    %cst_64 = arith.constant dense<0.000000e+00> : vector<16x128xf32>
    %157 = tpu.matmul %149, %156, %cst_64 {dimension_numbers = #tpu.dot_dimension_numbers<[1], [0], [0], [1], [0, 0, 1, 1], [], []>} : vector<16x128xf32>, vector<128x128xf32>, vector<16x128xf32> -> vector<16x128xf32>
    %158 = tpu.iota {dimensions = array<i32: 0>} : vector<128x128xi32>
    %159 = tpu.iota {dimensions = array<i32: 1>} : vector<128x128xi32>
    %c-3_i32 = arith.constant -3 : i32
    %160 = vector.broadcast %c-3_i32 : i32 to vector<128x128xi32>
    %161 = arith.addi %159, %160 : vector<128x128xi32>
    %162 = arith.cmpi eq, %158, %161 : vector<128x128xi32>
    %163 = arith.extui %162 : vector<128x128xi1> to vector<128x128xi32>
    %164 = arith.sitofp %163 : vector<128x128xi32> to vector<128x128xf32>
    %cst_65 = arith.constant dense<0.000000e+00> : vector<16x128xf32>
    %165 = tpu.matmul %144, %164, %cst_65 {dimension_numbers = #tpu.dot_dimension_numbers<[1], [0], [0], [1], [0, 0, 1, 1], [], []>} : vector<16x128xf32>, vector<128x128xf32>, vector<16x128xf32> -> vector<16x128xf32>
    %cst_66 = arith.constant dense<0.000000e+00> : vector<16x128xf32>
    %166 = tpu.matmul %149, %80, %cst_66 {dimension_numbers = #tpu.dot_dimension_numbers<[1], [0], [0], [1], [0, 0, 1, 1], [], []>} : vector<16x128xf32>, vector<128x128xf32>, vector<16x128xf32> -> vector<16x128xf32>
    %cst_67 = arith.constant dense<0.000000e+00> : vector<16x128xf32>
    %167 = tpu.matmul %149, %21, %cst_67 {dimension_numbers = #tpu.dot_dimension_numbers<[1], [0], [0], [1], [0, 0, 1, 1], [], []>} : vector<16x128xf32>, vector<128x128xf32>, vector<16x128xf32> -> vector<16x128xf32>
    %168 = tpu.iota {dimensions = array<i32: 0>} : vector<128x128xi32>
    %169 = tpu.iota {dimensions = array<i32: 1>} : vector<128x128xi32>
    %c3_i32 = arith.constant 3 : i32
    %170 = vector.broadcast %c3_i32 : i32 to vector<128x128xi32>
    %171 = arith.addi %169, %170 : vector<128x128xi32>
    %172 = arith.cmpi eq, %168, %171 : vector<128x128xi32>
    %173 = arith.extui %172 : vector<128x128xi1> to vector<128x128xi32>
    %174 = arith.sitofp %173 : vector<128x128xi32> to vector<128x128xf32>
    %cst_68 = arith.constant dense<0.000000e+00> : vector<16x128xf32>
    %175 = tpu.matmul %144, %174, %cst_68 {dimension_numbers = #tpu.dot_dimension_numbers<[1], [0], [0], [1], [0, 0, 1, 1], [], []>} : vector<16x128xf32>, vector<128x128xf32>, vector<16x128xf32> -> vector<16x128xf32>
    %176 = tpu.iota {dimensions = array<i32: 0>} : vector<128x128xi32>
    %177 = tpu.iota {dimensions = array<i32: 1>} : vector<128x128xi32>
    %c4_i32 = arith.constant 4 : i32
    %178 = vector.broadcast %c4_i32 : i32 to vector<128x128xi32>
    %179 = arith.addi %177, %178 : vector<128x128xi32>
    %180 = arith.cmpi eq, %176, %179 : vector<128x128xi32>
    %181 = arith.extui %180 : vector<128x128xi1> to vector<128x128xi32>
    %182 = arith.sitofp %181 : vector<128x128xi32> to vector<128x128xf32>
    %cst_69 = arith.constant dense<0.000000e+00> : vector<16x128xf32>
    %183 = tpu.matmul %149, %182, %cst_69 {dimension_numbers = #tpu.dot_dimension_numbers<[1], [0], [0], [1], [0, 0, 1, 1], [], []>} : vector<16x128xf32>, vector<128x128xf32>, vector<16x128xf32> -> vector<16x128xf32>
    %184 = tpu.concatenate %157, %165, %166, %144, %167, %175, %183 in 0 : vector<16x128xf32>, vector<16x128xf32>, vector<16x128xf32>, vector<16x128xf32>, vector<16x128xf32>, vector<16x128xf32>, vector<16x128xf32> -> vector<112x128xf32>
    %cst_70 = arith.constant dense<0.000000e+00> : vector<16x128xf32>
    %185 = tpu.matmul %136, %184, %cst_70 {dimension_numbers = #tpu.dot_dimension_numbers<[1], [0], [0], [1], [0, 0, 1, 1], [], []>} : vector<16x112xf32>, vector<112x128xf32>, vector<16x128xf32> -> vector<16x128xf32>
    %186 = vector.broadcast %137 : vector<16x1xf32> to vector<16x128xf32>
    %187 = arith.addf %185, %186 : vector<16x128xf32>
    %cst_71 = arith.constant 0.000000e+00 : f32
    %188 = vector.shape_cast %2 : vector<1x128xi1> to vector<1x128xi1>
    %189 = vector.broadcast %188 : vector<1x128xi1> to vector<16x128xi1>
    %190 = vector.broadcast %cst_71 : f32 to vector<16x128xf32>
    %191 = arith.select %189, %187, %190 : vector<16x128xi1>, vector<16x128xf32>
    %192 = tpu.iota {dimensions = array<i32: 0>} : vector<128x128xi32>
    %193 = tpu.iota {dimensions = array<i32: 1>} : vector<128x128xi32>
    %c-4_i32 = arith.constant -4 : i32
    %194 = vector.broadcast %c-4_i32 : i32 to vector<128x128xi32>
    %195 = arith.addi %193, %194 : vector<128x128xi32>
    %196 = arith.cmpi eq, %192, %195 : vector<128x128xi32>
    %197 = arith.extui %196 : vector<128x128xi1> to vector<128x128xi32>
    %198 = arith.sitofp %197 : vector<128x128xi32> to vector<128x128xf32>
    %cst_72 = arith.constant dense<0.000000e+00> : vector<16x128xf32>
    %199 = tpu.matmul %144, %198, %cst_72 {dimension_numbers = #tpu.dot_dimension_numbers<[1], [0], [0], [1], [0, 0, 1, 1], [], []>} : vector<16x128xf32>, vector<128x128xf32>, vector<16x128xf32> -> vector<16x128xf32>
    %cst_73 = arith.constant dense<0.000000e+00> : vector<16x128xf32>
    %200 = tpu.matmul %149, %164, %cst_73 {dimension_numbers = #tpu.dot_dimension_numbers<[1], [0], [0], [1], [0, 0, 1, 1], [], []>} : vector<16x128xf32>, vector<128x128xf32>, vector<16x128xf32> -> vector<16x128xf32>
    %cst_74 = arith.constant dense<0.000000e+00> : vector<16x128xf32>
    %201 = tpu.matmul %144, %13, %cst_74 {dimension_numbers = #tpu.dot_dimension_numbers<[1], [0], [0], [1], [0, 0, 1, 1], [], []>} : vector<16x128xf32>, vector<128x128xf32>, vector<16x128xf32> -> vector<16x128xf32>
    %cst_75 = arith.constant dense<0.000000e+00> : vector<16x128xf32>
    %202 = tpu.matmul %144, %100, %cst_75 {dimension_numbers = #tpu.dot_dimension_numbers<[1], [0], [0], [1], [0, 0, 1, 1], [], []>} : vector<16x128xf32>, vector<128x128xf32>, vector<16x128xf32> -> vector<16x128xf32>
    %cst_76 = arith.constant dense<0.000000e+00> : vector<16x128xf32>
    %203 = tpu.matmul %149, %174, %cst_76 {dimension_numbers = #tpu.dot_dimension_numbers<[1], [0], [0], [1], [0, 0, 1, 1], [], []>} : vector<16x128xf32>, vector<128x128xf32>, vector<16x128xf32> -> vector<16x128xf32>
    %204 = tpu.iota {dimensions = array<i32: 0>} : vector<128x128xi32>
    %205 = tpu.iota {dimensions = array<i32: 1>} : vector<128x128xi32>
    %c5_i32 = arith.constant 5 : i32
    %206 = vector.broadcast %c5_i32 : i32 to vector<128x128xi32>
    %207 = arith.addi %205, %206 : vector<128x128xi32>
    %208 = arith.cmpi eq, %204, %207 : vector<128x128xi32>
    %209 = arith.extui %208 : vector<128x128xi1> to vector<128x128xi32>
    %210 = arith.sitofp %209 : vector<128x128xi32> to vector<128x128xf32>
    %cst_77 = arith.constant dense<0.000000e+00> : vector<16x128xf32>
    %211 = tpu.matmul %144, %210, %cst_77 {dimension_numbers = #tpu.dot_dimension_numbers<[1], [0], [0], [1], [0, 0, 1, 1], [], []>} : vector<16x128xf32>, vector<128x128xf32>, vector<16x128xf32> -> vector<16x128xf32>
    %212 = tpu.concatenate %199, %200, %201, %149, %202, %203, %211 in 0 : vector<16x128xf32>, vector<16x128xf32>, vector<16x128xf32>, vector<16x128xf32>, vector<16x128xf32>, vector<16x128xf32>, vector<16x128xf32> -> vector<112x128xf32>
    %cst_78 = arith.constant dense<0.000000e+00> : vector<16x128xf32>
    %213 = tpu.matmul %136, %212, %cst_78 {dimension_numbers = #tpu.dot_dimension_numbers<[1], [0], [0], [1], [0, 0, 1, 1], [], []>} : vector<16x112xf32>, vector<112x128xf32>, vector<16x128xf32> -> vector<16x128xf32>
    %214 = vector.broadcast %137 : vector<16x1xf32> to vector<16x128xf32>
    %215 = arith.addf %213, %214 : vector<16x128xf32>
    %cst_79 = arith.constant 0.000000e+00 : f32
    %216 = vector.shape_cast %2 : vector<1x128xi1> to vector<1x128xi1>
    %217 = vector.broadcast %216 : vector<1x128xi1> to vector<16x128xi1>
    %218 = vector.broadcast %cst_79 : f32 to vector<16x128xf32>
    %219 = arith.select %217, %215, %218 : vector<16x128xi1>, vector<16x128xf32>
    %cst_80 = arith.constant 0.000000e+00 : f32
    %220 = vector.broadcast %cst_80 : f32 to vector<16x128xf32>
    %221 = arith.cmpf ogt, %191, %220 : vector<16x128xf32>
    %cst_81 = arith.constant 0.00999999977 : f32
    %222 = vector.broadcast %cst_81 : f32 to vector<16x128xf32>
    %223 = arith.mulf %222, %191 : vector<16x128xf32>
    %224 = arith.select %221, %191, %223 : vector<16x128xi1>, vector<16x128xf32>
    %cst_82 = arith.constant 0.000000e+00 : f32
    %225 = vector.broadcast %cst_82 : f32 to vector<16x128xf32>
    %226 = arith.cmpf ogt, %219, %225 : vector<16x128xf32>
    %cst_83 = arith.constant 0.00999999977 : f32
    %227 = vector.broadcast %cst_83 : f32 to vector<16x128xf32>
    %228 = arith.mulf %227, %219 : vector<16x128xf32>
    %229 = arith.select %226, %219, %228 : vector<16x128xi1>, vector<16x128xf32>
    %cst_84 = arith.constant dense<0.000000e+00> : vector<16x128xf32>
    %230 = tpu.matmul %138, %224, %cst_84 {dimension_numbers = #tpu.dot_dimension_numbers<[1], [0], [0], [1], [0, 0, 1, 1], [], []>} : vector<16x16xf32>, vector<16x128xf32>, vector<16x128xf32> -> vector<16x128xf32>
    %231 = vector.broadcast %139 : vector<16x1xf32> to vector<16x128xf32>
    %232 = arith.addf %230, %231 : vector<16x128xf32>
    %cst_85 = arith.constant 0.000000e+00 : f32
    %233 = vector.shape_cast %2 : vector<1x128xi1> to vector<1x128xi1>
    %234 = vector.broadcast %233 : vector<1x128xi1> to vector<16x128xi1>
    %235 = vector.broadcast %cst_85 : f32 to vector<16x128xf32>
    %236 = arith.select %234, %232, %235 : vector<16x128xi1>, vector<16x128xf32>
    %cst_86 = arith.constant dense<0.000000e+00> : vector<16x128xf32>
    %237 = tpu.matmul %138, %229, %cst_86 {dimension_numbers = #tpu.dot_dimension_numbers<[1], [0], [0], [1], [0, 0, 1, 1], [], []>} : vector<16x16xf32>, vector<16x128xf32>, vector<16x128xf32> -> vector<16x128xf32>
    %238 = vector.broadcast %139 : vector<16x1xf32> to vector<16x128xf32>
    %239 = arith.addf %237, %238 : vector<16x128xf32>
    %cst_87 = arith.constant 0.000000e+00 : f32
    %240 = vector.shape_cast %2 : vector<1x128xi1> to vector<1x128xi1>
    %241 = vector.broadcast %240 : vector<1x128xi1> to vector<16x128xi1>
    %242 = vector.broadcast %cst_87 : f32 to vector<16x128xf32>
    %243 = arith.select %241, %239, %242 : vector<16x128xi1>, vector<16x128xf32>
    %244 = arith.addf %134, %236 : vector<16x128xf32>
    %245 = arith.addf %135, %243 : vector<16x128xf32>
    %c0_88 = arith.constant 0 : index
    %c0_89 = arith.constant 0 : index
    %c0_90 = arith.constant 0 : index
    %246 = vector.load %arg14[%c0_88, %c0_89, %c0_90] : memref<2x8x32xf32, #tpu.memory_space<vmem>>, vector<2x8x32xf32>
    %c0_91 = arith.constant 0 : index
    %c0_92 = arith.constant 0 : index
    %247 = vector.load %arg15[%c0_91, %c0_92] : memref<8x1xf32, #tpu.memory_space<vmem>>, vector<8x1xf32>
    %cst_93 = arith.constant 0.000000e+00 : f32
    %248 = vector.broadcast %cst_93 : f32 to vector<16x128xf32>
    %249 = arith.cmpf ogt, %244, %248 : vector<16x128xf32>
    %cst_94 = arith.constant 0.00999999977 : f32
    %250 = vector.broadcast %cst_94 : f32 to vector<16x128xf32>
    %251 = arith.mulf %250, %244 : vector<16x128xf32>
    %252 = arith.select %249, %244, %251 : vector<16x128xi1>, vector<16x128xf32>
    %cst_95 = arith.constant 0.000000e+00 : f32
    %253 = vector.broadcast %cst_95 : f32 to vector<16x128xf32>
    %254 = arith.cmpf ogt, %245, %253 : vector<16x128xf32>
    %cst_96 = arith.constant 0.00999999977 : f32
    %255 = vector.broadcast %cst_96 : f32 to vector<16x128xf32>
    %256 = arith.mulf %255, %245 : vector<16x128xf32>
    %257 = arith.select %254, %245, %256 : vector<16x128xi1>, vector<16x128xf32>
    %cst_97 = arith.constant dense<0.000000e+00> : vector<16x128xf32>
    %258 = tpu.matmul %257, %13, %cst_97 {dimension_numbers = #tpu.dot_dimension_numbers<[1], [0], [0], [1], [0, 0, 1, 1], [], []>} : vector<16x128xf32>, vector<128x128xf32>, vector<16x128xf32> -> vector<16x128xf32>
    %259 = tpu.concatenate %252, %258 in 0 : vector<16x128xf32>, vector<16x128xf32> -> vector<32x128xf32>
    %260 = vector.extract_strided_slice %246 {offsets = [0, 0, 0], sizes = [1, 8, 32], strides = [1, 1, 1]} : vector<2x8x32xf32> to vector<1x8x32xf32>
    %261 = vector.shape_cast %260 : vector<1x8x32xf32> to vector<8x32xf32>
    %cst_98 = arith.constant dense<0.000000e+00> : vector<8x128xf32>
    %262 = tpu.matmul %261, %259, %cst_98 {dimension_numbers = #tpu.dot_dimension_numbers<[1], [0], [0], [1], [0, 0, 1, 1], [], []>} : vector<8x32xf32>, vector<32x128xf32>, vector<8x128xf32> -> vector<8x128xf32>
    %263 = vector.broadcast %247 : vector<8x1xf32> to vector<8x128xf32>
    %264 = arith.addf %262, %263 : vector<8x128xf32>
    %cst_99 = arith.constant 0.000000e+00 : f32
    %265 = vector.shape_cast %2 : vector<1x128xi1> to vector<1x128xi1>
    %266 = vector.broadcast %265 : vector<1x128xi1> to vector<8x128xi1>
    %267 = vector.broadcast %cst_99 : f32 to vector<8x128xf32>
    %268 = arith.select %266, %264, %267 : vector<8x128xi1>, vector<8x128xf32>
    %269 = tpu.concatenate %257, %252 in 0 : vector<16x128xf32>, vector<16x128xf32> -> vector<32x128xf32>
    %270 = vector.extract_strided_slice %246 {offsets = [1, 0, 0], sizes = [1, 8, 32], strides = [1, 1, 1]} : vector<2x8x32xf32> to vector<1x8x32xf32>
    %271 = vector.shape_cast %270 : vector<1x8x32xf32> to vector<8x32xf32>
    %cst_100 = arith.constant dense<0.000000e+00> : vector<8x128xf32>
    %272 = tpu.matmul %271, %269, %cst_100 {dimension_numbers = #tpu.dot_dimension_numbers<[1], [0], [0], [1], [0, 0, 1, 1], [], []>} : vector<8x32xf32>, vector<32x128xf32>, vector<8x128xf32> -> vector<8x128xf32>
    %273 = vector.broadcast %247 : vector<8x1xf32> to vector<8x128xf32>
    %274 = arith.addf %272, %273 : vector<8x128xf32>
    %cst_101 = arith.constant 0.000000e+00 : f32
    %275 = vector.shape_cast %2 : vector<1x128xi1> to vector<1x128xi1>
    %276 = vector.broadcast %275 : vector<1x128xi1> to vector<8x128xi1>
    %277 = vector.broadcast %cst_101 : f32 to vector<8x128xf32>
    %278 = arith.select %276, %274, %277 : vector<8x128xi1>, vector<8x128xf32>
    %279 = tpu.concatenate %257, %252 in 0 : vector<16x128xf32>, vector<16x128xf32> -> vector<32x128xf32>
    %280 = vector.extract_strided_slice %246 {offsets = [0, 0, 0], sizes = [1, 8, 32], strides = [1, 1, 1]} : vector<2x8x32xf32> to vector<1x8x32xf32>
    %281 = vector.shape_cast %280 : vector<1x8x32xf32> to vector<8x32xf32>
    %cst_102 = arith.constant dense<0.000000e+00> : vector<8x128xf32>
    %282 = tpu.matmul %281, %279, %cst_102 {dimension_numbers = #tpu.dot_dimension_numbers<[1], [0], [0], [1], [0, 0, 1, 1], [], []>} : vector<8x32xf32>, vector<32x128xf32>, vector<8x128xf32> -> vector<8x128xf32>
    %283 = vector.broadcast %247 : vector<8x1xf32> to vector<8x128xf32>
    %284 = arith.addf %282, %283 : vector<8x128xf32>
    %cst_103 = arith.constant 0.000000e+00 : f32
    %285 = vector.shape_cast %2 : vector<1x128xi1> to vector<1x128xi1>
    %286 = vector.broadcast %285 : vector<1x128xi1> to vector<8x128xi1>
    %287 = vector.broadcast %cst_103 : f32 to vector<8x128xf32>
    %288 = arith.select %286, %284, %287 : vector<8x128xi1>, vector<8x128xf32>
    %cst_104 = arith.constant dense<0.000000e+00> : vector<16x128xf32>
    %289 = tpu.matmul %252, %21, %cst_104 {dimension_numbers = #tpu.dot_dimension_numbers<[1], [0], [0], [1], [0, 0, 1, 1], [], []>} : vector<16x128xf32>, vector<128x128xf32>, vector<16x128xf32> -> vector<16x128xf32>
    %290 = tpu.concatenate %289, %257 in 0 : vector<16x128xf32>, vector<16x128xf32> -> vector<32x128xf32>
    %291 = vector.extract_strided_slice %246 {offsets = [1, 0, 0], sizes = [1, 8, 32], strides = [1, 1, 1]} : vector<2x8x32xf32> to vector<1x8x32xf32>
    %292 = vector.shape_cast %291 : vector<1x8x32xf32> to vector<8x32xf32>
    %cst_105 = arith.constant dense<0.000000e+00> : vector<8x128xf32>
    %293 = tpu.matmul %292, %290, %cst_105 {dimension_numbers = #tpu.dot_dimension_numbers<[1], [0], [0], [1], [0, 0, 1, 1], [], []>} : vector<8x32xf32>, vector<32x128xf32>, vector<8x128xf32> -> vector<8x128xf32>
    %294 = vector.broadcast %247 : vector<8x1xf32> to vector<8x128xf32>
    %295 = arith.addf %293, %294 : vector<8x128xf32>
    %cst_106 = arith.constant 0.000000e+00 : f32
    %296 = vector.shape_cast %2 : vector<1x128xi1> to vector<1x128xi1>
    %297 = vector.broadcast %296 : vector<1x128xi1> to vector<8x128xi1>
    %298 = vector.broadcast %cst_106 : f32 to vector<8x128xf32>
    %299 = arith.select %297, %295, %298 : vector<8x128xi1>, vector<8x128xf32>
    %c0_107 = arith.constant 0 : index
    %c0_108 = arith.constant 0 : index
    %300 = vector.load %arg16[%c0_107, %c0_108] : memref<8x56xf32, #tpu.memory_space<vmem>>, vector<8x56xf32>
    %c0_109 = arith.constant 0 : index
    %c0_110 = arith.constant 0 : index
    %301 = vector.load %arg17[%c0_109, %c0_110] : memref<8x1xf32, #tpu.memory_space<vmem>>, vector<8x1xf32>
    %c0_111 = arith.constant 0 : index
    %c0_112 = arith.constant 0 : index
    %302 = vector.load %arg18[%c0_111, %c0_112] : memref<8x8xf32, #tpu.memory_space<vmem>>, vector<8x8xf32>
    %c0_113 = arith.constant 0 : index
    %c0_114 = arith.constant 0 : index
    %303 = vector.load %arg19[%c0_113, %c0_114] : memref<8x1xf32, #tpu.memory_space<vmem>>, vector<8x1xf32>
    %cst_115 = arith.constant 0.000000e+00 : f32
    %304 = vector.broadcast %cst_115 : f32 to vector<8x128xf32>
    %305 = arith.cmpf ogt, %268, %304 : vector<8x128xf32>
    %cst_116 = arith.constant 0.00999999977 : f32
    %306 = vector.broadcast %cst_116 : f32 to vector<8x128xf32>
    %307 = arith.mulf %306, %268 : vector<8x128xf32>
    %308 = arith.select %305, %268, %307 : vector<8x128xi1>, vector<8x128xf32>
    %cst_117 = arith.constant 0.000000e+00 : f32
    %309 = vector.broadcast %cst_117 : f32 to vector<8x128xf32>
    %310 = arith.cmpf ogt, %278, %309 : vector<8x128xf32>
    %cst_118 = arith.constant 0.00999999977 : f32
    %311 = vector.broadcast %cst_118 : f32 to vector<8x128xf32>
    %312 = arith.mulf %311, %278 : vector<8x128xf32>
    %313 = arith.select %310, %278, %312 : vector<8x128xi1>, vector<8x128xf32>
    %cst_119 = arith.constant 0.000000e+00 : f32
    %314 = vector.broadcast %cst_119 : f32 to vector<8x128xf32>
    %315 = arith.cmpf ogt, %288, %314 : vector<8x128xf32>
    %cst_120 = arith.constant 0.00999999977 : f32
    %316 = vector.broadcast %cst_120 : f32 to vector<8x128xf32>
    %317 = arith.mulf %316, %288 : vector<8x128xf32>
    %318 = arith.select %315, %288, %317 : vector<8x128xi1>, vector<8x128xf32>
    %cst_121 = arith.constant 0.000000e+00 : f32
    %319 = vector.broadcast %cst_121 : f32 to vector<8x128xf32>
    %320 = arith.cmpf ogt, %299, %319 : vector<8x128xf32>
    %cst_122 = arith.constant 0.00999999977 : f32
    %321 = vector.broadcast %cst_122 : f32 to vector<8x128xf32>
    %322 = arith.mulf %321, %299 : vector<8x128xf32>
    %323 = arith.select %320, %299, %322 : vector<8x128xi1>, vector<8x128xf32>
    %cst_123 = arith.constant dense<0.000000e+00> : vector<8x128xf32>
    %324 = tpu.matmul %313, %13, %cst_123 {dimension_numbers = #tpu.dot_dimension_numbers<[1], [0], [0], [1], [0, 0, 1, 1], [], []>} : vector<8x128xf32>, vector<128x128xf32>, vector<8x128xf32> -> vector<8x128xf32>
    %cst_124 = arith.constant dense<0.000000e+00> : vector<8x128xf32>
    %325 = tpu.matmul %318, %13, %cst_124 {dimension_numbers = #tpu.dot_dimension_numbers<[1], [0], [0], [1], [0, 0, 1, 1], [], []>} : vector<8x128xf32>, vector<128x128xf32>, vector<8x128xf32> -> vector<8x128xf32>
    %cst_125 = arith.constant dense<0.000000e+00> : vector<8x128xf32>
    %326 = tpu.matmul %323, %13, %cst_125 {dimension_numbers = #tpu.dot_dimension_numbers<[1], [0], [0], [1], [0, 0, 1, 1], [], []>} : vector<8x128xf32>, vector<128x128xf32>, vector<8x128xf32> -> vector<8x128xf32>
    %327 = tpu.concatenate %324, %325, %326, %308, %313, %318, %323 in 0 : vector<8x128xf32>, vector<8x128xf32>, vector<8x128xf32>, vector<8x128xf32>, vector<8x128xf32>, vector<8x128xf32>, vector<8x128xf32> -> vector<56x128xf32>
    %cst_126 = arith.constant dense<0.000000e+00> : vector<8x128xf32>
    %328 = tpu.matmul %300, %327, %cst_126 {dimension_numbers = #tpu.dot_dimension_numbers<[1], [0], [0], [1], [0, 0, 1, 1], [], []>} : vector<8x56xf32>, vector<56x128xf32>, vector<8x128xf32> -> vector<8x128xf32>
    %329 = vector.broadcast %301 : vector<8x1xf32> to vector<8x128xf32>
    %330 = arith.addf %328, %329 : vector<8x128xf32>
    %cst_127 = arith.constant 0.000000e+00 : f32
    %331 = vector.shape_cast %2 : vector<1x128xi1> to vector<1x128xi1>
    %332 = vector.broadcast %331 : vector<1x128xi1> to vector<8x128xi1>
    %333 = vector.broadcast %cst_127 : f32 to vector<8x128xf32>
    %334 = arith.select %332, %330, %333 : vector<8x128xi1>, vector<8x128xf32>
    %cst_128 = arith.constant dense<0.000000e+00> : vector<8x128xf32>
    %335 = tpu.matmul %308, %21, %cst_128 {dimension_numbers = #tpu.dot_dimension_numbers<[1], [0], [0], [1], [0, 0, 1, 1], [], []>} : vector<8x128xf32>, vector<128x128xf32>, vector<8x128xf32> -> vector<8x128xf32>
    %336 = tpu.concatenate %325, %326, %308, %313, %318, %323, %335 in 0 : vector<8x128xf32>, vector<8x128xf32>, vector<8x128xf32>, vector<8x128xf32>, vector<8x128xf32>, vector<8x128xf32>, vector<8x128xf32> -> vector<56x128xf32>
    %cst_129 = arith.constant dense<0.000000e+00> : vector<8x128xf32>
    %337 = tpu.matmul %300, %336, %cst_129 {dimension_numbers = #tpu.dot_dimension_numbers<[1], [0], [0], [1], [0, 0, 1, 1], [], []>} : vector<8x56xf32>, vector<56x128xf32>, vector<8x128xf32> -> vector<8x128xf32>
    %338 = vector.broadcast %301 : vector<8x1xf32> to vector<8x128xf32>
    %339 = arith.addf %337, %338 : vector<8x128xf32>
    %cst_130 = arith.constant 0.000000e+00 : f32
    %340 = vector.shape_cast %2 : vector<1x128xi1> to vector<1x128xi1>
    %341 = vector.broadcast %340 : vector<1x128xi1> to vector<8x128xi1>
    %342 = vector.broadcast %cst_130 : f32 to vector<8x128xf32>
    %343 = arith.select %341, %339, %342 : vector<8x128xi1>, vector<8x128xf32>
    %cst_131 = arith.constant dense<0.000000e+00> : vector<8x128xf32>
    %344 = tpu.matmul %313, %21, %cst_131 {dimension_numbers = #tpu.dot_dimension_numbers<[1], [0], [0], [1], [0, 0, 1, 1], [], []>} : vector<8x128xf32>, vector<128x128xf32>, vector<8x128xf32> -> vector<8x128xf32>
    %345 = tpu.concatenate %326, %308, %313, %318, %323, %335, %344 in 0 : vector<8x128xf32>, vector<8x128xf32>, vector<8x128xf32>, vector<8x128xf32>, vector<8x128xf32>, vector<8x128xf32>, vector<8x128xf32> -> vector<56x128xf32>
    %cst_132 = arith.constant dense<0.000000e+00> : vector<8x128xf32>
    %346 = tpu.matmul %300, %345, %cst_132 {dimension_numbers = #tpu.dot_dimension_numbers<[1], [0], [0], [1], [0, 0, 1, 1], [], []>} : vector<8x56xf32>, vector<56x128xf32>, vector<8x128xf32> -> vector<8x128xf32>
    %347 = vector.broadcast %301 : vector<8x1xf32> to vector<8x128xf32>
    %348 = arith.addf %346, %347 : vector<8x128xf32>
    %cst_133 = arith.constant 0.000000e+00 : f32
    %349 = vector.shape_cast %2 : vector<1x128xi1> to vector<1x128xi1>
    %350 = vector.broadcast %349 : vector<1x128xi1> to vector<8x128xi1>
    %351 = vector.broadcast %cst_133 : f32 to vector<8x128xf32>
    %352 = arith.select %350, %348, %351 : vector<8x128xi1>, vector<8x128xf32>
    %cst_134 = arith.constant dense<0.000000e+00> : vector<8x128xf32>
    %353 = tpu.matmul %318, %21, %cst_134 {dimension_numbers = #tpu.dot_dimension_numbers<[1], [0], [0], [1], [0, 0, 1, 1], [], []>} : vector<8x128xf32>, vector<128x128xf32>, vector<8x128xf32> -> vector<8x128xf32>
    %354 = tpu.concatenate %308, %313, %318, %323, %335, %344, %353 in 0 : vector<8x128xf32>, vector<8x128xf32>, vector<8x128xf32>, vector<8x128xf32>, vector<8x128xf32>, vector<8x128xf32>, vector<8x128xf32> -> vector<56x128xf32>
    %cst_135 = arith.constant dense<0.000000e+00> : vector<8x128xf32>
    %355 = tpu.matmul %300, %354, %cst_135 {dimension_numbers = #tpu.dot_dimension_numbers<[1], [0], [0], [1], [0, 0, 1, 1], [], []>} : vector<8x56xf32>, vector<56x128xf32>, vector<8x128xf32> -> vector<8x128xf32>
    %356 = vector.broadcast %301 : vector<8x1xf32> to vector<8x128xf32>
    %357 = arith.addf %355, %356 : vector<8x128xf32>
    %cst_136 = arith.constant 0.000000e+00 : f32
    %358 = vector.shape_cast %2 : vector<1x128xi1> to vector<1x128xi1>
    %359 = vector.broadcast %358 : vector<1x128xi1> to vector<8x128xi1>
    %360 = vector.broadcast %cst_136 : f32 to vector<8x128xf32>
    %361 = arith.select %359, %357, %360 : vector<8x128xi1>, vector<8x128xf32>
    %cst_137 = arith.constant 0.000000e+00 : f32
    %362 = vector.broadcast %cst_137 : f32 to vector<8x128xf32>
    %363 = arith.cmpf ogt, %334, %362 : vector<8x128xf32>
    %cst_138 = arith.constant 0.00999999977 : f32
    %364 = vector.broadcast %cst_138 : f32 to vector<8x128xf32>
    %365 = arith.mulf %364, %334 : vector<8x128xf32>
    %366 = arith.select %363, %334, %365 : vector<8x128xi1>, vector<8x128xf32>
    %cst_139 = arith.constant 0.000000e+00 : f32
    %367 = vector.broadcast %cst_139 : f32 to vector<8x128xf32>
    %368 = arith.cmpf ogt, %343, %367 : vector<8x128xf32>
    %cst_140 = arith.constant 0.00999999977 : f32
    %369 = vector.broadcast %cst_140 : f32 to vector<8x128xf32>
    %370 = arith.mulf %369, %343 : vector<8x128xf32>
    %371 = arith.select %368, %343, %370 : vector<8x128xi1>, vector<8x128xf32>
    %cst_141 = arith.constant 0.000000e+00 : f32
    %372 = vector.broadcast %cst_141 : f32 to vector<8x128xf32>
    %373 = arith.cmpf ogt, %352, %372 : vector<8x128xf32>
    %cst_142 = arith.constant 0.00999999977 : f32
    %374 = vector.broadcast %cst_142 : f32 to vector<8x128xf32>
    %375 = arith.mulf %374, %352 : vector<8x128xf32>
    %376 = arith.select %373, %352, %375 : vector<8x128xi1>, vector<8x128xf32>
    %cst_143 = arith.constant 0.000000e+00 : f32
    %377 = vector.broadcast %cst_143 : f32 to vector<8x128xf32>
    %378 = arith.cmpf ogt, %361, %377 : vector<8x128xf32>
    %cst_144 = arith.constant 0.00999999977 : f32
    %379 = vector.broadcast %cst_144 : f32 to vector<8x128xf32>
    %380 = arith.mulf %379, %361 : vector<8x128xf32>
    %381 = arith.select %378, %361, %380 : vector<8x128xi1>, vector<8x128xf32>
    %cst_145 = arith.constant dense<0.000000e+00> : vector<8x128xf32>
    %382 = tpu.matmul %302, %366, %cst_145 {dimension_numbers = #tpu.dot_dimension_numbers<[1], [0], [0], [1], [0, 0, 1, 1], [], []>} : vector<8x8xf32>, vector<8x128xf32>, vector<8x128xf32> -> vector<8x128xf32>
    %383 = vector.broadcast %303 : vector<8x1xf32> to vector<8x128xf32>
    %384 = arith.addf %382, %383 : vector<8x128xf32>
    %cst_146 = arith.constant 0.000000e+00 : f32
    %385 = vector.shape_cast %2 : vector<1x128xi1> to vector<1x128xi1>
    %386 = vector.broadcast %385 : vector<1x128xi1> to vector<8x128xi1>
    %387 = vector.broadcast %cst_146 : f32 to vector<8x128xf32>
    %388 = arith.select %386, %384, %387 : vector<8x128xi1>, vector<8x128xf32>
    %cst_147 = arith.constant dense<0.000000e+00> : vector<8x128xf32>
    %389 = tpu.matmul %302, %371, %cst_147 {dimension_numbers = #tpu.dot_dimension_numbers<[1], [0], [0], [1], [0, 0, 1, 1], [], []>} : vector<8x8xf32>, vector<8x128xf32>, vector<8x128xf32> -> vector<8x128xf32>
    %390 = vector.broadcast %303 : vector<8x1xf32> to vector<8x128xf32>
    %391 = arith.addf %389, %390 : vector<8x128xf32>
    %cst_148 = arith.constant 0.000000e+00 : f32
    %392 = vector.shape_cast %2 : vector<1x128xi1> to vector<1x128xi1>
    %393 = vector.broadcast %392 : vector<1x128xi1> to vector<8x128xi1>
    %394 = vector.broadcast %cst_148 : f32 to vector<8x128xf32>
    %395 = arith.select %393, %391, %394 : vector<8x128xi1>, vector<8x128xf32>
    %cst_149 = arith.constant dense<0.000000e+00> : vector<8x128xf32>
    %396 = tpu.matmul %302, %376, %cst_149 {dimension_numbers = #tpu.dot_dimension_numbers<[1], [0], [0], [1], [0, 0, 1, 1], [], []>} : vector<8x8xf32>, vector<8x128xf32>, vector<8x128xf32> -> vector<8x128xf32>
    %397 = vector.broadcast %303 : vector<8x1xf32> to vector<8x128xf32>
    %398 = arith.addf %396, %397 : vector<8x128xf32>
    %cst_150 = arith.constant 0.000000e+00 : f32
    %399 = vector.shape_cast %2 : vector<1x128xi1> to vector<1x128xi1>
    %400 = vector.broadcast %399 : vector<1x128xi1> to vector<8x128xi1>
    %401 = vector.broadcast %cst_150 : f32 to vector<8x128xf32>
    %402 = arith.select %400, %398, %401 : vector<8x128xi1>, vector<8x128xf32>
    %cst_151 = arith.constant dense<0.000000e+00> : vector<8x128xf32>
    %403 = tpu.matmul %302, %381, %cst_151 {dimension_numbers = #tpu.dot_dimension_numbers<[1], [0], [0], [1], [0, 0, 1, 1], [], []>} : vector<8x8xf32>, vector<8x128xf32>, vector<8x128xf32> -> vector<8x128xf32>
    %404 = vector.broadcast %303 : vector<8x1xf32> to vector<8x128xf32>
    %405 = arith.addf %403, %404 : vector<8x128xf32>
    %cst_152 = arith.constant 0.000000e+00 : f32
    %406 = vector.shape_cast %2 : vector<1x128xi1> to vector<1x128xi1>
    %407 = vector.broadcast %406 : vector<1x128xi1> to vector<8x128xi1>
    %408 = vector.broadcast %cst_152 : f32 to vector<8x128xf32>
    %409 = arith.select %407, %405, %408 : vector<8x128xi1>, vector<8x128xf32>
    %410 = arith.addf %268, %388 : vector<8x128xf32>
    %411 = arith.addf %278, %395 : vector<8x128xf32>
    %412 = arith.addf %288, %402 : vector<8x128xf32>
    %413 = arith.addf %299, %409 : vector<8x128xf32>
    %c0_153 = arith.constant 0 : index
    %c0_154 = arith.constant 0 : index
    %414 = vector.load %arg20[%c0_153, %c0_154] : memref<8x56xf32, #tpu.memory_space<vmem>>, vector<8x56xf32>
    %c0_155 = arith.constant 0 : index
    %c0_156 = arith.constant 0 : index
    %415 = vector.load %arg21[%c0_155, %c0_156] : memref<8x1xf32, #tpu.memory_space<vmem>>, vector<8x1xf32>
    %c0_157 = arith.constant 0 : index
    %c0_158 = arith.constant 0 : index
    %416 = vector.load %arg22[%c0_157, %c0_158] : memref<8x8xf32, #tpu.memory_space<vmem>>, vector<8x8xf32>
    %c0_159 = arith.constant 0 : index
    %c0_160 = arith.constant 0 : index
    %417 = vector.load %arg23[%c0_159, %c0_160] : memref<8x1xf32, #tpu.memory_space<vmem>>, vector<8x1xf32>
    %cst_161 = arith.constant 0.000000e+00 : f32
    %418 = vector.broadcast %cst_161 : f32 to vector<8x128xf32>
    %419 = arith.cmpf ogt, %410, %418 : vector<8x128xf32>
    %cst_162 = arith.constant 0.00999999977 : f32
    %420 = vector.broadcast %cst_162 : f32 to vector<8x128xf32>
    %421 = arith.mulf %420, %410 : vector<8x128xf32>
    %422 = arith.select %419, %410, %421 : vector<8x128xi1>, vector<8x128xf32>
    %cst_163 = arith.constant 0.000000e+00 : f32
    %423 = vector.broadcast %cst_163 : f32 to vector<8x128xf32>
    %424 = arith.cmpf ogt, %411, %423 : vector<8x128xf32>
    %cst_164 = arith.constant 0.00999999977 : f32
    %425 = vector.broadcast %cst_164 : f32 to vector<8x128xf32>
    %426 = arith.mulf %425, %411 : vector<8x128xf32>
    %427 = arith.select %424, %411, %426 : vector<8x128xi1>, vector<8x128xf32>
    %cst_165 = arith.constant 0.000000e+00 : f32
    %428 = vector.broadcast %cst_165 : f32 to vector<8x128xf32>
    %429 = arith.cmpf ogt, %412, %428 : vector<8x128xf32>
    %cst_166 = arith.constant 0.00999999977 : f32
    %430 = vector.broadcast %cst_166 : f32 to vector<8x128xf32>
    %431 = arith.mulf %430, %412 : vector<8x128xf32>
    %432 = arith.select %429, %412, %431 : vector<8x128xi1>, vector<8x128xf32>
    %cst_167 = arith.constant 0.000000e+00 : f32
    %433 = vector.broadcast %cst_167 : f32 to vector<8x128xf32>
    %434 = arith.cmpf ogt, %413, %433 : vector<8x128xf32>
    %cst_168 = arith.constant 0.00999999977 : f32
    %435 = vector.broadcast %cst_168 : f32 to vector<8x128xf32>
    %436 = arith.mulf %435, %413 : vector<8x128xf32>
    %437 = arith.select %434, %413, %436 : vector<8x128xi1>, vector<8x128xf32>
    %cst_169 = arith.constant dense<0.000000e+00> : vector<8x128xf32>
    %438 = tpu.matmul %437, %164, %cst_169 {dimension_numbers = #tpu.dot_dimension_numbers<[1], [0], [0], [1], [0, 0, 1, 1], [], []>} : vector<8x128xf32>, vector<128x128xf32>, vector<8x128xf32> -> vector<8x128xf32>
    %cst_170 = arith.constant dense<0.000000e+00> : vector<8x128xf32>
    %439 = tpu.matmul %432, %80, %cst_170 {dimension_numbers = #tpu.dot_dimension_numbers<[1], [0], [0], [1], [0, 0, 1, 1], [], []>} : vector<8x128xf32>, vector<128x128xf32>, vector<8x128xf32> -> vector<8x128xf32>
    %cst_171 = arith.constant dense<0.000000e+00> : vector<8x128xf32>
    %440 = tpu.matmul %427, %13, %cst_171 {dimension_numbers = #tpu.dot_dimension_numbers<[1], [0], [0], [1], [0, 0, 1, 1], [], []>} : vector<8x128xf32>, vector<128x128xf32>, vector<8x128xf32> -> vector<8x128xf32>
    %cst_172 = arith.constant dense<0.000000e+00> : vector<8x128xf32>
    %441 = tpu.matmul %432, %21, %cst_172 {dimension_numbers = #tpu.dot_dimension_numbers<[1], [0], [0], [1], [0, 0, 1, 1], [], []>} : vector<8x128xf32>, vector<128x128xf32>, vector<8x128xf32> -> vector<8x128xf32>
    %cst_173 = arith.constant dense<0.000000e+00> : vector<8x128xf32>
    %442 = tpu.matmul %427, %100, %cst_173 {dimension_numbers = #tpu.dot_dimension_numbers<[1], [0], [0], [1], [0, 0, 1, 1], [], []>} : vector<8x128xf32>, vector<128x128xf32>, vector<8x128xf32> -> vector<8x128xf32>
    %443 = tpu.concatenate %438, %439, %440, %422, %437, %441, %442 in 0 : vector<8x128xf32>, vector<8x128xf32>, vector<8x128xf32>, vector<8x128xf32>, vector<8x128xf32>, vector<8x128xf32>, vector<8x128xf32> -> vector<56x128xf32>
    %cst_174 = arith.constant dense<0.000000e+00> : vector<8x128xf32>
    %444 = tpu.matmul %414, %443, %cst_174 {dimension_numbers = #tpu.dot_dimension_numbers<[1], [0], [0], [1], [0, 0, 1, 1], [], []>} : vector<8x56xf32>, vector<56x128xf32>, vector<8x128xf32> -> vector<8x128xf32>
    %445 = vector.broadcast %415 : vector<8x1xf32> to vector<8x128xf32>
    %446 = arith.addf %444, %445 : vector<8x128xf32>
    %cst_175 = arith.constant 0.000000e+00 : f32
    %447 = vector.shape_cast %2 : vector<1x128xi1> to vector<1x128xi1>
    %448 = vector.broadcast %447 : vector<1x128xi1> to vector<8x128xi1>
    %449 = vector.broadcast %cst_175 : f32 to vector<8x128xf32>
    %450 = arith.select %448, %446, %449 : vector<8x128xi1>, vector<8x128xf32>
    %cst_176 = arith.constant dense<0.000000e+00> : vector<8x128xf32>
    %451 = tpu.matmul %422, %80, %cst_176 {dimension_numbers = #tpu.dot_dimension_numbers<[1], [0], [0], [1], [0, 0, 1, 1], [], []>} : vector<8x128xf32>, vector<128x128xf32>, vector<8x128xf32> -> vector<8x128xf32>
    %cst_177 = arith.constant dense<0.000000e+00> : vector<8x128xf32>
    %452 = tpu.matmul %437, %80, %cst_177 {dimension_numbers = #tpu.dot_dimension_numbers<[1], [0], [0], [1], [0, 0, 1, 1], [], []>} : vector<8x128xf32>, vector<128x128xf32>, vector<8x128xf32> -> vector<8x128xf32>
    %cst_178 = arith.constant dense<0.000000e+00> : vector<8x128xf32>
    %453 = tpu.matmul %432, %13, %cst_178 {dimension_numbers = #tpu.dot_dimension_numbers<[1], [0], [0], [1], [0, 0, 1, 1], [], []>} : vector<8x128xf32>, vector<128x128xf32>, vector<8x128xf32> -> vector<8x128xf32>
    %cst_179 = arith.constant dense<0.000000e+00> : vector<8x128xf32>
    %454 = tpu.matmul %422, %21, %cst_179 {dimension_numbers = #tpu.dot_dimension_numbers<[1], [0], [0], [1], [0, 0, 1, 1], [], []>} : vector<8x128xf32>, vector<128x128xf32>, vector<8x128xf32> -> vector<8x128xf32>
    %cst_180 = arith.constant dense<0.000000e+00> : vector<8x128xf32>
    %455 = tpu.matmul %437, %21, %cst_180 {dimension_numbers = #tpu.dot_dimension_numbers<[1], [0], [0], [1], [0, 0, 1, 1], [], []>} : vector<8x128xf32>, vector<128x128xf32>, vector<8x128xf32> -> vector<8x128xf32>
    %cst_181 = arith.constant dense<0.000000e+00> : vector<8x128xf32>
    %456 = tpu.matmul %432, %100, %cst_181 {dimension_numbers = #tpu.dot_dimension_numbers<[1], [0], [0], [1], [0, 0, 1, 1], [], []>} : vector<8x128xf32>, vector<128x128xf32>, vector<8x128xf32> -> vector<8x128xf32>
    %457 = tpu.concatenate %451, %452, %453, %427, %454, %455, %456 in 0 : vector<8x128xf32>, vector<8x128xf32>, vector<8x128xf32>, vector<8x128xf32>, vector<8x128xf32>, vector<8x128xf32>, vector<8x128xf32> -> vector<56x128xf32>
    %cst_182 = arith.constant dense<0.000000e+00> : vector<8x128xf32>
    %458 = tpu.matmul %414, %457, %cst_182 {dimension_numbers = #tpu.dot_dimension_numbers<[1], [0], [0], [1], [0, 0, 1, 1], [], []>} : vector<8x56xf32>, vector<56x128xf32>, vector<8x128xf32> -> vector<8x128xf32>
    %459 = vector.broadcast %415 : vector<8x1xf32> to vector<8x128xf32>
    %460 = arith.addf %458, %459 : vector<8x128xf32>
    %cst_183 = arith.constant 0.000000e+00 : f32
    %461 = vector.shape_cast %2 : vector<1x128xi1> to vector<1x128xi1>
    %462 = vector.broadcast %461 : vector<1x128xi1> to vector<8x128xi1>
    %463 = vector.broadcast %cst_183 : f32 to vector<8x128xf32>
    %464 = arith.select %462, %460, %463 : vector<8x128xi1>, vector<8x128xf32>
    %cst_184 = arith.constant dense<0.000000e+00> : vector<8x128xf32>
    %465 = tpu.matmul %427, %80, %cst_184 {dimension_numbers = #tpu.dot_dimension_numbers<[1], [0], [0], [1], [0, 0, 1, 1], [], []>} : vector<8x128xf32>, vector<128x128xf32>, vector<8x128xf32> -> vector<8x128xf32>
    %cst_185 = arith.constant dense<0.000000e+00> : vector<8x128xf32>
    %466 = tpu.matmul %422, %13, %cst_185 {dimension_numbers = #tpu.dot_dimension_numbers<[1], [0], [0], [1], [0, 0, 1, 1], [], []>} : vector<8x128xf32>, vector<128x128xf32>, vector<8x128xf32> -> vector<8x128xf32>
    %cst_186 = arith.constant dense<0.000000e+00> : vector<8x128xf32>
    %467 = tpu.matmul %437, %13, %cst_186 {dimension_numbers = #tpu.dot_dimension_numbers<[1], [0], [0], [1], [0, 0, 1, 1], [], []>} : vector<8x128xf32>, vector<128x128xf32>, vector<8x128xf32> -> vector<8x128xf32>
    %cst_187 = arith.constant dense<0.000000e+00> : vector<8x128xf32>
    %468 = tpu.matmul %427, %21, %cst_187 {dimension_numbers = #tpu.dot_dimension_numbers<[1], [0], [0], [1], [0, 0, 1, 1], [], []>} : vector<8x128xf32>, vector<128x128xf32>, vector<8x128xf32> -> vector<8x128xf32>
    %cst_188 = arith.constant dense<0.000000e+00> : vector<8x128xf32>
    %469 = tpu.matmul %422, %100, %cst_188 {dimension_numbers = #tpu.dot_dimension_numbers<[1], [0], [0], [1], [0, 0, 1, 1], [], []>} : vector<8x128xf32>, vector<128x128xf32>, vector<8x128xf32> -> vector<8x128xf32>
    %cst_189 = arith.constant dense<0.000000e+00> : vector<8x128xf32>
    %470 = tpu.matmul %437, %100, %cst_189 {dimension_numbers = #tpu.dot_dimension_numbers<[1], [0], [0], [1], [0, 0, 1, 1], [], []>} : vector<8x128xf32>, vector<128x128xf32>, vector<8x128xf32> -> vector<8x128xf32>
    %471 = tpu.concatenate %465, %466, %467, %432, %468, %469, %470 in 0 : vector<8x128xf32>, vector<8x128xf32>, vector<8x128xf32>, vector<8x128xf32>, vector<8x128xf32>, vector<8x128xf32>, vector<8x128xf32> -> vector<56x128xf32>
    %cst_190 = arith.constant dense<0.000000e+00> : vector<8x128xf32>
    %472 = tpu.matmul %414, %471, %cst_190 {dimension_numbers = #tpu.dot_dimension_numbers<[1], [0], [0], [1], [0, 0, 1, 1], [], []>} : vector<8x56xf32>, vector<56x128xf32>, vector<8x128xf32> -> vector<8x128xf32>
    %473 = vector.broadcast %415 : vector<8x1xf32> to vector<8x128xf32>
    %474 = arith.addf %472, %473 : vector<8x128xf32>
    %cst_191 = arith.constant 0.000000e+00 : f32
    %475 = vector.shape_cast %2 : vector<1x128xi1> to vector<1x128xi1>
    %476 = vector.broadcast %475 : vector<1x128xi1> to vector<8x128xi1>
    %477 = vector.broadcast %cst_191 : f32 to vector<8x128xf32>
    %478 = arith.select %476, %474, %477 : vector<8x128xi1>, vector<8x128xf32>
    %cst_192 = arith.constant dense<0.000000e+00> : vector<8x128xf32>
    %479 = tpu.matmul %422, %174, %cst_192 {dimension_numbers = #tpu.dot_dimension_numbers<[1], [0], [0], [1], [0, 0, 1, 1], [], []>} : vector<8x128xf32>, vector<128x128xf32>, vector<8x128xf32> -> vector<8x128xf32>
    %480 = tpu.concatenate %439, %440, %422, %437, %441, %442, %479 in 0 : vector<8x128xf32>, vector<8x128xf32>, vector<8x128xf32>, vector<8x128xf32>, vector<8x128xf32>, vector<8x128xf32>, vector<8x128xf32> -> vector<56x128xf32>
    %cst_193 = arith.constant dense<0.000000e+00> : vector<8x128xf32>
    %481 = tpu.matmul %414, %480, %cst_193 {dimension_numbers = #tpu.dot_dimension_numbers<[1], [0], [0], [1], [0, 0, 1, 1], [], []>} : vector<8x56xf32>, vector<56x128xf32>, vector<8x128xf32> -> vector<8x128xf32>
    %482 = vector.broadcast %415 : vector<8x1xf32> to vector<8x128xf32>
    %483 = arith.addf %481, %482 : vector<8x128xf32>
    %cst_194 = arith.constant 0.000000e+00 : f32
    %484 = vector.shape_cast %2 : vector<1x128xi1> to vector<1x128xi1>
    %485 = vector.broadcast %484 : vector<1x128xi1> to vector<8x128xi1>
    %486 = vector.broadcast %cst_194 : f32 to vector<8x128xf32>
    %487 = arith.select %485, %483, %486 : vector<8x128xi1>, vector<8x128xf32>
    %cst_195 = arith.constant 0.000000e+00 : f32
    %488 = vector.broadcast %cst_195 : f32 to vector<8x128xf32>
    %489 = arith.cmpf ogt, %450, %488 : vector<8x128xf32>
    %cst_196 = arith.constant 0.00999999977 : f32
    %490 = vector.broadcast %cst_196 : f32 to vector<8x128xf32>
    %491 = arith.mulf %490, %450 : vector<8x128xf32>
    %492 = arith.select %489, %450, %491 : vector<8x128xi1>, vector<8x128xf32>
    %cst_197 = arith.constant 0.000000e+00 : f32
    %493 = vector.broadcast %cst_197 : f32 to vector<8x128xf32>
    %494 = arith.cmpf ogt, %464, %493 : vector<8x128xf32>
    %cst_198 = arith.constant 0.00999999977 : f32
    %495 = vector.broadcast %cst_198 : f32 to vector<8x128xf32>
    %496 = arith.mulf %495, %464 : vector<8x128xf32>
    %497 = arith.select %494, %464, %496 : vector<8x128xi1>, vector<8x128xf32>
    %cst_199 = arith.constant 0.000000e+00 : f32
    %498 = vector.broadcast %cst_199 : f32 to vector<8x128xf32>
    %499 = arith.cmpf ogt, %478, %498 : vector<8x128xf32>
    %cst_200 = arith.constant 0.00999999977 : f32
    %500 = vector.broadcast %cst_200 : f32 to vector<8x128xf32>
    %501 = arith.mulf %500, %478 : vector<8x128xf32>
    %502 = arith.select %499, %478, %501 : vector<8x128xi1>, vector<8x128xf32>
    %cst_201 = arith.constant 0.000000e+00 : f32
    %503 = vector.broadcast %cst_201 : f32 to vector<8x128xf32>
    %504 = arith.cmpf ogt, %487, %503 : vector<8x128xf32>
    %cst_202 = arith.constant 0.00999999977 : f32
    %505 = vector.broadcast %cst_202 : f32 to vector<8x128xf32>
    %506 = arith.mulf %505, %487 : vector<8x128xf32>
    %507 = arith.select %504, %487, %506 : vector<8x128xi1>, vector<8x128xf32>
    %cst_203 = arith.constant dense<0.000000e+00> : vector<8x128xf32>
    %508 = tpu.matmul %416, %492, %cst_203 {dimension_numbers = #tpu.dot_dimension_numbers<[1], [0], [0], [1], [0, 0, 1, 1], [], []>} : vector<8x8xf32>, vector<8x128xf32>, vector<8x128xf32> -> vector<8x128xf32>
    %509 = vector.broadcast %417 : vector<8x1xf32> to vector<8x128xf32>
    %510 = arith.addf %508, %509 : vector<8x128xf32>
    %cst_204 = arith.constant 0.000000e+00 : f32
    %511 = vector.shape_cast %2 : vector<1x128xi1> to vector<1x128xi1>
    %512 = vector.broadcast %511 : vector<1x128xi1> to vector<8x128xi1>
    %513 = vector.broadcast %cst_204 : f32 to vector<8x128xf32>
    %514 = arith.select %512, %510, %513 : vector<8x128xi1>, vector<8x128xf32>
    %cst_205 = arith.constant dense<0.000000e+00> : vector<8x128xf32>
    %515 = tpu.matmul %416, %497, %cst_205 {dimension_numbers = #tpu.dot_dimension_numbers<[1], [0], [0], [1], [0, 0, 1, 1], [], []>} : vector<8x8xf32>, vector<8x128xf32>, vector<8x128xf32> -> vector<8x128xf32>
    %516 = vector.broadcast %417 : vector<8x1xf32> to vector<8x128xf32>
    %517 = arith.addf %515, %516 : vector<8x128xf32>
    %cst_206 = arith.constant 0.000000e+00 : f32
    %518 = vector.shape_cast %2 : vector<1x128xi1> to vector<1x128xi1>
    %519 = vector.broadcast %518 : vector<1x128xi1> to vector<8x128xi1>
    %520 = vector.broadcast %cst_206 : f32 to vector<8x128xf32>
    %521 = arith.select %519, %517, %520 : vector<8x128xi1>, vector<8x128xf32>
    %cst_207 = arith.constant dense<0.000000e+00> : vector<8x128xf32>
    %522 = tpu.matmul %416, %502, %cst_207 {dimension_numbers = #tpu.dot_dimension_numbers<[1], [0], [0], [1], [0, 0, 1, 1], [], []>} : vector<8x8xf32>, vector<8x128xf32>, vector<8x128xf32> -> vector<8x128xf32>
    %523 = vector.broadcast %417 : vector<8x1xf32> to vector<8x128xf32>
    %524 = arith.addf %522, %523 : vector<8x128xf32>
    %cst_208 = arith.constant 0.000000e+00 : f32
    %525 = vector.shape_cast %2 : vector<1x128xi1> to vector<1x128xi1>
    %526 = vector.broadcast %525 : vector<1x128xi1> to vector<8x128xi1>
    %527 = vector.broadcast %cst_208 : f32 to vector<8x128xf32>
    %528 = arith.select %526, %524, %527 : vector<8x128xi1>, vector<8x128xf32>
    %cst_209 = arith.constant dense<0.000000e+00> : vector<8x128xf32>
    %529 = tpu.matmul %416, %507, %cst_209 {dimension_numbers = #tpu.dot_dimension_numbers<[1], [0], [0], [1], [0, 0, 1, 1], [], []>} : vector<8x8xf32>, vector<8x128xf32>, vector<8x128xf32> -> vector<8x128xf32>
    %530 = vector.broadcast %417 : vector<8x1xf32> to vector<8x128xf32>
    %531 = arith.addf %529, %530 : vector<8x128xf32>
    %cst_210 = arith.constant 0.000000e+00 : f32
    %532 = vector.shape_cast %2 : vector<1x128xi1> to vector<1x128xi1>
    %533 = vector.broadcast %532 : vector<1x128xi1> to vector<8x128xi1>
    %534 = vector.broadcast %cst_210 : f32 to vector<8x128xf32>
    %535 = arith.select %533, %531, %534 : vector<8x128xi1>, vector<8x128xf32>
    %536 = arith.addf %410, %514 : vector<8x128xf32>
    %537 = arith.addf %411, %521 : vector<8x128xf32>
    %538 = arith.addf %412, %528 : vector<8x128xf32>
    %539 = arith.addf %413, %535 : vector<8x128xf32>
    %c0_211 = arith.constant 0 : index
    %c0_212 = arith.constant 0 : index
    %540 = vector.load %arg24[%c0_211, %c0_212] : memref<4x56xf32, #tpu.memory_space<vmem>>, vector<4x56xf32>
    %c0_213 = arith.constant 0 : index
    %c0_214 = arith.constant 0 : index
    %541 = vector.load %arg25[%c0_213, %c0_214] : memref<4x1xf32, #tpu.memory_space<vmem>>, vector<4x1xf32>
    %cst_215 = arith.constant 0.000000e+00 : f32
    %542 = vector.broadcast %cst_215 : f32 to vector<8x128xf32>
    %543 = arith.cmpf ogt, %536, %542 : vector<8x128xf32>
    %cst_216 = arith.constant 0.00999999977 : f32
    %544 = vector.broadcast %cst_216 : f32 to vector<8x128xf32>
    %545 = arith.mulf %544, %536 : vector<8x128xf32>
    %546 = arith.select %543, %536, %545 : vector<8x128xi1>, vector<8x128xf32>
    %cst_217 = arith.constant 0.000000e+00 : f32
    %547 = vector.broadcast %cst_217 : f32 to vector<8x128xf32>
    %548 = arith.cmpf ogt, %537, %547 : vector<8x128xf32>
    %cst_218 = arith.constant 0.00999999977 : f32
    %549 = vector.broadcast %cst_218 : f32 to vector<8x128xf32>
    %550 = arith.mulf %549, %537 : vector<8x128xf32>
    %551 = arith.select %548, %537, %550 : vector<8x128xi1>, vector<8x128xf32>
    %cst_219 = arith.constant 0.000000e+00 : f32
    %552 = vector.broadcast %cst_219 : f32 to vector<8x128xf32>
    %553 = arith.cmpf ogt, %538, %552 : vector<8x128xf32>
    %cst_220 = arith.constant 0.00999999977 : f32
    %554 = vector.broadcast %cst_220 : f32 to vector<8x128xf32>
    %555 = arith.mulf %554, %538 : vector<8x128xf32>
    %556 = arith.select %553, %538, %555 : vector<8x128xi1>, vector<8x128xf32>
    %cst_221 = arith.constant 0.000000e+00 : f32
    %557 = vector.broadcast %cst_221 : f32 to vector<8x128xf32>
    %558 = arith.cmpf ogt, %539, %557 : vector<8x128xf32>
    %cst_222 = arith.constant 0.00999999977 : f32
    %559 = vector.broadcast %cst_222 : f32 to vector<8x128xf32>
    %560 = arith.mulf %559, %539 : vector<8x128xf32>
    %561 = arith.select %558, %539, %560 : vector<8x128xi1>, vector<8x128xf32>
    %cst_223 = arith.constant dense<0.000000e+00> : vector<8x128xf32>
    %562 = tpu.matmul %551, %13, %cst_223 {dimension_numbers = #tpu.dot_dimension_numbers<[1], [0], [0], [1], [0, 0, 1, 1], [], []>} : vector<8x128xf32>, vector<128x128xf32>, vector<8x128xf32> -> vector<8x128xf32>
    %cst_224 = arith.constant dense<0.000000e+00> : vector<8x128xf32>
    %563 = tpu.matmul %556, %13, %cst_224 {dimension_numbers = #tpu.dot_dimension_numbers<[1], [0], [0], [1], [0, 0, 1, 1], [], []>} : vector<8x128xf32>, vector<128x128xf32>, vector<8x128xf32> -> vector<8x128xf32>
    %cst_225 = arith.constant dense<0.000000e+00> : vector<8x128xf32>
    %564 = tpu.matmul %561, %13, %cst_225 {dimension_numbers = #tpu.dot_dimension_numbers<[1], [0], [0], [1], [0, 0, 1, 1], [], []>} : vector<8x128xf32>, vector<128x128xf32>, vector<8x128xf32> -> vector<8x128xf32>
    %565 = tpu.concatenate %562, %563, %564, %546, %551, %556, %561 in 0 : vector<8x128xf32>, vector<8x128xf32>, vector<8x128xf32>, vector<8x128xf32>, vector<8x128xf32>, vector<8x128xf32>, vector<8x128xf32> -> vector<56x128xf32>
    %cst_226 = arith.constant dense<0.000000e+00> : vector<4x128xf32>
    %566 = tpu.matmul %540, %565, %cst_226 {dimension_numbers = #tpu.dot_dimension_numbers<[1], [0], [0], [1], [0, 0, 1, 1], [], []>} : vector<4x56xf32>, vector<56x128xf32>, vector<4x128xf32> -> vector<4x128xf32>
    %567 = vector.broadcast %541 : vector<4x1xf32> to vector<4x128xf32>
    %568 = arith.addf %566, %567 : vector<4x128xf32>
    %cst_227 = arith.constant 0.000000e+00 : f32
    %569 = vector.shape_cast %2 : vector<1x128xi1> to vector<1x128xi1>
    %570 = vector.broadcast %569 : vector<1x128xi1> to vector<4x128xi1>
    %571 = vector.broadcast %cst_227 : f32 to vector<4x128xf32>
    %572 = arith.select %570, %568, %571 : vector<4x128xi1>, vector<4x128xf32>
    %cst_228 = arith.constant dense<0.000000e+00> : vector<8x128xf32>
    %573 = tpu.matmul %546, %21, %cst_228 {dimension_numbers = #tpu.dot_dimension_numbers<[1], [0], [0], [1], [0, 0, 1, 1], [], []>} : vector<8x128xf32>, vector<128x128xf32>, vector<8x128xf32> -> vector<8x128xf32>
    %574 = tpu.concatenate %563, %564, %546, %551, %556, %561, %573 in 0 : vector<8x128xf32>, vector<8x128xf32>, vector<8x128xf32>, vector<8x128xf32>, vector<8x128xf32>, vector<8x128xf32>, vector<8x128xf32> -> vector<56x128xf32>
    %cst_229 = arith.constant dense<0.000000e+00> : vector<4x128xf32>
    %575 = tpu.matmul %540, %574, %cst_229 {dimension_numbers = #tpu.dot_dimension_numbers<[1], [0], [0], [1], [0, 0, 1, 1], [], []>} : vector<4x56xf32>, vector<56x128xf32>, vector<4x128xf32> -> vector<4x128xf32>
    %576 = vector.broadcast %541 : vector<4x1xf32> to vector<4x128xf32>
    %577 = arith.addf %575, %576 : vector<4x128xf32>
    %cst_230 = arith.constant 0.000000e+00 : f32
    %578 = vector.shape_cast %2 : vector<1x128xi1> to vector<1x128xi1>
    %579 = vector.broadcast %578 : vector<1x128xi1> to vector<4x128xi1>
    %580 = vector.broadcast %cst_230 : f32 to vector<4x128xf32>
    %581 = arith.select %579, %577, %580 : vector<4x128xi1>, vector<4x128xf32>
    %cst_231 = arith.constant dense<0.000000e+00> : vector<8x128xf32>
    %582 = tpu.matmul %551, %21, %cst_231 {dimension_numbers = #tpu.dot_dimension_numbers<[1], [0], [0], [1], [0, 0, 1, 1], [], []>} : vector<8x128xf32>, vector<128x128xf32>, vector<8x128xf32> -> vector<8x128xf32>
    %583 = tpu.concatenate %564, %546, %551, %556, %561, %573, %582 in 0 : vector<8x128xf32>, vector<8x128xf32>, vector<8x128xf32>, vector<8x128xf32>, vector<8x128xf32>, vector<8x128xf32>, vector<8x128xf32> -> vector<56x128xf32>
    %cst_232 = arith.constant dense<0.000000e+00> : vector<4x128xf32>
    %584 = tpu.matmul %540, %583, %cst_232 {dimension_numbers = #tpu.dot_dimension_numbers<[1], [0], [0], [1], [0, 0, 1, 1], [], []>} : vector<4x56xf32>, vector<56x128xf32>, vector<4x128xf32> -> vector<4x128xf32>
    %585 = vector.broadcast %541 : vector<4x1xf32> to vector<4x128xf32>
    %586 = arith.addf %584, %585 : vector<4x128xf32>
    %cst_233 = arith.constant 0.000000e+00 : f32
    %587 = vector.shape_cast %2 : vector<1x128xi1> to vector<1x128xi1>
    %588 = vector.broadcast %587 : vector<1x128xi1> to vector<4x128xi1>
    %589 = vector.broadcast %cst_233 : f32 to vector<4x128xf32>
    %590 = arith.select %588, %586, %589 : vector<4x128xi1>, vector<4x128xf32>
    %cst_234 = arith.constant dense<0.000000e+00> : vector<8x128xf32>
    %591 = tpu.matmul %556, %21, %cst_234 {dimension_numbers = #tpu.dot_dimension_numbers<[1], [0], [0], [1], [0, 0, 1, 1], [], []>} : vector<8x128xf32>, vector<128x128xf32>, vector<8x128xf32> -> vector<8x128xf32>
    %592 = tpu.concatenate %546, %551, %556, %561, %573, %582, %591 in 0 : vector<8x128xf32>, vector<8x128xf32>, vector<8x128xf32>, vector<8x128xf32>, vector<8x128xf32>, vector<8x128xf32>, vector<8x128xf32> -> vector<56x128xf32>
    %cst_235 = arith.constant dense<0.000000e+00> : vector<4x128xf32>
    %593 = tpu.matmul %540, %592, %cst_235 {dimension_numbers = #tpu.dot_dimension_numbers<[1], [0], [0], [1], [0, 0, 1, 1], [], []>} : vector<4x56xf32>, vector<56x128xf32>, vector<4x128xf32> -> vector<4x128xf32>
    %594 = vector.broadcast %541 : vector<4x1xf32> to vector<4x128xf32>
    %595 = arith.addf %593, %594 : vector<4x128xf32>
    %cst_236 = arith.constant 0.000000e+00 : f32
    %596 = vector.shape_cast %2 : vector<1x128xi1> to vector<1x128xi1>
    %597 = vector.broadcast %596 : vector<1x128xi1> to vector<4x128xi1>
    %598 = vector.broadcast %cst_236 : f32 to vector<4x128xf32>
    %599 = arith.select %597, %595, %598 : vector<4x128xi1>, vector<4x128xf32>
    %600 = vector.extract_strided_slice %572 {offsets = [0, 0], sizes = [2, 128], strides = [1, 1]} : vector<4x128xf32> to vector<2x128xf32>
    %601 = vector.extract_strided_slice %572 {offsets = [2, 0], sizes = [2, 128], strides = [1, 1]} : vector<4x128xf32> to vector<2x128xf32>
    %cst_237 = arith.constant 0.000000e+00 : f32
    %602 = vector.broadcast %cst_237 : f32 to vector<2x128xf32>
    %603 = arith.subf %602, %601 : vector<2x128xf32>
    %604 = math.exp %603 : vector<2x128xf32>
    %cst_238 = arith.constant 1.000000e+00 : f32
    %605 = vector.broadcast %cst_238 : f32 to vector<2x128xf32>
    %606 = arith.addf %605, %604 : vector<2x128xf32>
    %cst_239 = arith.constant 1.000000e+00 : f32
    %607 = vector.broadcast %cst_239 : f32 to vector<2x128xf32>
    %608 = arith.divf %607, %606 : vector<2x128xf32>
    %609 = arith.mulf %600, %608 : vector<2x128xf32>
    %610 = vector.extract_strided_slice %581 {offsets = [0, 0], sizes = [2, 128], strides = [1, 1]} : vector<4x128xf32> to vector<2x128xf32>
    %611 = vector.extract_strided_slice %581 {offsets = [2, 0], sizes = [2, 128], strides = [1, 1]} : vector<4x128xf32> to vector<2x128xf32>
    %cst_240 = arith.constant 0.000000e+00 : f32
    %612 = vector.broadcast %cst_240 : f32 to vector<2x128xf32>
    %613 = arith.subf %612, %611 : vector<2x128xf32>
    %614 = math.exp %613 : vector<2x128xf32>
    %cst_241 = arith.constant 1.000000e+00 : f32
    %615 = vector.broadcast %cst_241 : f32 to vector<2x128xf32>
    %616 = arith.addf %615, %614 : vector<2x128xf32>
    %cst_242 = arith.constant 1.000000e+00 : f32
    %617 = vector.broadcast %cst_242 : f32 to vector<2x128xf32>
    %618 = arith.divf %617, %616 : vector<2x128xf32>
    %619 = arith.mulf %610, %618 : vector<2x128xf32>
    %620 = vector.extract_strided_slice %590 {offsets = [0, 0], sizes = [2, 128], strides = [1, 1]} : vector<4x128xf32> to vector<2x128xf32>
    %621 = vector.extract_strided_slice %590 {offsets = [2, 0], sizes = [2, 128], strides = [1, 1]} : vector<4x128xf32> to vector<2x128xf32>
    %cst_243 = arith.constant 0.000000e+00 : f32
    %622 = vector.broadcast %cst_243 : f32 to vector<2x128xf32>
    %623 = arith.subf %622, %621 : vector<2x128xf32>
    %624 = math.exp %623 : vector<2x128xf32>
    %cst_244 = arith.constant 1.000000e+00 : f32
    %625 = vector.broadcast %cst_244 : f32 to vector<2x128xf32>
    %626 = arith.addf %625, %624 : vector<2x128xf32>
    %cst_245 = arith.constant 1.000000e+00 : f32
    %627 = vector.broadcast %cst_245 : f32 to vector<2x128xf32>
    %628 = arith.divf %627, %626 : vector<2x128xf32>
    %629 = arith.mulf %620, %628 : vector<2x128xf32>
    %630 = vector.extract_strided_slice %599 {offsets = [0, 0], sizes = [2, 128], strides = [1, 1]} : vector<4x128xf32> to vector<2x128xf32>
    %631 = vector.extract_strided_slice %599 {offsets = [2, 0], sizes = [2, 128], strides = [1, 1]} : vector<4x128xf32> to vector<2x128xf32>
    %cst_246 = arith.constant 0.000000e+00 : f32
    %632 = vector.broadcast %cst_246 : f32 to vector<2x128xf32>
    %633 = arith.subf %632, %631 : vector<2x128xf32>
    %634 = math.exp %633 : vector<2x128xf32>
    %cst_247 = arith.constant 1.000000e+00 : f32
    %635 = vector.broadcast %cst_247 : f32 to vector<2x128xf32>
    %636 = arith.addf %635, %634 : vector<2x128xf32>
    %cst_248 = arith.constant 1.000000e+00 : f32
    %637 = vector.broadcast %cst_248 : f32 to vector<2x128xf32>
    %638 = arith.divf %637, %636 : vector<2x128xf32>
    %639 = arith.mulf %630, %638 : vector<2x128xf32>
    %c0_249 = arith.constant 0 : index
    %c0_250 = arith.constant 0 : index
    %c0_251 = arith.constant 0 : index
    %c0_252 = arith.constant 0 : index
    %640 = vector.load %arg26[%c0_249, %c0_250, %c0_251, %c0_252] : memref<1x4x2x128xf32, #tpu.memory_space<vmem>>, vector<1x1x2x128xf32>
    %641 = vector.shape_cast %640 : vector<1x1x2x128xf32> to vector<2x128xf32>
    %642 = vector.shape_cast %609 : vector<2x128xf32> to vector<1x1x2x128xf32>
    tpu.vector_store %arg26[%c0_249, %c0_250, %c0_251, %c0_252], %642 {strides = array<i32>} : memref<1x4x2x128xf32, #tpu.memory_space<vmem>>, vector<1x1x2x128xf32>,
    %c0_253 = arith.constant 0 : index
    %c1 = arith.constant 1 : index
    %c0_254 = arith.constant 0 : index
    %c0_255 = arith.constant 0 : index
    %643 = vector.load %arg26[%c0_253, %c1, %c0_254, %c0_255] : memref<1x4x2x128xf32, #tpu.memory_space<vmem>>, vector<1x1x2x128xf32>
    %644 = vector.shape_cast %643 : vector<1x1x2x128xf32> to vector<2x128xf32>
    %645 = vector.shape_cast %619 : vector<2x128xf32> to vector<1x1x2x128xf32>
    tpu.vector_store %arg26[%c0_253, %c1, %c0_254, %c0_255], %645 {strides = array<i32>} : memref<1x4x2x128xf32, #tpu.memory_space<vmem>>, vector<1x1x2x128xf32>,
    %c0_256 = arith.constant 0 : index
    %c2 = arith.constant 2 : index
    %c0_257 = arith.constant 0 : index
    %c0_258 = arith.constant 0 : index
    %646 = vector.load %arg26[%c0_256, %c2, %c0_257, %c0_258] : memref<1x4x2x128xf32, #tpu.memory_space<vmem>>, vector<1x1x2x128xf32>
    %647 = vector.shape_cast %646 : vector<1x1x2x128xf32> to vector<2x128xf32>
    %648 = vector.shape_cast %629 : vector<2x128xf32> to vector<1x1x2x128xf32>
    tpu.vector_store %arg26[%c0_256, %c2, %c0_257, %c0_258], %648 {strides = array<i32>} : memref<1x4x2x128xf32, #tpu.memory_space<vmem>>, vector<1x1x2x128xf32>,
    %c0_259 = arith.constant 0 : index
    %c3 = arith.constant 3 : index
    %c0_260 = arith.constant 0 : index
    %c0_261 = arith.constant 0 : index
    %649 = vector.load %arg26[%c0_259, %c3, %c0_260, %c0_261] : memref<1x4x2x128xf32, #tpu.memory_space<vmem>>, vector<1x1x2x128xf32>
    %650 = vector.shape_cast %649 : vector<1x1x2x128xf32> to vector<2x128xf32>
    %651 = vector.shape_cast %639 : vector<2x128xf32> to vector<1x1x2x128xf32>
    tpu.vector_store %arg26[%c0_259, %c3, %c0_260, %c0_261], %651 {strides = array<i32>} : memref<1x4x2x128xf32, #tpu.memory_space<vmem>>, vector<1x1x2x128xf32>,
    return
  }
  func.func @transform_0(%arg0: i32) -> (i32, i32, i32) {
    %c0_i32 = arith.constant 0 : i32
    %c0_i32_0 = arith.constant 0 : i32
    %c0_i32_1 = arith.constant 0 : i32
    return %arg0, %c0_i32, %c0_i32_0 : i32, i32, i32
  }
  func.func @transform_1(%arg0: i32) -> (i32, i32) {
    %c0_i32 = arith.constant 0 : i32
    %c0_i32_0 = arith.constant 0 : i32
    %c0_i32_1 = arith.constant 0 : i32
    return %c0_i32, %c0_i32_0 : i32, i32
  }
  func.func @transform_2(%arg0: i32) -> (i32, i32) {
    %c0_i32 = arith.constant 0 : i32
    %c0_i32_0 = arith.constant 0 : i32
    %c0_i32_1 = arith.constant 0 : i32
    return %c0_i32, %c0_i32_0 : i32, i32
  }
  func.func @transform_3(%arg0: i32) -> (i32, i32, i32) {
    %c0_i32 = arith.constant 0 : i32
    %c0_i32_0 = arith.constant 0 : i32
    %c0_i32_1 = arith.constant 0 : i32
    %c0_i32_2 = arith.constant 0 : i32
    return %c0_i32, %c0_i32_0, %c0_i32_1 : i32, i32, i32
  }
  func.func @transform_4(%arg0: i32) -> (i32, i32) {
    %c0_i32 = arith.constant 0 : i32
    %c0_i32_0 = arith.constant 0 : i32
    %c0_i32_1 = arith.constant 0 : i32
    return %c0_i32, %c0_i32_0 : i32, i32
  }
  func.func @transform_5(%arg0: i32) -> (i32, i32) {
    %c0_i32 = arith.constant 0 : i32
    %c0_i32_0 = arith.constant 0 : i32
    %c0_i32_1 = arith.constant 0 : i32
    return %c0_i32, %c0_i32_0 : i32, i32
  }
  func.func @transform_6(%arg0: i32) -> (i32, i32) {
    %c0_i32 = arith.constant 0 : i32
    %c0_i32_0 = arith.constant 0 : i32
    %c0_i32_1 = arith.constant 0 : i32
    return %c0_i32, %c0_i32_0 : i32, i32
  }
  func.func @transform_7(%arg0: i32) -> (i32, i32) {
    %c0_i32 = arith.constant 0 : i32
    %c0_i32_0 = arith.constant 0 : i32
    %c0_i32_1 = arith.constant 0 : i32
    return %c0_i32, %c0_i32_0 : i32, i32
  }
  func.func @transform_8(%arg0: i32) -> (i32, i32) {
    %c0_i32 = arith.constant 0 : i32
    %c0_i32_0 = arith.constant 0 : i32
    %c0_i32_1 = arith.constant 0 : i32
    return %c0_i32, %c0_i32_0 : i32, i32
  }
  func.func @transform_9(%arg0: i32) -> (i32, i32) {
    %c0_i32 = arith.constant 0 : i32
    %c0_i32_0 = arith.constant 0 : i32
    %c0_i32_1 = arith.constant 0 : i32
    return %c0_i32, %c0_i32_0 : i32, i32
  }
  func.func @transform_10(%arg0: i32) -> (i32, i32) {
    %c0_i32 = arith.constant 0 : i32
    %c0_i32_0 = arith.constant 0 : i32
    %c0_i32_1 = arith.constant 0 : i32
    return %c0_i32, %c0_i32_0 : i32, i32
  }
  func.func @transform_11(%arg0: i32) -> (i32, i32) {
    %c0_i32 = arith.constant 0 : i32
    %c0_i32_0 = arith.constant 0 : i32
    %c0_i32_1 = arith.constant 0 : i32
    return %c0_i32, %c0_i32_0 : i32, i32
  }
  func.func @transform_12(%arg0: i32) -> (i32, i32) {
    %c0_i32 = arith.constant 0 : i32
    %c0_i32_0 = arith.constant 0 : i32
    %c0_i32_1 = arith.constant 0 : i32
    return %c0_i32, %c0_i32_0 : i32, i32
  }
  func.func @transform_13(%arg0: i32) -> (i32, i32, i32) {
    %c0_i32 = arith.constant 0 : i32
    %c0_i32_0 = arith.constant 0 : i32
    %c0_i32_1 = arith.constant 0 : i32
    %c0_i32_2 = arith.constant 0 : i32
    return %c0_i32, %c0_i32_0, %c0_i32_1 : i32, i32, i32
  }
  func.func @transform_14(%arg0: i32) -> (i32, i32) {
    %c0_i32 = arith.constant 0 : i32
    %c0_i32_0 = arith.constant 0 : i32
    %c0_i32_1 = arith.constant 0 : i32
    return %c0_i32, %c0_i32_0 : i32, i32
  }
  func.func @transform_15(%arg0: i32) -> (i32, i32) {
    %c0_i32 = arith.constant 0 : i32
    %c0_i32_0 = arith.constant 0 : i32
    %c0_i32_1 = arith.constant 0 : i32
    return %c0_i32, %c0_i32_0 : i32, i32
  }
  func.func @transform_16(%arg0: i32) -> (i32, i32) {
    %c0_i32 = arith.constant 0 : i32
    %c0_i32_0 = arith.constant 0 : i32
    %c0_i32_1 = arith.constant 0 : i32
    return %c0_i32, %c0_i32_0 : i32, i32
  }
  func.func @transform_17(%arg0: i32) -> (i32, i32) {
    %c0_i32 = arith.constant 0 : i32
    %c0_i32_0 = arith.constant 0 : i32
    %c0_i32_1 = arith.constant 0 : i32
    return %c0_i32, %c0_i32_0 : i32, i32
  }
  func.func @transform_18(%arg0: i32) -> (i32, i32) {
    %c0_i32 = arith.constant 0 : i32
    %c0_i32_0 = arith.constant 0 : i32
    %c0_i32_1 = arith.constant 0 : i32
    return %c0_i32, %c0_i32_0 : i32, i32
  }
  func.func @transform_19(%arg0: i32) -> (i32, i32) {
    %c0_i32 = arith.constant 0 : i32
    %c0_i32_0 = arith.constant 0 : i32
    %c0_i32_1 = arith.constant 0 : i32
    return %c0_i32, %c0_i32_0 : i32, i32
  }
  func.func @transform_20(%arg0: i32) -> (i32, i32) {
    %c0_i32 = arith.constant 0 : i32
    %c0_i32_0 = arith.constant 0 : i32
    %c0_i32_1 = arith.constant 0 : i32
    return %c0_i32, %c0_i32_0 : i32, i32
  }
  func.func @transform_21(%arg0: i32) -> (i32, i32) {
    %c0_i32 = arith.constant 0 : i32
    %c0_i32_0 = arith.constant 0 : i32
    %c0_i32_1 = arith.constant 0 : i32
    return %c0_i32, %c0_i32_0 : i32, i32
  }
  func.func @transform_22(%arg0: i32) -> (i32, i32) {
    %c0_i32 = arith.constant 0 : i32
    %c0_i32_0 = arith.constant 0 : i32
    %c0_i32_1 = arith.constant 0 : i32
    return %c0_i32, %c0_i32_0 : i32, i32
  }
  func.func @transform_23(%arg0: i32) -> (i32, i32) {
    %c0_i32 = arith.constant 0 : i32
    %c0_i32_0 = arith.constant 0 : i32
    %c0_i32_1 = arith.constant 0 : i32
    return %c0_i32, %c0_i32_0 : i32, i32
  }
  func.func @transform_24(%arg0: i32) -> (i32, i32) {
    %c0_i32 = arith.constant 0 : i32
    %c0_i32_0 = arith.constant 0 : i32
    %c0_i32_1 = arith.constant 0 : i32
    return %c0_i32, %c0_i32_0 : i32, i32
  }
  func.func @transform_25(%arg0: i32) -> (i32, i32, i32, i32) {
    %c0_i32 = arith.constant 0 : i32
    %c0_i32_0 = arith.constant 0 : i32
    %c0_i32_1 = arith.constant 0 : i32
    %c0_i32_2 = arith.constant 0 : i32
    return %arg0, %c0_i32, %c0_i32_0, %c0_i32_1 : i32, i32, i32, i32
  }
}

</mosaic_0001>

<bundles_post_ra>
// kernel: tpu_custom_call.1
= control target key start
LH: loop header
LB: loop body
LE: loop exit
PB: predicated region body
PF: predicated region fallthrough
CT: control target
= control target key end

     0   :  { %6 = vsyncpa [#allocation3], 0  ;;  %s128_s0 = inlined_call_operand.hbm [shape: f32[8,128], index: 0, kind: input, shape index: {}]   ;;  %s129_s1 = inlined_call_operand.hbm [shape: f32[8,128], index: 1, kind: output, shape index: {}]  }
   0x1   :  { %7 = vsyncpa [#allocation4], 0  ;;  %s91_s6 = smov [#allocation2]   ;;  %s43_s10 = scalar_lea.hbm %s128_s0, 128 }
   0x2   :  { %s14_s7 = sshll.u32 %s91_s6, 4  ;;  %p44_p0 = scmp.ne.s32.totalorder %s128_s0, %s43_s10  ;;  %s15_s7 = int_to_ptr.vmem [resolvable:$true] %s14_s7 }
   0x3   :  { %p47_p1 = scmp.lt.u32.totalorder %s43_s10, %s128_s0 }
   0x5   :  { %p49_p2 = pnand %p47_p1, %p44_p0 }
   0x7   :  { %52 = shalt.err (!%p49_p2)
}
   0x8   :  { %s53_s15 = scalar_lea.vmem %s15_s7, 128  ;;  %p58_p4 = scmp.lt.s32.totalorder %s15_s7, %s15_s7 }
   0x9   :  { %p54_p3 = scmp.ne.s32.totalorder %s15_s7, %s53_s15  ;;  %p59_p5 = scmp.lt.s32.totalorder %s53_s15, %s53_s15 }
   0xb   :  { %p60_p6 = por %p59_p5, %p58_p4 }
   0xd   :  { %p61_p7 = pnand %p60_p6, %p54_p3 }
   0xf   :  { %64 = shalt.err (!%p61_p7)
}
  0x10   :  { %17 = dma.hbm_to_vmem [thread:$0]  %s128_s0, 128, %s15_s7, [#allocation3]  }
  0x11   :  { %87 = dma.done.wait [#allocation3], 128  }
  0x12   :  { %88 = vsyncadd [#allocation3], 4294967168  ;;  %v21_v0 = vld [vmem:[#allocation2] sm:$0xff]  ;;  %s92_s18 = smov 1   ;;  %s93_s19 = smov [#allocation5]  }
  0x13   :  { %22 = vrot.lane.b32.xlu0 %v21_v0, %s92_s18  ;;  %s31_s20 = sshll.u32 %s93_s19, 4  ;;  %s32_s20 = int_to_ptr.vmem [resolvable:$true] %s31_s20 }
  0x14   :  { %s65_s21 = scalar_lea.vmem %s32_s20, 128  ;;  %p70_p9 = scmp.lt.s32.totalorder %s32_s20, %s32_s20 }
  0x15   :  { %p66_p8 = scmp.ne.s32.totalorder %s32_s20, %s65_s21  ;;  %p71_p10 = scmp.lt.s32.totalorder %s65_s21, %s65_s21 }
  0x17   :  { %p72_p11 = por %p71_p10, %p70_p9 }
  0x19   :  { %p73_p12 = pnand %p72_p11, %p66_p8 }
  0x85   :  { %v23_v1 = vpop.permute.xlu0 %22 }
  0x86   :  { %24 = vst [vmem:[#allocation5] sm:$0xff] %v23_v1 }
  0x87   :  { %76 = shalt.err (!%p73_p12)
}
  0x88   :  { %s77_s0 = scalar_lea.hbm %s129_s1, 128 }
  0x89   :  { %p78_p13 = scmp.ne.s32.totalorder %s129_s1, %s77_s0  ;;  %p81_p0 = scmp.lt.u32.totalorder %s77_s0, %s129_s1 }
  0x8b   :  { %p83_p1 = pnand %p81_p0, %p78_p13 }
  0x8d   :  { %86 = shalt.err (!%p83_p1)
}
  0x8e   :  { %34 = dma.vmem_to_hbm [thread:$0]  %s32_s20, 128, %s129_s1, [#allocation4]  }
  0x8f   :  { %89 = dma.done.wait [#allocation4], 128  }
  0x90   :  { %90 = vsyncadd [#allocation4], 4294967168 }
  0x91   :  { %38 = vsyncpa [#allocation3], 1 }
  0x92   :  { %39 = vsyncpa [#allocation4], 1 }

// kernel: tpu_custom_call.1
= control target key start
LH: loop header
LB: loop body
LE: loop exit
PB: predicated region body
PF: predicated region fallthrough
CT: control target
= control target key end

     0   :  { %s18396_s0 = inlined_call_operand.vmem [shape: f32[2,8,128], index: 0, kind: input, shape index: {}]   ;;  %s18397_s1 = inlined_call_operand.vmem [shape: f32[32,24], index: 1, kind: input, shape index: {}]   ;;  %s18398_s2 = inlined_call_operand.vmem [shape: f32[32,1], index: 2, kind: input, shape index: {}]   ;;  %s18399_s3 = inlined_call_operand.vmem [shape: f32[2,16,64], index: 3, kind: input, shape index: {}]   ;;  %s18400_s4 = inlined_call_operand.vmem [shape: f32[16,1], index: 4, kind: input, shape index: {}]   ;;  %s18401_s5 = inlined_call_operand.vmem [shape: f32[16,112], index: 5, kind: input, shape index: {}]   ;;  %s18402_s6 = inlined_call_operand.vmem [shape: f32[16,1], index: 6, kind: input, shape index: {}]   ;;  %s18403_s7 = inlined_call_operand.vmem [shape: f32[16,16], index: 7, kind: input, shape index: {}]   ;;  %s18404_s8 = inlined_call_operand.vmem [shape: f32[16,1], index: 8, kind: input, shape index: {}]   ;;  %s18405_s9 = inlined_call_operand.vmem [shape: f32[16,112], index: 9, kind: input, shape index: {}]   ;;  %s18406_s10 = inlined_call_operand.vmem [shape: f32[16,1], index: 10, kind: input, shape index: {}]   ;;  %s18407_s11 = inlined_call_operand.vmem [shape: f32[16,16], index: 11, kind: input, shape index: {}]   ;;  %s18408_s12 = inlined_call_operand.vmem [shape: f32[16,1], index: 12, kind: input, shape index: {}]   ;;  %s18409_s13 = inlined_call_operand.vmem [shape: f32[2,8,32], index: 13, kind: input, shape index: {}]   ;;  %s18410_s14 = inlined_call_operand.vmem [shape: f32[8,1], index: 14, kind: input, shape index: {}]   ;;  %s18411_s15 = inlined_call_operand.vmem [shape: f32[8,56], index: 15, kind: input, shape index: {}]   ;;  %s18412_s16 = inlined_call_operand.vmem [shape: f32[8,1], index: 16, kind: input, shape index: {}]   ;;  %s18413_s17 = inlined_call_operand.vmem [shape: f32[8,8], index: 17, kind: input, shape index: {}]   ;;  %s18414_s18 = inlined_call_operand.vmem [shape: f32[8,1], index: 18, kind: input, shape index: {}]   ;;  %s18415_s19 = inlined_call_operand.vmem [shape: f32[8,56], index: 19, kind: input, shape index: {}]   ;;  %s18416_s20 = inlined_call_operand.vmem [shape: f32[8,1], index: 20, kind: input, shape index: {}]   ;;  %s18417_s21 = inlined_call_operand.vmem [shape: f32[8,8], index: 21, kind: input, shape index: {}]   ;;  %s18418_s22 = inlined_call_operand.vmem [shape: f32[8,1], index: 22, kind: input, shape index: {}]   ;;  %s18419_s23 = inlined_call_operand.vmem [shape: f32[4,56], index: 23, kind: input, shape index: {}]   ;;  %s18420_s24 = inlined_call_operand.vmem [shape: f32[4,1], index: 24, kind: input, shape index: {}]   ;;  %s18421_s25 = inlined_call_operand.hbm [shape: f32[2,4,2,128], index: 25, kind: output, shape index: {}]  }
   0x1   :  { %18661 = sst [smem:[#allocation42_spill]] %s18396_s0 }
   0x2   :  { %18662 = sst [smem:[#allocation43_spill]] %s18397_s1 }
   0x3   :  { %18663 = sst [smem:[#allocation44_spill]] %s18398_s2 }
   0x4   :  { %18664 = sst [smem:[#allocation45_spill]] %s18399_s3 }
   0x5   :  { %18665 = sst [smem:[#allocation46_spill]] %s18400_s4 }
   0x6   :  { %18666 = sst [smem:[#allocation47_spill]] %s18401_s5 }
   0x7   :  { %18667 = sst [smem:[#allocation48_spill]] %s18402_s6 }
   0x8   :  { %18668 = sst [smem:[#allocation49_spill]] %s18403_s7 }
   0x9   :  { %18669 = sst [smem:[#allocation50_spill]] %s18404_s8 }
   0xa   :  { %18670 = sst [smem:[#allocation51_spill]] %s18405_s9 }
   0xb   :  { %18671 = sst [smem:[#allocation52_spill]] %s18406_s10 }
   0xc   :  { %18672 = sst [smem:[#allocation53_spill]] %s18407_s11 }
   0xd   :  { %18673 = sst [smem:[#allocation54_spill]] %s18408_s12 }
   0xe   :  { %18674 = sst [smem:[#allocation55_spill]] %s18421_s25 }
   0xf   :  { %30 = vsyncpa [#allocation3], 0 }
  0x10   :  { %32 = vsyncpa [#allocation3 + $0x1], 0  ;;  %s14926_s29 = smov 0   ;;  %s14928_s2 = smov 0  }
  0x11   :  { %s14930_s6 = smov 0   ;;  %s14932_s30 = smov 0  }
  0x12 LB: > { %18675 = sst [smem:[#allocation5_spill]] %s14774_s29  ;;  %s14947_s7 = sadd.s32 4294967295, %s14786_s30   ;;  %s14786_s30 = sphi %s14932_s30, %s19103_s30   ;;  %s14782_s6 = sphi %s14930_s6, %s19108_s6   ;;  %s14778_s2 = sphi %s14928_s2, %s19107_s2   ;;  %s14774_s29 = sphi %s14926_s29, %s19106_s29  }
  0x13   : > { %18676 = sst [smem:[#allocation6_spill]] %s14782_s6  ;;  %s8236_s3 = sadd.s32 4294967294, %s14786_s30  }
  0x14   : > { %18677 = sst [smem:[#allocation7_spill]] %s14786_s30  ;;  %s14951_s26 = sadd.s32 1, %s14786_s30  }
  0x15   : > { %18678 = sst [smem:[#allocation8_spill]] %s14947_s7  ;;  %s575_s1 = sadd.s32 1, %s14782_s6 }
  0x16   : > { %18679 = sst [smem:[#allocation9_spill]] %s14951_s26  ;;  %s572_s8 = ssub.s32 %s14786_s30, %s14951_s26 }
  0x17   : > { %p585_p0 = scmp.ne.s32.totalorder %s14782_s6, %s14778_s2  ;;  %p573_p1 = scmp.eq.s32.totalorder %s572_s8, 0 }
  0x18   : > { %p586_p2 = scmp.eq.s32.totalorder %s14947_s7, 1  ;;  %p591_p3 = scmp.ne.s32.totalorder %s14778_s2, %s14774_s29 }
  0x19   : > { %p592_p4 = scmp.eq.s32.totalorder %s8236_s3, 1  ;;  %p8239_p7 = scmp.ge.s32.totalorder %s14786_s30, 1 }
  0x1a   : > { %s14962_s27 = scalar_select %p573_p1, %s14782_s6, %s575_s1  }
  0x1b   : > { %p14964_p5 = por %p586_p2, %p585_p0  ;;  %p14968_p6 = por %p592_p4, %p591_p3 }
  0x1c   : > { %18680 = sst [smem:[#allocation10_spill]] %s14962_s27  ;;  %p689_p8 = scmp.lt.s32.totalorder %s14786_s30, 3 }
  0x1d   : > { %s18681_s4 = scalar_select %p14964_p5, 1, 0 }
  0x1e   : > { %s18683_s28 = scalar_select %p14968_p6, 1, 0 }
  0x1f   : > { %18682 = sst [smem:[#allocation11_spill]] %s18681_s4  ;;  %p690_p9 = pnand %p8239_p7, %p689_p8 }
  0x20   : > { %18684 = sst [smem:[#allocation12_spill]] %s18683_s28 }
  0x21   : > { %693 = sbr.rel (%p690_p9) target bundleno = 7496 (0x1d48), region = 120 }
  0x28   : > { %v760_v0 = vlaneseq  ;;  %v18507_v1 = vmov 0.0|0.0   ;;  %vm18431_vm0 = vmmov 0   ;;  %v18505_v4 = vmov 0.0   ;;  %p756_p10 = scmp.lt.s32.totalorder %s14947_s7, 1  ;;  %s18718_s1 = sld [smem:[#allocation42_spill]]  ;;  %v4014_v56 = vld [vmem:[%s18410_s14] sm:$0xff] }
  0x29   : > { %12892 = vmatprep.subr.bf16.mxu0 %v18507_v1  ;;  %12916 = vmatprep.subr.bf16.mxu1 %v18507_v1  ;;  %v18685_v12 = vmov 0  ;;  %v18511_v13 = vmov 1.0|1.0   ;;  %v18687_v14 = vmov 0  ;;  %v18689_v15 = vmov 0  ;;  %s18722_s0 = sld [smem:[#allocation43_spill]] }
  0x2a   : > { %v14976_v2 = vand.u32 127, %v760_v0  ;;  %v14978_v3 = vshrl.u32 %v760_v0, 7  ;;  %10538 = vmatprep.mubr.msk.f32.mxu0 %vm18431_vm0, %v18505_v4  ;;  %10573 = vmatprep.mubr.msk.f32.mxu1 %vm18431_vm0, %v18505_v4  ;;  %v18691_v18 = vmov 0  ;;  %v18693_v19 = vmov 0  ;;  %s757_s9 = scalar_select %p756_p10, %s14947_s7, 1  ;;  %v4474_v57 = vld [vmem:[%s18412_s16] sm:$0xff] }
  0x2b   : > { %v18695_v22 = vmov 0  ;;  %v18697_v23 = vmov 0  ;;  %v18699_v26 = vmov 0  ;;  %v18701_v27 = vmov 0  ;;  %s18724_s29 = sld [smem:[#allocation46_spill]]  ;;  %s18726_s26 = sld [smem:[#allocation48_spill]] }
  0x2c   : > { %v14985_v5 = vadd.s32 8, %v14978_v3  ;;  %v14988_v6 = vadd.s32 4294967295, %v14976_v2  ;;  %v14991_v7 = vadd.s32 16, %v14978_v3  ;;  %v14994_v8 = vadd.s32 24, %v14978_v3  ;;  %s8241_s5 = sshll.u32 %s757_s9, 3  ;;  %s18727_s3 = sld [smem:[#allocation50_spill]] }
  0x2d   : > { %v14997_v9 = vadd.s32 1, %v14976_v2  ;;  %v15000_v10 = vadd.s32 32, %v14978_v3  ;;  %v15009_v11 = vadd.s32 40, %v14978_v3  ;;  %v15045_v16 = vadd.s32 48, %v14978_v3  ;;  %s18728_s10 = sld [smem:[#allocation52_spill]]  ;;  %s18729_s12 = sld [smem:[#allocation54_spill]] }
  0x2e   : > { %vm790_vm1 = vcmp.eq.s32.totalorder %v14978_v3, %v14988_v6  ;;  %vm791_vm2 = vcmp.eq.s32.totalorder %v14985_v5, %v14988_v6  ;;  %vm792_vm3 = vcmp.eq.s32.totalorder %v14991_v7, %v14988_v6  ;;  %vm793_vm5 = vcmp.eq.s32.totalorder %v14994_v8, %v14988_v6  ;;  %s759_s8 = scalar_lea.vmem %s18718_s1, %s8241_s5  ;;  %v4476_v58 = vld [vmem:[%s18414_s18] sm:$0xff]  ;;  %s18801_s28 = sld [smem:[#allocation49_spill]] }
  0x2f   : > { %vm15011_vm4 = vmpackc.low %vm791_vm2, %vm790_vm1  ;;  %vm909_vm6 = vcmp.eq.s32.totalorder %v14978_v3, %v14997_v9  ;;  %vm910_vm7 = vcmp.eq.s32.totalorder %v14985_v5, %v14997_v9  ;;  %vm911_vm9 = vcmp.eq.s32.totalorder %v14991_v7, %v14997_v9  ;;  %vm912_vm10 = vcmp.eq.s32.totalorder %v14994_v8, %v14997_v9  ;;  %v15227_v39 = vld [vmem:[%s759_s8] sm:$0xff]  ;;  %s18723_s8 = sld [smem:[#allocation44_spill]]  ;;  %s18883_s30 = sld [smem:[#allocation51_spill]] }
  0x30   : > { %v18686_v12 = vsel %vm15011_vm4, 4294967295, %v18685_v12  ;;  %12894 = vmatpush3.bf16.msk.msra.mxu0 %vm15011_vm4, %v18511_v13  ;;  %vm15024_vm8 = vmpackc.low %vm793_vm5, %vm792_vm3  ;;  %vm794_vm12 = vcmp.eq.s32.totalorder %v15000_v10, %v14988_v6  ;;  %vm795_vm13 = vcmp.eq.s32.totalorder %v15009_v11, %v14988_v6  ;;  %v15048_v17 = vadd.s32 56, %v14978_v3  ;;  %v764_v40 = vld [vmem:[%s18722_s0] sm:$0xff]  ;;  %s18912_s11 = sld [smem:[#allocation53_spill]]  ;;  %s18655_s5 = sand.u32 1, %s14778_s2  }
  0x31   : > { %v18688_v14 = vsel %vm15024_vm8, 4294967295, %v18687_v14  ;;  %12895 = vmatprep.subr.bf16.mxu0 %v18507_v1  ;;  %vm15033_vm11 = vmpackc.low %vm910_vm7, %vm909_vm6  ;;  %vm913_vm15 = vcmp.eq.s32.totalorder %v15000_v10, %v14997_v9  ;;  %vm914_vm1 = vcmp.eq.s32.totalorder %v15009_v11, %v14997_v9  ;;  %vm796_vm3 = vcmp.eq.s32.totalorder %v15045_v16, %v14988_v6  ;;  %s18725_s25 = smov %s18724_s29  ;;  %v1155_v46 = vld [vmem:[%s18724_s29] sm:$0xff]  ;;  %v1519_v49 = vld [vmem:[%s18726_s26 + $0x8] sm:$0xff]  ;;  %s18730_s29 = sld [smem:[#allocation45_spill]] }
  0x32   : > { %v18690_v15 = vsel %vm15033_vm11, 4294967295, %v18689_v15  ;;  %12918 = vmatpush3.bf16.msk.msra.mxu1 %vm15033_vm11, %v18511_v13  ;;  %vm15051_vm14 = vmpackc.low %vm912_vm10, %vm911_vm9  ;;  %vm797_vm5 = vcmp.eq.s32.totalorder %v15048_v17, %v14988_v6  ;;  %v15075_v20 = vadd.s32 64, %v14978_v3  ;;  %v15078_v21 = vadd.s32 72, %v14978_v3  ;;  %v1156_v47 = vld [vmem:[%s18725_s25 + $0x8] sm:$0xff]  ;;  %v1518_v48 = vld [vmem:[%s18726_s26] sm:$0xff] }
  0x33   : > { %12919 = vmatprep.subr.bf16.mxu1 %v18507_v1  ;;  %v18692_v18 = vsel %vm15051_vm14, 4294967295, %v18691_v18  ;;  %vm15063_vm2 = vmpackc.low %vm795_vm13, %vm794_vm12  ;;  %vm915_vm7 = vcmp.eq.s32.totalorder %v15045_v16, %v14997_v9  ;;  %vm916_vm9 = vcmp.eq.s32.totalorder %v15048_v17, %v14997_v9  ;;  %v15105_v24 = vadd.s32 80, %v14978_v3  ;;  %v1522_v50 = vld [vmem:[%s18727_s3] sm:$0xff]  ;;  %v1523_v51 = vld [vmem:[%s18727_s3 + $0x8] sm:$0xff] }
  0x34   : > { %12897 = vmatpush3.bf16.msk.msra.mxu0 %vm15024_vm8, %v18511_v13  ;;  %v18694_v19 = vsel %vm15063_vm2, 4294967295, %v18693_v19  ;;  %vm15081_vm6 = vmpackc.low %vm914_vm1, %vm913_vm15  ;;  %vm798_vm12 = vcmp.eq.s32.totalorder %v15075_v20, %v14988_v6  ;;  %vm799_vm13 = vcmp.eq.s32.totalorder %v15078_v21, %v14988_v6  ;;  %v15108_v25 = vadd.s32 88, %v14978_v3  ;;  %v2444_v52 = vld [vmem:[%s18728_s10] sm:$0xff]  ;;  %v2445_v53 = vld [vmem:[%s18728_s10 + $0x8] sm:$0xff] }
  0x35   : > { %12898 = vmatprep.subr.bf16.mxu0 %v18507_v1  ;;  %v18696_v22 = vsel %vm15081_vm6, 4294967295, %v18695_v22  ;;  %vm15093_vm10 = vmpackc.low %vm797_vm5, %vm796_vm3  ;;  %vm917_vm1 = vcmp.eq.s32.totalorder %v15075_v20, %v14997_v9  ;;  %vm918_vm3 = vcmp.eq.s32.totalorder %v15078_v21, %v14997_v9  ;;  %v15135_v28 = vadd.s32 96, %v14978_v3  ;;  %v768_v41 = vld [vmem:[%s18723_s8] sm:$0xff]  ;;  %v770_v42 = vld [vmem:[%s18723_s8 + $0x10] sm:$0xff]  ;;  %s18884_s4 = smov %s18883_s30 }
  0x36   : > { %12921 = vmatpush3.bf16.msk.msra.mxu1 %vm15051_vm14, %v18511_v13  ;;  %v18698_v23 = vsel %vm15093_vm10, 4294967295, %v18697_v23  ;;  %vm15111_vm15 = vmpackc.low %vm916_vm9, %vm915_vm7  ;;  %vm800_vm7 = vcmp.eq.s32.totalorder %v15105_v24, %v14988_v6  ;;  %vm801_vm9 = vcmp.eq.s32.totalorder %v15108_v25, %v14988_v6  ;;  %v15138_v29 = vadd.s32 104, %v14978_v3  ;;  %v769_v44 = vld [vmem:[%s18723_s8 + $0x8] sm:$0xff]  ;;  %v771_v45 = vld [vmem:[%s18723_s8 + $0x18] sm:$0xff] }
  0x37   : > { %12922 = vmatprep.subr.bf16.mxu1 %v18507_v1  ;;  %v18700_v26 = vsel %vm15111_vm15, 4294967295, %v18699_v26  ;;  %vm15123_vm5 = vmpackc.low %vm799_vm13, %vm798_vm12  ;;  %v18703_v30 = vmov 0  ;;  %vm919_vm13 = vcmp.eq.s32.totalorder %v15105_v24, %v14997_v9  ;;  %vm920_vm0 = vcmp.eq.s32.totalorder %v15108_v25, %v14997_v9  ;;  %v2448_v54 = vld [vmem:[%s18729_s12] sm:$0xff]  ;;  %v2449_v55 = vld [vmem:[%s18729_s12 + $0x8] sm:$0xff]  ;;  %s18731_s1 = smov %s18730_s29 }
  0x38   : > { %12900 = vmatpush3.bf16.msk.msra.mxu0 %vm15063_vm2, %v18511_v13  ;;  %v18702_v27 = vsel %vm15123_vm5, 4294967295, %v18701_v27  ;;  %vm15142_vm12 = vmpackc.low %vm918_vm3, %vm917_vm1  ;;  %v18706_v31 = vmov 0  ;;  %vm802_vm1 = vcmp.eq.s32.totalorder %v15135_v28, %v14988_v6  ;;  %vm803_vm3 = vcmp.eq.s32.totalorder %v15138_v29, %v14988_v6  ;;  %v5512_v59 = vld [vmem:[%s18416_s20] sm:$0xff] }
  0x39   : > { %12901 = vmatprep.subr.bf16.mxu0 %v18507_v1  ;;  %v18704_v30 = vsel %vm15142_vm12, 4294967295, %v18703_v30  ;;  %v15166_v32 = vadd.s32 112, %v14978_v3  ;;  %v15169_v33 = vadd.s32 120, %v14978_v3  ;;  %v18708_v34 = vmov 0  ;;  %v5514_v60 = vld [vmem:[%s18418_s22] sm:$0xff] }
  0x3a   : > { %12924 = vmatpush3.bf16.msk.msra.mxu1 %vm15081_vm6, %v18511_v13  ;;  %18705 = vst [vmem:[#allocation13_spill] sm:$0xff] %v18704_v30  ;;  %vm15185_vm6 = vmpackc.low %vm803_vm3, %vm802_vm1  ;;  %v18711_v35 = vmov 0  ;;  %v18713_v36 = vmov 0  ;;  %v18716_v37 = vmov 0  ;;  %v18719_v38 = vmov 0 }
  0x3b   : > { %12925 = vmatprep.subr.bf16.mxu1 %v18507_v1  ;;  %v18712_v35 = vsel %vm15185_vm6, 4294967295, %v18711_v35  ;;  %vm923_vm1 = vcmp.eq.s32.totalorder %v15166_v32, %v14997_v9  ;;  %vm924_vm3 = vcmp.eq.s32.totalorder %v15169_v33, %v14997_v9  ;;  %v14792_v43 = vmov 0   ;;  %v7388_v61 = vld [vmem:[%s18420_s24] sm:$0xf] }
  0x3c   : > { %12903 = vmatpush3.bf16.msk.msra.mxu0 %vm15093_vm10, %v18511_v13  ;;  %14706 = vset.pattern.permute.xlu0 %v14792_v43 }
  0x3d   : > { %12904 = vmatprep.subr.bf16.mxu0 %v18507_v1  ;;  %14707 = vset.pattern.permute.xlu1 %v14792_v43 }
  0x3e   : > { %12927 = vmatpush3.bf16.msk.msra.mxu1 %vm15111_vm15, %v18511_v13  ;;  %vm15154_vm15 = vmpackc.low %vm801_vm9, %vm800_vm7  ;;  %vm921_vm9 = vcmp.eq.s32.totalorder %v15135_v28, %v14997_v9  ;;  %1029 = vperm.xlu0 %14706, %v768_v41   ;;  %v766_v41 = vld [vmem:[%s18722_s0 + $0x10] sm:$0xff] }
  0x3f   : > { %12928 = vmatprep.subr.bf16.mxu1 %v18507_v1  ;;  %v18707_v31 = vsel %vm15154_vm15, 4294967295, %v18706_v31  ;;  %vm15173_vm7 = vmpackc.low %vm920_vm0, %vm919_vm13  ;;  %vm804_vm0 = vcmp.eq.s32.totalorder %v15166_v32, %v14988_v6  ;;  %vm805_vm13 = vcmp.eq.s32.totalorder %v15169_v33, %v14988_v6  ;;  %1039 = vperm.xlu1 %14707, %v770_v42  }
  0x40   : > { %12906 = vmatpush3.bf16.msk.msra.mxu0 %vm15123_vm5, %v18511_v13  ;;  %v18709_v34 = vsel %vm15173_vm7, 4294967295, %v18708_v34 }
  0x41   : > { %12907 = vmatprep.subr.bf16.mxu0 %v18507_v1  ;;  %18710 = vst [vmem:[#allocation14_spill] sm:$0xff] %v18709_v34 }
  0x42   : > { %12930 = vmatpush3.bf16.msk.msra.mxu1 %vm15142_vm12, %v18511_v13  ;;  %vm922_vm12 = vcmp.eq.s32.totalorder %v15138_v29, %v14997_v9  ;;  %1034 = vperm.xlu0 %14706, %v769_v44  }
  0x43   : > { %12931 = vmatprep.subr.bf16.mxu1 %v18507_v1  ;;  %vm15197_vm14 = vmpackc.low %vm922_vm12, %vm921_vm9  ;;  %vm1047_vm9 = vcmask 195584   ;;  %1044 = vperm.xlu1 %14707, %v771_v45  }
  0x44   : > { %12909 = vmatpush3.bf16.msk.msra.mxu0 %vm15154_vm15, %v18511_v13  ;;  %v18714_v36 = vsel %vm15197_vm14, 4294967295, %v18713_v36  ;;  %vm15220_vm12 = vmpackc.low %vm924_vm3, %vm923_vm1 }
  0x45   : > { %12910 = vmatprep.subr.bf16.mxu0 %v18507_v1  ;;  %18715 = vst [vmem:[#allocation15_spill] sm:$0xff] %v18714_v36  ;;  %v18720_v38 = vsel %vm15220_vm12, 4294967295, %v18719_v38 }
  0x46   : > { %12933 = vmatpush3.bf16.msk.msra.mxu1 %vm15173_vm7, %v18511_v13  ;;  %vm15209_vm7 = vmpackc.low %vm805_vm13, %vm804_vm0  ;;  %18721 = vst [vmem:[#allocation16_spill] sm:$0xff] %v18720_v38  ;;  %1256 = vperm.xlu0 %14706, %v1155_v46   ;;  %vm18453_vm0 = vcmp.lt.s32.totalorder %v14976_v2, 16 }
  0x47   : > { %12934 = vmatprep.subr.bf16.mxu1 %v18507_v1  ;;  %v18717_v37 = vsel %vm15209_vm7, 4294967295, %v18716_v37  ;;  %1261 = vperm.xlu1 %14707, %v1156_v47  }
  0x48   : > { %12912 = vmatpush3.bf16.msk.msra.mxu0 %vm15185_vm6, %v18511_v13 }
  0x49   : > { %12913 = vmatprep.subr.bf16.mxu0 %v18507_v1 }
  0x4a   : > { %12936 = vmatpush3.bf16.msk.msra.mxu1 %vm15197_vm14, %v18511_v13  ;;  %1962 = vperm.xlu0 %14706, %v1518_v48  }
  0x4b   : > { %12937 = vmatprep.subr.bf16.mxu1 %v18507_v1  ;;  %1967 = vperm.xlu1 %14707, %v1519_v49  }
  0x4c   : > { %12915 = vmatpush3.bf16.msk.msra.mxu0 %vm15209_vm7, %v18511_v13 }
  0x4e   : > { %12939 = vmatpush3.bf16.msk.msra.mxu1 %vm15220_vm12, %v18511_v13  ;;  %2269 = vperm.xlu0 %14706, %v1522_v50  }
  0x4f   : > { %10539 = vmatmul.mubr.f32.vlgmr.msra.gmra.mrb[0].mxu0 %v15227_v39  ;;  %12945 = vmatprep.subr.msk.bf16.mxu1 %vm15011_vm4, %v18511_v13 }
  0x50   : > { %10582 = vmatprep.mubr.msk.f32.mxu0 %vm1047_vm9, %v764_v40  ;;  %2274 = vperm.xlu1 %14707, %v1523_v51   ;;  %v765_v40 = vld [vmem:[%s18722_s0 + $0x8] sm:$0xff] }
  0x51   : > { %10574 = vmatmul.mubr.f32.vlgmr.msra.gmra.mrb[0].mxu1 %v15227_v39 }
  0x52   : > { %12947 = vmatpush3.bf16.msk.msra.mxu1 %vm15011_vm4, %v18511_v13  ;;  %3110 = vperm.xlu0 %14706, %v2444_v52  }
  0x53   : > { %12949 = vmatprep.subr.msk.bf16.mxu1 %vm15024_vm8, %v18511_v13 }
  0x54   : > { %3115 = vperm.xlu1 %14707, %v2445_v53  }
  0x56   : > { %12951 = vmatpush3.bf16.msk.msra.mxu1 %vm15024_vm8, %v18511_v13  ;;  %3840 = vperm.xlu0 %14706, %v2448_v54  }
  0x57   : > { %12953 = vmatprep.subr.msk.bf16.mxu1 %vm15063_vm2, %v18511_v13 }
  0x58   : > { %3845 = vperm.xlu1 %14707, %v2449_v55  }
  0x5a   : > { %12955 = vmatpush3.bf16.msk.msra.mxu1 %vm15063_vm2, %v18511_v13  ;;  %4104 = vperm.xlu0 %14706, %v4014_v56  }
  0x5b   : > { %12957 = vmatprep.subr.msk.bf16.mxu1 %vm15093_vm10, %v18511_v13 }
  0x5c   : > { %4701 = vperm.xlu1 %14707, %v4474_v57  }
  0x5e   : > { %12959 = vmatpush3.bf16.msk.msra.mxu1 %vm15093_vm10, %v18511_v13  ;;  %5216 = vperm.xlu0 %14706, %v4476_v58  }
  0x5f   : > { %12961 = vmatprep.subr.msk.bf16.mxu1 %vm15123_vm5, %v18511_v13 }
  0x60   : > { %5879 = vperm.xlu1 %14707, %v5512_v59  }
  0x62   : > { %12963 = vmatpush3.bf16.msk.msra.mxu1 %vm15123_vm5, %v18511_v13  ;;  %7093 = vperm.xlu0 %14706, %v5514_v60  }
  0x63   : > { %12965 = vmatprep.subr.msk.bf16.mxu1 %vm15154_vm15, %v18511_v13 }
  0x64   : > { %7613 = vperm.xlu1 %14707, %v7388_v61  }
  0x66   : > { %12967 = vmatpush3.bf16.msk.msra.mxu1 %vm15154_vm15, %v18511_v13 }
  0x67   : > { %12969 = vmatprep.subr.msk.bf16.mxu1 %vm15185_vm6, %v18511_v13 }
  0x6a   : > { %12971 = vmatpush3.bf16.msk.msra.mxu1 %vm15185_vm6, %v18511_v13 }
  0x6b   : > { %12973 = vmatprep.subr.msk.bf16.mxu1 %vm15209_vm7, %v18511_v13 }
  0x6e   : > { %12975 = vmatpush3.bf16.msk.msra.mxu1 %vm15209_vm7, %v18511_v13 }
  0xbd   : > { %v1030_v42 = vpop.permute.xlu0 %1029 }
  0xbe   : > { %v1040_v43 = vpop.permute.xlu1 %1039 }
  0xc1   : > { %v1035_v44 = vpop.permute.xlu0 %1034 }
  0xc2   : > { %v1045_v50 = vpop.permute.xlu1 %1044 }
 0x122   : > { %v904_v62 = vpop.f32.mrb[0].mxu0 }
 0x123   : > { %v12940_v63 = vpack.c.bf16 %v15227_v39, %v904_v62  ;;  %v10540_v0 = vpop.f32.mrb[1].mxu0  ;;  %v767_v39 = vld [vmem:[%s18722_s0 + $0x18] sm:$0xff] }
 0x124   : > { %v1023_v6 = vpop.f32.mrb[0].mxu1 }
 0x125   : > { %12941 = vmatprep.subr.bf16.mxu0 %v12940_v63  ;;  %v10575_v9 = vpop.f32.mrb[1].mxu1 }
 0x126   : > { %12943 = vmatpush3.bf16.msra.mxu0 %v12940_v63 }
 0x127   : > { %10580 = vmatprep.subr.mxu0 %v1023_v6 }
 0x12a   : > { %10581 = vmatpush3.msra.mxu0 %v1023_v6 }
 0x12b   : > { %10583 = vmatmul.mubr.msk.f32.vlgmr.msra.gmra.mrb[2].mxu0 %vm1047_vm9, %v765_v40 }
 0x12c   : > { %10585 = vmatprep.mubr.msk.f32.mxu0 %vm1047_vm9, %v766_v41  ;;  %v1151_v41 = vld [vmem:[%s18730_s29] sm:$0xff]  ;;  %s18799_s29 = sld [smem:[#allocation47_spill]] }
 0x12f   : > { %10586 = vmatmul.mubr.msk.f32.gmra.mrb[4].mxu0 %vm1047_vm9, %v767_v39 }
 0x132   : > { %s18800_s27 = smov %s18799_s29 }
 0x1fe   : > { %v10584_v45 = vpop.f32.mrb[2].mxu0 }
 0x1ff   : > { %v1132_v46 = vadd.f32 %v10584_v45, %v1035_v44  ;;  %v1126_v47 = vpop.f32.mrb[3].mxu0 }
 0x200   : > { %v1127_v48 = vadd.f32 %v1126_v47, %v1030_v42  ;;  %v1152_v47 = vld [vmem:[%s18731_s1 + $0x8] sm:$0xff] }
 0x201   : > { %v1148_v49 = vsel %vm18453_vm0, %v1132_v46, 0.0 }
 0x202   : > { %vm1158_vm13 = vcmp.gt.f32.partialorder %v1148_v49, 0.0  ;;  %v1162_v51 = vmul.f32 0.01, %v1148_v49  ;;  %v1147_v52 = vsel %vm18453_vm0, %v1127_v48, 0.0  ;;  %v10587_v53 = vpop.f32.mrb[4].mxu0  ;;  %v1153_v48 = vld [vmem:[%s18731_s1 + $0x10] sm:$0xff] }
 0x203   : > { %v1161_v54 = vmul.f32 0.01, %v1147_v52  ;;  %v1142_v55 = vadd.f32 %v10587_v53, %v1045_v50  ;;  %v1136_v56 = vpop.f32.mrb[5].mxu0  ;;  %vm1157_vm1 = vcmp.gt.f32.partialorder %v1147_v52, 0.0 }
 0x204   : > { %v1137_v57 = vadd.f32 %v1136_v56, %v1040_v43  ;;  %v1166_v58 = vsel %vm1158_vm13, %v1148_v49, %v1162_v51  ;;  %vm18454_vm13 = vcmask 523264   ;;  %v15487_v49 = vpop.permute.xlu1 %1261  ;;  %v15489_v51 = vpop.permute.xlu0 %1256 }
 0x205   : > { %v1150_v59 = vsel %vm18453_vm0, %v1142_v55, 0.0  ;;  %v1165_v60 = vsel %vm1157_vm1, %v1147_v52, %v1161_v54  ;;  %10642 = vmatprep.mubr.msk.f32.mxu0 %vm18454_vm13, %v1151_v41  ;;  %vm18732_vm1 = vnez %v18692_v18 }
 0x206   : > { %v1164_v61 = vmul.f32 0.01, %v1150_v59  ;;  %v1149_v62 = vsel %vm18453_vm0, %v1137_v57, 0.0  ;;  %10620 = vmatprep.mubr.f32.mxu1 %v1165_v60  ;;  %v15368_v63 = vpack.c.bf16 %v1166_v58, %v1165_v60  ;;  %vm1160_vm3 = vcmp.gt.f32.partialorder %v1150_v59, 0.0 }
 0x207   : > { %v1163_v0 = vmul.f32 0.01, %v1149_v62  ;;  %10621 = vmatmul.mubr.f32.vlgmr.msra.gmra.mrb[2].mxu1 %v1166_v58  ;;  %vm1159_vm9 = vcmp.gt.f32.partialorder %v1149_v62, 0.0  ;;  %vm18735_vm0 = vnez %v18704_v30 }
 0x208   : > { %12977 = vmatprep.subr.bf16.mxu0 %v15368_v63  ;;  %v1168_v6 = vsel %vm1160_vm3, %v1150_v59, %v1164_v61  ;;  %vm18733_vm3 = vnez %v18696_v22 }
 0x209   : > { %12979 = vmatpush3.bf16.msra.mxu0 %v15368_v63  ;;  %v1167_v9 = vsel %vm1159_vm9, %v1149_v62, %v1163_v0  ;;  %vm18734_vm9 = vnez %v18700_v26 }
 0x20a   : > { %10623 = vmatprep.mubr.f32.mxu1 %v1167_v9  ;;  %v15372_v40 = vpack.c.bf16 %v1168_v6, %v1167_v9 }
 0x20b   : > { %10624 = vmatmul.mubr.f32.gmra.mrb[4].mxu1 %v1168_v6 }
 0x20c   : > { %12981 = vmatprep.subr.bf16.mxu0 %v15372_v40 }
 0x20d   : > { %12983 = vmatpush3.bf16.msra.mxu0 %v15372_v40 }
 0x2da   : > { %v10622_v39 = vpop.f32.mrb[2].mxu1 }
 0x2db   : > { %v1235_v42 = vpop.f32.mrb[3].mxu1 }
 0x2dc   : > { %v12984_v43 = vpack.c.bf16 %v10622_v39, %v1235_v42  ;;  %v1154_v39 = vld [vmem:[%s18731_s1 + $0x18] sm:$0xff]  ;;  %v1536_v42 = vadd.s32 4294967294, %v14976_v2  ;;  %s19098_s1 = sld [smem:[#allocation55_spill]] }
 0x2de   : > { %v10625_v44 = vpop.f32.mrb[4].mxu1  ;;  %12985 = vmatprep.subr.bf16.mxu0 %v12984_v43 }
 0x2df   : > { %v1245_v45 = vpop.f32.mrb[5].mxu1  ;;  %12987 = vmatpush3.bf16.msra.mxu0 %v12984_v43  ;;  %v18747_v43 = vmov 0 }
 0x2e0   : > { %v12988_v46 = vpack.c.bf16 %v10625_v44, %v1245_v45  ;;  %v18750_v44 = vmov 0  ;;  %v18753_v45 = vmov 0 }
 0x2e2   : > { %12989 = vmatprep.subr.bf16.mxu0 %v12988_v46 }
 0x2e3   : > { %12991 = vmatpush3.bf16.msra.mxu0 %v12988_v46  ;;  %v18756_v46 = vmov 0 }
 0x2e4   : > { %12993 = vmatprep.subr.msk.bf16.mxu0 %vm15033_vm11, %v18511_v13 }
 0x2e6   : > { %10643 = vmatmul.mubr.msk.f32.vlgmr.msra.gmra.mrb[6].mxu0 %vm18454_vm13, %v1152_v47  ;;  %vm18736_vm13 = vnez %v18709_v34  ;;  %v18759_v47 = vmov 0 }
 0x2e7   : > { %12995 = vmatpush3.bf16.msk.msra.mxu0 %vm15033_vm11, %v18511_v13  ;;  %10677 = vmatprep.mubr.f32.mxu0 %v1165_v60 }
 0x2e8   : > { %12997 = vmatprep.subr.msk.bf16.mxu0 %vm18732_vm1, %v18511_v13 }
 0x2eb   : > { %12999 = vmatpush3.bf16.msk.msra.mxu0 %vm18732_vm1, %v18511_v13 }
 0x2ec   : > { %13001 = vmatprep.subr.msk.bf16.mxu0 %vm18733_vm3, %v18511_v13 }
 0x2ef   : > { %13003 = vmatpush3.bf16.msk.msra.mxu0 %vm18733_vm3, %v18511_v13 }
 0x2f0   : > { %13005 = vmatprep.subr.msk.bf16.mxu0 %vm18734_vm9, %v18511_v13 }
 0x2f3   : > { %13007 = vmatpush3.bf16.msk.msra.mxu0 %vm18734_vm9, %v18511_v13 }
 0x2f4   : > { %13009 = vmatprep.subr.msk.bf16.mxu0 %vm18735_vm0, %v18511_v13 }
 0x2f7   : > { %13011 = vmatpush3.bf16.msk.msra.mxu0 %vm18735_vm0, %v18511_v13 }
 0x2f8   : > { %13013 = vmatprep.subr.msk.bf16.mxu0 %vm18736_vm13, %v18511_v13 }
 0x2fb   : > { %13015 = vmatpush3.bf16.msk.msra.mxu0 %vm18736_vm13, %v18511_v13 }
 0x2fc   : > { %13017 = vmatprep.subr.msk.bf16.mxu0 %vm15197_vm14, %v18511_v13 }
 0x2ff   : > { %13019 = vmatpush3.bf16.msk.msra.mxu0 %vm15197_vm14, %v18511_v13 }
 0x300   : > { %13021 = vmatprep.subr.msk.bf16.mxu0 %vm15220_vm12, %v18511_v13 }
 0x303   : > { %13023 = vmatpush3.bf16.msk.msra.mxu0 %vm15220_vm12, %v18511_v13 }
 0x304   : > { %13073 = vmatprep.subr.msk.bf16.mxu0 %vm15011_vm4, %v18511_v13 }
 0x306   : > { %10678 = vmatmul.mubr.f32.vlgmr.msra.gmra.mrb[8].mxu0 %v1166_v58 }
 0x307   : > { %10680 = vmatprep.mubr.f32.mxu0 %v1167_v9  ;;  %13075 = vmatpush3.bf16.msk.msra.mxu0 %vm15011_vm4, %v18511_v13 }
 0x308   : > { %13077 = vmatprep.subr.msk.bf16.mxu0 %vm15024_vm8, %v18511_v13 }
 0x30a   : > { %10681 = vmatmul.mubr.f32.gmra.mrb[10].mxu0 %v1168_v6 }
 0x30b   : > { %13079 = vmatpush3.bf16.msk.msra.mxu0 %vm15024_vm8, %v18511_v13 }
 0x30c   : > { %13081 = vmatprep.subr.msk.bf16.mxu0 %vm15063_vm2, %v18511_v13 }
 0x30f   : > { %13083 = vmatpush3.bf16.msk.msra.mxu0 %vm15063_vm2, %v18511_v13 }
 0x310   : > { %13085 = vmatprep.subr.msk.bf16.mxu0 %vm15093_vm10, %v18511_v13 }
 0x313   : > { %13087 = vmatpush3.bf16.msk.msra.mxu0 %vm15093_vm10, %v18511_v13 }
 0x314   : > { %13089 = vmatprep.subr.msk.bf16.mxu0 %vm15123_vm5, %v18511_v13 }
 0x317   : > { %13091 = vmatpush3.bf16.msk.msra.mxu0 %vm15123_vm5, %v18511_v13 }
 0x318   : > { %13093 = vmatprep.subr.msk.bf16.mxu0 %vm15154_vm15, %v18511_v13 }
 0x31b   : > { %13095 = vmatpush3.bf16.msk.msra.mxu0 %vm15154_vm15, %v18511_v13  ;;  %vm18737_vm15 = vcmask 523264  }
 0x31c   : > { %13097 = vmatprep.subr.msk.bf16.mxu0 %vm15185_vm6, %v18511_v13  ;;  %10699 = vmatprep.mubr.msk.f32.mxu1 %vm18737_vm15, %v1153_v48  ;;  %v18762_v48 = vmov 0 }
 0x31f   : > { %13099 = vmatpush3.bf16.msk.msra.mxu0 %vm15185_vm6, %v18511_v13 }
 0x320   : > { %13101 = vmatprep.subr.msk.bf16.mxu0 %vm15209_vm7, %v18511_v13 }
 0x323   : > { %13103 = vmatpush3.bf16.msk.msra.mxu0 %vm15209_vm7, %v18511_v13  ;;  %vm18738_vm7 = vcmp.lt.s32.totalorder %v14976_v2, 16 }
 0x324   : > { %13137 = vmatprep.subr.msk.bf16.mxu0 %vm15033_vm11, %v18511_v13  ;;  %vm18739_vm6 = vmmov %vm18738_vm7 }
 0x3b9   : > { %v10644_v50 = vpop.f32.mrb[6].mxu0 }
 0x3ba   : > { %v1343_v52 = vadd.f32 %v10644_v50, %v15487_v49  ;;  %v1337_v53 = vpop.f32.mrb[7].mxu0 }
 0x3bb   : > { %v1338_v54 = vadd.f32 %v1337_v53, %v15489_v51 }
 0x3bc   : > { %v15495_v55 = vsel %vm18738_vm7, %v1343_v52, 0.0  ;;  %vm1538_vm7 = vcmp.eq.s32.totalorder %v14985_v5, %v1536_v42 }
 0x3bd   : > { %v1527_v56 = vmul.f32 0.01, %v15495_v55  ;;  %v15500_v57 = vsel %vm18739_vm6, %v1338_v54, 0.0  ;;  %vm1525_vm15 = vcmp.gt.f32.partialorder %v15495_v55, 0.0  ;;  %vm18740_vm6 = vcmask 523264  }
 0x3be   : > { %v1526_v58 = vmul.f32 0.01, %v15500_v57  ;;  %vm1524_vm5 = vcmp.gt.f32.partialorder %v15500_v57, 0.0 }
 0x3bf   : > { %v15510_v60 = vsel %vm1525_vm15, %v15495_v55, %v1527_v56  ;;  %vm1539_vm15 = vcmp.eq.s32.totalorder %v14991_v7, %v1536_v42 }
 0x3c0   : > { %v15506_v59 = vsel %vm1524_vm5, %v15500_v57, %v1526_v58  ;;  %vm1537_vm5 = vcmp.eq.s32.totalorder %v14978_v3, %v1536_v42 }
 0x3c1   : > { %10769 = vmatprep.mubr.f32.mxu0 %v15506_v59 }
 0x3c2   : > { %10770 = vmatmul.mubr.f32.vlgmr.msra.gmra.mrb[12].mxu0 %v15510_v60 }
 0x3c3   : > { %13139 = vmatpush3.bf16.msk.msra.mxu0 %vm15033_vm11, %v18511_v13  ;;  %10839 = vmatprep.mubr.f32.mxu0 %v15506_v59 }
 0x3c4   : > { %13141 = vmatprep.subr.msk.bf16.mxu0 %vm18732_vm1, %v18511_v13 }
 0x3c7   : > { %13143 = vmatpush3.bf16.msk.msra.mxu0 %vm18732_vm1, %v18511_v13 }
 0x3c8   : > { %13145 = vmatprep.subr.msk.bf16.mxu0 %vm18733_vm3, %v18511_v13 }
 0x3cb   : > { %13147 = vmatpush3.bf16.msk.msra.mxu0 %vm18733_vm3, %v18511_v13 }
 0x3cc   : > { %13149 = vmatprep.subr.msk.bf16.mxu0 %vm18734_vm9, %v18511_v13 }
 0x3cf   : > { %13151 = vmatpush3.bf16.msk.msra.mxu0 %vm18734_vm9, %v18511_v13 }
 0x3d0   : > { %13153 = vmatprep.subr.msk.bf16.mxu0 %vm18735_vm0, %v18511_v13 }
 0x3d3   : > { %13155 = vmatpush3.bf16.msk.msra.mxu0 %vm18735_vm0, %v18511_v13  ;;  %vm1542_vm0 = vcmp.eq.s32.totalorder %v15009_v11, %v1536_v42 }
 0x3d4   : > { %13157 = vmatprep.subr.msk.bf16.mxu0 %vm18736_vm13, %v18511_v13 }
 0x3d7   : > { %13159 = vmatpush3.bf16.msk.msra.mxu0 %vm18736_vm13, %v18511_v13 }
 0x3d8   : > { %13161 = vmatprep.subr.msk.bf16.mxu0 %vm15197_vm14, %v18511_v13 }
 0x3d9   : > { %v10679_v61 = vpop.f32.mrb[8].mxu0 }
 0x3da   : > { %v1414_v62 = vpop.f32.mrb[9].mxu0 }
 0x3db   : > { %v13024_v0 = vpack.c.bf16 %v10679_v61, %v1414_v62  ;;  %13163 = vmatpush3.bf16.msk.msra.mxu0 %vm15197_vm14, %v18511_v13  ;;  %vm15573_vm14 = vmpackc.low %vm1538_vm7, %vm1537_vm5  ;;  %vm1544_vm7 = vcmp.eq.s32.totalorder %v15048_v17, %v1536_v42 }
 0x3dc   : > { %13165 = vmatprep.subr.msk.bf16.mxu0 %vm15220_vm12, %v18511_v13 }
 0x3dd   : > { %v10682_v6 = vpop.f32.mrb[10].mxu0  ;;  %13025 = vmatprep.subr.bf16.mxu1 %v13024_v0 }
 0x3de   : > { %v1424_v9 = vpop.f32.mrb[11].mxu0  ;;  %13027 = vmatpush3.bf16.msra.mxu1 %v13024_v0 }
 0x3df   : > { %v13028_v41 = vpack.c.bf16 %v10682_v6, %v1424_v9  ;;  %13167 = vmatpush3.bf16.msk.msra.mxu0 %vm15220_vm12, %v18511_v13  ;;  %vm1540_vm12 = vcmp.eq.s32.totalorder %v14994_v8, %v1536_v42 }
 0x3e0   : > { %vm15580_vm13 = vmpackc.low %vm1540_vm12, %vm1539_vm15  ;;  %vm1543_vm12 = vcmp.eq.s32.totalorder %v15045_v16, %v1536_v42 }
 0x3e1   : > { %13029 = vmatprep.subr.bf16.mxu1 %v13028_v41  ;;  %vm15604_vm15 = vmpackc.low %vm1544_vm7, %vm1543_vm12  ;;  %vm1547_vm12 = vcmp.eq.s32.totalorder %v15105_v24, %v1536_v42  ;;  %vm1548_vm7 = vcmp.eq.s32.totalorder %v15108_v25, %v1536_v42 }
 0x3e2   : > { %10840 = vmatmul.mubr.f32.vlgmr.msra.gmra.mrb[14].mxu0 %v15510_v60  ;;  %13031 = vmatpush3.bf16.msra.mxu1 %v13028_v41  ;;  %v18751_v44 = vsel %vm15604_vm15, 4294967295, %v18750_v44 }
 0x3e3   : > { %13033 = vmatprep.subr.bf16.mxu1 %v15368_v63  ;;  %18752 = vst [vmem:[#allocation20_spill] sm:$0xff] %v18751_v44 }
 0x3e6   : > { %13035 = vmatpush3.bf16.msra.mxu1 %v15368_v63  ;;  %v18741_v63 = vmov 0 }
 0x3e7   : > { %13037 = vmatprep.subr.bf16.mxu1 %v15372_v40  ;;  %v18742_v63 = vsel %vm15573_vm14, 4294967295, %v18741_v63 }
 0x3e8   : > { %18743 = vst [vmem:[#allocation17_spill] sm:$0xff] %v18742_v63 }
 0x3ea   : > { %13039 = vmatpush3.bf16.msra.mxu1 %v15372_v40  ;;  %v18744_v40 = vmov 0 }
 0x3eb   : > { %13041 = vmatprep.subr.msk.bf16.mxu1 %vm15573_vm14, %v18511_v13  ;;  %v18745_v40 = vsel %vm15580_vm13, 4294967295, %v18744_v40 }
 0x3ec   : > { %18746 = vst [vmem:[#allocation18_spill] sm:$0xff] %v18745_v40 }
 0x3ed   : > { %10700 = vmatmul.mubr.msk.f32.vlgmr.msra.gmra.mrb[6].mxu1 %vm18740_vm6, %v1154_v39  ;;  %vm1541_vm6 = vcmp.eq.s32.totalorder %v15000_v10, %v1536_v42 }
 0x3ee   : > { %13043 = vmatpush3.bf16.msk.msra.mxu1 %vm15573_vm14, %v18511_v13  ;;  %vm15592_vm5 = vmpackc.low %vm1542_vm0, %vm1541_vm6  ;;  %vm1545_vm0 = vcmp.eq.s32.totalorder %v15075_v20, %v1536_v42  ;;  %vm1546_vm6 = vcmp.eq.s32.totalorder %v15078_v21, %v1536_v42 }
 0x3ef   : > { %13045 = vmatprep.subr.msk.bf16.mxu1 %vm15580_vm13, %v18511_v13  ;;  %v18748_v43 = vsel %vm15592_vm5, 4294967295, %v18747_v43 }
 0x3f0   : > { %18749 = vst [vmem:[#allocation19_spill] sm:$0xff] %v18748_v43 }
 0x3f2   : > { %13047 = vmatpush3.bf16.msk.msra.mxu1 %vm15580_vm13, %v18511_v13  ;;  %vm15621_vm13 = vmpackc.low %vm1546_vm6, %vm1545_vm0  ;;  %vm1549_vm0 = vcmp.eq.s32.totalorder %v15135_v28, %v1536_v42  ;;  %vm1550_vm6 = vcmp.eq.s32.totalorder %v15138_v29, %v1536_v42 }
 0x3f3   : > { %13049 = vmatprep.subr.msk.bf16.mxu1 %vm15592_vm5, %v18511_v13  ;;  %v18754_v45 = vsel %vm15621_vm13, 4294967295, %v18753_v45 }
 0x3f4   : > { %18755 = vst [vmem:[#allocation21_spill] sm:$0xff] %v18754_v45 }
 0x3f6   : > { %13051 = vmatpush3.bf16.msk.msra.mxu1 %vm15592_vm5, %v18511_v13  ;;  %vm15628_vm5 = vmpackc.low %vm1548_vm7, %vm1547_vm12  ;;  %vm1551_vm7 = vcmp.eq.s32.totalorder %v15166_v32, %v1536_v42 }
 0x3f7   : > { %13053 = vmatprep.subr.msk.bf16.mxu1 %vm15604_vm15, %v18511_v13  ;;  %v18757_v46 = vsel %vm15628_vm5, 4294967295, %v18756_v46  ;;  %vm15643_vm12 = vmpackc.low %vm1550_vm6, %vm1549_vm0 }
 0x3f8   : > { %18758 = vst [vmem:[#allocation22_spill] sm:$0xff] %v18757_v46  ;;  %v18760_v47 = vsel %vm15643_vm12, 4294967295, %v18759_v47 }
 0x3f9   : > { %18761 = vst [vmem:[#allocation23_spill] sm:$0xff] %v18760_v47 }
 0x3fa   : > { %13055 = vmatpush3.bf16.msk.msra.mxu1 %vm15604_vm15, %v18511_v13 }
 0x3fb   : > { %13057 = vmatprep.subr.msk.bf16.mxu1 %vm15621_vm13, %v18511_v13 }
 0x3fe   : > { %13059 = vmatpush3.bf16.msk.msra.mxu1 %vm15621_vm13, %v18511_v13 }
 0x3ff   : > { %13061 = vmatprep.subr.msk.bf16.mxu1 %vm15628_vm5, %v18511_v13 }
 0x402   : > { %13063 = vmatpush3.bf16.msk.msra.mxu1 %vm15628_vm5, %v18511_v13  ;;  %vm1552_vm5 = vcmp.eq.s32.totalorder %v15169_v33, %v1536_v42 }
 0x403   : > { %13065 = vmatprep.subr.msk.bf16.mxu1 %vm15643_vm12, %v18511_v13  ;;  %vm15655_vm13 = vmpackc.low %vm1552_vm5, %vm1551_vm7  ;;  %vm18765_vm5 = vcmp.lt.s32.totalorder %v14976_v2, 16 }
 0x404   : > { %v18763_v48 = vsel %vm15655_vm13, 4294967295, %v18762_v48  ;;  %vm18766_vm0 = vmmov %vm18765_vm5 }
 0x405   : > { %18764 = vst [vmem:[#allocation24_spill] sm:$0xff] %v18763_v48 }
 0x406   : > { %13067 = vmatpush3.bf16.msk.msra.mxu1 %vm15643_vm12, %v18511_v13 }
 0x407   : > { %13069 = vmatprep.subr.msk.bf16.mxu1 %vm15655_vm13, %v18511_v13 }
 0x40a   : > { %13071 = vmatpush3.bf16.msk.msra.mxu1 %vm15655_vm13, %v18511_v13 }
 0x40b   : > { %13105 = vmatprep.subr.msk.bf16.mxu1 %vm15011_vm4, %v18511_v13 }
 0x495   : > { %v10771_v50 = vpop.f32.mrb[12].mxu0 }
 0x496   : > { %v1726_v52 = vpop.f32.mrb[13].mxu0 }
 0x497   : > { %v15668_v53 = vpack.c.bf16 %v10771_v50, %v1726_v52  ;;  %v2054_v50 = vadd.s32 2, %v14976_v2  ;;  %v18775_v52 = vmov 0 }
 0x499   : > { %vm2058_vm13 = vcmp.eq.s32.totalorder %v14994_v8, %v2054_v50  ;;  %vm2062_vm15 = vcmp.eq.s32.totalorder %v15048_v17, %v2054_v50 }
 0x4b5   : > { %v10841_v54 = vpop.f32.mrb[14].mxu0 }
 0x4b6   : > { %v1876_v56 = vpop.f32.mrb[15].mxu0 }
 0x4b7   : > { %v15670_v58 = vpack.c.bf16 %v10841_v54, %v1876_v56  ;;  %v18778_v54 = vmov 0  ;;  %v18781_v56 = vmov 0 }
 0x4c0   : > { %v10701_v61 = vpop.f32.mrb[6].mxu1 }
 0x4c1   : > { %v1511_v62 = vadd.f32 %v10701_v61, %v15487_v49  ;;  %v1505_v0 = vpop.f32.mrb[7].mxu1  ;;  %v18784_v61 = vmov 0 }
 0x4c2   : > { %v1506_v6 = vadd.f32 %v1505_v0, %v15489_v51  ;;  %v18790_v0 = vmov 0 }
 0x4c3   : > { %v15676_v9 = vsel %vm18765_vm5, %v1511_v62, 0.0  ;;  %vm18767_vm5 = vnez %v18702_v27  ;;  %v18787_v62 = vmov 0 }
 0x4c4   : > { %v1533_v41 = vmul.f32 0.01, %v15676_v9  ;;  %v15681_v39 = vsel %vm18766_vm0, %v1506_v6, 0.0  ;;  %vm1531_vm7 = vcmp.gt.f32.partialorder %v15676_v9, 0.0  ;;  %vm18768_vm0 = vnez %v18707_v31 }
 0x4c5   : > { %v1532_v42 = vmul.f32 0.01, %v15681_v39  ;;  %vm1530_vm6 = vcmp.gt.f32.partialorder %v15681_v39, 0.0  ;;  %v18793_v6 = vmov 0 }
 0x4c6   : > { %v15691_v51 = vsel %vm1531_vm7, %v15676_v9, %v1533_v41  ;;  %vm18770_vm7 = vnez %v18717_v37  ;;  %v18796_v41 = vmov 0 }
 0x4c7   : > { %v15687_v49 = vsel %vm1530_vm6, %v15681_v39, %v1532_v42  ;;  %vm18769_vm6 = vnez %v18712_v35  ;;  %v1516_v42 = vld [vmem:[%s18799_s29] sm:$0xff]  ;;  %s8240_s29 = sshll.u32 %s18655_s5, 3 }
 0x4c8   : > { %10734 = vmatprep.mubr.f32.mxu1 %v15687_v49  ;;  %s18250_s6 = scalar_lea.vmem [#allocation2], %s8240_s29 }
 0x4c9   : > { %10735 = vmatmul.mubr.f32.vlgmr.msra.gmra.mrb[8].mxu1 %v15691_v51  ;;  %s8174_s9 = sshll.u32 %s18250_s6, 4  ;;  %s18345_s9 = int_to_ptr.vmem [resolvable:$true] %s8174_s9 }
 0x4ca   : > { %13107 = vmatpush3.bf16.msk.msra.mxu1 %vm15011_vm4, %v18511_v13  ;;  %10804 = vmatprep.mubr.f32.mxu1 %v15687_v49  ;;  %vm2057_vm4 = vcmp.eq.s32.totalorder %v14991_v7, %v2054_v50  ;;  %s14724_s10 = scalar_lea.vmem %s18345_s9, 128 }
 0x4cb   : > { %13109 = vmatprep.subr.msk.bf16.mxu1 %vm15024_vm8, %v18511_v13  ;;  %vm15802_vm12 = vmpackc.low %vm2058_vm13, %vm2057_vm4  ;;  %vm2061_vm13 = vcmp.eq.s32.totalorder %v15045_v16, %v2054_v50  ;;  %p14725_p11 = scmp.ne.s32.totalorder %s18345_s9, %s14724_s10 }
 0x4cc   : > { %v18779_v54 = vsel %vm15802_vm12, 4294967295, %v18778_v54 }
 0x4cd   : > { %18780 = vst [vmem:[#allocation26_spill] sm:$0xff] %v18779_v54  ;;  %p14726_p12 = pnand %p14725_p11, %p14964_p5 }
 0x4ce   : > { %13111 = vmatpush3.bf16.msk.msra.mxu1 %vm15024_vm8, %v18511_v13 }
 0x4cf   : > { %13113 = vmatprep.subr.msk.bf16.mxu1 %vm15063_vm2, %v18511_v13  ;;  %p14727_p13 = pneg %p14726_p12 }
 0x4d2   : > { %13115 = vmatpush3.bf16.msk.msra.mxu1 %vm15063_vm2, %v18511_v13  ;;  %vm18774_vm2 = vnez %v18720_v38 }
 0x4d3   : > { %13117 = vmatprep.subr.msk.bf16.mxu1 %vm15093_vm10, %v18511_v13 }
 0x4d6   : > { %13119 = vmatpush3.bf16.msk.msra.mxu1 %vm15093_vm10, %v18511_v13  ;;  %vm2056_vm10 = vcmp.eq.s32.totalorder %v14985_v5, %v2054_v50 }
 0x4d7   : > { %13121 = vmatprep.subr.msk.bf16.mxu1 %vm18767_vm5, %v18511_v13 }
 0x4da   : > { %13123 = vmatpush3.bf16.msk.msra.mxu1 %vm18767_vm5, %v18511_v13  ;;  %vm2055_vm5 = vcmp.eq.s32.totalorder %v14978_v3, %v2054_v50 }
 0x4db   : > { %13125 = vmatprep.subr.msk.bf16.mxu1 %vm18768_vm0, %v18511_v13  ;;  %vm15790_vm8 = vmpackc.low %vm2056_vm10, %vm2055_vm5  ;;  %vm2059_vm10 = vcmp.eq.s32.totalorder %v15000_v10, %v2054_v50  ;;  %vm2060_vm5 = vcmp.eq.s32.totalorder %v15009_v11, %v2054_v50 }
 0x4dc   : > { %v18776_v52 = vsel %vm15790_vm8, 4294967295, %v18775_v52  ;;  %vm15816_vm4 = vmpackc.low %vm2060_vm5, %vm2059_vm10  ;;  %vm2063_vm10 = vcmp.eq.s32.totalorder %v15075_v20, %v2054_v50  ;;  %vm2064_vm5 = vcmp.eq.s32.totalorder %v15078_v21, %v2054_v50 }
 0x4dd   : > { %18777 = vst [vmem:[#allocation25_spill] sm:$0xff] %v18776_v52  ;;  %v18782_v56 = vsel %vm15816_vm4, 4294967295, %v18781_v56 }
 0x4de   : > { %13127 = vmatpush3.bf16.msk.msra.mxu1 %vm18768_vm0, %v18511_v13  ;;  %vm18773_vm0 = vnez %v18714_v36  ;;  %18783 = vst [vmem:[#allocation27_spill] sm:$0xff] %v18782_v56 }
 0x4df   : > { %13129 = vmatprep.subr.msk.bf16.mxu1 %vm18769_vm6, %v18511_v13 }
 0x4e2   : > { %13131 = vmatpush3.bf16.msk.msra.mxu1 %vm18769_vm6, %v18511_v13  ;;  %vm18772_vm6 = vnez %v18709_v34 }
 0x4e3   : > { %13133 = vmatprep.subr.msk.bf16.mxu1 %vm18770_vm7, %v18511_v13 }
 0x4e6   : > { %13135 = vmatpush3.bf16.msk.msra.mxu1 %vm18770_vm7, %v18511_v13  ;;  %vm18771_vm7 = vnez %v18704_v30 }
 0x4e7   : > { %13169 = vmatprep.subr.msk.bf16.mxu1 %vm15033_vm11, %v18511_v13 }
 0x4e9   : > { %10805 = vmatmul.mubr.f32.vlgmr.msra.gmra.mrb[10].mxu1 %v15691_v51 }
 0x4ea   : > { %13171 = vmatpush3.bf16.msk.msra.mxu1 %vm15033_vm11, %v18511_v13  ;;  %10874 = vmatprep.mubr.f32.mxu1 %v15687_v49 }
 0x4eb   : > { %13173 = vmatprep.subr.msk.bf16.mxu1 %vm18732_vm1, %v18511_v13 }
 0x4ee   : > { %13175 = vmatpush3.bf16.msk.msra.mxu1 %vm18732_vm1, %v18511_v13 }
 0x4ef   : > { %13177 = vmatprep.subr.msk.bf16.mxu1 %vm18733_vm3, %v18511_v13 }
 0x4f2   : > { %13179 = vmatpush3.bf16.msk.msra.mxu1 %vm18733_vm3, %v18511_v13 }
 0x4f3   : > { %13181 = vmatprep.subr.msk.bf16.mxu1 %vm18734_vm9, %v18511_v13 }
 0x4f6   : > { %13183 = vmatpush3.bf16.msk.msra.mxu1 %vm18734_vm9, %v18511_v13 }
 0x4f7   : > { %13185 = vmatprep.subr.msk.bf16.mxu1 %vm18771_vm7, %v18511_v13 }
 0x4fa   : > { %13187 = vmatpush3.bf16.msk.msra.mxu1 %vm18771_vm7, %v18511_v13 }
 0x4fb   : > { %13189 = vmatprep.subr.msk.bf16.mxu1 %vm18772_vm6, %v18511_v13 }
 0x4fe   : > { %13191 = vmatpush3.bf16.msk.msra.mxu1 %vm18772_vm6, %v18511_v13 }
 0x4ff   : > { %13193 = vmatprep.subr.msk.bf16.mxu1 %vm18773_vm0, %v18511_v13 }
 0x502   : > { %13195 = vmatpush3.bf16.msk.msra.mxu1 %vm18773_vm0, %v18511_v13 }
 0x503   : > { %13197 = vmatprep.subr.msk.bf16.mxu1 %vm18774_vm2, %v18511_v13 }
 0x506   : > { %13199 = vmatpush3.bf16.msk.msra.mxu1 %vm18774_vm2, %v18511_v13 }
 0x507   : > { %13229 = vmatprep.subr.msk.bf16.mxu1 %vm15790_vm8, %v18511_v13 }
 0x509   : > { %10875 = vmatmul.mubr.f32.vlgmr.msra.gmra.mrb[12].mxu1 %v15691_v51 }
 0x50a   : > { %13231 = vmatpush3.bf16.msk.msra.mxu1 %vm15790_vm8, %v18511_v13  ;;  %10940 = vmatprep.mubr.f32.mxu1 %v15506_v59  ;;  %vm15828_vm8 = vmpackc.low %vm2062_vm15, %vm2061_vm13  ;;  %vm2065_vm15 = vcmp.eq.s32.totalorder %v15105_v24, %v2054_v50  ;;  %vm2066_vm13 = vcmp.eq.s32.totalorder %v15108_v25, %v2054_v50 }
 0x50b   : > { %13233 = vmatprep.subr.msk.bf16.mxu1 %vm15802_vm12, %v18511_v13  ;;  %v18785_v61 = vsel %vm15828_vm8, 4294967295, %v18784_v61 }
 0x50c   : > { %18786 = vst [vmem:[#allocation28_spill] sm:$0xff] %v18785_v61  ;;  %v2586_v61 = vadd.s32 4294967293, %v14976_v2 }
 0x50e   : > { %13235 = vmatpush3.bf16.msk.msra.mxu1 %vm15802_vm12, %v18511_v13  ;;  %vm15840_vm12 = vmpackc.low %vm2064_vm5, %vm2063_vm10  ;;  %vm2067_vm10 = vcmp.eq.s32.totalorder %v15135_v28, %v2054_v50  ;;  %vm2068_vm5 = vcmp.eq.s32.totalorder %v15138_v29, %v2054_v50  ;;  %vm2590_vm2 = vcmp.eq.s32.totalorder %v14994_v8, %v2586_v61 }
 0x50f   : > { %13237 = vmatprep.subr.msk.bf16.mxu1 %vm15816_vm4, %v18511_v13  ;;  %v18788_v62 = vsel %vm15840_vm12, 4294967295, %v18787_v62 }
 0x510   : > { %18789 = vst [vmem:[#allocation29_spill] sm:$0xff] %v18788_v62  ;;  %v13216_v62 = vpack.c.bf16 %v15691_v51, %v15687_v49  ;;  %v1968_v51 = vpop.permute.xlu1 %1967 }
 0x512   : > { %13239 = vmatpush3.bf16.msk.msra.mxu1 %vm15816_vm4, %v18511_v13  ;;  %vm15852_vm4 = vmpackc.low %vm2066_vm13, %vm2065_vm15  ;;  %vm2069_vm15 = vcmp.eq.s32.totalorder %v15166_v32, %v2054_v50  ;;  %vm2070_vm13 = vcmp.eq.s32.totalorder %v15169_v33, %v2054_v50 }
 0x513   : > { %13241 = vmatprep.subr.msk.bf16.mxu1 %vm15828_vm8, %v18511_v13  ;;  %v18791_v0 = vsel %vm15852_vm4, 4294967295, %v18790_v0 }
 0x514   : > { %18792 = vst [vmem:[#allocation30_spill] sm:$0xff] %v18791_v0  ;;  %v13212_v0 = vpack.c.bf16 %v15510_v60, %v15506_v59 }
 0x516   : > { %13243 = vmatpush3.bf16.msk.msra.mxu1 %vm15828_vm8, %v18511_v13  ;;  %vm15864_vm8 = vmpackc.low %vm2068_vm5, %vm2067_vm10  ;;  %vm18519_vm10 = vcmask 916480   ;;  %vm18526_vm5 = vcmask 130048  }
 0x517   : > { %13245 = vmatprep.subr.msk.bf16.mxu1 %vm15840_vm12, %v18511_v13  ;;  %v18794_v6 = vsel %vm15864_vm8, 4294967295, %v18793_v6  ;;  %10905 = vmatprep.mubr.msk.f32.mxu0 %vm18519_vm10, %v1516_v42 }
 0x518   : > { %18795 = vst [vmem:[#allocation31_spill] sm:$0xff] %v18794_v6 }
 0x51a   : > { %13247 = vmatpush3.bf16.msk.msra.mxu1 %vm15840_vm12, %v18511_v13  ;;  %vm15876_vm12 = vmpackc.low %vm2070_vm13, %vm2069_vm15  ;;  %vm18802_vm15 = vcmp.lt.s32.totalorder %v14976_v2, 16 }
 0x51b   : > { %13249 = vmatprep.subr.msk.bf16.mxu1 %vm15852_vm4, %v18511_v13  ;;  %v18797_v41 = vsel %vm15876_vm12, 4294967295, %v18796_v41 }
 0x51c   : > { %18798 = vst [vmem:[#allocation32_spill] sm:$0xff] %v18797_v41 }
 0x51e   : > { %13251 = vmatpush3.bf16.msk.msra.mxu1 %vm15852_vm4, %v18511_v13 }
 0x51f   : > { %13253 = vmatprep.subr.msk.bf16.mxu1 %vm15864_vm8, %v18511_v13 }
 0x522   : > { %13255 = vmatpush3.bf16.msk.msra.mxu1 %vm15864_vm8, %v18511_v13  ;;  %vm2587_vm8 = vcmp.eq.s32.totalorder %v14978_v3, %v2586_v61 }
 0x523   : > { %13257 = vmatprep.subr.msk.bf16.mxu1 %vm15876_vm12, %v18511_v13 }
 0x526   : > { %13259 = vmatpush3.bf16.msk.msra.mxu1 %vm15876_vm12, %v18511_v13 }
 0x529   : > { %10941 = vmatmul.mubr.f32.vlgmr.msra.gmra.mrb[14].mxu1 %v15510_v60 }
 0x59c   : > { %v10736_v50 = vpop.f32.mrb[8].mxu1 }
 0x59d   : > { %v1651_v4 = vpop.f32.mrb[9].mxu1 }
 0x59e   : > { %v13200_v1 = vpack.c.bf16 %v10736_v50, %v1651_v4 }
 0x5a0   : > { %13201 = vmatprep.subr.bf16.mxu0 %v13200_v1 }
 0x5a1   : > { %13203 = vmatpush3.bf16.msra.mxu0 %v13200_v1 }
 0x5a2   : > { %13205 = vmatprep.subr.bf16.mxu0 %v15668_v53 }
 0x5a5   : > { %13207 = vmatpush3.bf16.msra.mxu0 %v15668_v53 }
 0x5bc   : > { %v10806_v41 = vpop.f32.mrb[10].mxu1 }
 0x5bd   : > { %v1801_v13 = vpop.f32.mrb[11].mxu1 }
 0x5be   : > { %v13208_v6 = vpack.c.bf16 %v10806_v41, %v1801_v13  ;;  %v1517_v13 = vld [vmem:[%s18800_s27 + $0x8] sm:$0xff] }
 0x5c0   : > { %13209 = vmatprep.subr.bf16.mxu0 %v13208_v6 }
 0x5c1   : > { %13211 = vmatpush3.bf16.msra.mxu0 %v13208_v6 }
 0x5c2   : > { %13213 = vmatprep.subr.bf16.mxu0 %v13212_v0 }
 0x5c5   : > { %13215 = vmatpush3.bf16.msra.mxu0 %v13212_v0 }
 0x5c6   : > { %13217 = vmatprep.subr.bf16.mxu0 %v13216_v62 }
 0x5c9   : > { %13219 = vmatpush3.bf16.msra.mxu0 %v13216_v62 }
 0x5ca   : > { %13221 = vmatprep.subr.bf16.mxu0 %v15670_v58 }
 0x5cd   : > { %13223 = vmatpush3.bf16.msra.mxu0 %v15670_v58 }
 0x5dc   : > { %v10876_v1 = vpop.f32.mrb[12].mxu1 }
 0x5dd   : > { %v1951_v4 = vpop.f32.mrb[13].mxu1 }
 0x5de   : > { %v13224_v50 = vpack.c.bf16 %v10876_v1, %v1951_v4 }
 0x5e0   : > { %13225 = vmatprep.subr.bf16.mxu0 %v13224_v50 }
 0x5e1   : > { %13227 = vmatpush3.bf16.msra.mxu0 %v13224_v50 }
 0x5e2   : > { %13261 = vmatprep.subr.bf16.mxu0 %v15668_v53 }
 0x5e4   : > { %10906 = vmatmul.mubr.msk.f32.vlgmr.msra.gmra.mrb[16].mxu0 %vm18519_vm10, %v1517_v13 }
 0x5e5   : > { %13263 = vmatpush3.bf16.msra.mxu0 %v15668_v53  ;;  %10971 = vmatprep.mubr.msk.f32.mxu0 %vm18519_vm10, %v1516_v42  ;;  %v1520_v53 = vld [vmem:[%s18801_s28] sm:$0xff] }
 0x5e6   : > { %13265 = vmatprep.subr.bf16.mxu0 %v13208_v6  ;;  %10985 = vmatprep.mubr.msk.f32.mxu1 %vm18526_vm5, %v1520_v53 }
 0x5e9   : > { %13267 = vmatpush3.bf16.msra.mxu0 %v13208_v6 }
 0x5ea   : > { %13269 = vmatprep.subr.bf16.mxu0 %v13212_v0 }
 0x5ed   : > { %13271 = vmatpush3.bf16.msra.mxu0 %v13212_v0 }
 0x5ee   : > { %13273 = vmatprep.subr.bf16.mxu0 %v13216_v62 }
 0x5f1   : > { %13275 = vmatpush3.bf16.msra.mxu0 %v13216_v62  ;;  %v1963_v62 = vpop.permute.xlu0 %1962 }
 0x5f2   : > { %13277 = vmatprep.subr.bf16.mxu0 %v15670_v58 }
 0x5f5   : > { %13279 = vmatpush3.bf16.msra.mxu0 %v15670_v58 }
 0x5f6   : > { %13281 = vmatprep.subr.bf16.mxu0 %v13224_v50 }
 0x5f9   : > { %13283 = vmatpush3.bf16.msra.mxu0 %v13224_v50 }
 0x5fc   : > { %v10942_v59 = vpop.f32.mrb[14].mxu1 }
 0x5fd   : > { %v2169_v60 = vpop.f32.mrb[15].mxu1 }
 0x5fe   : > { %v13284_v49 = vpack.c.bf16 %v10942_v59, %v2169_v60 }
 0x600   : > { %13285 = vmatprep.subr.bf16.mxu0 %v13284_v49 }
 0x601   : > { %13287 = vmatpush3.bf16.msra.mxu0 %v13284_v49  ;;  %v1521_v49 = vld [vmem:[%s18801_s28 + $0x8] sm:$0xff] }
 0x604   : > { %10972 = vmatmul.mubr.msk.f32.vlgmr.msra.gmra.mrb[18].mxu0 %vm18519_vm10, %v1517_v13  ;;  %vm18803_vm10 = vmmov %vm18802_vm15 }
 0x605   : > { %10978 = vmatprep.mubr.msk.f32.mxu0 %vm18526_vm5, %v1520_v53 }
 0x6b7   : > { %v10907_v58 = vpop.f32.mrb[16].mxu0 }
 0x6b8   : > { %v2049_v0 = vadd.f32 %v10907_v58, %v1968_v51  ;;  %v2043_v6 = vpop.f32.mrb[17].mxu0 }
 0x6b9   : > { %v2044_v41 = vadd.f32 %v2043_v6, %v1963_v62 }
 0x6ba   : > { %v2053_v42 = vsel %vm18802_vm15, %v2049_v0, 0.0 }
 0x6bb   : > { %vm2256_vm13 = vcmp.gt.f32.partialorder %v2053_v42, 0.0  ;;  %v2258_v1 = vmul.f32 0.01, %v2053_v42  ;;  %v2052_v4 = vsel %vm18803_vm10, %v2044_v41, 0.0 }
 0x6bc   : > { %vm2255_vm12 = vcmp.gt.f32.partialorder %v2052_v4, 0.0  ;;  %v2257_v50 = vmul.f32 0.01, %v2052_v4 }
 0x6bd   : > { %v2260_v13 = vsel %vm2256_vm13, %v2053_v42, %v2258_v1 }
 0x6be   : > { %v2259_v59 = vsel %vm2255_vm12, %v2052_v4, %v2257_v50  ;;  %vm18804_vm12 = vmmov %vm18803_vm10 }
 0x6bf   : > { %v13288_v60 = vpack.c.bf16 %v2260_v13, %v2259_v59  ;;  %v18807_v59 = vmov 1.0|1.0  }
 0x6c1   : > { %13289 = vmatprep.subr.bf16.mxu0 %v13288_v60 }
 0x6c2   : > { %13291 = vmatpush3.bf16.msra.mxu0 %v13288_v60  ;;  %v18808_v60 = vmov 0 }
 0x6c5   : > { %10979 = vmatmul.mubr.msk.f32.vlgmr.msra.gmra.mrb[20].mxu0 %vm18526_vm5, %v1521_v49  ;;  %vm2588_vm5 = vcmp.eq.s32.totalorder %v14985_v5, %v2586_v61 }
 0x6c6   : > { %vm15932_vm4 = vmpackc.low %vm2588_vm5, %vm2587_vm8  ;;  %vm2591_vm8 = vcmp.eq.s32.totalorder %v15000_v10, %v2586_v61  ;;  %vm2592_vm5 = vcmp.eq.s32.totalorder %v15009_v11, %v2586_v61 }
 0x6d7   : > { %v10973_v53 = vpop.f32.mrb[18].mxu0 }
 0x6d8   : > { %v2250_v58 = vadd.f32 %v10973_v53, %v1968_v51  ;;  %v2244_v0 = vpop.f32.mrb[19].mxu0  ;;  %v18811_v53 = vmov 0 }
 0x6d9   : > { %v2245_v6 = vadd.f32 %v2244_v0, %v1963_v62  ;;  %v18805_v62 = vmov 0  ;;  %v18817_v0 = vmov 0 }
 0x6da   : > { %v2254_v41 = vsel %vm18803_vm10, %v2250_v58, 0.0  ;;  %v18806_v62 = vsel %vm15932_vm4, 4294967295, %v18805_v62  ;;  %vm2589_vm10 = vcmp.eq.s32.totalorder %v14991_v7, %v2586_v61  ;;  %v18815_v58 = vmov 0 }
 0x6db   : > { %vm2262_vm15 = vcmp.gt.f32.partialorder %v2254_v41, 0.0  ;;  %v2264_v42 = vmul.f32 0.01, %v2254_v41  ;;  %v2253_v1 = vsel %vm18804_vm12, %v2245_v6, 0.0  ;;  %vm18810_vm12 = vcmask 130048  }
 0x6dc   : > { %vm2261_vm13 = vcmp.gt.f32.partialorder %v2253_v1, 0.0  ;;  %v2263_v4 = vmul.f32 0.01, %v2253_v1  ;;  %v18819_v6 = vmov 0 }
 0x6dd   : > { %v2266_v50 = vsel %vm2262_vm15, %v2254_v41, %v2264_v42  ;;  %vm15941_vm15 = vmpackc.low %vm2590_vm2, %vm2589_vm10  ;;  %vm2593_vm2 = vcmp.eq.s32.totalorder %v15045_v16, %v2586_v61  ;;  %vm2594_vm10 = vcmp.eq.s32.totalorder %v15048_v17, %v2586_v61  ;;  %v18821_v41 = vmov 0 }
 0x6de   : > { %v2265_v51 = vsel %vm2261_vm13, %v2253_v1, %v2263_v4  ;;  %v18809_v60 = vsel %vm15941_vm15, 4294967295, %v18808_v60  ;;  %vm15954_vm13 = vmpackc.low %vm2592_vm5, %vm2591_vm8  ;;  %vm2595_vm8 = vcmp.eq.s32.totalorder %v15075_v20, %v2586_v61  ;;  %vm2596_vm5 = vcmp.eq.s32.totalorder %v15078_v21, %v2586_v61  ;;  %v2270_v4 = vpop.permute.xlu0 %2269 }
 0x6df   : > { %v13292_v13 = vpack.c.bf16 %v2266_v50, %v2265_v51  ;;  %v18812_v53 = vsel %vm15954_vm13, 4294967295, %v18811_v53  ;;  %v2462_v42 = vadd.s32 4294967291, %v14976_v2 }
 0x6e1   : > { %13293 = vmatprep.subr.bf16.mxu1 %v13292_v13 }
 0x6e2   : > { %13295 = vmatpush3.bf16.msra.mxu1 %v13292_v13 }
 0x6e3   : > { %13329 = vmatprep.subr.msk.bf16.mxu1 %vm15932_vm4, %v18807_v59 }
 0x6e5   : > { %10986 = vmatmul.mubr.msk.f32.vlgmr.msra.gmra.mrb[16].mxu1 %vm18810_vm12, %v1521_v49  ;;  %vm15966_vm12 = vmpackc.low %vm2594_vm10, %vm2593_vm2  ;;  %v18813_v49 = vmov 0  ;;  %vm2597_vm2 = vcmp.eq.s32.totalorder %v15105_v24, %v2586_v61  ;;  %vm2598_vm10 = vcmp.eq.s32.totalorder %v15108_v25, %v2586_v61 }
 0x6e6   : > { %13331 = vmatpush3.bf16.msk.msra.mxu1 %vm15932_vm4, %v18807_v59  ;;  %v18814_v49 = vsel %vm15966_vm12, 4294967295, %v18813_v49  ;;  %vm2468_vm4 = vcmp.eq.s32.totalorder %v15009_v11, %v2462_v42 }
 0x6e7   : > { %13333 = vmatprep.subr.msk.bf16.mxu1 %vm15941_vm15, %v18807_v59 }
 0x6ea   : > { %13335 = vmatpush3.bf16.msk.msra.mxu1 %vm15941_vm15, %v18807_v59  ;;  %vm15978_vm15 = vmpackc.low %vm2596_vm5, %vm2595_vm8  ;;  %vm2599_vm8 = vcmp.eq.s32.totalorder %v15135_v28, %v2586_v61  ;;  %vm2600_vm5 = vcmp.eq.s32.totalorder %v15138_v29, %v2586_v61 }
 0x6eb   : > { %13337 = vmatprep.subr.msk.bf16.mxu1 %vm15954_vm13, %v18807_v59  ;;  %v18816_v58 = vsel %vm15978_vm15, 4294967295, %v18815_v58 }
 0x6ee   : > { %13339 = vmatpush3.bf16.msk.msra.mxu1 %vm15954_vm13, %v18807_v59  ;;  %vm15990_vm13 = vmpackc.low %vm2598_vm10, %vm2597_vm2  ;;  %vm2601_vm10 = vcmp.eq.s32.totalorder %v15166_v32, %v2586_v61 }
 0x6ef   : > { %13341 = vmatprep.subr.msk.bf16.mxu1 %vm15966_vm12, %v18807_v59  ;;  %v18818_v0 = vsel %vm15990_vm13, 4294967295, %v18817_v0  ;;  %vm16005_vm2 = vmpackc.low %vm2600_vm5, %vm2599_vm8  ;;  %vm2463_vm8 = vcmp.eq.s32.totalorder %v14978_v3, %v2462_v42  ;;  %vm2464_vm5 = vcmp.eq.s32.totalorder %v14985_v5, %v2462_v42 }
 0x6f0   : > { %v18820_v6 = vsel %vm16005_vm2, 4294967295, %v18819_v6 }
 0x6f2   : > { %13343 = vmatpush3.bf16.msk.msra.mxu1 %vm15966_vm12, %v18807_v59 }
 0x6f3   : > { %13345 = vmatprep.subr.msk.bf16.mxu1 %vm15978_vm15, %v18807_v59 }
 0x6f6   : > { %13347 = vmatpush3.bf16.msk.msra.mxu1 %vm15978_vm15, %v18807_v59 }
 0x6f7   : > { %13349 = vmatprep.subr.msk.bf16.mxu1 %vm15990_vm13, %v18807_v59 }
 0x6fa   : > { %13351 = vmatpush3.bf16.msk.msra.mxu1 %vm15990_vm13, %v18807_v59  ;;  %vm2602_vm13 = vcmp.eq.s32.totalorder %v15169_v33, %v2586_v61  ;;  %v2275_v61 = vpop.permute.xlu1 %2274 }
 0x6fb   : > { %13353 = vmatprep.subr.msk.bf16.mxu1 %vm16005_vm2, %v18807_v59  ;;  %vm16017_vm15 = vmpackc.low %vm2602_vm13, %vm2601_vm10  ;;  %vm2465_vm10 = vcmp.eq.s32.totalorder %v14991_v7, %v2462_v42 }
 0x6fc   : > { %v18822_v41 = vsel %vm16017_vm15, 4294967295, %v18821_v41  ;;  %vm13296_vm13 = vmpackc.low %vm2464_vm5, %vm2463_vm8  ;;  %vm2469_vm8 = vcmp.eq.s32.totalorder %v15045_v16, %v2462_v42  ;;  %vm2470_vm5 = vcmp.eq.s32.totalorder %v15048_v17, %v2462_v42 }
 0x6fd   : > { %18823 = vst [vmem:[#allocation33_spill] sm:$0xff] %v18822_v41  ;;  %13297 = vmatprep.subr.msk.bf16.mxu0 %vm13296_vm13, %v18807_v59 }
 0x6fe   : > { %13355 = vmatpush3.bf16.msk.msra.mxu1 %vm16005_vm2, %v18807_v59  ;;  %13299 = vmatpush3.bf16.msk.msra.mxu0 %vm13296_vm13, %v18807_v59  ;;  %vm2466_vm2 = vcmp.eq.s32.totalorder %v14994_v8, %v2462_v42  ;;  %vm13308_vm13 = vmpackc.low %vm2470_vm5, %vm2469_vm8  ;;  %vm2475_vm8 = vcmp.eq.s32.totalorder %v15135_v28, %v2462_v42  ;;  %vm2476_vm5 = vcmp.eq.s32.totalorder %v15138_v29, %v2462_v42 }
 0x6ff   : > { %13357 = vmatprep.subr.msk.bf16.mxu1 %vm16017_vm15, %v18807_v59  ;;  %vm13300_vm12 = vmpackc.low %vm2466_vm2, %vm2465_vm10  ;;  %vm2472_vm2 = vcmp.eq.s32.totalorder %v15078_v21, %v2462_v42 }
 0x700   : > { %13301 = vmatprep.subr.msk.bf16.mxu0 %vm13300_vm12, %v18807_v59 }
 0x702   : > { %13359 = vmatpush3.bf16.msk.msra.mxu1 %vm16017_vm15, %v18807_v59  ;;  %13303 = vmatpush3.bf16.msk.msra.mxu0 %vm13300_vm12, %v18807_v59  ;;  %vm2467_vm15 = vcmp.eq.s32.totalorder %v15000_v10, %v2462_v42  ;;  %vm2471_vm12 = vcmp.eq.s32.totalorder %v15075_v20, %v2462_v42 }
 0x703   : > { %13393 = vmatprep.subr.msk.bf16.mxu1 %vm15033_vm11, %v18807_v59  ;;  %vm13304_vm0 = vmpackc.low %vm2468_vm4, %vm2467_vm15  ;;  %vm2474_vm4 = vcmp.eq.s32.totalorder %v15108_v25, %v2462_v42 }
 0x704   : > { %13305 = vmatprep.subr.msk.bf16.mxu0 %vm13304_vm0, %v18807_v59  ;;  %vm13312_vm10 = vmpackc.low %vm2472_vm2, %vm2471_vm12  ;;  %vm2477_vm12 = vcmp.eq.s32.totalorder %v15166_v32, %v2462_v42  ;;  %vm2478_vm2 = vcmp.eq.s32.totalorder %v15169_v33, %v2462_v42 }
 0x706   : > { %13307 = vmatpush3.bf16.msk.msra.mxu0 %vm13304_vm0, %v18807_v59  ;;  %vm2473_vm0 = vcmp.eq.s32.totalorder %v15105_v24, %v2462_v42 }
 0x707   : > { %13309 = vmatprep.subr.msk.bf16.mxu0 %vm13308_vm13, %v18807_v59  ;;  %vm13316_vm15 = vmpackc.low %vm2474_vm4, %vm2473_vm0  ;;  %vm18824_vm0 = vcmp.lt.s32.totalorder %v14976_v2, 16 }
 0x708   : > { %vm18825_vm4 = vmmov %vm18824_vm0 }
 0x70a   : > { %13311 = vmatpush3.bf16.msk.msra.mxu0 %vm13308_vm13, %v18807_v59  ;;  %vm13320_vm13 = vmpackc.low %vm2476_vm5, %vm2475_vm8  ;;  %vm18826_vm5 = vnez %v18714_v36 }
 0x70b   : > { %13313 = vmatprep.subr.msk.bf16.mxu0 %vm13312_vm10, %v18807_v59 }
 0x70e   : > { %13315 = vmatpush3.bf16.msk.msra.mxu0 %vm13312_vm10, %v18807_v59  ;;  %vm13324_vm10 = vmpackc.low %vm2478_vm2, %vm2477_vm12 }
 0x70f   : > { %13317 = vmatprep.subr.msk.bf16.mxu0 %vm13316_vm15, %v18807_v59 }
 0x712   : > { %13319 = vmatpush3.bf16.msk.msra.mxu0 %vm13316_vm15, %v18807_v59 }
 0x713   : > { %13321 = vmatprep.subr.msk.bf16.mxu0 %vm13320_vm13, %v18807_v59 }
 0x716   : > { %13323 = vmatpush3.bf16.msk.msra.mxu0 %vm13320_vm13, %v18807_v59  ;;  %vm18827_vm13 = vmmov %vm18824_vm0 }
 0x717   : > { %13325 = vmatprep.subr.msk.bf16.mxu0 %vm13324_vm10, %v18807_v59 }
 0x71a   : > { %13327 = vmatpush3.bf16.msk.msra.mxu0 %vm13324_vm10, %v18807_v59  ;;  %vm18828_vm10 = vmmov %vm18824_vm0 }
 0x71b   : > { %13361 = vmatprep.subr.msk.bf16.mxu0 %vm15573_vm14, %v18807_v59 }
 0x798   : > { %v10980_v1 = vpop.f32.mrb[20].mxu0 }
 0x799   : > { %v2356_v50 = vadd.f32 %v10980_v1, %v2275_v61  ;;  %v2350_v51 = vpop.f32.mrb[21].mxu0 }
 0x79a   : > { %v2351_v13 = vadd.f32 %v2350_v51, %v2270_v4 }
 0x79b   : > { %v2360_v56 = vsel %vm18824_vm0, %v2356_v50, 0.0  ;;  %vm18829_vm0 = vnez %v18720_v38 }
 0x79c   : > { %v16069_v42 = vadd.f32 %v2360_v56, %v15495_v55  ;;  %v2359_v54 = vsel %vm18825_vm4, %v2351_v13, 0.0 }
 0x79d   : > { %v16074_v52 = vadd.f32 %v2359_v54, %v15500_v57  ;;  %v16119_v57 = vadd.s32 4, %v14976_v2 }
 0x79e   : > { %v2453_v41 = vmul.f32 0.01, %v16069_v42  ;;  %vm2451_vm15 = vcmp.gt.f32.partialorder %v16069_v42, 0.0 }
 0x79f   : > { %vm2450_vm8 = vcmp.gt.f32.partialorder %v16074_v52, 0.0  ;;  %v2452_v1 = vmul.f32 0.01, %v16074_v52  ;;  %vm2985_vm12 = vcmp.eq.s32.totalorder %v14978_v3, %v16119_v57  ;;  %vm2986_vm2 = vcmp.eq.s32.totalorder %v14985_v5, %v16119_v57 }
 0x7a0   : > { %v16084_v55 = vsel %vm2451_vm15, %v16069_v42, %v2453_v41  ;;  %vm16148_vm4 = vmpackc.low %vm2986_vm2, %vm2985_vm12  ;;  %vm2989_vm2 = vcmp.eq.s32.totalorder %v15000_v10, %v16119_v57 }
 0x7a1   : > { %v16081_v51 = vsel %vm2450_vm8, %v16074_v52, %v2452_v1 }
 0x7a2   : > { %11055 = vmatprep.mubr.f32.mxu1 %v16081_v51 }
 0x7a3   : > { %11056 = vmatmul.mubr.f32.vlgmr.msra.gmra.mrb[18].mxu1 %v16084_v55 }
 0x7a4   : > { %13395 = vmatpush3.bf16.msk.msra.mxu1 %vm15033_vm11, %v18807_v59 }
 0x7a5   : > { %13397 = vmatprep.subr.msk.bf16.mxu1 %vm18732_vm1, %v18807_v59 }
 0x7a8   : > { %13399 = vmatpush3.bf16.msk.msra.mxu1 %vm18732_vm1, %v18807_v59 }
 0x7a9   : > { %13401 = vmatprep.subr.msk.bf16.mxu1 %vm18733_vm3, %v18807_v59 }
 0x7ac   : > { %13403 = vmatpush3.bf16.msk.msra.mxu1 %vm18733_vm3, %v18807_v59 }
 0x7ad   : > { %13405 = vmatprep.subr.msk.bf16.mxu1 %vm18734_vm9, %v18807_v59 }
 0x7b0   : > { %13407 = vmatpush3.bf16.msk.msra.mxu1 %vm18734_vm9, %v18807_v59 }
 0x7b1   : > { %13409 = vmatprep.subr.msk.bf16.mxu1 %vm18771_vm7, %v18807_v59 }
 0x7b4   : > { %13411 = vmatpush3.bf16.msk.msra.mxu1 %vm18771_vm7, %v18807_v59 }
 0x7b5   : > { %13413 = vmatprep.subr.msk.bf16.mxu1 %vm18772_vm6, %v18807_v59 }
 0x7b8   : > { %13415 = vmatpush3.bf16.msk.msra.mxu1 %vm18772_vm6, %v18807_v59  ;;  %v10987_v54 = vpop.f32.mrb[16].mxu1 }
 0x7b9   : > { %v2433_v56 = vadd.f32 %v10987_v54, %v2275_v61  ;;  %v2427_v41 = vpop.f32.mrb[17].mxu1  ;;  %13417 = vmatprep.subr.msk.bf16.mxu1 %vm18826_vm5, %v18807_v59 }
 0x7ba   : > { %v2428_v50 = vadd.f32 %v2427_v41, %v2270_v4 }
 0x7bb   : > { %v2437_v13 = vsel %vm18827_vm13, %v2433_v56, 0.0  ;;  %vm2987_vm13 = vcmp.eq.s32.totalorder %v14991_v7, %v16119_v57  ;;  %v18859_v56 = vmov 0 }
 0x7bc   : > { %v16134_v1 = vadd.f32 %v2437_v13, %v15676_v9  ;;  %v2436_v61 = vsel %vm18828_vm10, %v2428_v50, 0.0  ;;  %13419 = vmatpush3.bf16.msk.msra.mxu1 %vm18826_vm5, %v18807_v59  ;;  %vm2988_vm10 = vcmp.eq.s32.totalorder %v14994_v8, %v16119_v57  ;;  %v16240_v50 = vadd.s32 3, %v14976_v2 }
 0x7bd   : > { %v16142_v4 = vadd.f32 %v2436_v61, %v15681_v39  ;;  %13421 = vmatprep.subr.msk.bf16.mxu1 %vm18829_vm0, %v18807_v59  ;;  %vm13460_vm12 = vmpackc.low %vm2988_vm10, %vm2987_vm13  ;;  %vm2991_vm10 = vcmp.eq.s32.totalorder %v15045_v16, %v16119_v57  ;;  %v16247_v13 = vadd.s32 4294967292, %v14976_v2  ;;  %v18854_v61 = vmov 0 }
 0x7be   : > { %v2459_v54 = vmul.f32 0.01, %v16134_v1  ;;  %vm2457_vm15 = vcmp.gt.f32.partialorder %v16134_v1, 0.0  ;;  %vm2863_vm6 = vcmp.eq.s32.totalorder %v14991_v7, %v16240_v50  ;;  %vm2869_vm7 = vcmp.eq.s32.totalorder %v15075_v20, %v16240_v50 }
 0x7bf   : > { %vm2456_vm8 = vcmp.gt.f32.partialorder %v16142_v4, 0.0  ;;  %v2458_v9 = vmul.f32 0.01, %v16142_v4  ;;  %vm3202_vm5 = vcmp.eq.s32.totalorder %v14978_v3, %v16247_v13  ;;  %vm2871_vm9 = vcmp.eq.s32.totalorder %v15105_v24, %v16240_v50 }
 0x7c0   : > { %13423 = vmatpush3.bf16.msk.msra.mxu1 %vm18829_vm0, %v18807_v59  ;;  %v16169_v41 = vsel %vm2457_vm15, %v16134_v1, %v2459_v54  ;;  %vm18832_vm15 = vnez %v18745_v40  ;;  %v18844_v54 = vmov 0  ;;  %vm2873_vm3 = vcmp.eq.s32.totalorder %v15135_v28, %v16240_v50 }
 0x7c1   : > { %v16163_v39 = vsel %vm2456_vm8, %v16142_v4, %v2458_v9  ;;  %13457 = vmatprep.subr.msk.bf16.mxu1 %vm16148_vm4, %v18807_v59  ;;  %vm2990_vm8 = vcmp.eq.s32.totalorder %v15009_v11, %v16119_v57  ;;  %v18849_v9 = vmov 0  ;;  %vm2875_vm1 = vcmp.eq.s32.totalorder %v15166_v32, %v16240_v50 }
 0x7c2   : > { %11020 = vmatprep.mubr.f32.mxu0 %v16163_v39  ;;  %11125 = vmatprep.mubr.f32.mxu1 %v16163_v39  ;;  %vm13464_vm13 = vmpackc.low %vm2990_vm8, %vm2989_vm2  ;;  %vm2993_vm2 = vcmp.eq.s32.totalorder %v15075_v20, %v16119_v57  ;;  %vm2994_vm8 = vcmp.eq.s32.totalorder %v15078_v21, %v16119_v57  ;;  %vm2876_vm11 = vcmp.eq.s32.totalorder %v15169_v33, %v16240_v50 }
 0x7c3   : > { %11021 = vmatmul.mubr.f32.vlgmr.msra.gmra.mrb[22].mxu0 %v16169_v41  ;;  %11126 = vmatmul.mubr.f32.vlgmr.msra.gmra.mrb[20].mxu1 %v16169_v41 }
 0x7c4   : > { %13363 = vmatpush3.bf16.msk.msra.mxu0 %vm15573_vm14, %v18807_v59  ;;  %13459 = vmatpush3.bf16.msk.msra.mxu1 %vm16148_vm4, %v18807_v59  ;;  %vm2992_vm14 = vcmp.eq.s32.totalorder %v15048_v17, %v16119_v57  ;;  %vm18833_vm4 = vnez %v18748_v43 }
 0x7c5   : > { %11090 = vmatprep.mubr.f32.mxu0 %v16163_v39  ;;  %11195 = vmatprep.mubr.f32.mxu1 %v16163_v39  ;;  %vm13468_vm0 = vmpackc.low %vm2992_vm14, %vm2991_vm10  ;;  %vm2995_vm14 = vcmp.eq.s32.totalorder %v15105_v24, %v16119_v57  ;;  %vm2996_vm10 = vcmp.eq.s32.totalorder %v15108_v25, %v16119_v57 }
 0x7c6   : > { %13365 = vmatprep.subr.msk.bf16.mxu0 %vm18832_vm15, %v18807_v59  ;;  %13461 = vmatprep.subr.msk.bf16.mxu1 %vm13460_vm12, %v18807_v59 }
 0x7c8   : > { %13367 = vmatpush3.bf16.msk.msra.mxu0 %vm18832_vm15, %v18807_v59  ;;  %13463 = vmatpush3.bf16.msk.msra.mxu1 %vm13460_vm12, %v18807_v59  ;;  %vm18834_vm12 = vnez %v18751_v44  ;;  %vm13472_vm15 = vmpackc.low %vm2994_vm8, %vm2993_vm2  ;;  %vm2997_vm2 = vcmp.eq.s32.totalorder %v15135_v28, %v16119_v57  ;;  %vm2998_vm8 = vcmp.eq.s32.totalorder %v15138_v29, %v16119_v57 }
 0x7c9   : > { %13369 = vmatprep.subr.msk.bf16.mxu0 %vm18833_vm4, %v18807_v59  ;;  %13465 = vmatprep.subr.msk.bf16.mxu1 %vm13464_vm13, %v18807_v59 }
 0x7cc   : > { %13371 = vmatpush3.bf16.msk.msra.mxu0 %vm18833_vm4, %v18807_v59  ;;  %13467 = vmatpush3.bf16.msk.msra.mxu1 %vm13464_vm13, %v18807_v59  ;;  %vm18835_vm13 = vnez %v18754_v45  ;;  %vm13476_vm4 = vmpackc.low %vm2996_vm10, %vm2995_vm14  ;;  %vm2999_vm14 = vcmp.eq.s32.totalorder %v15166_v32, %v16119_v57  ;;  %vm3000_vm10 = vcmp.eq.s32.totalorder %v15169_v33, %v16119_v57  ;;  %v18839_v57 = vmov 0  ;;  %v2442_v45 = vld [vmem:[%s18883_s30] sm:$0xff]  ;;  %s19094_s30 = sld [smem:[#allocation8_spill]] }
 0x7cd   : > { %13373 = vmatprep.subr.msk.bf16.mxu0 %vm18834_vm12, %v18807_v59  ;;  %13469 = vmatprep.subr.msk.bf16.mxu1 %vm13468_vm0, %v18807_v59 }
 0x7d0   : > { %13375 = vmatpush3.bf16.msk.msra.mxu0 %vm18834_vm12, %v18807_v59  ;;  %13471 = vmatpush3.bf16.msk.msra.mxu1 %vm13468_vm0, %v18807_v59  ;;  %vm18836_vm0 = vnez %v18757_v46  ;;  %vm13480_vm12 = vmpackc.low %vm2998_vm8, %vm2997_vm2  ;;  %vm2861_vm8 = vcmp.eq.s32.totalorder %v14978_v3, %v16240_v50  ;;  %v18872_v46 = vmov 0 }
 0x7d1   : > { %13377 = vmatprep.subr.msk.bf16.mxu0 %vm18835_vm13, %v18807_v59  ;;  %13473 = vmatprep.subr.msk.bf16.mxu1 %vm13472_vm15, %v18807_v59  ;;  %vm13484_vm2 = vmpackc.low %vm3000_vm10, %vm2999_vm14 }
 0x7d2   : > { %s9322_s29 = sshll.u32 %s19094_s30, 7  ;;  %s14793_s30 = smov [#allocation2]  }
 0x7d3   : > { %s18350_s3 = scalar_lea.hbm %s19098_s1, %s9322_s29 }
 0x7d4   : > { %13379 = vmatpush3.bf16.msk.msra.mxu0 %vm18835_vm13, %v18807_v59  ;;  %13475 = vmatpush3.bf16.msk.msra.mxu1 %vm13472_vm15, %v18807_v59  ;;  %vm18837_vm15 = vnez %v18760_v47  ;;  %vm2862_vm13 = vcmp.eq.s32.totalorder %v14985_v5, %v16240_v50  ;;  %v18869_v47 = vmov 0 }
 0x7d5   : > { %13381 = vmatprep.subr.msk.bf16.mxu0 %vm18836_vm0, %v18807_v59  ;;  %13477 = vmatprep.subr.msk.bf16.mxu1 %vm13476_vm4, %v18807_v59  ;;  %vm16273_vm14 = vmpackc.low %vm2862_vm13, %vm2861_vm8  ;;  %vm3204_vm13 = vcmp.eq.s32.totalorder %v14991_v7, %v16247_v13  ;;  %vm2865_vm8 = vcmp.eq.s32.totalorder %v15000_v10, %v16240_v50 }
 0x7d6   : > { %v18840_v57 = vsel %vm16273_vm14, 4294967295, %v18839_v57 }
 0x7d7   : > { %18841 = vst [vmem:[#allocation34_spill] sm:$0xff] %v18840_v57 }
 0x7d8   : > { %13383 = vmatpush3.bf16.msk.msra.mxu0 %vm18836_vm0, %v18807_v59  ;;  %13479 = vmatpush3.bf16.msk.msra.mxu1 %vm13476_vm4, %v18807_v59  ;;  %vm3203_vm0 = vcmp.eq.s32.totalorder %v14985_v5, %v16247_v13  ;;  %vm18838_vm4 = vnez %v18763_v48  ;;  %v18864_v48 = vmov 0 }
 0x7d9   : > { %13385 = vmatprep.subr.msk.bf16.mxu0 %vm18837_vm15, %v18807_v59  ;;  %13481 = vmatprep.subr.msk.bf16.mxu1 %vm13480_vm12, %v18807_v59  ;;  %vm16277_vm10 = vmpackc.low %vm3203_vm0, %vm3202_vm5  ;;  %vm3205_vm5 = vcmp.eq.s32.totalorder %v14994_v8, %v16247_v13 }
 0x7dc   : > { %13387 = vmatpush3.bf16.msk.msra.mxu0 %vm18837_vm15, %v18807_v59  ;;  %13483 = vmatpush3.bf16.msk.msra.mxu1 %vm13480_vm12, %v18807_v59  ;;  %vm2864_vm12 = vcmp.eq.s32.totalorder %v14994_v8, %v16240_v50  ;;  %vm2868_vm15 = vcmp.eq.s32.totalorder %v15048_v17, %v16240_v50 }
 0x7dd   : > { %13389 = vmatprep.subr.msk.bf16.mxu0 %vm18838_vm4, %v18807_v59  ;;  %13485 = vmatprep.subr.msk.bf16.mxu1 %vm13484_vm2, %v18807_v59  ;;  %vm16299_vm0 = vmpackc.low %vm2864_vm12, %vm2863_vm6  ;;  %vm3206_vm6 = vcmp.eq.s32.totalorder %v15000_v10, %v16247_v13  ;;  %vm3207_vm12 = vcmp.eq.s32.totalorder %v15009_v11, %v16247_v13 }
 0x7de   : > { %v18845_v54 = vsel %vm16299_vm0, 4294967295, %v18844_v54 }
 0x7df   : > { %18846 = vst [vmem:[#allocation35_spill] sm:$0xff] %v18845_v54 }
 0x7e0   : > { %13391 = vmatpush3.bf16.msk.msra.mxu0 %vm18838_vm4, %v18807_v59  ;;  %13487 = vmatpush3.bf16.msk.msra.mxu1 %vm13484_vm2, %v18807_v59  ;;  %vm16305_vm2 = vmpackc.low %vm3205_vm5, %vm3204_vm13  ;;  %vm2866_vm4 = vcmp.eq.s32.totalorder %v15009_v11, %v16240_v50 }
 0x7e1   : > { %13425 = vmatprep.subr.msk.bf16.mxu0 %vm16273_vm14, %v18807_v59  ;;  %13517 = vmatprep.subr.msk.bf16.mxu1 %vm16277_vm10, %v18807_v59  ;;  %vm16331_vm13 = vmpackc.low %vm2866_vm4, %vm2865_vm8  ;;  %vm3208_vm4 = vcmp.eq.s32.totalorder %v15045_v16, %v16247_v13  ;;  %vm3209_vm8 = vcmp.eq.s32.totalorder %v15048_v17, %v16247_v13 }
 0x7e2   : > { %v18850_v9 = vsel %vm16331_vm13, 4294967295, %v18849_v9  ;;  %vm16335_vm5 = vmpackc.low %vm3207_vm12, %vm3206_vm6 }
 0x7e3   : > { %11091 = vmatmul.mubr.f32.vlgmr.msra.gmra.mrb[24].mxu0 %v16169_v41  ;;  %11196 = vmatmul.mubr.f32.vlgmr.msra.gmra.mrb[22].mxu1 %v16169_v41  ;;  %18851 = vst [vmem:[#allocation36_spill] sm:$0xff] %v18850_v9  ;;  %vm16363_vm12 = vmpackc.low %vm3209_vm8, %vm3208_vm4 }
 0x7e4   : > { %13427 = vmatpush3.bf16.msk.msra.mxu0 %vm16273_vm14, %v18807_v59  ;;  %11160 = vmatprep.mubr.f32.mxu0 %v16081_v51 }
 0x7e5   : > { %13519 = vmatpush3.bf16.msk.msra.mxu1 %vm16277_vm10, %v18807_v59  ;;  %11261 = vmatprep.mubr.f32.mxu1 %v16081_v51  ;;  %vm2867_vm10 = vcmp.eq.s32.totalorder %v15045_v16, %v16240_v50 }
 0x7e6   : > { %13429 = vmatprep.subr.msk.bf16.mxu0 %vm16299_vm0, %v18807_v59  ;;  %13521 = vmatprep.subr.msk.bf16.mxu1 %vm16305_vm2, %v18807_v59  ;;  %vm16359_vm6 = vmpackc.low %vm2868_vm15, %vm2867_vm10  ;;  %vm3210_vm15 = vcmp.eq.s32.totalorder %v15075_v20, %v16247_v13  ;;  %vm3211_vm10 = vcmp.eq.s32.totalorder %v15078_v21, %v16247_v13 }
 0x7e7   : > { %v18855_v61 = vsel %vm16359_vm6, 4294967295, %v18854_v61  ;;  %vm16391_vm8 = vmpackc.low %vm3211_vm10, %vm3210_vm15 }
 0x7e8   : > { %13431 = vmatpush3.bf16.msk.msra.mxu0 %vm16299_vm0, %v18807_v59  ;;  %18856 = vst [vmem:[#allocation37_spill] sm:$0xff] %v18855_v61 }
 0x7e9   : > { %13523 = vmatpush3.bf16.msk.msra.mxu1 %vm16305_vm2, %v18807_v59  ;;  %13433 = vmatprep.subr.msk.bf16.mxu0 %vm16331_vm13, %v18807_v59  ;;  %vm2870_vm2 = vcmp.eq.s32.totalorder %v15078_v21, %v16240_v50 }
 0x7ea   : > { %13525 = vmatprep.subr.msk.bf16.mxu1 %vm16335_vm5, %v18807_v59  ;;  %vm16387_vm4 = vmpackc.low %vm2870_vm2, %vm2869_vm7  ;;  %vm3212_vm7 = vcmp.eq.s32.totalorder %v15105_v24, %v16247_v13  ;;  %vm3213_vm2 = vcmp.eq.s32.totalorder %v15108_v25, %v16247_v13 }
 0x7eb   : > { %v18860_v56 = vsel %vm16387_vm4, 4294967295, %v18859_v56  ;;  %vm16419_vm10 = vmpackc.low %vm3213_vm2, %vm3212_vm7 }
 0x7ec   : > { %13435 = vmatpush3.bf16.msk.msra.mxu0 %vm16331_vm13, %v18807_v59  ;;  %18861 = vst [vmem:[#allocation38_spill] sm:$0xff] %v18860_v56 }
 0x7ed   : > { %13527 = vmatpush3.bf16.msk.msra.mxu1 %vm16335_vm5, %v18807_v59  ;;  %13437 = vmatprep.subr.msk.bf16.mxu0 %vm16359_vm6, %v18807_v59  ;;  %vm2872_vm5 = vcmp.eq.s32.totalorder %v15108_v25, %v16240_v50 }
 0x7ee   : > { %13529 = vmatprep.subr.msk.bf16.mxu1 %vm16363_vm12, %v18807_v59  ;;  %vm16415_vm15 = vmpackc.low %vm2872_vm5, %vm2871_vm9  ;;  %vm3214_vm9 = vcmp.eq.s32.totalorder %v15135_v28, %v16247_v13  ;;  %vm3215_vm5 = vcmp.eq.s32.totalorder %v15138_v29, %v16247_v13 }
 0x7ef   : > { %v18865_v48 = vsel %vm16415_vm15, 4294967295, %v18864_v48  ;;  %vm13540_vm2 = vmpackc.low %vm3215_vm5, %vm3214_vm9  ;;  %vm18878_vm5 = vnez %v18698_v23 }
 0x7f0   : > { %13439 = vmatpush3.bf16.msk.msra.mxu0 %vm16359_vm6, %v18807_v59  ;;  %18866 = vst [vmem:[#allocation39_spill] sm:$0xff] %v18865_v48 }
 0x7f1   : > { %13531 = vmatpush3.bf16.msk.msra.mxu1 %vm16363_vm12, %v18807_v59  ;;  %13441 = vmatprep.subr.msk.bf16.mxu0 %vm16387_vm4, %v18807_v59  ;;  %vm2874_vm12 = vcmp.eq.s32.totalorder %v15138_v29, %v16240_v50 }
 0x7f2   : > { %13533 = vmatprep.subr.msk.bf16.mxu1 %vm16391_vm8, %v18807_v59  ;;  %vm16443_vm7 = vmpackc.low %vm2874_vm12, %vm2873_vm3  ;;  %vm3217_vm3 = vcmp.eq.s32.totalorder %v15169_v33, %v16247_v13 }
 0x7f3   : > { %v18870_v47 = vsel %vm16443_vm7, 4294967295, %v18869_v47  ;;  %vm16465_vm12 = vmpackc.low %vm2876_vm11, %vm2875_vm1  ;;  %vm18875_vm11 = vnez %v18686_v12  ;;  %vm18876_vm1 = vnez %v18688_v14 }
 0x7f4   : > { %13443 = vmatpush3.bf16.msk.msra.mxu0 %vm16387_vm4, %v18807_v59  ;;  %18871 = vst [vmem:[#allocation40_spill] sm:$0xff] %v18870_v47  ;;  %v18873_v46 = vsel %vm16465_vm12, 4294967295, %v18872_v46 }
 0x7f5   : > { %13535 = vmatpush3.bf16.msk.msra.mxu1 %vm16391_vm8, %v18807_v59  ;;  %13445 = vmatprep.subr.msk.bf16.mxu0 %vm16415_vm15, %v18807_v59  ;;  %vm3216_vm8 = vcmp.eq.s32.totalorder %v15166_v32, %v16247_v13  ;;  %18874 = vst [vmem:[#allocation41_spill] sm:$0xff] %v18873_v46 }
 0x7f6   : > { %13537 = vmatprep.subr.msk.bf16.mxu1 %vm16419_vm10, %v18807_v59  ;;  %vm13544_vm9 = vmpackc.low %vm3217_vm3, %vm3216_vm8  ;;  %vm18880_vm8 = vnez %v18707_v31  ;;  %vm18881_vm3 = vnez %v18712_v35 }
 0x7f8   : > { %13447 = vmatpush3.bf16.msk.msra.mxu0 %vm16415_vm15, %v18807_v59 }
 0x7f9   : > { %13539 = vmatpush3.bf16.msk.msra.mxu1 %vm16419_vm10, %v18807_v59  ;;  %13449 = vmatprep.subr.msk.bf16.mxu0 %vm16443_vm7, %v18807_v59  ;;  %vm18877_vm10 = vnez %v18694_v19 }
 0x7fa   : > { %13541 = vmatprep.subr.msk.bf16.mxu1 %vm13540_vm2, %v18807_v59 }
 0x7fc   : > { %13451 = vmatpush3.bf16.msk.msra.mxu0 %vm16443_vm7, %v18807_v59 }
 0x7fd   : > { %13543 = vmatpush3.bf16.msk.msra.mxu1 %vm13540_vm2, %v18807_v59  ;;  %13453 = vmatprep.subr.msk.bf16.mxu0 %vm16465_vm12, %v18807_v59  ;;  %vm18879_vm2 = vnez %v18702_v27 }
 0x7fe   : > { %13545 = vmatprep.subr.msk.bf16.mxu1 %vm13544_vm9, %v18807_v59 }
 0x800   : > { %13455 = vmatpush3.bf16.msk.msra.mxu0 %vm16465_vm12, %v18807_v59 }
 0x801   : > { %13547 = vmatpush3.bf16.msk.msra.mxu1 %vm13544_vm9, %v18807_v59  ;;  %vm18882_vm9 = vnez %v18717_v37 }
 0x802   : > { %13581 = vmatprep.subr.msk.bf16.mxu1 %vm18875_vm11, %v18807_v59 }
 0x803   : > { %11161 = vmatmul.mubr.f32.vlgmr.msra.gmra.mrb[26].mxu0 %v16084_v55 }
 0x804   : > { %11262 = vmatmul.mubr.f32.vlgmr.msra.gmra.mrb[24].mxu1 %v16084_v55 }
 0x805   : > { %13583 = vmatpush3.bf16.msk.msra.mxu1 %vm18875_vm11, %v18807_v59  ;;  %11331 = vmatprep.mubr.f32.mxu1 %v16081_v51 }
 0x806   : > { %13585 = vmatprep.subr.msk.bf16.mxu1 %vm18876_vm1, %v18807_v59 }
 0x809   : > { %13587 = vmatpush3.bf16.msk.msra.mxu1 %vm18876_vm1, %v18807_v59 }
 0x80a   : > { %13589 = vmatprep.subr.msk.bf16.mxu1 %vm18877_vm10, %v18807_v59 }
 0x80d   : > { %13591 = vmatpush3.bf16.msk.msra.mxu1 %vm18877_vm10, %v18807_v59 }
 0x80e   : > { %13593 = vmatprep.subr.msk.bf16.mxu1 %vm18878_vm5, %v18807_v59 }
 0x811   : > { %13595 = vmatpush3.bf16.msk.msra.mxu1 %vm18878_vm5, %v18807_v59 }
 0x812   : > { %13597 = vmatprep.subr.msk.bf16.mxu1 %vm18879_vm2, %v18807_v59 }
 0x815   : > { %13599 = vmatpush3.bf16.msk.msra.mxu1 %vm18879_vm2, %v18807_v59 }
 0x816   : > { %13601 = vmatprep.subr.msk.bf16.mxu1 %vm18880_vm8, %v18807_v59 }
 0x819   : > { %13603 = vmatpush3.bf16.msk.msra.mxu1 %vm18880_vm8, %v18807_v59 }
 0x81a   : > { %13605 = vmatprep.subr.msk.bf16.mxu1 %vm18881_vm3, %v18807_v59 }
 0x81d   : > { %13607 = vmatpush3.bf16.msk.msra.mxu1 %vm18881_vm3, %v18807_v59 }
 0x81e   : > { %13609 = vmatprep.subr.msk.bf16.mxu1 %vm18882_vm9, %v18807_v59 }
 0x821   : > { %13611 = vmatpush3.bf16.msk.msra.mxu1 %vm18882_vm9, %v18807_v59 }
 0x822   : > { %13645 = vmatprep.subr.msk.bf16.mxu1 %vm16273_vm14, %v18807_v59 }
 0x824   : > { %11332 = vmatmul.mubr.f32.vlgmr.msra.gmra.mrb[26].mxu1 %v16084_v55 }
 0x825   : > { %13647 = vmatpush3.bf16.msk.msra.mxu1 %vm16273_vm14, %v18807_v59  ;;  %11401 = vmatprep.mubr.f32.mxu1 %v16163_v39 }
 0x826   : > { %13649 = vmatprep.subr.msk.bf16.mxu1 %vm16299_vm0, %v18807_v59 }
 0x829   : > { %13651 = vmatpush3.bf16.msk.msra.mxu1 %vm16299_vm0, %v18807_v59  ;;  %vm18893_vm0 = vnez %v18820_v6 }
 0x82a   : > { %13653 = vmatprep.subr.msk.bf16.mxu1 %vm16331_vm13, %v18807_v59 }
 0x82d   : > { %13655 = vmatpush3.bf16.msk.msra.mxu1 %vm16331_vm13, %v18807_v59  ;;  %vm18892_vm13 = vnez %v18818_v0 }
 0x82e   : > { %13657 = vmatprep.subr.msk.bf16.mxu1 %vm16359_vm6, %v18807_v59 }
 0x831   : > { %13659 = vmatpush3.bf16.msk.msra.mxu1 %vm16359_vm6, %v18807_v59  ;;  %vm18891_vm6 = vnez %v18816_v58 }
 0x832   : > { %13661 = vmatprep.subr.msk.bf16.mxu1 %vm16387_vm4, %v18807_v59 }
 0x835   : > { %13663 = vmatpush3.bf16.msk.msra.mxu1 %vm16387_vm4, %v18807_v59 }
 0x836   : > { %13665 = vmatprep.subr.msk.bf16.mxu1 %vm16415_vm15, %v18807_v59 }
 0x839   : > { %13667 = vmatpush3.bf16.msk.msra.mxu1 %vm16415_vm15, %v18807_v59  ;;  %vm18885_vm15 = vcmask 916480  }
 0x83a   : > { %13669 = vmatprep.subr.msk.bf16.mxu1 %vm16443_vm7, %v18807_v59  ;;  %11226 = vmatprep.mubr.msk.f32.mxu0 %vm18885_vm15, %v2442_v45  ;;  %vm18886_vm4 = vmmov %vm18885_vm15 }
 0x83d   : > { %13671 = vmatpush3.bf16.msk.msra.mxu1 %vm16443_vm7, %v18807_v59  ;;  %vm18889_vm7 = vnez %v18812_v53 }
 0x83e   : > { %13673 = vmatprep.subr.msk.bf16.mxu1 %vm16465_vm12, %v18807_v59 }
 0x841   : > { %13675 = vmatpush3.bf16.msk.msra.mxu1 %vm16465_vm12, %v18807_v59  ;;  %vm18888_vm12 = vnez %v18809_v60 }
 0x844   : > { %11402 = vmatmul.mubr.f32.vlgmr.msra.gmra.mrb[28].mxu1 %v16169_v41 }
 0x845   : > { %11467 = vmatprep.mubr.msk.f32.mxu1 %vm18886_vm4, %v2442_v45  ;;  %v13500_v45 = vpack.c.bf16 %v16084_v55, %v16081_v51  ;;  %vm18887_vm4 = vnez %v18806_v62 }
 0x876   : > { %v11057_v50 = vpop.f32.mrb[18].mxu1 }
 0x877   : > { %v2701_v13 = vpop.f32.mrb[19].mxu1 }
 0x878   : > { %v13492_v47 = vpack.c.bf16 %v11057_v50, %v2701_v13  ;;  %v18900_v50 = vld [vmem:[#allocation27_spill] sm:$0xff]  ;;  %v18902_v13 = vld [vmem:[#allocation28_spill] sm:$0xff] }
 0x896   : > { %v11022_v48 = vpop.f32.mrb[22].mxu0  ;;  %v11127_v56 = vpop.f32.mrb[20].mxu1 }
 0x897   : > { %v2577_v61 = vpop.f32.mrb[23].mxu0  ;;  %v2851_v9 = vpop.f32.mrb[21].mxu1 }
 0x898   : > { %v13488_v54 = vpack.c.bf16 %v11022_v48, %v2577_v61  ;;  %v13504_v46 = vpack.c.bf16 %v11127_v56, %v2851_v9 }
 0x89a   : > { %13489 = vmatprep.subr.bf16.mxu0 %v13488_v54 }
 0x89b   : > { %13491 = vmatpush3.bf16.msra.mxu0 %v13488_v54 }
 0x89c   : > { %13493 = vmatprep.subr.bf16.mxu0 %v13492_v47 }
 0x89f   : > { %13495 = vmatpush3.bf16.msra.mxu0 %v13492_v47 }
 0x8b6   : > { %v11092_v57 = vpop.f32.mrb[24].mxu0  ;;  %v11197_v44 = vpop.f32.mrb[22].mxu1 }
 0x8b7   : > { %v2776_v43 = vpop.f32.mrb[25].mxu0  ;;  %v3099_v40 = vpop.f32.mrb[23].mxu1 }
 0x8b8   : > { %v13496_v63 = vpack.c.bf16 %v11092_v57, %v2776_v43  ;;  %v13512_v38 = vpack.c.bf16 %v11197_v44, %v3099_v40  ;;  %v18894_v44 = vld [vmem:[#allocation33_spill] sm:$0xff] }
 0x8b9   : > { %vm18895_vm14 = vnez %v18894_v44  ;;  %v18896_v57 = vld [vmem:[#allocation25_spill] sm:$0xff] }
 0x8ba   : > { %13497 = vmatprep.subr.bf16.mxu0 %v13496_v63 }
 0x8bb   : > { %13499 = vmatpush3.bf16.msra.mxu0 %v13496_v63  ;;  %v16593_v63 = vld [vmem:[%s18884_s4 + $0x8] sm:$0xff]  ;;  %s19099_s4 = sand.u32 1, %s14778_s2  }
 0x8bc   : > { %13501 = vmatprep.subr.bf16.mxu0 %v13500_v45  ;;  %s18355_s8 = scalar_lea.sflag [#allocation3], %s19099_s4 }
 0x8bf   : > { %13503 = vmatpush3.bf16.msra.mxu0 %v13500_v45  ;;  %v18904_v45 = vld [vmem:[#allocation29_spill] sm:$0xff] }
 0x8c0   : > { %13505 = vmatprep.subr.bf16.mxu0 %v13504_v46 }
 0x8c3   : > { %13507 = vmatpush3.bf16.msra.mxu0 %v13504_v46  ;;  %v18898_v46 = vld [vmem:[#allocation26_spill] sm:$0xff] }
 0x8d6   : > { %v11162_v9 = vpop.f32.mrb[26].mxu0 }
 0x8d7   : > { %v11263_v61 = vpop.f32.mrb[24].mxu1  ;;  %v2975_v54 = vpop.f32.mrb[27].mxu0 }
 0x8d8   : > { %v13508_v56 = vpack.c.bf16 %v11162_v9, %v2975_v54  ;;  %v3316_v48 = vpop.f32.mrb[25].mxu1  ;;  %v18906_v9 = vld [vmem:[#allocation30_spill] sm:$0xff] }
 0x8d9   : > { %v13708_v47 = vpack.c.bf16 %v11263_v61, %v3316_v48  ;;  %v3625_v61 = vadd.s32 5, %v14976_v2  ;;  %v18908_v48 = vld [vmem:[#allocation31_spill] sm:$0xff] }
 0x8da   : > { %13509 = vmatprep.subr.bf16.mxu0 %v13508_v56 }
 0x8db   : > { %13709 = vmatprep.subr.bf16.mxu1 %v13708_v47  ;;  %13511 = vmatpush3.bf16.msra.mxu0 %v13508_v56  ;;  %vm3631_vm9 = vcmp.eq.s32.totalorder %v15009_v11, %v3625_v61  ;;  %vm3635_vm3 = vcmp.eq.s32.totalorder %v15078_v21, %v3625_v61 }
 0x8dc   : > { %13711 = vmatpush3.bf16.msra.mxu1 %v13708_v47  ;;  %13513 = vmatprep.subr.bf16.mxu0 %v13512_v38 }
 0x8df   : > { %13515 = vmatpush3.bf16.msra.mxu0 %v13512_v38 }
 0x8e0   : > { %13549 = vmatprep.subr.msk.bf16.mxu0 %vm18887_vm4, %v18807_v59 }
 0x8e2   : > { %11227 = vmatmul.mubr.msk.f32.vlgmr.msra.gmra.mrb[28].mxu0 %vm18885_vm15, %v16593_v63  ;;  %vm18890_vm15 = vnez %v18814_v49 }
 0x8e3   : > { %13551 = vmatpush3.bf16.msk.msra.mxu0 %vm18887_vm4, %v18807_v59  ;;  %11296 = vmatprep.mubr.f32.mxu0 %v16163_v39 }
 0x8e4   : > { %13553 = vmatprep.subr.msk.bf16.mxu0 %vm18888_vm12, %v18807_v59 }
 0x8e7   : > { %13555 = vmatpush3.bf16.msk.msra.mxu0 %vm18888_vm12, %v18807_v59  ;;  %vm3629_vm12 = vcmp.eq.s32.totalorder %v14994_v8, %v3625_v61  ;;  %v16742_v8 = vpop.permute.xlu0 %3110 }
 0x8e8   : > { %13557 = vmatprep.subr.msk.bf16.mxu0 %vm18889_vm7, %v18807_v59 }
 0x8eb   : > { %13559 = vmatpush3.bf16.msk.msra.mxu0 %vm18889_vm7, %v18807_v59  ;;  %vm3628_vm7 = vcmp.eq.s32.totalorder %v14991_v7, %v3625_v61 }
 0x8ec   : > { %13561 = vmatprep.subr.msk.bf16.mxu0 %vm18890_vm15, %v18807_v59  ;;  %vm13680_vm4 = vmpackc.low %vm3629_vm12, %vm3628_vm7  ;;  %vm3634_vm12 = vcmp.eq.s32.totalorder %v15075_v20, %v3625_v61 }
 0x8ef   : > { %13563 = vmatpush3.bf16.msk.msra.mxu0 %vm18890_vm15, %v18807_v59 }
 0x8f0   : > { %13565 = vmatprep.subr.msk.bf16.mxu0 %vm18891_vm6, %v18807_v59 }
 0x8f3   : > { %13567 = vmatpush3.bf16.msk.msra.mxu0 %vm18891_vm6, %v18807_v59  ;;  %vm18905_vm6 = vnez %v18904_v45 }
 0x8f4   : > { %13569 = vmatprep.subr.msk.bf16.mxu0 %vm18892_vm13, %v18807_v59 }
 0x8f7   : > { %v11333_v38 = vpop.f32.mrb[26].mxu1  ;;  %13571 = vmatpush3.bf16.msk.msra.mxu0 %vm18892_vm13, %v18807_v59  ;;  %vm18897_vm13 = vnez %v18896_v57 }
 0x8f8   : > { %v3466_v40 = vpop.f32.mrb[27].mxu1  ;;  %13573 = vmatprep.subr.msk.bf16.mxu0 %vm18893_vm0, %v18807_v59 }
 0x8f9   : > { %v16637_v43 = vpack.c.bf16 %v11333_v38, %v3466_v40  ;;  %v18910_v38 = vld [vmem:[#allocation32_spill] sm:$0xff]  ;;  %v13720_v40 = vpack.c.bf16 %v16169_v41, %v16163_v39 }
 0x8fa   : > { %vm18911_vm15 = vnez %v18910_v38 }
 0x8fb   : > { %13575 = vmatpush3.bf16.msk.msra.mxu0 %vm18893_vm0, %v18807_v59  ;;  %vm18899_vm0 = vnez %v18898_v46 }
 0x8fc   : > { %13577 = vmatprep.subr.msk.bf16.mxu0 %vm18895_vm14, %v18807_v59 }
 0x8ff   : > { %13579 = vmatpush3.bf16.msk.msra.mxu0 %vm18895_vm14, %v18807_v59  ;;  %vm18901_vm14 = vnez %v18900_v50 }
 0x900   : > { %13613 = vmatprep.subr.msk.bf16.mxu0 %vm18897_vm13, %v18807_v59 }
 0x902   : > { %11297 = vmatmul.mubr.f32.vlgmr.msra.gmra.mrb[30].mxu0 %v16169_v41 }
 0x903   : > { %13615 = vmatpush3.bf16.msk.msra.mxu0 %vm18897_vm13, %v18807_v59  ;;  %11366 = vmatprep.mubr.f32.mxu0 %v16081_v51  ;;  %vm18903_vm13 = vnez %v18902_v13 }
 0x904   : > { %13617 = vmatprep.subr.msk.bf16.mxu0 %vm18899_vm0, %v18807_v59 }
 0x907   : > { %13619 = vmatpush3.bf16.msk.msra.mxu0 %vm18899_vm0, %v18807_v59  ;;  %vm18907_vm0 = vnez %v18906_v9 }
 0x908   : > { %13621 = vmatprep.subr.msk.bf16.mxu0 %vm18901_vm14, %v18807_v59 }
 0x90b   : > { %13623 = vmatpush3.bf16.msk.msra.mxu0 %vm18901_vm14, %v18807_v59  ;;  %vm3627_vm14 = vcmp.eq.s32.totalorder %v14985_v5, %v3625_v61  ;;  %v16740_v5 = vpop.permute.xlu1 %3115 }
 0x90c   : > { %13625 = vmatprep.subr.msk.bf16.mxu0 %vm18903_vm13, %v18807_v59 }
 0x90f   : > { %13627 = vmatpush3.bf16.msk.msra.mxu0 %vm18903_vm13, %v18807_v59  ;;  %vm18909_vm13 = vnez %v18908_v48 }
 0x910   : > { %13629 = vmatprep.subr.msk.bf16.mxu0 %vm18905_vm6, %v18807_v59 }
 0x913   : > { %13631 = vmatpush3.bf16.msk.msra.mxu0 %vm18905_vm6, %v18807_v59  ;;  %vm3626_vm6 = vcmp.eq.s32.totalorder %v14978_v3, %v3625_v61  ;;  %v2446_v3 = vld [vmem:[%s18912_s11] sm:$0xff] }
 0x914   : > { %13633 = vmatprep.subr.msk.bf16.mxu0 %vm18907_vm0, %v18807_v59 }
 0x917   : > { %v11403_v54 = vpop.f32.mrb[28].mxu1  ;;  %13635 = vmatpush3.bf16.msk.msra.mxu0 %vm18907_vm0, %v18807_v59  ;;  %vm13676_vm0 = vmpackc.low %vm3627_vm14, %vm3626_vm6  ;;  %vm3632_vm6 = vcmp.eq.s32.totalorder %v15045_v16, %v3625_v61 }
 0x918   : > { %v3616_v56 = vpop.f32.mrb[29].mxu1  ;;  %13637 = vmatprep.subr.msk.bf16.mxu0 %vm18909_vm13, %v18807_v59 }
 0x919   : > { %v16690_v47 = vpack.c.bf16 %v11403_v54, %v3616_v56 }
 0x91b   : > { %13639 = vmatpush3.bf16.msk.msra.mxu0 %vm18909_vm13, %v18807_v59  ;;  %vm3630_vm13 = vcmp.eq.s32.totalorder %v15000_v10, %v3625_v61 }
 0x91c   : > { %13641 = vmatprep.subr.msk.bf16.mxu0 %vm18911_vm15, %v18807_v59  ;;  %vm13684_vm14 = vmpackc.low %vm3631_vm9, %vm3630_vm13  ;;  %vm3636_vm13 = vcmp.eq.s32.totalorder %v15105_v24, %v3625_v61  ;;  %vm3637_vm9 = vcmp.eq.s32.totalorder %v15108_v25, %v3625_v61 }
 0x91f   : > { %13643 = vmatpush3.bf16.msk.msra.mxu0 %vm18911_vm15, %v18807_v59  ;;  %vm3633_vm15 = vcmp.eq.s32.totalorder %v15048_v17, %v3625_v61 }
 0x920   : > { %13677 = vmatprep.subr.msk.bf16.mxu0 %vm13676_vm0, %v18807_v59  ;;  %vm13688_vm7 = vmpackc.low %vm3633_vm15, %vm3632_vm6  ;;  %vm3638_vm15 = vcmp.eq.s32.totalorder %v15135_v28, %v3625_v61  ;;  %vm3639_vm6 = vcmp.eq.s32.totalorder %v15138_v29, %v3625_v61 }
 0x922   : > { %11367 = vmatmul.mubr.f32.vlgmr.msra.gmra.mrb[32].mxu0 %v16084_v55 }
 0x923   : > { %13679 = vmatpush3.bf16.msk.msra.mxu0 %vm13676_vm0, %v18807_v59  ;;  %11436 = vmatprep.mubr.f32.mxu0 %v16081_v51  ;;  %vm13692_vm0 = vmpackc.low %vm3635_vm3, %vm3634_vm12  ;;  %vm3640_vm3 = vcmp.eq.s32.totalorder %v15166_v32, %v3625_v61  ;;  %vm3641_vm12 = vcmp.eq.s32.totalorder %v15169_v33, %v3625_v61  ;;  %v16753_v32 = vld [vmem:[%s18912_s11 + $0x8] sm:$0xff]  ;;  %v18919_v61 = vmov 0.0|0.0   ;;  %s14728_s11 = sshll.u32 %s14793_s30, 4  ;;  %s14729_s11 = int_to_ptr.vmem [resolvable:$false] %s14728_s11 }
 0x924   : > { %13681 = vmatprep.subr.msk.bf16.mxu0 %vm13680_vm4, %v18807_v59  ;;  %s14730_s12 = scalar_lea.vmem %s14729_s11, 256  ;;  %p14731_p0 = scmp.lt.s32.totalorder %s18345_s9, %s14729_s11 }
 0x925   : > { %p14732_p1 = scmp.lt.s32.totalorder %s14730_s12, %s14724_s10 }
 0x927   : > { %13683 = vmatpush3.bf16.msk.msra.mxu0 %vm13680_vm4, %v18807_v59  ;;  %vm13696_vm4 = vmpackc.low %vm3637_vm9, %vm3636_vm13  ;;  %vm18914_vm13 = vcmp.lt.s32.totalorder %v14976_v2, 16  ;;  %p14733_p2 = por %p14732_p1, %p14731_p0 }
 0x928   : > { %13685 = vmatprep.subr.msk.bf16.mxu0 %vm13684_vm14, %v18807_v59 }
 0x929   : > { %p14734_p3 = pnand %p14733_p2, %p14727_p13 }
 0x92b   : > { %13687 = vmatpush3.bf16.msk.msra.mxu0 %vm13684_vm14, %v18807_v59  ;;  %vm13700_vm14 = vmpackc.low %vm3639_vm6, %vm3638_vm15 }
 0x92c   : > { %13689 = vmatprep.subr.msk.bf16.mxu0 %vm13688_vm7, %v18807_v59 }
 0x92f   : > { %13691 = vmatpush3.bf16.msk.msra.mxu0 %vm13688_vm7, %v18807_v59  ;;  %vm13704_vm7 = vmpackc.low %vm3641_vm12, %vm3640_vm3  ;;  %vm18918_vm3 = vnez %v18717_v37  ;;  %vm18920_vm12 = vcmask 916480  }
 0x930   : > { %13693 = vmatprep.subr.msk.bf16.mxu0 %vm13692_vm0, %v18807_v59 }
 0x933   : > { %13695 = vmatpush3.bf16.msk.msra.mxu0 %vm13692_vm0, %v18807_v59  ;;  %vm18913_vm0 = vcmask 130048  }
 0x934   : > { %13697 = vmatprep.subr.msk.bf16.mxu0 %vm13696_vm4, %v18807_v59  ;;  %vm18916_vm6 = vmmov %vm18913_vm0 }
 0x937   : > { %13699 = vmatpush3.bf16.msk.msra.mxu0 %vm13696_vm4, %v18807_v59  ;;  %vm18915_vm4 = vmmov %vm18914_vm13 }
 0x938   : > { %13701 = vmatprep.subr.msk.bf16.mxu0 %vm13700_vm14, %v18807_v59 }
 0x93b   : > { %13703 = vmatpush3.bf16.msk.msra.mxu0 %vm13700_vm14, %v18807_v59  ;;  %vm18917_vm14 = vnez %v18712_v35 }
 0x93c   : > { %13705 = vmatprep.subr.msk.bf16.mxu0 %vm13704_vm7, %v18807_v59 }
 0x93f   : > { %13707 = vmatpush3.bf16.msk.msra.mxu0 %vm13704_vm7, %v18807_v59  ;;  %vm18921_vm7 = vmmov %vm18913_vm0 }
 0x942   : > { %11437 = vmatmul.mubr.f32.vlgmr.msra.gmra.mrb[34].mxu0 %v16084_v55 }
 0x943   : > { %11474 = vmatprep.mubr.msk.f32.mxu0 %vm18913_vm0, %v2446_v3  ;;  %vm18922_vm0 = vmmov %vm18915_vm4 }
 0x9b5   : > { %v11228_v7 = vpop.f32.mrb[28].mxu0 }
 0x9b6   : > { %v3196_v10 = vadd.f32 %v11228_v7, %v16740_v5  ;;  %v3190_v11 = vpop.f32.mrb[29].mxu0 }
 0x9b7   : > { %v3191_v16 = vadd.f32 %v3190_v11, %v16742_v8 }
 0x9b8   : > { %v3200_v17 = vsel %vm18914_vm13, %v3196_v10, 0.0  ;;  %vm18923_vm13 = vmmov %vm18922_vm0 }
 0x9b9   : > { %vm3827_vm9 = vcmp.gt.f32.partialorder %v3200_v17, 0.0  ;;  %v3829_v20 = vmul.f32 0.01, %v3200_v17  ;;  %v3199_v21 = vsel %vm18915_vm4, %v3191_v16, 0.0  ;;  %v3841_v16 = vpop.permute.xlu0 %3840 }
 0x9ba   : > { %vm3826_vm15 = vcmp.gt.f32.partialorder %v3199_v21, 0.0  ;;  %v3828_v24 = vmul.f32 0.01, %v3199_v21 }
 0x9bb   : > { %v3831_v25 = vsel %vm3827_vm9, %v3200_v17, %v3829_v20  ;;  %v3846_v17 = vpop.permute.xlu1 %3845  ;;  %vm18924_vm9 = vmmov %vm18922_vm0 }
 0x9bc   : > { %v3830_v28 = vsel %vm3826_vm15, %v3199_v21, %v3828_v24  ;;  %vm18925_vm15 = vmmov %vm18922_vm0 }
 0x9bd   : > { %v13736_v29 = vpack.c.bf16 %v3831_v25, %v3830_v28 }
 0x9bf   : > { %13737 = vmatprep.subr.bf16.mxu0 %v13736_v29 }
 0x9c0   : > { %13739 = vmatpush3.bf16.msra.mxu0 %v13736_v29 }
 0x9c1   : > { %13745 = vmatprep.subr.msk.bf16.mxu0 %vm18875_vm11, %v18807_v59 }
 0x9c3   : > { %11475 = vmatmul.mubr.msk.f32.vlgmr.msra.gmra.mrb[36].mxu0 %vm18916_vm6, %v16753_v32 }
 0x9c4   : > { %13747 = vmatpush3.bf16.msk.msra.mxu0 %vm18875_vm11, %v18807_v59 }
 0x9c5   : > { %13749 = vmatprep.subr.msk.bf16.mxu0 %vm18876_vm1, %v18807_v59 }
 0x9c8   : > { %13751 = vmatpush3.bf16.msk.msra.mxu0 %vm18876_vm1, %v18807_v59 }
 0x9c9   : > { %13753 = vmatprep.subr.msk.bf16.mxu0 %vm18877_vm10, %v18807_v59 }
 0x9cc   : > { %13755 = vmatpush3.bf16.msk.msra.mxu0 %vm18877_vm10, %v18807_v59 }
 0x9cd   : > { %13757 = vmatprep.subr.msk.bf16.mxu0 %vm18878_vm5, %v18807_v59 }
 0x9d0   : > { %13759 = vmatpush3.bf16.msk.msra.mxu0 %vm18878_vm5, %v18807_v59 }
 0x9d1   : > { %13761 = vmatprep.subr.msk.bf16.mxu0 %vm18879_vm2, %v18807_v59 }
 0x9d4   : > { %13763 = vmatpush3.bf16.msk.msra.mxu0 %vm18879_vm2, %v18807_v59 }
 0x9d5   : > { %v11298_v33 = vpop.f32.mrb[30].mxu0  ;;  %13765 = vmatprep.subr.msk.bf16.mxu0 %vm18880_vm8, %v18807_v59 }
 0x9d6   : > { %v3391_v51 = vpop.f32.mrb[31].mxu0 }
 0x9d7   : > { %v13712_v55 = vpack.c.bf16 %v11298_v33, %v3391_v51 }
 0x9d8   : > { %13767 = vmatpush3.bf16.msk.msra.mxu0 %vm18880_vm8, %v18807_v59 }
 0x9d9   : > { %13713 = vmatprep.subr.bf16.mxu1 %v13712_v55  ;;  %13769 = vmatprep.subr.msk.bf16.mxu0 %vm18917_vm14, %v18807_v59 }
 0x9da   : > { %13715 = vmatpush3.bf16.msra.mxu1 %v13712_v55 }
 0x9db   : > { %13717 = vmatprep.subr.bf16.mxu1 %v16637_v43 }
 0x9dc   : > { %13771 = vmatpush3.bf16.msk.msra.mxu0 %vm18917_vm14, %v18807_v59 }
 0x9dd   : > { %13773 = vmatprep.subr.msk.bf16.mxu0 %vm18918_vm3, %v18807_v59 }
 0x9de   : > { %13719 = vmatpush3.bf16.msra.mxu1 %v16637_v43 }
 0x9df   : > { %13721 = vmatprep.subr.bf16.mxu1 %v13720_v40 }
 0x9e0   : > { %13775 = vmatpush3.bf16.msk.msra.mxu0 %vm18918_vm3, %v18807_v59 }
 0x9e1   : > { %13826 = vmatprep.subr.bf16.mxu0 %v18919_v61 }
 0x9e2   : > { %13723 = vmatpush3.bf16.msra.mxu1 %v13720_v40 }
 0x9f5   : > { %v11368_v54 = vpop.f32.mrb[32].mxu0 }
 0x9f6   : > { %v3541_v56 = vpop.f32.mrb[33].mxu0 }
 0x9f7   : > { %v13724_v7 = vpack.c.bf16 %v11368_v54, %v3541_v56 }
 0x9f9   : > { %13725 = vmatprep.subr.bf16.mxu1 %v13724_v7 }
 0x9fa   : > { %13727 = vmatpush3.bf16.msra.mxu1 %v13724_v7 }
 0x9fb   : > { %13729 = vmatprep.subr.bf16.mxu1 %v16690_v47 }
 0x9fe   : > { %13731 = vmatpush3.bf16.msra.mxu1 %v16690_v47 }
 0xa15   : > { %v11438_v39 = vpop.f32.mrb[34].mxu0 }
 0xa16   : > { %v3740_v41 = vpop.f32.mrb[35].mxu0 }
 0xa17   : > { %v13732_v43 = vpack.c.bf16 %v11438_v39, %v3740_v41 }
 0xa19   : > { %13733 = vmatprep.subr.bf16.mxu1 %v13732_v43 }
 0xa1a   : > { %13735 = vmatpush3.bf16.msra.mxu1 %v13732_v43  ;;  %v18927_v43 = vmov 0.0  }
 0xa1d   : > { %11468 = vmatmul.mubr.msk.f32.vlgmr.msra.gmra.mrb[30].mxu1 %vm18920_vm12, %v16593_v63 }
 0xa1e   : > { %11481 = vmatprep.mubr.msk.f32.mxu1 %vm18921_vm7, %v2446_v3 }
 0xa96   : > { %v11476_v10 = vpop.f32.mrb[36].mxu0 }
 0xa97   : > { %v3920_v11 = vpop.f32.mrb[37].mxu0  ;;  %v3926_v20 = vadd.f32 %v11476_v10, %v3846_v17 }
 0xa98   : > { %v3921_v21 = vadd.f32 %v3920_v11, %v3841_v16 }
 0xa99   : > { %v3930_v24 = vsel %vm18922_vm0, %v3926_v20, 0.0  ;;  %vm18926_vm0 = vcmask 130048  }
 0xa9a   : > { %v3929_v47 = vsel %vm18923_vm13, %v3921_v21, 0.0  ;;  %v4009_v63 = vadd.f32 %v3930_v24, %v16069_v42  ;;  %vm18928_vm13 = vmmov 0  }
 0xa9b   : > { %v4008_v3 = vadd.f32 %v3929_v47, %v16074_v52 }
 0xa9c   : > { %v4018_v56 = vmul.f32 0.01, %v4009_v63  ;;  %vm4016_vm12 = vcmp.gt.f32.partialorder %v4009_v63, 0.0 }
 0xa9d   : > { %v4017_v7 = vmul.f32 0.01, %v4008_v3  ;;  %vm4015_vm7 = vcmp.gt.f32.partialorder %v4008_v3, 0.0 }
 0xa9e   : > { %v16827_v52 = vsel %vm4016_vm12, %v4009_v63, %v4018_v56  ;;  %vm18625_vm12 = vcmask 261120  }
 0xaf0   : > { %v11469_v25 = vpop.f32.mrb[30].mxu1 }
 0xaf1   : > { %v3821_v28 = vadd.f32 %v11469_v25, %v16740_v5  ;;  %v3815_v29 = vpop.f32.mrb[31].mxu1 }
 0xaf2   : > { %v3816_v33 = vadd.f32 %v3815_v29, %v16742_v8  ;;  %v4019_v8 = vsel %vm4015_vm7, %v4008_v3, %v4017_v7  ;;  %vm18930_vm7 = vnez %v18690_v15 }
 0xaf3   : > { %v3825_v51 = vsel %vm18924_vm9, %v3821_v28, 0.0  ;;  %v13777_v41 = vpack.c.bf16 %v16827_v52, %v4019_v8 }
 0xaf4   : > { %vm3833_vm4 = vcmp.gt.f32.partialorder %v3825_v51, 0.0  ;;  %v3835_v55 = vmul.f32 0.01, %v3825_v51  ;;  %v3824_v40 = vsel %vm18925_vm15, %v3816_v33, 0.0 }
 0xaf5   : > { %vm3832_vm6 = vcmp.gt.f32.partialorder %v3824_v40, 0.0  ;;  %v3834_v54 = vmul.f32 0.01, %v3824_v40 }
 0xaf6   : > { %v3837_v5 = vsel %vm3833_vm4, %v3825_v51, %v3835_v55  ;;  %vm18929_vm4 = vmmov %vm18924_vm9  ;;  %v16858_v51 = vld [vmem:[%s18409_s13 + $0x8] sm:$0xff] }
 0xaf7   : > { %v3836_v42 = vsel %vm3832_vm6, %v3824_v40, %v3834_v54  ;;  %v18937_v55 = vld [vmem:[#allocation16_spill] sm:$0xff] }
 0xaf8   : > { %v13740_v39 = vpack.c.bf16 %v3837_v5, %v3836_v42  ;;  %v16954_v5 = vpop.permute.xlu0 %4104 }
 0xafa   : > { %13741 = vmatprep.subr.bf16.mxu1 %v13740_v39 }
 0xafb   : > { %13743 = vmatpush3.bf16.msra.mxu1 %v13740_v39 }
 0xafc   : > { %13776 = vmatprep.subr.bf16.mxu1 %v18919_v61 }
 0xafe   : > { %11482 = vmatmul.mubr.msk.f32.vlgmr.msra.gmra.mrb[32].mxu1 %vm18926_vm0, %v16753_v32  ;;  %vm18931_vm0 = vnez %v18692_v18 }
 0xaff   : > { %13778 = vmatpush3.bf16.msra.mxu1 %v13777_v41  ;;  %11527 = vmatprep.mubr.msk.f32.mxu1 %vm18928_vm13, %v18927_v43 }
 0xb00   : > { %13779 = vmatprep.subr.bf16.mxu1 %v18919_v61 }
 0xbd1   : > { %v11483_v10 = vpop.f32.mrb[32].mxu1 }
 0xbd2   : > { %v4003_v11 = vadd.f32 %v11483_v10, %v3846_v17  ;;  %v3997_v20 = vpop.f32.mrb[33].mxu1 }
 0xbd3   : > { %v3998_v21 = vadd.f32 %v3997_v20, %v3841_v16 }
 0xbd4   : > { %v4007_v24 = vsel %vm18924_vm9, %v4003_v11, 0.0  ;;  %vm18932_vm9 = vnez %v18696_v22 }
 0xbd5   : > { %v4011_v47 = vadd.f32 %v4007_v24, %v16134_v1  ;;  %v4006_v25 = vsel %vm18929_vm4, %v3998_v21, 0.0  ;;  %vm18933_vm4 = vnez %v18700_v26 }
 0xbd6   : > { %v4010_v32 = vadd.f32 %v4006_v25, %v16142_v4  ;;  %v4012_v4 = vld [vmem:[%s18409_s13] sm:$0xff] }
 0xbd7   : > { %v4024_v28 = vmul.f32 0.01, %v4011_v47  ;;  %vm4022_vm15 = vcmp.gt.f32.partialorder %v4011_v47, 0.0 }
 0xbd8   : > { %vm4021_vm6 = vcmp.gt.f32.partialorder %v4010_v32, 0.0  ;;  %v4023_v29 = vmul.f32 0.01, %v4010_v32 }
 0xbd9   : > { %v4026_v63 = vsel %vm4022_vm15, %v4011_v47, %v4024_v28  ;;  %vm18934_vm15 = vnez %v18704_v30 }
 0xbda   : > { %v4025_v3 = vsel %vm4021_vm6, %v4010_v32, %v4023_v29  ;;  %vm18935_vm6 = vnez %v18709_v34 }
 0xbdb   : > { %11516 = vmatprep.mubr.f32.mxu0 %v4025_v3  ;;  %v16842_v17 = vpack.c.bf16 %v4026_v63, %v4025_v3 }
 0xbdc   : > { %11517 = vmatmul.mubr.f32.vlgmr.msra.gmra.mrb[38].mxu0 %v4026_v63 }
 0xbdd   : > { %11595 = vmatprep.mubr.msk.f32.mxu0 %vm18928_vm13, %v18927_v43 }
 0xcaf   : > { %v11518_v16 = vpop.f32.mrb[38].mxu0 }
 0xcb0   : > { %v4093_v1 = vpop.f32.mrb[39].mxu0 }
 0xcb1   : > { %v13780_v33 = vpack.c.bf16 %v11518_v16, %v4093_v1 }
 0xcb3   : > { %13781 = vmatpush3.bf16.msra.mxu1 %v13780_v33 }
 0xcb4   : > { %13782 = vmatprep.subr.bf16.mxu1 %v18919_v61 }
 0xcb6   : > { %11528 = vmatmul.mubr.msk.f32.vlgmr.msra.gmra.mrb[34].mxu1 %vm18625_vm12, %v4012_v4 }
 0xcb7   : > { %13784 = vmatpush3.bf16.msra.mxu1 %v16842_v17  ;;  %11538 = vmatprep.mubr.msk.f32.mxu1 %vm18928_vm13, %v18927_v43 }
 0xcb8   : > { %13785 = vmatprep.subr.bf16.mxu1 %v18919_v61 }
 0xcbb   : > { %13787 = vmatpush3.bf16.msra.mxu1 %v13777_v41 }
 0xcbc   : > { %13788 = vmatprep.subr.bf16.mxu1 %v18919_v61 }
 0xcbe   : > { %11539 = vmatmul.mubr.msk.f32.vlgmr.msra.gmra.mrb[36].mxu1 %vm18625_vm12, %v16858_v51 }
 0xcbf   : > { %13790 = vmatpush3.bf16.msra.mxu1 %v16842_v17  ;;  %11549 = vmatprep.mubr.msk.f32.mxu1 %vm18928_vm13, %v18927_v43 }
 0xcc0   : > { %13791 = vmatprep.subr.bf16.mxu1 %v18919_v61 }
 0xcc3   : > { %13793 = vmatpush3.bf16.msra.mxu1 %v13777_v41 }
 0xcc4   : > { %13795 = vmatprep.subr.msk.bf16.mxu1 %vm18930_vm7, %v18807_v59 }
 0xcc6   : > { %11550 = vmatmul.mubr.msk.f32.vlgmr.msra.gmra.mrb[38].mxu1 %vm18625_vm12, %v4012_v4  ;;  %vm18936_vm12 = vnez %v18714_v36 }
 0xcc7   : > { %13797 = vmatpush3.bf16.msk.msra.mxu1 %vm18930_vm7, %v18807_v59  ;;  %11584 = vmatprep.mubr.f32.mxu1 %v4019_v8 }
 0xcc8   : > { %13799 = vmatprep.subr.msk.bf16.mxu1 %vm18931_vm0, %v18807_v59 }
 0xccb   : > { %13801 = vmatpush3.bf16.msk.msra.mxu1 %vm18931_vm0, %v18807_v59 }
 0xccc   : > { %13803 = vmatprep.subr.msk.bf16.mxu1 %vm18932_vm9, %v18807_v59 }
 0xccf   : > { %13805 = vmatpush3.bf16.msk.msra.mxu1 %vm18932_vm9, %v18807_v59 }
 0xcd0   : > { %13807 = vmatprep.subr.msk.bf16.mxu1 %vm18933_vm4, %v18807_v59 }
 0xcd3   : > { %13809 = vmatpush3.bf16.msk.msra.mxu1 %vm18933_vm4, %v18807_v59  ;;  %vm18938_vm4 = vnez %v18937_v55 }
 0xcd4   : > { %13811 = vmatprep.subr.msk.bf16.mxu1 %vm18934_vm15, %v18807_v59 }
 0xcd7   : > { %13813 = vmatpush3.bf16.msk.msra.mxu1 %vm18934_vm15, %v18807_v59 }
 0xcd8   : > { %13815 = vmatprep.subr.msk.bf16.mxu1 %vm18935_vm6, %v18807_v59 }
 0xcdb   : > { %13817 = vmatpush3.bf16.msk.msra.mxu1 %vm18935_vm6, %v18807_v59 }
 0xcdc   : > { %13819 = vmatprep.subr.msk.bf16.mxu1 %vm18936_vm12, %v18807_v59 }
 0xcdf   : > { %13821 = vmatpush3.bf16.msk.msra.mxu1 %vm18936_vm12, %v18807_v59 }
 0xce0   : > { %13823 = vmatprep.subr.msk.bf16.mxu1 %vm18938_vm4, %v18807_v59 }
 0xce3   : > { %13825 = vmatpush3.bf16.msk.msra.mxu1 %vm18938_vm4, %v18807_v59  ;;  %vm18939_vm4 = vcmp.lt.s32.totalorder %v14976_v2, 16 }
 0xce4   : > { %13856 = vmatprep.subr.bf16.mxu1 %v18919_v61 }
 0xce6   : > { %11585 = vmatmul.mubr.f32.vlgmr.msra.gmra.mrb[40].mxu1 %v16827_v52 }
 0xce7   : > { %13858 = vmatpush3.bf16.msk.msra.mxu1 %vm18875_vm11, %v18807_v59  ;;  %11665 = vmatprep.mubr.msk.f32.mxu1 %vm18928_vm13, %v18927_v43 }
 0xce8   : > { %13859 = vmatprep.subr.bf16.mxu1 %v18919_v61 }
 0xceb   : > { %13861 = vmatpush3.bf16.msk.msra.mxu1 %vm18876_vm1, %v18807_v59 }
 0xcec   : > { %13862 = vmatprep.subr.bf16.mxu1 %v18919_v61 }
 0xcef   : > { %13864 = vmatpush3.bf16.msk.msra.mxu1 %vm18877_vm10, %v18807_v59 }
 0xcf0   : > { %13865 = vmatprep.subr.bf16.mxu1 %v18919_v61 }
 0xcf3   : > { %13867 = vmatpush3.bf16.msk.msra.mxu1 %vm18878_vm5, %v18807_v59 }
 0xcf4   : > { %13868 = vmatprep.subr.bf16.mxu1 %v18919_v61 }
 0xcf7   : > { %13870 = vmatpush3.bf16.msk.msra.mxu1 %vm18879_vm2, %v18807_v59 }
 0xcf8   : > { %13871 = vmatprep.subr.bf16.mxu1 %v18919_v61 }
 0xcfb   : > { %13873 = vmatpush3.bf16.msk.msra.mxu1 %vm18880_vm8, %v18807_v59 }
 0xcfc   : > { %13874 = vmatprep.subr.bf16.mxu1 %v18919_v61 }
 0xcff   : > { %13876 = vmatpush3.bf16.msk.msra.mxu1 %vm18917_vm14, %v18807_v59 }
 0xd00   : > { %13877 = vmatprep.subr.bf16.mxu1 %v18919_v61 }
 0xd03   : > { %13879 = vmatpush3.bf16.msk.msra.mxu1 %vm18918_vm3, %v18807_v59 }
 0xd04   : > { %13904 = vmatprep.subr.bf16.mxu1 %v18919_v61 }
 0xd89   : > { %v16952_v40 = vpop.f32.mrb[34].mxu1 }
 0xd8a   : > { %v11529_v54 = vpop.f32.mrb[35].mxu1  ;;  %v4178_v4 = vadd.f32 %v16952_v40, %v16954_v5 }
 0xd91   : > { %v4251_v56 = vpop.f32.mrb[36].mxu1 }
 0xd92   : > { %v11540_v7 = vpop.f32.mrb[37].mxu1  ;;  %v4252_v24 = vadd.f32 %v4251_v56, %v16954_v5 }
 0xd99   : > { %v4322_v42 = vpop.f32.mrb[38].mxu1 }
 0xd9a   : > { %v4323_v39 = vadd.f32 %v4322_v42, %v16954_v5  ;;  %v11551_v52 = vpop.f32.mrb[39].mxu1 }
 0xd9c   : > { %v16959_v8 = vsel %vm18939_vm4, %v4323_v39, 0.0  ;;  %vm18940_vm4 = vcmask 261120  }
 0xd9d   : > { %v4484_v41 = vmul.f32 0.01, %v16959_v8  ;;  %vm4483_vm12 = vcmp.gt.f32.partialorder %v16959_v8, 0.0 }
 0xd9f   : > { %v16964_v10 = vsel %vm4483_vm12, %v16959_v8, %v4484_v41  ;;  %vm18941_vm12 = vcmp.lt.s32.totalorder %v14976_v2, 16 }
 0xda0   : > { %11666 = vmatmul.mubr.f32.vlgmr.msra.gmra.mrb[42].mxu1 %v16964_v10  ;;  %v17003_v47 = vsel %vm18941_vm12, %v4252_v24, 0.0 }
 0xda1   : > { %11717 = vmatprep.mubr.msk.f32.mxu1 %vm18928_vm13, %v18927_v43  ;;  %v4481_v25 = vmul.f32 0.01, %v17003_v47 }
 0xdb9   : > { %v11586_v11 = vpop.f32.mrb[40].mxu1 }
 0xdba   : > { %v4393_v20 = vpop.f32.mrb[41].mxu1 }
 0xdbb   : > { %v13827_v21 = vpack.c.bf16 %v11586_v11, %v4393_v20  ;;  %v17119_v20 = vld [vmem:[%s18411_s15] sm:$0xff] }
 0xdbd   : > { %13828 = vmatpush3.bf16.msra.mxu0 %v13827_v21 }
 0xdbe   : > { %13829 = vmatprep.subr.bf16.mxu0 %v18919_v61 }
 0xdc1   : > { %13831 = vmatpush3.bf16.msra.mxu0 %v16842_v17 }
 0xdc2   : > { %13832 = vmatprep.subr.bf16.mxu0 %v18919_v61 }
 0xdc4   : > { %11596 = vmatmul.mubr.msk.f32.vlgmr.msra.gmra.mrb[40].mxu0 %vm18940_vm4, %v16858_v51  ;;  %vm4480_vm4 = vcmp.gt.f32.partialorder %v17003_v47, 0.0 }
 0xdc5   : > { %13834 = vmatpush3.bf16.msk.msra.mxu0 %vm18875_vm11, %v18807_v59  ;;  %11630 = vmatprep.mubr.msk.f32.mxu0 %vm18928_vm13, %v18927_v43  ;;  %v17016_v32 = vsel %vm4480_vm4, %v17003_v47, %v4481_v25 }
 0xdc6   : > { %13835 = vmatprep.subr.bf16.mxu0 %v18919_v61  ;;  %v13911_v11 = vpack.c.bf16 %v16964_v10, %v17016_v32 }
 0xdc9   : > { %13837 = vmatpush3.bf16.msk.msra.mxu0 %vm18876_vm1, %v18807_v59 }
 0xdca   : > { %13838 = vmatprep.subr.bf16.mxu0 %v18919_v61 }
 0xdcd   : > { %13840 = vmatpush3.bf16.msk.msra.mxu0 %vm18877_vm10, %v18807_v59 }
 0xdce   : > { %13841 = vmatprep.subr.bf16.mxu0 %v18919_v61 }
 0xdd1   : > { %13843 = vmatpush3.bf16.msk.msra.mxu0 %vm18878_vm5, %v18807_v59 }
 0xdd2   : > { %13844 = vmatprep.subr.bf16.mxu0 %v18919_v61 }
 0xdd5   : > { %13846 = vmatpush3.bf16.msk.msra.mxu0 %vm18879_vm2, %v18807_v59 }
 0xdd6   : > { %13847 = vmatprep.subr.bf16.mxu0 %v18919_v61 }
 0xdd9   : > { %13849 = vmatpush3.bf16.msk.msra.mxu0 %vm18880_vm8, %v18807_v59 }
 0xdda   : > { %13850 = vmatprep.subr.bf16.mxu0 %v18919_v61 }
 0xddd   : > { %13852 = vmatpush3.bf16.msk.msra.mxu0 %vm18917_vm14, %v18807_v59 }
 0xdde   : > { %13853 = vmatprep.subr.bf16.mxu0 %v18919_v61 }
 0xde1   : > { %13855 = vmatpush3.bf16.msk.msra.mxu0 %vm18918_vm3, %v18807_v59 }
 0xde2   : > { %13880 = vmatprep.subr.bf16.mxu0 %v18919_v61 }
 0xde4   : > { %11631 = vmatmul.mubr.f32.vlgmr.msra.gmra.mrb[42].mxu0 %v17016_v32 }
 0xde5   : > { %13882 = vmatpush3.bf16.msk.msra.mxu0 %vm18875_vm11, %v18807_v59  ;;  %11700 = vmatprep.mubr.msk.f32.mxu0 %vm18928_vm13, %v18927_v43 }
 0xde6   : > { %13883 = vmatprep.subr.bf16.mxu0 %v18919_v61 }
 0xde9   : > { %13885 = vmatpush3.bf16.msk.msra.mxu0 %vm18876_vm1, %v18807_v59 }
 0xdea   : > { %13886 = vmatprep.subr.bf16.mxu0 %v18919_v61 }
 0xded   : > { %13888 = vmatpush3.bf16.msk.msra.mxu0 %vm18877_vm10, %v18807_v59 }
 0xdee   : > { %13889 = vmatprep.subr.bf16.mxu0 %v18919_v61 }
 0xdf1   : > { %13891 = vmatpush3.bf16.msk.msra.mxu0 %vm18878_vm5, %v18807_v59 }
 0xdf2   : > { %13892 = vmatprep.subr.bf16.mxu0 %v18919_v61 }
 0xdf5   : > { %13894 = vmatpush3.bf16.msk.msra.mxu0 %vm18879_vm2, %v18807_v59 }
 0xdf6   : > { %13895 = vmatprep.subr.bf16.mxu0 %v18919_v61 }
 0xdf9   : > { %13897 = vmatpush3.bf16.msk.msra.mxu0 %vm18880_vm8, %v18807_v59  ;;  %vm18945_vm8 = vnez %v18937_v55 }
 0xdfa   : > { %13898 = vmatprep.subr.bf16.mxu0 %v18919_v61 }
 0xdfd   : > { %13900 = vmatpush3.bf16.msk.msra.mxu0 %vm18917_vm14, %v18807_v59 }
 0xdfe   : > { %13901 = vmatprep.subr.bf16.mxu0 %v18919_v61 }
 0xe01   : > { %13903 = vmatpush3.bf16.msk.msra.mxu0 %vm18918_vm3, %v18807_v59  ;;  %vm18944_vm3 = vnez %v18714_v36 }
 0xe02   : > { %13913 = vmatprep.subr.bf16.mxu0 %v18919_v61 }
 0xe73   : > { %v4625_v28 = vpop.f32.mrb[42].mxu1 }
 0xe74   : > { %v11667_v29 = vpop.f32.mrb[43].mxu1 }
 0xe97   : > { %v4468_v63 = vpop.f32.mrb[40].mxu0 }
 0xe98   : > { %v4469_v3 = vadd.f32 %v4468_v63, %v16954_v5  ;;  %v11597_v17 = vpop.f32.mrb[41].mxu0 }
 0xe9a   : > { %v17056_v16 = vsel %vm18941_vm12, %v4469_v3, 0.0  ;;  %vm18942_vm12 = vnez %v18700_v26 }
 0xe9b   : > { %v4487_v1 = vmul.f32 0.01, %v17056_v16  ;;  %vm4486_vm4 = vcmp.gt.f32.partialorder %v17056_v16, 0.0 }
 0xe9d   : > { %v17061_v33 = vsel %vm4486_vm4, %v17056_v16, %v4487_v1  ;;  %vm18943_vm4 = vcmp.lt.s32.totalorder %v14976_v2, 16 }
 0xe9e   : > { %11701 = vmatmul.mubr.f32.vlgmr.msra.gmra.mrb[44].mxu0 %v17061_v33  ;;  %v17094_v51 = vsel %vm18943_vm4, %v4178_v4, 0.0  ;;  %v13944_v24 = vpack.c.bf16 %v17061_v33, %v16964_v10 }
 0xe9f   : > { %13915 = vmatpush3.bf16.msk.msra.mxu0 %vm18930_vm7, %v18807_v59  ;;  %11752 = vmatprep.mubr.msk.f32.mxu0 %vm18928_vm13, %v18927_v43  ;;  %v4478_v40 = vmul.f32 0.01, %v17094_v51  ;;  %vm4477_vm14 = vcmp.gt.f32.partialorder %v17094_v51, 0.0 }
 0xea0   : > { %13916 = vmatprep.subr.bf16.mxu0 %v18919_v61 }
 0xea1   : > { %v4479_v5 = vsel %vm4477_vm14, %v17094_v51, %v4478_v40  ;;  %vm18632_vm14 = vcmask 457728   ;;  %v18954_v40 = vld [vmem:[#allocation21_spill] sm:$0xff] }
 0xea2   : > { %v13941_v21 = vpack.c.bf16 %v17016_v32, %v4479_v5  ;;  %vm18955_vm5 = vnez %v18954_v40 }
 0xea3   : > { %13918 = vmatpush3.bf16.msk.msra.mxu0 %vm18931_vm0, %v18807_v59 }
 0xea4   : > { %13919 = vmatprep.subr.bf16.mxu0 %v18919_v61 }
 0xea7   : > { %13921 = vmatpush3.bf16.msk.msra.mxu0 %vm18932_vm9, %v18807_v59 }
 0xea8   : > { %13922 = vmatprep.subr.bf16.mxu0 %v18919_v61 }
 0xeab   : > { %13924 = vmatpush3.bf16.msk.msra.mxu0 %vm18942_vm12, %v18807_v59 }
 0xeac   : > { %13925 = vmatprep.subr.bf16.mxu0 %v18919_v61 }
 0xeaf   : > { %13927 = vmatpush3.bf16.msk.msra.mxu0 %vm18934_vm15, %v18807_v59 }
 0xeb0   : > { %13928 = vmatprep.subr.bf16.mxu0 %v18919_v61 }
 0xeb3   : > { %13930 = vmatpush3.bf16.msk.msra.mxu0 %vm18935_vm6, %v18807_v59 }
 0xeb4   : > { %13931 = vmatprep.subr.bf16.mxu0 %v18919_v61 }
 0xeb7   : > { %13933 = vmatpush3.bf16.msk.msra.mxu0 %vm18944_vm3, %v18807_v59  ;;  %v4555_v54 = vpop.f32.mrb[42].mxu0 }
 0xeb8   : > { %v13905_v56 = vpack.c.bf16 %v4625_v28, %v4555_v54  ;;  %v11632_v7 = vpop.f32.mrb[43].mxu0  ;;  %13934 = vmatprep.subr.bf16.mxu0 %v18919_v61 }
 0xeb9   : > { %v18950_v7 = vld [vmem:[#allocation19_spill] sm:$0xff] }
 0xeba   : > { %13906 = vmatpush3.bf16.msra.mxu1 %v13905_v56  ;;  %v18948_v56 = vld [vmem:[#allocation18_spill] sm:$0xff]  ;;  %vm18951_vm2 = vnez %v18950_v7 }
 0xebb   : > { %13936 = vmatpush3.bf16.msk.msra.mxu0 %vm18945_vm8, %v18807_v59  ;;  %13907 = vmatprep.subr.bf16.mxu1 %v18919_v61 }
 0xebc   : > { %13970 = vmatprep.subr.bf16.mxu0 %v18919_v61 }
 0xebe   : > { %11753 = vmatmul.mubr.f32.vlgmr.msra.gmra.mrb[46].mxu0 %v4479_v5 }
 0xebf   : > { %11821 = vmatprep.mubr.msk.f32.mxu0 %vm18928_vm13, %v18927_v43 }
 0xf71   : > { %v4695_v42 = vpop.f32.mrb[44].mxu0 }
 0xf72   : > { %v13908_v39 = vpack.c.bf16 %v4479_v5, %v4695_v42  ;;  %v13938_v52 = vpack.c.bf16 %v4695_v42, %v4625_v28  ;;  %v11702_v41 = vpop.f32.mrb[45].mxu0  ;;  %v18956_v5 = vld [vmem:[#allocation22_spill] sm:$0xff]  ;;  %v18958_v42 = vld [vmem:[#allocation23_spill] sm:$0xff] }
 0xf74   : > { %13909 = vmatpush3.bf16.msra.mxu1 %v13908_v39  ;;  %13972 = vmatpush3.bf16.msra.mxu0 %v13908_v39  ;;  %v18960_v39 = vld [vmem:[#allocation24_spill] sm:$0xff] }
 0xf75   : > { %13910 = vmatprep.subr.bf16.mxu1 %v18919_v61  ;;  %13973 = vmatprep.subr.bf16.mxu0 %v18919_v61 }
 0xf78   : > { %13912 = vmatpush3.bf16.msra.mxu1 %v13911_v11  ;;  %13975 = vmatpush3.bf16.msra.mxu0 %v13911_v11  ;;  %v4702_v11 = vpop.permute.xlu1 %4701 }
 0xf79   : > { %11715 = vmatprep.subr.mxu1 %v18927_v43  ;;  %13976 = vmatprep.subr.bf16.mxu0 %v18919_v61 }
 0xf7c   : > { %11716 = vmatpush3.msra.mxu1 %v17061_v33 }
 0xf7d   : > { %11718 = vmatmul.mubr.msk.f32.vlgmr.msra.gmra.mrb[44].mxu1 %vm18632_vm14, %v17119_v20  ;;  %13937 = vmatprep.subr.bf16.mxu1 %v18919_v61 }
 0xf7e   : > { %13939 = vmatpush3.bf16.msra.mxu1 %v13938_v52  ;;  %11769 = vmatprep.mubr.msk.f32.mxu1 %vm18928_vm13, %v18927_v43 }
 0xf7f   : > { %13940 = vmatprep.subr.bf16.mxu1 %v18919_v61 }
 0xf82   : > { %13942 = vmatpush3.bf16.msra.mxu1 %v13941_v21 }
 0xf83   : > { %13943 = vmatprep.subr.bf16.mxu1 %v18919_v61 }
 0xf86   : > { %13945 = vmatpush3.bf16.msra.mxu1 %v13944_v24 }
 0xf87   : > { %11767 = vmatprep.subr.mxu1 %v18927_v43 }
 0xf91   : > { %v4845_v25 = vpop.f32.mrb[46].mxu0 }
 0xf92   : > { %v13977_v28 = vpack.c.bf16 %v4845_v25, %v17061_v33  ;;  %v11754_v29 = vpop.f32.mrb[47].mxu0  ;;  %11768 = vmatpush3.msra.mxu1 %v4845_v25 }
 0xf93   : > { %11770 = vmatmul.mubr.msk.f32.vlgmr.msra.gmra.mrb[46].mxu1 %vm18632_vm14, %v17119_v20  ;;  %13946 = vmatprep.subr.bf16.mxu1 %v18919_v61 }
 0xf94   : > { %13948 = vmatpush3.bf16.msk.msra.mxu1 %vm18930_vm7, %v18807_v59  ;;  %13978 = vmatpush3.bf16.msra.mxu0 %v13977_v28 }
 0xf95   : > { %13949 = vmatprep.subr.bf16.mxu1 %v18919_v61  ;;  %11804 = vmatprep.mubr.msk.f32.mxu1 %vm18928_vm13, %v18927_v43 }
 0xf96   : > { %11819 = vmatprep.subr.mxu0 %v18927_v43 }
 0xf98   : > { %13951 = vmatpush3.bf16.msk.msra.mxu1 %vm18931_vm0, %v18807_v59 }
 0xf99   : > { %13952 = vmatprep.subr.bf16.mxu1 %v18919_v61 }
 0xf9c   : > { %13954 = vmatpush3.bf16.msk.msra.mxu1 %vm18932_vm9, %v18807_v59 }
 0xf9d   : > { %13955 = vmatprep.subr.bf16.mxu1 %v18919_v61 }
 0xfa0   : > { %13957 = vmatpush3.bf16.msk.msra.mxu1 %vm18942_vm12, %v18807_v59 }
 0xfa1   : > { %13958 = vmatprep.subr.bf16.mxu1 %v18919_v61 }
 0xfa4   : > { %13960 = vmatpush3.bf16.msk.msra.mxu1 %vm18934_vm15, %v18807_v59 }
 0xfa5   : > { %13961 = vmatprep.subr.bf16.mxu1 %v18919_v61 }
 0xfa8   : > { %13963 = vmatpush3.bf16.msk.msra.mxu1 %vm18935_vm6, %v18807_v59 }
 0xfa9   : > { %13964 = vmatprep.subr.bf16.mxu1 %v18919_v61 }
 0xfac   : > { %13966 = vmatpush3.bf16.msk.msra.mxu1 %vm18944_vm3, %v18807_v59 }
 0xfad   : > { %13967 = vmatprep.subr.bf16.mxu1 %v18919_v61 }
 0xfb0   : > { %13969 = vmatpush3.bf16.msk.msra.mxu1 %vm18945_vm8, %v18807_v59 }
 0xfb1   : > { %14003 = vmatprep.subr.bf16.mxu1 %v18919_v61 }
 0xfb3   : > { %11805 = vmatmul.mubr.f32.vlgmr.msra.gmra.mrb[48].mxu1 %v17016_v32  ;;  %v18946_v32 = vld [vmem:[#allocation17_spill] sm:$0xff] }
 0xfb4   : > { %14005 = vmatpush3.bf16.msra.mxu1 %v13941_v21  ;;  %11873 = vmatprep.mubr.msk.f32.mxu1 %vm18928_vm13, %v18927_v43  ;;  %vm18947_vm4 = vnez %v18946_v32 }
 0xfb5   : > { %14006 = vmatprep.subr.bf16.mxu1 %v18919_v61 }
 0xfb8   : > { %14008 = vmatpush3.bf16.msra.mxu1 %v13944_v24 }
 0xfb9   : > { %14009 = vmatprep.subr.bf16.mxu1 %v18919_v61 }
0x1050   : > { %v4774_v63 = vpop.f32.mrb[44].mxu1 }
0x1051   : > { %v11719_v3 = vpop.f32.mrb[45].mxu1  ;;  %v4775_v21 = vadd.f32 %v4774_v63, %v4702_v11 }
0x1066   : > { %v4915_v17 = vpop.f32.mrb[46].mxu1 }
0x1067   : > { %v11771_v1 = vpop.f32.mrb[47].mxu1 }
0x1086   : > { %v4986_v33 = vpop.f32.mrb[48].mxu1 }
0x1087   : > { %v14010_v4 = vpack.c.bf16 %v4986_v33, %v4845_v25  ;;  %v11806_v54 = vpop.f32.mrb[49].mxu1  ;;  %11820 = vmatpush3.msra.mxu0 %v4986_v33  ;;  %v4916_v25 = vadd.f32 %v4915_v17, %v4702_v11 }
0x1088   : > { %11822 = vmatmul.mubr.msk.f32.vlgmr.msra.gmra.mrb[48].mxu0 %vm18632_vm14, %v17119_v20  ;;  %13979 = vmatprep.subr.bf16.mxu0 %v18919_v61  ;;  %vm18949_vm14 = vnez %v18948_v56  ;;  %v4475_v54 = vld [vmem:[%s18413_s17] sm:$0xff] }
0x1089   : > { %13981 = vmatpush3.bf16.msk.msra.mxu0 %vm18930_vm7, %v18807_v59  ;;  %14011 = vmatpush3.bf16.msra.mxu1 %v14010_v4 }
0x108a   : > { %13982 = vmatprep.subr.bf16.mxu0 %v18919_v61  ;;  %11856 = vmatprep.mubr.msk.f32.mxu0 %vm18928_vm13, %v18927_v43 }
0x108b   : > { %11871 = vmatprep.subr.mxu1 %v18927_v43 }
0x108d   : > { %13984 = vmatpush3.bf16.msk.msra.mxu0 %vm18931_vm0, %v18807_v59 }
0x108e   : > { %13985 = vmatprep.subr.bf16.mxu0 %v18919_v61 }
0x1091   : > { %13987 = vmatpush3.bf16.msk.msra.mxu0 %vm18932_vm9, %v18807_v59 }
0x1092   : > { %13988 = vmatprep.subr.bf16.mxu0 %v18919_v61 }
0x1095   : > { %13990 = vmatpush3.bf16.msk.msra.mxu0 %vm18942_vm12, %v18807_v59 }
0x1096   : > { %13991 = vmatprep.subr.bf16.mxu0 %v18919_v61 }
0x1099   : > { %13993 = vmatpush3.bf16.msk.msra.mxu0 %vm18934_vm15, %v18807_v59 }
0x109a   : > { %13994 = vmatprep.subr.bf16.mxu0 %v18919_v61 }
0x109d   : > { %13996 = vmatpush3.bf16.msk.msra.mxu0 %vm18935_vm6, %v18807_v59 }
0x109e   : > { %13997 = vmatprep.subr.bf16.mxu0 %v18919_v61 }
0x10a1   : > { %13999 = vmatpush3.bf16.msk.msra.mxu0 %vm18944_vm3, %v18807_v59 }
0x10a2   : > { %14000 = vmatprep.subr.bf16.mxu0 %v18919_v61 }
0x10a5   : > { %14002 = vmatpush3.bf16.msk.msra.mxu0 %vm18945_vm8, %v18807_v59 }
0x10a6   : > { %14036 = vmatprep.subr.bf16.mxu0 %v18919_v61 }
0x10a8   : > { %11857 = vmatmul.mubr.f32.vlgmr.msra.gmra.mrb[50].mxu0 %v16964_v10  ;;  %v18952_v10 = vld [vmem:[#allocation20_spill] sm:$0xff] }
0x10a9   : > { %14038 = vmatpush3.bf16.msk.msra.mxu0 %vm18947_vm4, %v18807_v59  ;;  %11963 = vmatprep.mubr.msk.f32.mxu0 %vm18928_vm13, %v18927_v43  ;;  %vm18953_vm4 = vnez %v18952_v10 }
0x10aa   : > { %14039 = vmatprep.subr.bf16.mxu0 %v18919_v61 }
0x10ad   : > { %14041 = vmatpush3.bf16.msk.msra.mxu0 %vm18949_vm14, %v18807_v59  ;;  %vm18957_vm14 = vnez %v18956_v5 }
0x10ae   : > { %14042 = vmatprep.subr.bf16.mxu0 %v18919_v61 }
0x10b1   : > { %14044 = vmatpush3.bf16.msk.msra.mxu0 %vm18951_vm2, %v18807_v59  ;;  %vm18959_vm2 = vnez %v18958_v42 }
0x10b2   : > { %14045 = vmatprep.subr.bf16.mxu0 %v18919_v61 }
0x10b5   : > { %14047 = vmatpush3.bf16.msk.msra.mxu0 %vm18953_vm4, %v18807_v59  ;;  %vm18961_vm4 = vnez %v18960_v39 }
0x10b6   : > { %14048 = vmatprep.subr.bf16.mxu0 %v18919_v61 }
0x10b9   : > { %14050 = vmatpush3.bf16.msk.msra.mxu0 %vm18955_vm5, %v18807_v59 }
0x10ba   : > { %14051 = vmatprep.subr.bf16.mxu0 %v18919_v61 }
0x10bd   : > { %14053 = vmatpush3.bf16.msk.msra.mxu0 %vm18957_vm14, %v18807_v59  ;;  %vm18962_vm14 = vcmp.lt.s32.totalorder %v14976_v2, 16 }
0x10be   : > { %14054 = vmatprep.subr.bf16.mxu0 %v18919_v61  ;;  %v4778_v24 = vsel %vm18962_vm14, %v4775_v21, 0.0 }
0x10bf   : > { %v5203_v28 = vmul.f32 0.01, %v4778_v24  ;;  %vm5202_vm5 = vcmp.gt.f32.partialorder %v4778_v24, 0.0 }
0x10c1   : > { %14056 = vmatpush3.bf16.msk.msra.mxu0 %vm18959_vm2, %v18807_v59  ;;  %vm18963_vm2 = vmmov %vm18962_vm14  ;;  %v5204_v63 = vsel %vm5202_vm5, %v4778_v24, %v5203_v28 }
0x10c2   : > { %14057 = vmatprep.subr.bf16.mxu0 %v18919_v61  ;;  %v4919_v29 = vsel %vm18963_vm2, %v4916_v25, 0.0  ;;  %vm18965_vm14 = vmmov %vm18963_vm2  ;;  %vm18636_vm2 = vcmask 64512  }
0x10c3   : > { %v5206_v4 = vmul.f32 0.01, %v4919_v29  ;;  %vm5205_vm10 = vcmp.gt.f32.partialorder %v4919_v29, 0.0 }
0x10c5   : > { %14059 = vmatpush3.bf16.msk.msra.mxu0 %vm18961_vm4, %v18807_v59  ;;  %vm18964_vm4 = vcmask 457728  }
0x10c6   : > { %14084 = vmatprep.subr.bf16.mxu0 %v18919_v61 }
0x115b   : > { %v5056_v52 = vpop.f32.mrb[48].mxu0 }
0x115c   : > { %v11823_v41 = vpop.f32.mrb[49].mxu0  ;;  %v5057_v3 = vadd.f32 %v5056_v52, %v4702_v11 }
0x115e   : > { %v5060_v17 = vsel %vm18965_vm14, %v5057_v3, 0.0 }
0x115f   : > { %v5209_v52 = vmul.f32 0.01, %v5060_v17  ;;  %vm5208_vm5 = vcmp.gt.f32.partialorder %v5060_v17, 0.0 }
0x1161   : > { %v5210_v41 = vsel %vm5208_vm5, %v5060_v17, %v5209_v52  ;;  %vm18968_vm5 = vnez %v18809_v60 }
0x117b   : > { %v5127_v1 = vpop.f32.mrb[50].mxu0 }
0x117c   : > { %v11858_v33 = vpop.f32.mrb[51].mxu0  ;;  %11872 = vmatpush3.msra.mxu1 %v5127_v1 }
0x117d   : > { %11874 = vmatmul.mubr.msk.f32.vlgmr.msra.gmra.mrb[50].mxu1 %vm18964_vm4, %v17119_v20  ;;  %11876 = vmatprep.subr.mxu1 %v18927_v43  ;;  %v5207_v20 = vsel %vm5205_vm10, %v4919_v29, %v5206_v4  ;;  %vm18966_vm10 = vmmov %vm18965_vm14  ;;  %vm18967_vm14 = vnez %v18806_v62 }
0x117e   : > { %11877 = vmatpush3.msra.mxu1 %v5204_v63  ;;  %11878 = vmatprep.mubr.msk.f32.mxu1 %vm18928_vm13, %v18927_v43 }
0x117f   : > { %11881 = vmatprep.subr.mxu1 %v18927_v43 }
0x1181   : > { %11879 = vmatmul.mubr.msk.f32.vlgmr.msra.gmra.mrb[52].mxu1 %vm18636_vm2, %v4475_v54 }
0x1182   : > { %11882 = vmatpush3.msra.mxu1 %v5207_v20  ;;  %11883 = vmatprep.mubr.msk.f32.mxu1 %vm18928_vm13, %v18927_v43 }
0x1183   : > { %11886 = vmatprep.subr.mxu1 %v18927_v43 }
0x1185   : > { %11884 = vmatmul.mubr.msk.f32.vlgmr.msra.gmra.mrb[54].mxu1 %vm18636_vm2, %v4475_v54 }
0x1186   : > { %11887 = vmatpush3.msra.mxu1 %v5210_v41  ;;  %11888 = vmatprep.mubr.msk.f32.mxu1 %vm18928_vm13, %v18927_v43 }
0x1187   : > { %11891 = vmatprep.subr.mxu1 %v18927_v43 }
0x1189   : > { %11889 = vmatmul.mubr.msk.f32.vlgmr.msra.gmra.mrb[56].mxu1 %vm18636_vm2, %v4475_v54 }
0x118a   : > { %11893 = vmatprep.mubr.msk.f32.mxu1 %vm18928_vm13, %v18927_v43 }
0x1250   : > { %v5197_v21 = vpop.f32.mrb[50].mxu1 }
0x1251   : > { %v5198_v24 = vadd.f32 %v5197_v21, %v4702_v11  ;;  %v11875_v25 = vpop.f32.mrb[51].mxu1  ;;  %v17290_v11 = vpop.permute.xlu0 %5216 }
0x1253   : > { %v5201_v28 = vsel %vm18966_vm10, %v5198_v24, 0.0 }
0x1254   : > { %vm5211_vm4 = vcmp.gt.f32.partialorder %v5201_v28, 0.0  ;;  %v5212_v29 = vmul.f32 0.01, %v5201_v28  ;;  %v17278_v3 = vpop.f32.mrb[52].mxu1 }
0x1255   : > { %v11880_v1 = vpop.f32.mrb[53].mxu1 }
0x1256   : > { %v5213_v33 = vsel %vm5211_vm4, %v5201_v28, %v5212_v29  ;;  %vm18969_vm4 = vnez %v18812_v53 }
0x1257   : > { %11892 = vmatpush3.msra.mxu1 %v5213_v33 }
0x1258   : > { %v17280_v4 = vpop.f32.mrb[54].mxu1  ;;  %11894 = vmatmul.mubr.msk.f32.vlgmr.msra.gmra.mrb[58].mxu1 %vm18636_vm2, %v4475_v54  ;;  %14012 = vmatprep.subr.bf16.mxu1 %v18919_v61  ;;  %vm18980_vm2 = vnez %v18707_v31 }
0x1259   : > { %v11885_v63 = vpop.f32.mrb[55].mxu1  ;;  %14014 = vmatpush3.bf16.msk.msra.mxu1 %vm18967_vm14, %v18807_v59  ;;  %11928 = vmatprep.mubr.msk.f32.mxu1 %vm18928_vm13, %v18927_v43  ;;  %v5361_v24 = vadd.f32 %v17280_v4, %v17290_v11  ;;  %v5290_v4 = vadd.f32 %v17278_v3, %v17290_v11 }
0x125a   : > { %14015 = vmatprep.subr.bf16.mxu1 %v18919_v61 }
0x125c   : > { %v5431_v17 = vpop.f32.mrb[56].mxu1 }
0x125d   : > { %v5432_v52 = vadd.f32 %v5431_v17, %v17290_v11  ;;  %14017 = vmatpush3.bf16.msk.msra.mxu1 %vm18968_vm5, %v18807_v59  ;;  %v11890_v54 = vpop.f32.mrb[57].mxu1  ;;  %vm18970_vm5 = vnez %v18814_v49 }
0x125e   : > { %14018 = vmatprep.subr.bf16.mxu1 %v18919_v61 }
0x125f   : > { %v5435_v62 = vsel %vm18966_vm10, %v5432_v52, 0.0  ;;  %vm18971_vm10 = vnez %v18816_v58 }
0x1260   : > { %v17300_v20 = vadd.f32 %v5435_v62, %v16959_v8 }
0x1261   : > { %14020 = vmatpush3.bf16.msk.msra.mxu1 %vm18969_vm4, %v18807_v59  ;;  %vm18972_vm4 = vnez %v18818_v0 }
0x1262   : > { %vm5521_vm14 = vcmp.gt.f32.partialorder %v17300_v20, 0.0  ;;  %v5522_v41 = vmul.f32 0.01, %v17300_v20  ;;  %14021 = vmatprep.subr.bf16.mxu1 %v18919_v61 }
0x1264   : > { %v17309_v60 = vsel %vm5521_vm14, %v17300_v20, %v5522_v41  ;;  %vm18973_vm14 = vnez %v18820_v6 }
0x1265   : > { %11964 = vmatmul.mubr.f32.vlgmr.msra.gmra.mrb[52].mxu0 %v17309_v60  ;;  %14023 = vmatpush3.bf16.msk.msra.mxu1 %vm18970_vm5, %v18807_v59  ;;  %vm18974_vm5 = vnez %v18894_v44 }
0x1266   : > { %14086 = vmatpush3.bf16.msk.msra.mxu0 %vm18930_vm7, %v18807_v59  ;;  %12033 = vmatprep.mubr.msk.f32.mxu0 %vm18928_vm13, %v18927_v43 }
0x1267   : > { %14087 = vmatprep.subr.bf16.mxu0 %v18919_v61  ;;  %14024 = vmatprep.subr.bf16.mxu1 %v18919_v61 }
0x1269   : > { %14026 = vmatpush3.bf16.msk.msra.mxu1 %vm18971_vm10, %v18807_v59  ;;  %vm18975_vm10 = vcmp.lt.s32.totalorder %v14976_v2, 16 }
0x126a   : > { %14089 = vmatpush3.bf16.msk.msra.mxu0 %vm18931_vm0, %v18807_v59  ;;  %14027 = vmatprep.subr.bf16.mxu1 %v18919_v61 }
0x126b   : > { %14090 = vmatprep.subr.bf16.mxu0 %v18919_v61 }
0x126d   : > { %14029 = vmatpush3.bf16.msk.msra.mxu1 %vm18972_vm4, %v18807_v59 }
0x126e   : > { %14092 = vmatpush3.bf16.msk.msra.mxu0 %vm18932_vm9, %v18807_v59  ;;  %14030 = vmatprep.subr.bf16.mxu1 %v18919_v61 }
0x126f   : > { %14093 = vmatprep.subr.bf16.mxu0 %v18919_v61 }
0x1271   : > { %14032 = vmatpush3.bf16.msk.msra.mxu1 %vm18973_vm14, %v18807_v59  ;;  %vm18976_vm14 = vnez %v18694_v19 }
0x1272   : > { %14095 = vmatpush3.bf16.msk.msra.mxu0 %vm18942_vm12, %v18807_v59  ;;  %14033 = vmatprep.subr.bf16.mxu1 %v18919_v61 }
0x1273   : > { %14096 = vmatprep.subr.bf16.mxu0 %v18919_v61 }
0x1275   : > { %14035 = vmatpush3.bf16.msk.msra.mxu1 %vm18974_vm5, %v18807_v59  ;;  %vm18977_vm5 = vnez %v18698_v23 }
0x1276   : > { %14098 = vmatpush3.bf16.msk.msra.mxu0 %vm18934_vm15, %v18807_v59  ;;  %14060 = vmatprep.subr.bf16.mxu1 %v18919_v61 }
0x1277   : > { %14099 = vmatprep.subr.bf16.mxu0 %v18919_v61 }
0x127a   : > { %14101 = vmatpush3.bf16.msk.msra.mxu0 %vm18935_vm6, %v18807_v59 }
0x127b   : > { %14102 = vmatprep.subr.bf16.mxu0 %v18919_v61 }
0x127e   : > { %14104 = vmatpush3.bf16.msk.msra.mxu0 %vm18944_vm3, %v18807_v59 }
0x127f   : > { %14105 = vmatprep.subr.bf16.mxu0 %v18919_v61 }
0x1282   : > { %14107 = vmatpush3.bf16.msk.msra.mxu0 %vm18945_vm8, %v18807_v59 }
0x1283   : > { %14132 = vmatprep.subr.bf16.mxu0 %v18919_v61 }
0x1285   : > { %12034 = vmatmul.mubr.f32.vlgmr.msra.gmra.mrb[54].mxu0 %v17309_v60 }
0x1286   : > { %12085 = vmatprep.mubr.msk.f32.mxu0 %vm18928_vm13, %v18927_v43 }
0x132b   : > { %v5502_v53 = vpop.f32.mrb[58].mxu1 }
0x132c   : > { %v5503_v49 = vadd.f32 %v5502_v53, %v17290_v11  ;;  %v11895_v58 = vpop.f32.mrb[59].mxu1 }
0x132e   : > { %v5506_v0 = vsel %vm18975_vm10, %v5503_v49, 0.0  ;;  %vm18978_vm10 = vnez %v18702_v27 }
0x132f   : > { %v17373_v6 = vadd.f32 %v5506_v0, %v17056_v16  ;;  %v19018_v0 = vld [vmem:[#allocation34_spill] sm:$0xff] }
0x1331   : > { %vm5524_vm4 = vcmp.gt.f32.partialorder %v17373_v6, 0.0  ;;  %v5525_v44 = vmul.f32 0.01, %v17373_v6 }
0x1333   : > { %v17378_v8 = vsel %vm5524_vm4, %v17373_v6, %v5525_v44  ;;  %vm18979_vm4 = vcmp.lt.s32.totalorder %v14976_v2, 16  ;;  %v19020_v44 = vld [vmem:[#allocation35_spill] sm:$0xff] }
0x1334   : > { %11929 = vmatmul.mubr.f32.vlgmr.msra.gmra.mrb[60].mxu1 %v17378_v8  ;;  %v5364_v25 = vsel %vm18979_vm4, %v5361_v24, 0.0  ;;  %vm18982_vm4 = vnez %v18717_v37  ;;  %v19024_v24 = vld [vmem:[#allocation37_spill] sm:$0xff] }
0x1335   : > { %14062 = vmatpush3.bf16.msk.msra.mxu1 %vm18875_vm11, %v18807_v59  ;;  %11998 = vmatprep.mubr.msk.f32.mxu1 %vm18928_vm13, %v18927_v43  ;;  %v17414_v28 = vadd.f32 %v5364_v25, %v17003_v47  ;;  %vm18989_vm11 = vnez %v18908_v48  ;;  %v19026_v25 = vld [vmem:[#allocation38_spill] sm:$0xff] }
0x1336   : > { %14063 = vmatprep.subr.bf16.mxu1 %v18919_v61 }
0x1337   : > { %v5519_v29 = vmul.f32 0.01, %v17414_v28 }
0x1338   : > { %v17387_v16 = vpop.f32.mrb[52].mxu0 }
0x1339   : > { %14065 = vmatpush3.bf16.msk.msra.mxu1 %vm18876_vm1, %v18807_v59  ;;  %v11965_v21 = vpop.f32.mrb[53].mxu0  ;;  %vm18988_vm1 = vnez %v18906_v9 }
0x133a   : > { %14066 = vmatprep.subr.bf16.mxu1 %v18919_v61  ;;  %v19022_v21 = vld [vmem:[#allocation36_spill] sm:$0xff] }
0x133d   : > { %14068 = vmatpush3.bf16.msk.msra.mxu1 %vm18976_vm14, %v18807_v59  ;;  %vm18987_vm14 = vnez %v18904_v45 }
0x133e   : > { %14069 = vmatprep.subr.bf16.mxu1 %v18919_v61 }
0x1341   : > { %14071 = vmatpush3.bf16.msk.msra.mxu1 %vm18977_vm5, %v18807_v59  ;;  %vm18981_vm5 = vnez %v18712_v35 }
0x1342   : > { %14072 = vmatprep.subr.bf16.mxu1 %v18919_v61 }
0x1345   : > { %14074 = vmatpush3.bf16.msk.msra.mxu1 %vm18978_vm10, %v18807_v59  ;;  %vm5518_vm10 = vcmp.gt.f32.partialorder %v17414_v28, 0.0 }
0x1346   : > { %14075 = vmatprep.subr.bf16.mxu1 %v18919_v61  ;;  %v17427_v1 = vsel %vm5518_vm10, %v17414_v28, %v5519_v29  ;;  %vm18985_vm10 = vnez %v18900_v50  ;;  %v17726_v29 = vld [vmem:[%s18415_s19] sm:$0xff] }
0x1349   : > { %14077 = vmatpush3.bf16.msk.msra.mxu1 %vm18980_vm2, %v18807_v59  ;;  %vm18986_vm2 = vnez %v18902_v13 }
0x134a   : > { %14078 = vmatprep.subr.bf16.mxu1 %v18919_v61 }
0x134d   : > { %14080 = vmatpush3.bf16.msk.msra.mxu1 %vm18981_vm5, %v18807_v59  ;;  %vm18983_vm5 = vnez %v18896_v57 }
0x134e   : > { %14081 = vmatprep.subr.bf16.mxu1 %v18919_v61 }
0x1351   : > { %14083 = vmatpush3.bf16.msk.msra.mxu1 %vm18982_vm4, %v18807_v59  ;;  %vm18984_vm4 = vnez %v18898_v46 }
0x1352   : > { %14108 = vmatprep.subr.bf16.mxu1 %v18919_v61 }
0x1354   : > { %11999 = vmatmul.mubr.f32.vlgmr.msra.gmra.mrb[62].mxu1 %v17427_v1 }
0x1355   : > { %14110 = vmatpush3.bf16.msk.msra.mxu1 %vm18983_vm5, %v18807_v59  ;;  %12068 = vmatprep.mubr.msk.f32.mxu1 %vm18928_vm13, %v18927_v43 }
0x1356   : > { %14111 = vmatprep.subr.bf16.mxu1 %v18919_v61 }
0x1358   : > { %v17436_v47 = vpop.f32.mrb[54].mxu0 }
0x1359   : > { %v12035_v33 = vpop.f32.mrb[55].mxu0  ;;  %14113 = vmatpush3.bf16.msk.msra.mxu1 %vm18984_vm4, %v18807_v59  ;;  %v14139_v58 = vpack.c.bf16 %v17436_v47, %v17378_v8 }
0x135a   : > { %14114 = vmatprep.subr.bf16.mxu1 %v18919_v61 }
0x135d   : > { %14116 = vmatpush3.bf16.msk.msra.mxu1 %vm18985_vm10, %v18807_v59 }
0x135e   : > { %14117 = vmatprep.subr.bf16.mxu1 %v18919_v61 }
0x1361   : > { %14119 = vmatpush3.bf16.msk.msra.mxu1 %vm18986_vm2, %v18807_v59  ;;  %vm18990_vm2 = vnez %v18910_v38 }
0x1362   : > { %14120 = vmatprep.subr.bf16.mxu1 %v18919_v61 }
0x1365   : > { %14122 = vmatpush3.bf16.msk.msra.mxu1 %vm18987_vm14, %v18807_v59  ;;  %vm18991_vm14 = vnez %v18946_v32 }
0x1366   : > { %14123 = vmatprep.subr.bf16.mxu1 %v18919_v61 }
0x1369   : > { %14125 = vmatpush3.bf16.msk.msra.mxu1 %vm18988_vm1, %v18807_v59  ;;  %vm18995_vm1 = vnez %v18954_v40 }
0x136a   : > { %14126 = vmatprep.subr.bf16.mxu1 %v18919_v61 }
0x136d   : > { %14128 = vmatpush3.bf16.msk.msra.mxu1 %vm18989_vm11, %v18807_v59  ;;  %vm18992_vm11 = vnez %v18948_v56 }
0x136e   : > { %14129 = vmatprep.subr.bf16.mxu1 %v18919_v61 }
0x1371   : > { %14131 = vmatpush3.bf16.msk.msra.mxu1 %vm18990_vm2, %v18807_v59  ;;  %vm18993_vm2 = vnez %v18950_v7 }
0x1372   : > { %14165 = vmatprep.subr.bf16.mxu1 %v18919_v61 }
0x1374   : > { %12069 = vmatmul.mubr.f32.vlgmr.msra.gmra.mrb[64].mxu1 %v17427_v1 }
0x1375   : > { %14167 = vmatpush3.bf16.msk.msra.mxu1 %vm18991_vm14, %v18807_v59  ;;  %12155 = vmatprep.mubr.msk.f32.mxu1 %vm18928_vm13, %v18927_v43  ;;  %vm18994_vm14 = vnez %v18952_v10 }
0x1376   : > { %14168 = vmatprep.subr.bf16.mxu1 %v18919_v61 }
0x1379   : > { %14170 = vmatpush3.bf16.msk.msra.mxu1 %vm18992_vm11, %v18807_v59  ;;  %vm18996_vm11 = vnez %v18956_v5 }
0x137a   : > { %14171 = vmatprep.subr.bf16.mxu1 %v18919_v61 }
0x137d   : > { %14173 = vmatpush3.bf16.msk.msra.mxu1 %vm18993_vm2, %v18807_v59  ;;  %vm18997_vm2 = vnez %v18958_v42 }
0x137e   : > { %14174 = vmatprep.subr.bf16.mxu1 %v18919_v61 }
0x1381   : > { %14176 = vmatpush3.bf16.msk.msra.mxu1 %vm18994_vm14, %v18807_v59  ;;  %vm18998_vm14 = vnez %v18960_v39 }
0x1382   : > { %14177 = vmatprep.subr.bf16.mxu1 %v18919_v61 }
0x1385   : > { %14179 = vmatpush3.bf16.msk.msra.mxu1 %vm18995_vm1, %v18807_v59  ;;  %vm19003_vm1 = vnez %v18908_v48 }
0x1386   : > { %14180 = vmatprep.subr.bf16.mxu1 %v18919_v61 }
0x1389   : > { %14182 = vmatpush3.bf16.msk.msra.mxu1 %vm18996_vm11, %v18807_v59  ;;  %vm19002_vm11 = vnez %v18906_v9 }
0x138a   : > { %14183 = vmatprep.subr.bf16.mxu1 %v18919_v61 }
0x138d   : > { %14185 = vmatpush3.bf16.msk.msra.mxu1 %vm18997_vm2, %v18807_v59 }
0x138e   : > { %14186 = vmatprep.subr.bf16.mxu1 %v18919_v61 }
0x1391   : > { %14188 = vmatpush3.bf16.msk.msra.mxu1 %vm18998_vm14, %v18807_v59  ;;  %vm18999_vm14 = vcmp.lt.s32.totalorder %v14976_v2, 16 }
0x1392   : > { %14213 = vmatprep.subr.bf16.mxu1 %v18919_v61  ;;  %v5293_v63 = vsel %vm18999_vm14, %v5290_v4, 0.0  ;;  %vm19001_vm14 = vnez %v18904_v45 }
0x1393   : > { %v17533_v17 = vadd.f32 %v5293_v63, %v17094_v51 }
0x1394   : > { %12156 = vmatmul.mubr.f32.vlgmr.msra.gmra.mrb[66].mxu1 %v17378_v8 }
0x1395   : > { %14215 = vmatpush3.bf16.msk.msra.mxu1 %vm18930_vm7, %v18807_v59  ;;  %12225 = vmatprep.mubr.msk.f32.mxu1 %vm18928_vm13, %v18927_v43  ;;  %v5516_v3 = vmul.f32 0.01, %v17533_v17  ;;  %vm5515_vm2 = vcmp.gt.f32.partialorder %v17533_v17, 0.0 }
0x1396   : > { %14216 = vmatprep.subr.bf16.mxu1 %v18919_v61 }
0x1397   : > { %v17546_v11 = vsel %vm5515_vm2, %v17533_v17, %v5516_v3  ;;  %vm19000_vm2 = vnez %v18902_v13  ;;  %v19029_v3 = vld [vmem:[#allocation39_spill] sm:$0xff] }
0x1399   : > { %14218 = vmatpush3.bf16.msk.msra.mxu1 %vm18931_vm0, %v18807_v59 }
0x139a   : > { %14219 = vmatprep.subr.bf16.mxu1 %v18919_v61 }
0x139d   : > { %14221 = vmatpush3.bf16.msk.msra.mxu1 %vm18932_vm9, %v18807_v59 }
0x139e   : > { %14222 = vmatprep.subr.bf16.mxu1 %v18919_v61 }
0x13a1   : > { %14224 = vmatpush3.bf16.msk.msra.mxu1 %vm18942_vm12, %v18807_v59 }
0x13a2   : > { %14225 = vmatprep.subr.bf16.mxu1 %v18919_v61 }
0x13a5   : > { %14227 = vmatpush3.bf16.msk.msra.mxu1 %vm18934_vm15, %v18807_v59 }
0x13a6   : > { %14228 = vmatprep.subr.bf16.mxu1 %v18919_v61 }
0x13a9   : > { %14230 = vmatpush3.bf16.msk.msra.mxu1 %vm18935_vm6, %v18807_v59 }
0x13aa   : > { %14231 = vmatprep.subr.bf16.mxu1 %v18919_v61 }
0x13ad   : > { %14233 = vmatpush3.bf16.msk.msra.mxu1 %vm18944_vm3, %v18807_v59 }
0x13ae   : > { %14234 = vmatprep.subr.bf16.mxu1 %v18919_v61 }
0x13b1   : > { %14236 = vmatpush3.bf16.msk.msra.mxu1 %vm18945_vm8, %v18807_v59 }
0x13b2   : > { %14261 = vmatprep.subr.bf16.mxu1 %v18919_v61 }
0x13b4   : > { %12226 = vmatmul.mubr.f32.vlgmr.msra.gmra.mrb[68].mxu1 %v17546_v11 }
0x13b5   : > { %14263 = vmatpush3.bf16.msk.msra.mxu1 %vm18983_vm5, %v18807_v59  ;;  %12295 = vmatprep.mubr.msk.f32.mxu1 %vm18928_vm13, %v18927_v43 }
0x13b6   : > { %14264 = vmatprep.subr.bf16.mxu1 %v18919_v61 }
0x13b9   : > { %14266 = vmatpush3.bf16.msk.msra.mxu1 %vm18984_vm4, %v18807_v59 }
0x13ba   : > { %14267 = vmatprep.subr.bf16.mxu1 %v18919_v61 }
0x13bd   : > { %14269 = vmatpush3.bf16.msk.msra.mxu1 %vm18985_vm10, %v18807_v59 }
0x13be   : > { %14270 = vmatprep.subr.bf16.mxu1 %v18919_v61 }
0x13c1   : > { %14272 = vmatpush3.bf16.msk.msra.mxu1 %vm19000_vm2, %v18807_v59  ;;  %vm19004_vm2 = vnez %v18910_v38 }
0x13c2   : > { %14273 = vmatprep.subr.bf16.mxu1 %v18919_v61 }
0x13c5   : > { %14275 = vmatpush3.bf16.msk.msra.mxu1 %vm19001_vm14, %v18807_v59  ;;  %vm19005_vm14 = vnez %v18686_v12 }
0x13c6   : > { %14276 = vmatprep.subr.bf16.mxu1 %v18919_v61 }
0x13c9   : > { %14278 = vmatpush3.bf16.msk.msra.mxu1 %vm19002_vm11, %v18807_v59  ;;  %vm19009_vm11 = vnez %v18702_v27 }
0x13ca   : > { %14279 = vmatprep.subr.bf16.mxu1 %v18919_v61 }
0x13cd   : > { %14281 = vmatpush3.bf16.msk.msra.mxu1 %vm19003_vm1, %v18807_v59  ;;  %vm19006_vm1 = vnez %v18688_v14 }
0x13ce   : > { %14282 = vmatprep.subr.bf16.mxu1 %v18919_v61 }
0x13d1   : > { %14284 = vmatpush3.bf16.msk.msra.mxu1 %vm19004_vm2, %v18807_v59  ;;  %vm19007_vm2 = vnez %v18694_v19 }
0x13d2   : > { %14318 = vmatprep.subr.bf16.mxu1 %v18919_v61 }
0x13d4   : > { %12296 = vmatmul.mubr.f32.vlgmr.msra.gmra.mrb[70].mxu1 %v17309_v60 }
0x13d5   : > { %14320 = vmatpush3.bf16.msk.msra.mxu1 %vm19005_vm14, %v18807_v59  ;;  %12382 = vmatprep.mubr.msk.f32.mxu1 %vm18928_vm13, %v18927_v43  ;;  %vm19008_vm14 = vnez %v18698_v23 }
0x13d6   : > { %14321 = vmatprep.subr.bf16.mxu1 %v18919_v61 }
0x13d9   : > { %14323 = vmatpush3.bf16.msk.msra.mxu1 %vm19006_vm1, %v18807_v59  ;;  %vm19010_vm1 = vnez %v18707_v31 }
0x13da   : > { %14324 = vmatprep.subr.bf16.mxu1 %v18919_v61 }
0x13dd   : > { %14326 = vmatpush3.bf16.msk.msra.mxu1 %vm19007_vm2, %v18807_v59  ;;  %vm19011_vm2 = vnez %v18712_v35 }
0x13de   : > { %14327 = vmatprep.subr.bf16.mxu1 %v18919_v61 }
0x13e1   : > { %14329 = vmatpush3.bf16.msk.msra.mxu1 %vm19008_vm14, %v18807_v59  ;;  %vm19012_vm14 = vnez %v18717_v37 }
0x13e2   : > { %14330 = vmatprep.subr.bf16.mxu1 %v18919_v61 }
0x13e5   : > { %14332 = vmatpush3.bf16.msk.msra.mxu1 %vm19009_vm11, %v18807_v59 }
0x13e6   : > { %14333 = vmatprep.subr.bf16.mxu1 %v18919_v61 }
0x13e9   : > { %14335 = vmatpush3.bf16.msk.msra.mxu1 %vm19010_vm1, %v18807_v59 }
0x13ea   : > { %14336 = vmatprep.subr.bf16.mxu1 %v18919_v61 }
0x13ed   : > { %14338 = vmatpush3.bf16.msk.msra.mxu1 %vm19011_vm2, %v18807_v59 }
0x13ee   : > { %14339 = vmatprep.subr.bf16.mxu1 %v18919_v61 }
0x13f1   : > { %14341 = vmatpush3.bf16.msk.msra.mxu1 %vm19012_vm14, %v18807_v59 }
0x13f2   : > { %14366 = vmatprep.subr.bf16.mxu1 %v18919_v61 }
0x13f4   : > { %12383 = vmatmul.mubr.f32.vlgmr.msra.gmra.mrb[72].mxu1 %v17546_v11 }
0x13f5   : > { %14368 = vmatpush3.bf16.msk.msra.mxu1 %vm18930_vm7, %v18807_v59  ;;  %12452 = vmatprep.mubr.msk.f32.mxu1 %vm18928_vm13, %v18927_v43 }
0x13f6   : > { %14369 = vmatprep.subr.bf16.mxu1 %v18919_v61 }
0x13f9   : > { %14371 = vmatpush3.bf16.msk.msra.mxu1 %vm18931_vm0, %v18807_v59 }
0x13fa   : > { %14372 = vmatprep.subr.bf16.mxu1 %v18919_v61 }
0x13fd   : > { %14374 = vmatpush3.bf16.msk.msra.mxu1 %vm18932_vm9, %v18807_v59 }
0x13fe   : > { %14375 = vmatprep.subr.bf16.mxu1 %v18919_v61 }
0x1401   : > { %14377 = vmatpush3.bf16.msk.msra.mxu1 %vm18942_vm12, %v18807_v59 }
0x1402   : > { %14378 = vmatprep.subr.bf16.mxu1 %v18919_v61 }
0x1405   : > { %14380 = vmatpush3.bf16.msk.msra.mxu1 %vm18934_vm15, %v18807_v59 }
0x1406   : > { %14381 = vmatprep.subr.bf16.mxu1 %v18919_v61 }
0x1407   : > { %v5593_v51 = vpop.f32.mrb[60].mxu1 }
0x1408   : > { %v14133_v52 = vpack.c.bf16 %v17387_v16, %v5593_v51  ;;  %v11930_v54 = vpop.f32.mrb[61].mxu1  ;;  %v19032_v51 = vld [vmem:[#allocation40_spill] sm:$0xff] }
0x1409   : > { %14383 = vmatpush3.bf16.msk.msra.mxu1 %vm18935_vm6, %v18807_v59 }
0x140a   : > { %14134 = vmatpush3.bf16.msra.mxu0 %v14133_v52  ;;  %14384 = vmatprep.subr.bf16.mxu1 %v18919_v61  ;;  %v19035_v52 = vld [vmem:[#allocation41_spill] sm:$0xff] }
0x140b   : > { %14135 = vmatprep.subr.bf16.mxu0 %v18919_v61 }
0x140d   : > { %14386 = vmatpush3.bf16.msk.msra.mxu1 %vm18944_vm3, %v18807_v59 }
0x140e   : > { %14387 = vmatprep.subr.bf16.mxu1 %v18919_v61 }
0x1411   : > { %14389 = vmatpush3.bf16.msk.msra.mxu1 %vm18945_vm8, %v18807_v59  ;;  %vm19014_vm8 = vnez %v18904_v45 }
0x1412   : > { %14414 = vmatprep.subr.bf16.mxu1 %v18919_v61 }
0x1414   : > { %12453 = vmatmul.mubr.f32.vlgmr.msra.gmra.mrb[74].mxu1 %v17427_v1 }
0x1415   : > { %14416 = vmatpush3.bf16.msk.msra.mxu1 %vm18983_vm5, %v18807_v59  ;;  %12522 = vmatprep.mubr.msk.f32.mxu1 %vm18928_vm13, %v18927_v43  ;;  %vm19013_vm5 = vnez %v18902_v13 }
0x1416   : > { %14417 = vmatprep.subr.bf16.mxu1 %v18919_v61 }
0x1419   : > { %14419 = vmatpush3.bf16.msk.msra.mxu1 %vm18984_vm4, %v18807_v59  ;;  %vm19027_vm4 = vnez %v19026_v25 }
0x141a   : > { %14420 = vmatprep.subr.bf16.mxu1 %v18919_v61 }
0x141d   : > { %14422 = vmatpush3.bf16.msk.msra.mxu1 %vm18985_vm10, %v18807_v59  ;;  %vm19019_vm10 = vnez %v19018_v0 }
0x141e   : > { %14423 = vmatprep.subr.bf16.mxu1 %v18919_v61 }
0x1421   : > { %14425 = vmatpush3.bf16.msk.msra.mxu1 %vm19013_vm5, %v18807_v59  ;;  %vm19015_vm5 = vnez %v18906_v9 }
0x1422   : > { %14426 = vmatprep.subr.bf16.mxu1 %v18919_v61 }
0x1425   : > { %14428 = vmatpush3.bf16.msk.msra.mxu1 %vm19014_vm8, %v18807_v59  ;;  %vm19016_vm8 = vnez %v18908_v48 }
0x1426   : > { %14429 = vmatprep.subr.bf16.mxu1 %v18919_v61 }
0x1427   : > { %v17678_v62 = vpop.f32.mrb[62].mxu1 }
0x1428   : > { %v14136_v41 = vpack.c.bf16 %v17546_v11, %v17678_v62  ;;  %v12000_v49 = vpop.f32.mrb[63].mxu1 }
0x1429   : > { %14431 = vmatpush3.bf16.msk.msra.mxu1 %vm19015_vm5, %v18807_v59  ;;  %vm19017_vm5 = vnez %v18910_v38 }
0x142a   : > { %14137 = vmatpush3.bf16.msra.mxu0 %v14136_v41  ;;  %14432 = vmatprep.subr.bf16.mxu1 %v18919_v61 }
0x142b   : > { %14138 = vmatprep.subr.bf16.mxu0 %v18919_v61 }
0x142d   : > { %14434 = vmatpush3.bf16.msk.msra.mxu1 %vm19016_vm8, %v18807_v59  ;;  %vm19021_vm8 = vnez %v19020_v44 }
0x142e   : > { %14140 = vmatpush3.bf16.msra.mxu0 %v14139_v58  ;;  %14435 = vmatprep.subr.bf16.mxu1 %v18919_v61 }
0x142f   : > { %12083 = vmatprep.subr.mxu0 %v18927_v43 }
0x1431   : > { %14437 = vmatpush3.bf16.msk.msra.mxu1 %vm19017_vm5, %v18807_v59  ;;  %vm19023_vm5 = vnez %v19022_v21 }
0x1432   : > { %14447 = vmatprep.subr.bf16.mxu1 %v18919_v61 }
0x1434   : > { %12523 = vmatmul.mubr.f32.vlgmr.msra.gmra.mrb[76].mxu1 %v17378_v8 }
0x1435   : > { %14449 = vmatpush3.bf16.msk.msra.mxu1 %vm19019_vm10, %v18807_v59  ;;  %12574 = vmatprep.mubr.msk.f32.mxu1 %vm18928_vm13, %v18927_v43  ;;  %vm19025_vm10 = vnez %v19024_v24 }
0x1436   : > { %14450 = vmatprep.subr.bf16.mxu1 %v18919_v61 }
0x1439   : > { %14452 = vmatpush3.bf16.msk.msra.mxu1 %vm19021_vm8, %v18807_v59  ;;  %vm19028_vm8 = vcmask 457728  }
0x143a   : > { %14453 = vmatprep.subr.bf16.mxu1 %v18919_v61 }
0x143d   : > { %14455 = vmatpush3.bf16.msk.msra.mxu1 %vm19023_vm5, %v18807_v59  ;;  %vm19030_vm5 = vnez %v19029_v3 }
0x143e   : > { %14456 = vmatprep.subr.bf16.mxu1 %v18919_v61 }
0x1441   : > { %14458 = vmatpush3.bf16.msk.msra.mxu1 %vm19025_vm10, %v18807_v59  ;;  %vm19033_vm10 = vnez %v19032_v51 }
0x1442   : > { %14459 = vmatprep.subr.bf16.mxu1 %v18919_v61 }
0x1445   : > { %14461 = vmatpush3.bf16.msk.msra.mxu1 %vm19027_vm4, %v18807_v59  ;;  %vm19031_vm4 = vnez %v18946_v32 }
0x1446   : > { %14462 = vmatprep.subr.bf16.mxu1 %v18919_v61 }
0x1447   : > { %v17728_v33 = vpop.f32.mrb[64].mxu1 }
0x1448   : > { %v12070_v63 = vpop.f32.mrb[65].mxu1  ;;  %12084 = vmatpush3.msra.mxu0 %v17728_v33 }
0x1449   : > { %12086 = vmatmul.mubr.msk.f32.vlgmr.msra.gmra.mrb[56].mxu0 %vm19028_vm8, %v17726_v29  ;;  %14141 = vmatprep.subr.bf16.mxu0 %v18919_v61  ;;  %vm19034_vm8 = vnez %v18948_v56 }
0x144a   : > { %14464 = vmatpush3.bf16.msk.msra.mxu1 %vm19030_vm5, %v18807_v59  ;;  %14143 = vmatpush3.bf16.msk.msra.mxu0 %vm19031_vm4, %v18807_v59  ;;  %vm19036_vm5 = vnez %v19035_v52  ;;  %vm19037_vm4 = vnez %v18950_v7 }
0x144b   : > { %14465 = vmatprep.subr.bf16.mxu1 %v18919_v61  ;;  %14144 = vmatprep.subr.bf16.mxu0 %v18919_v61 }
0x144c   : > { %12120 = vmatprep.mubr.msk.f32.mxu0 %vm18928_vm13, %v18927_v43 }
0x144e   : > { %14467 = vmatpush3.bf16.msk.msra.mxu1 %vm19033_vm10, %v18807_v59  ;;  %14146 = vmatpush3.bf16.msk.msra.mxu0 %vm19034_vm8, %v18807_v59  ;;  %vm19038_vm10 = vnez %v18952_v10  ;;  %vm19042_vm8 = vnez %v18960_v39 }
0x144f   : > { %14468 = vmatprep.subr.bf16.mxu1 %v18919_v61  ;;  %14147 = vmatprep.subr.bf16.mxu0 %v18919_v61 }
0x1452   : > { %14470 = vmatpush3.bf16.msk.msra.mxu1 %vm19036_vm5, %v18807_v59  ;;  %14149 = vmatpush3.bf16.msk.msra.mxu0 %vm19037_vm4, %v18807_v59  ;;  %vm19039_vm5 = vnez %v18954_v40  ;;  %vm19040_vm4 = vnez %v18956_v5 }
0x1453   : > { %14150 = vmatprep.subr.bf16.mxu0 %v18919_v61  ;;  %12604 = vmatprep.subr.mxu1 %v18927_v43 }
0x1455   : > { %12575 = vmatmul.mubr.f32.vlgmr.msra.gmra.mrb[78].mxu1 %v17546_v11 }
0x1456   : > { %14152 = vmatpush3.bf16.msk.msra.mxu0 %vm19038_vm10, %v18807_v59  ;;  %12606 = vmatprep.mubr.msk.f32.mxu1 %vm18928_vm13, %v18927_v43  ;;  %vm19041_vm10 = vnez %v18958_v42 }
0x1457   : > { %14153 = vmatprep.subr.bf16.mxu0 %v18919_v61 }
0x145a   : > { %14155 = vmatpush3.bf16.msk.msra.mxu0 %vm19039_vm5, %v18807_v59 }
0x145b   : > { %14156 = vmatprep.subr.bf16.mxu0 %v18919_v61 }
0x145e   : > { %14158 = vmatpush3.bf16.msk.msra.mxu0 %vm19040_vm4, %v18807_v59  ;;  %vm19043_vm4 = vnez %v18686_v12 }
0x145f   : > { %14159 = vmatprep.subr.bf16.mxu0 %v18919_v61 }
0x1462   : > { %14161 = vmatpush3.bf16.msk.msra.mxu0 %vm19041_vm10, %v18807_v59  ;;  %vm19044_vm10 = vnez %v18688_v14 }
0x1463   : > { %14162 = vmatprep.subr.bf16.mxu0 %v18919_v61 }
0x1466   : > { %14164 = vmatpush3.bf16.msk.msra.mxu0 %vm19042_vm8, %v18807_v59  ;;  %vm19045_vm8 = vnez %v18694_v19 }
0x1467   : > { %v6092_v54 = vpop.f32.mrb[66].mxu1  ;;  %14189 = vmatprep.subr.bf16.mxu0 %v18919_v61 }
0x1468   : > { %v12157_v41 = vpop.f32.mrb[67].mxu1 }
0x1469   : > { %12121 = vmatmul.mubr.f32.vlgmr.msra.gmra.mrb[58].mxu0 %v17546_v11 }
0x146a   : > { %14191 = vmatpush3.bf16.msk.msra.mxu0 %vm19043_vm4, %v18807_v59  ;;  %12190 = vmatprep.mubr.msk.f32.mxu0 %vm18928_vm13, %v18927_v43  ;;  %vm19046_vm4 = vnez %v18698_v23 }
0x146b   : > { %14192 = vmatprep.subr.bf16.mxu0 %v18919_v61 }
0x146e   : > { %14194 = vmatpush3.bf16.msk.msra.mxu0 %vm19044_vm10, %v18807_v59 }
0x146f   : > { %14195 = vmatprep.subr.bf16.mxu0 %v18919_v61 }
0x1472   : > { %14197 = vmatpush3.bf16.msk.msra.mxu0 %vm19045_vm8, %v18807_v59 }
0x1473   : > { %14198 = vmatprep.subr.bf16.mxu0 %v18919_v61 }
0x1476   : > { %14200 = vmatpush3.bf16.msk.msra.mxu0 %vm19046_vm4, %v18807_v59 }
0x1477   : > { %14201 = vmatprep.subr.bf16.mxu0 %v18919_v61 }
0x147a   : > { %14203 = vmatpush3.bf16.msk.msra.mxu0 %vm19009_vm11, %v18807_v59 }
0x147b   : > { %14204 = vmatprep.subr.bf16.mxu0 %v18919_v61 }
0x147e   : > { %14206 = vmatpush3.bf16.msk.msra.mxu0 %vm19010_vm1, %v18807_v59 }
0x147f   : > { %14207 = vmatprep.subr.bf16.mxu0 %v18919_v61 }
0x1482   : > { %14209 = vmatpush3.bf16.msk.msra.mxu0 %vm19011_vm2, %v18807_v59 }
0x1483   : > { %14210 = vmatprep.subr.bf16.mxu0 %v18919_v61 }
0x1486   : > { %14212 = vmatpush3.bf16.msk.msra.mxu0 %vm19012_vm14, %v18807_v59 }
0x1487   : > { %v6232_v49 = vpop.f32.mrb[68].mxu1  ;;  %14237 = vmatprep.subr.bf16.mxu0 %v18919_v61 }
0x1488   : > { %v12227_v58 = vpop.f32.mrb[69].mxu1 }
0x1489   : > { %12191 = vmatmul.mubr.f32.vlgmr.msra.gmra.mrb[60].mxu0 %v17309_v60 }
0x148a   : > { %14239 = vmatpush3.bf16.msk.msra.mxu0 %vm18930_vm7, %v18807_v59  ;;  %12260 = vmatprep.mubr.msk.f32.mxu0 %vm18928_vm13, %v18927_v43 }
0x148b   : > { %14240 = vmatprep.subr.bf16.mxu0 %v18919_v61 }
0x148e   : > { %14242 = vmatpush3.bf16.msk.msra.mxu0 %vm18931_vm0, %v18807_v59 }
0x148f   : > { %14243 = vmatprep.subr.bf16.mxu0 %v18919_v61 }
0x1492   : > { %14245 = vmatpush3.bf16.msk.msra.mxu0 %vm18932_vm9, %v18807_v59 }
0x1493   : > { %14246 = vmatprep.subr.bf16.mxu0 %v18919_v61 }
0x1496   : > { %14248 = vmatpush3.bf16.msk.msra.mxu0 %vm18942_vm12, %v18807_v59  ;;  %vm19047_vm12 = vnez %v18937_v55 }
0x1497   : > { %14249 = vmatprep.subr.bf16.mxu0 %v18919_v61 }
0x149a   : > { %14251 = vmatpush3.bf16.msk.msra.mxu0 %vm18934_vm15, %v18807_v59  ;;  %vm19061_vm15 = vnez %v18904_v45 }
0x149b   : > { %14252 = vmatprep.subr.bf16.mxu0 %v18919_v61 }
0x149e   : > { %14254 = vmatpush3.bf16.msk.msra.mxu0 %vm18935_vm6, %v18807_v59  ;;  %vm19050_vm6 = vnez %v18948_v56 }
0x149f   : > { %14255 = vmatprep.subr.bf16.mxu0 %v18919_v61 }
0x14a2   : > { %14257 = vmatpush3.bf16.msk.msra.mxu0 %vm18944_vm3, %v18807_v59  ;;  %vm19049_vm3 = vnez %v18946_v32  ;;  %v5880_v32 = vpop.permute.xlu1 %5879 }
0x14a3   : > { %14258 = vmatprep.subr.bf16.mxu0 %v18919_v61 }
0x14a6   : > { %14260 = vmatpush3.bf16.msk.msra.mxu0 %vm19047_vm12, %v18807_v59  ;;  %vm19048_vm12 = vcmask 457728  }
0x14a7   : > { %v6372_v0 = vpop.f32.mrb[70].mxu1  ;;  %14285 = vmatprep.subr.bf16.mxu0 %v18919_v61 }
0x14a8   : > { %v12297_v44 = vpop.f32.mrb[71].mxu1 }
0x14a9   : > { %12261 = vmatmul.mubr.f32.vlgmr.msra.gmra.mrb[62].mxu0 %v17378_v8 }
0x14aa   : > { %12312 = vmatprep.mubr.msk.f32.mxu0 %vm18928_vm13, %v18927_v43 }
0x14c7   : > { %v17858_v21 = vpop.f32.mrb[72].mxu1 }
0x14c8   : > { %v12384_v24 = vpop.f32.mrb[73].mxu1 }
0x14e7   : > { %v17860_v25 = vpop.f32.mrb[74].mxu1 }
0x14e8   : > { %v12454_v63 = vpop.f32.mrb[75].mxu1 }
0x1507   : > { %v17862_v3 = vpop.f32.mrb[76].mxu1 }
0x1508   : > { %v12524_v51 = vpop.f32.mrb[77].mxu1 }
0x151c   : > { %v17864_v52 = vpop.f32.mrb[56].mxu0 }
0x151d   : > { %v12087_v41 = vpop.f32.mrb[57].mxu0  ;;  %v5952_v56 = vadd.f32 %v17864_v52, %v5880_v32 }
0x1528   : > { %v17866_v58 = vpop.f32.mrb[78].mxu1 }
0x1529   : > { %v12576_v44 = vpop.f32.mrb[79].mxu1 }
0x153c   : > { %v6022_v4 = vpop.f32.mrb[58].mxu0 }
0x153d   : > { %v14286_v53 = vpack.c.bf16 %v6092_v54, %v6022_v4  ;;  %v12122_v55 = vpop.f32.mrb[59].mxu0 }
0x153e   : > { %v19066_v55 = vpack.c.bf16 %v17678_v62, %v17387_v16  ;;  %v5513_v16 = vld [vmem:[%s18417_s21] sm:$0xff] }
0x153f   : > { %14287 = vmatpush3.bf16.msra.mxu0 %v14286_v53 }
0x1540   : > { %14288 = vmatprep.subr.bf16.mxu0 %v18919_v61 }
0x155c   : > { %v6162_v36 = vpop.f32.mrb[60].mxu0 }
0x155d   : > { %v14289_v24 = vpack.c.bf16 %v17427_v1, %v6162_v36  ;;  %v12192_v34 = vpop.f32.mrb[61].mxu0 }
0x155f   : > { %14290 = vmatpush3.bf16.msra.mxu0 %v14289_v24 }
0x1560   : > { %14291 = vmatprep.subr.bf16.mxu0 %v18919_v61 }
0x157c   : > { %v6302_v63 = vpop.f32.mrb[62].mxu0 }
0x157d   : > { %v14292_v51 = vpack.c.bf16 %v6302_v63, %v6232_v49  ;;  %v12262_v30 = vpop.f32.mrb[63].mxu0 }
0x157f   : > { %14293 = vmatpush3.bf16.msra.mxu0 %v14292_v51 }
0x1580   : > { %12310 = vmatprep.subr.mxu0 %v18927_v43 }
0x1583   : > { %12311 = vmatpush3.msra.mxu0 %v6372_v0 }
0x1584   : > { %12313 = vmatmul.mubr.msk.f32.vlgmr.msra.gmra.mrb[64].mxu0 %vm19048_vm12, %v17726_v29  ;;  %14294 = vmatprep.subr.bf16.mxu0 %v18919_v61  ;;  %vm19051_vm12 = vnez %v18950_v7  ;;  %v14475_v7 = vpack.c.bf16 %v17378_v8, %v17546_v11 }
0x1585   : > { %14296 = vmatpush3.bf16.msk.msra.mxu0 %vm19049_vm3, %v18807_v59  ;;  %12347 = vmatprep.mubr.msk.f32.mxu0 %vm18928_vm13, %v18927_v43  ;;  %vm19052_vm3 = vnez %v18952_v10 }
0x1586   : > { %14297 = vmatprep.subr.bf16.mxu0 %v18919_v61 }
0x1589   : > { %14299 = vmatpush3.bf16.msk.msra.mxu0 %vm19050_vm6, %v18807_v59  ;;  %vm19053_vm6 = vnez %v18956_v5  ;;  %v19068_v5 = vpack.c.bf16 %v17728_v33, %v17436_v47 }
0x158a   : > { %14300 = vmatprep.subr.bf16.mxu0 %v18919_v61 }
0x158d   : > { %14302 = vmatpush3.bf16.msk.msra.mxu0 %vm19051_vm12, %v18807_v59  ;;  %vm19054_vm12 = vnez %v18958_v42 }
0x158e   : > { %14303 = vmatprep.subr.bf16.mxu0 %v18919_v61 }
0x1591   : > { %14305 = vmatpush3.bf16.msk.msra.mxu0 %vm19052_vm3, %v18807_v59  ;;  %vm19055_vm3 = vnez %v18960_v39 }
0x1592   : > { %14306 = vmatprep.subr.bf16.mxu0 %v18919_v61 }
0x1595   : > { %14308 = vmatpush3.bf16.msk.msra.mxu0 %vm19039_vm5, %v18807_v59  ;;  %vm19056_vm5 = vnez %v18686_v12 }
0x1596   : > { %14309 = vmatprep.subr.bf16.mxu0 %v18919_v61 }
0x1599   : > { %14311 = vmatpush3.bf16.msk.msra.mxu0 %vm19053_vm6, %v18807_v59  ;;  %vm19057_vm6 = vnez %v18896_v57 }
0x159a   : > { %14312 = vmatprep.subr.bf16.mxu0 %v18919_v61 }
0x159d   : > { %14314 = vmatpush3.bf16.msk.msra.mxu0 %vm19054_vm12, %v18807_v59  ;;  %vm19058_vm12 = vnez %v18898_v46 }
0x159e   : > { %14315 = vmatprep.subr.bf16.mxu0 %v18919_v61 }
0x15a1   : > { %14317 = vmatpush3.bf16.msk.msra.mxu0 %vm19055_vm3, %v18807_v59  ;;  %vm19059_vm3 = vnez %v18900_v50 }
0x15a2   : > { %14342 = vmatprep.subr.bf16.mxu0 %v18919_v61 }
0x15a4   : > { %12348 = vmatmul.mubr.f32.vlgmr.msra.gmra.mrb[66].mxu0 %v17427_v1 }
0x15a5   : > { %14344 = vmatpush3.bf16.msk.msra.mxu0 %vm19056_vm5, %v18807_v59  ;;  %12417 = vmatprep.mubr.msk.f32.mxu0 %vm18928_vm13, %v18927_v43 }
0x15a6   : > { %14345 = vmatprep.subr.bf16.mxu0 %v18919_v61 }
0x15a9   : > { %14347 = vmatpush3.bf16.msk.msra.mxu0 %vm19044_vm10, %v18807_v59 }
0x15aa   : > { %14348 = vmatprep.subr.bf16.mxu0 %v18919_v61 }
0x15ad   : > { %14350 = vmatpush3.bf16.msk.msra.mxu0 %vm19045_vm8, %v18807_v59 }
0x15ae   : > { %14351 = vmatprep.subr.bf16.mxu0 %v18919_v61 }
0x15b1   : > { %14353 = vmatpush3.bf16.msk.msra.mxu0 %vm19046_vm4, %v18807_v59 }
0x15b2   : > { %14354 = vmatprep.subr.bf16.mxu0 %v18919_v61 }
0x15b5   : > { %14356 = vmatpush3.bf16.msk.msra.mxu0 %vm19009_vm11, %v18807_v59 }
0x15b6   : > { %14357 = vmatprep.subr.bf16.mxu0 %v18919_v61 }
0x15b9   : > { %14359 = vmatpush3.bf16.msk.msra.mxu0 %vm19010_vm1, %v18807_v59 }
0x15ba   : > { %14360 = vmatprep.subr.bf16.mxu0 %v18919_v61 }
0x15bd   : > { %14362 = vmatpush3.bf16.msk.msra.mxu0 %vm19011_vm2, %v18807_v59 }
0x15be   : > { %14363 = vmatprep.subr.bf16.mxu0 %v18919_v61 }
0x15c1   : > { %14365 = vmatpush3.bf16.msk.msra.mxu0 %vm19012_vm14, %v18807_v59 }
0x15c2   : > { %14390 = vmatprep.subr.bf16.mxu0 %v18919_v61 }
0x15c4   : > { %12418 = vmatmul.mubr.f32.vlgmr.msra.gmra.mrb[68].mxu0 %v17378_v8 }
0x15c5   : > { %14392 = vmatpush3.bf16.msk.msra.mxu0 %vm19057_vm6, %v18807_v59  ;;  %12487 = vmatprep.mubr.msk.f32.mxu0 %vm18928_vm13, %v18927_v43  ;;  %vm19060_vm6 = vnez %v18902_v13 }
0x15c6   : > { %14393 = vmatprep.subr.bf16.mxu0 %v18919_v61 }
0x15c9   : > { %14395 = vmatpush3.bf16.msk.msra.mxu0 %vm19058_vm12, %v18807_v59  ;;  %vm19062_vm12 = vnez %v18906_v9 }
0x15ca   : > { %14396 = vmatprep.subr.bf16.mxu0 %v18919_v61 }
0x15cd   : > { %14398 = vmatpush3.bf16.msk.msra.mxu0 %vm19059_vm3, %v18807_v59  ;;  %vm19063_vm3 = vnez %v18908_v48 }
0x15ce   : > { %14399 = vmatprep.subr.bf16.mxu0 %v18919_v61 }
0x15d1   : > { %14401 = vmatpush3.bf16.msk.msra.mxu0 %vm19060_vm6, %v18807_v59  ;;  %vm19064_vm6 = vnez %v18910_v38 }
0x15d2   : > { %14402 = vmatprep.subr.bf16.mxu0 %v18919_v61 }
0x15d5   : > { %14404 = vmatpush3.bf16.msk.msra.mxu0 %vm19061_vm15, %v18807_v59  ;;  %vm19065_vm15 = vcmask 457728  }
0x15d6   : > { %14405 = vmatprep.subr.bf16.mxu0 %v18919_v61 }
0x15d9   : > { %14407 = vmatpush3.bf16.msk.msra.mxu0 %vm19062_vm12, %v18807_v59  ;;  %vm19067_vm12 = vcmp.lt.s32.totalorder %v14976_v2, 16 }
0x15da   : > { %14408 = vmatprep.subr.bf16.mxu0 %v18919_v61  ;;  %v5955_v10 = vsel %vm19067_vm12, %v5952_v56, 0.0 }
0x15db   : > { %v7080_v42 = vmul.f32 0.01, %v5955_v10 }
0x15dd   : > { %14410 = vmatpush3.bf16.msk.msra.mxu0 %vm19063_vm3, %v18807_v59  ;;  %vm7079_vm3 = vcmp.gt.f32.partialorder %v5955_v10, 0.0 }
0x15de   : > { %14411 = vmatprep.subr.bf16.mxu0 %v18919_v61  ;;  %v7081_v8 = vsel %vm7079_vm3, %v5955_v10, %v7080_v42 }
0x15e1   : > { %14413 = vmatpush3.bf16.msk.msra.mxu0 %vm19064_vm6, %v18807_v59  ;;  %vm19069_vm6 = vmmov %vm19067_vm12 }
0x15e2   : > { %14438 = vmatprep.subr.bf16.mxu0 %v18919_v61 }
0x15e4   : > { %12488 = vmatmul.mubr.f32.vlgmr.msra.gmra.mrb[70].mxu0 %v17546_v11 }
0x15e5   : > { %12539 = vmatprep.mubr.msk.f32.mxu0 %vm18928_vm13, %v18927_v43 }
0x1657   : > { %v6442_v30 = vpop.f32.mrb[64].mxu0 }
0x1658   : > { %v12314_v34 = vpop.f32.mrb[65].mxu0  ;;  %v6443_v40 = vadd.f32 %v6442_v30, %v5880_v32 }
0x165a   : > { %v6446_v39 = vsel %vm19069_vm6, %v6443_v40, 0.0  ;;  %vm19070_vm6 = vcmask 64512  }
0x165b   : > { %vm7082_vm12 = vcmp.gt.f32.partialorder %v6446_v39, 0.0  ;;  %vm19071_vm3 = vmmov %vm19070_vm6 }
0x1677   : > { %v6513_v36 = vpop.f32.mrb[66].mxu0 }
0x1678   : > { %v14439_v57 = vpack.c.bf16 %v17858_v21, %v6513_v36  ;;  %v12349_v46 = vpop.f32.mrb[67].mxu0 }
0x167a   : > { %14440 = vmatpush3.bf16.msra.mxu0 %v14439_v57 }
0x167b   : > { %14441 = vmatprep.subr.bf16.mxu0 %v18919_v61 }
0x1697   : > { %v6653_v50 = vpop.f32.mrb[68].mxu0 }
0x1698   : > { %v14442_v13 = vpack.c.bf16 %v17309_v60, %v6653_v50  ;;  %v12419_v45 = vpop.f32.mrb[69].mxu0  ;;  %v7083_v60 = vmul.f32 0.01, %v6446_v39 }
0x169a   : > { %14443 = vmatpush3.bf16.msra.mxu0 %v14442_v13  ;;  %v7084_v1 = vsel %vm7082_vm12, %v6446_v39, %v7083_v60  ;;  %vm19073_vm12 = vmmov %vm19071_vm3 }
0x169b   : > { %14444 = vmatprep.subr.bf16.mxu0 %v18919_v61 }
0x16b7   : > { %v6793_v9 = vpop.f32.mrb[70].mxu0 }
0x16b8   : > { %v14445_v48 = vpack.c.bf16 %v6793_v9, %v17860_v25  ;;  %v12489_v38 = vpop.f32.mrb[71].mxu0 }
0x16ba   : > { %14446 = vmatpush3.bf16.msra.mxu0 %v14445_v48 }
0x16bb   : > { %12537 = vmatprep.subr.mxu0 %v18927_v43 }
0x16be   : > { %12538 = vmatpush3.msra.mxu0 %v17862_v3 }
0x16bf   : > { %12540 = vmatmul.mubr.msk.f32.vlgmr.msra.gmra.mrb[72].mxu0 %vm19065_vm15, %v17726_v29  ;;  %14471 = vmatprep.subr.bf16.mxu0 %v18919_v61 }
0x16c0   : > { %14473 = vmatpush3.bf16.msra.mxu0 %v19066_v55  ;;  %12591 = vmatprep.mubr.msk.f32.mxu0 %vm18928_vm13, %v18927_v43 }
0x16c1   : > { %14474 = vmatprep.subr.bf16.mxu0 %v18919_v61 }
0x16c4   : > { %14476 = vmatpush3.bf16.msra.mxu0 %v14475_v7 }
0x16c5   : > { %14477 = vmatprep.subr.bf16.mxu0 %v18919_v61 }
0x16c8   : > { %14479 = vmatpush3.bf16.msra.mxu0 %v19068_v5 }
0x16c9   : > { %12589 = vmatprep.subr.mxu0 %v18927_v43 }
0x16cc   : > { %12590 = vmatpush3.msra.mxu0 %v17866_v58  ;;  %v18054_v58 = vpop.permute.xlu0 %7093 }
0x16cd   : > { %12592 = vmatmul.mubr.msk.f32.vlgmr.msra.gmra.mrb[74].mxu0 %vm19065_vm15, %v17726_v29  ;;  %12594 = vmatprep.subr.mxu0 %v18927_v43  ;;  %vm19072_vm15 = vcmp.lt.s32.totalorder %v14976_v2, 16 }
0x16ce   : > { %12595 = vmatpush3.msra.mxu0 %v7081_v8  ;;  %12596 = vmatprep.mubr.msk.f32.mxu0 %vm18928_vm13, %v18927_v43  ;;  %v18189_v8 = vld [vmem:[%s18419_s23] sm:$0xf] }
0x16cf   : > { %12599 = vmatprep.subr.mxu0 %v18927_v43 }
0x16d1   : > { %12597 = vmatmul.mubr.msk.f32.vlgmr.msra.gmra.mrb[76].mxu0 %vm19070_vm6, %v5513_v16 }
0x16d2   : > { %12600 = vmatpush3.msra.mxu0 %v7084_v1  ;;  %12601 = vmatprep.mubr.msk.f32.mxu0 %vm18928_vm13, %v18927_v43  ;;  %v19084_v1 = vld [vmem:[#allocation14_spill] sm:$0xff] }
0x16d3   : > { %12609 = vmatprep.subr.mxu0 %v18927_v43 }
0x16d5   : > { %12602 = vmatmul.mubr.msk.f32.vlgmr.msra.gmra.mrb[78].mxu0 %vm19071_vm3, %v5513_v16 }
0x16d6   : > { %12611 = vmatprep.mubr.msk.f32.mxu0 %vm18928_vm13, %v18927_v43 }
0x1792   : > { %v6933_v47 = vpop.f32.mrb[72].mxu0 }
0x1793   : > { %v6934_v11 = vadd.f32 %v6933_v47, %v5880_v32  ;;  %v12541_v62 = vpop.f32.mrb[73].mxu0  ;;  %v19086_v47 = vld [vmem:[#allocation15_spill] sm:$0xff] }
0x1794   : > { %v18235_v62 = vpop.permute.xlu1 %7613 }
0x1795   : > { %v6937_v53 = vsel %vm19072_vm15, %v6934_v11, 0.0  ;;  %v19088_v11 = vld [vmem:[#allocation16_spill] sm:$0xff] }
0x1796   : > { %vm7085_vm9 = vcmp.gt.f32.partialorder %v6937_v53, 0.0  ;;  %v7086_v29 = vmul.f32 0.01, %v6937_v53 }
0x1798   : > { %v7087_v33 = vsel %vm7085_vm9, %v6937_v53, %v7086_v29  ;;  %vm19074_vm9 = vmmov %vm19072_vm15 }
0x1799   : > { %12605 = vmatpush3.msra.mxu1 %v7087_v33  ;;  %vm19075_vm15 = vmmov %vm19074_vm9 }
0x179a   : > { %12607 = vmatmul.mubr.msk.f32.vlgmr.msra.gmra.mrb[80].mxu1 %vm19073_vm12, %v5513_v16  ;;  %14480 = vmatprep.subr.bf16.mxu1 %v18919_v61 }
0x179b   : > { %14482 = vmatpush3.bf16.msk.msra.mxu1 %vm19056_vm5, %v18807_v59  ;;  %12646 = vmatprep.mubr.msk.f32.mxu1 %vm18928_vm13, %v18927_v43 }
0x179c   : > { %14483 = vmatprep.subr.bf16.mxu1 %v18919_v61 }
0x179f   : > { %14485 = vmatpush3.bf16.msk.msra.mxu1 %vm19044_vm10, %v18807_v59 }
0x17a0   : > { %v7074_v4 = vpop.f32.mrb[74].mxu0  ;;  %14486 = vmatprep.subr.bf16.mxu1 %v18919_v61 }
0x17a1   : > { %v7075_v54 = vadd.f32 %v7074_v4, %v5880_v32  ;;  %v12593_v49 = vpop.f32.mrb[75].mxu0 }
0x17a3   : > { %v7078_v0 = vsel %vm19074_vm9, %v7075_v54, 0.0  ;;  %14488 = vmatpush3.bf16.msk.msra.mxu1 %vm19045_vm8, %v18807_v59 }
0x17a4   : > { %vm7088_vm6 = vcmp.gt.f32.partialorder %v7078_v0, 0.0  ;;  %v7089_v21 = vmul.f32 0.01, %v7078_v0  ;;  %v18046_v25 = vpop.f32.mrb[76].mxu0  ;;  %14489 = vmatprep.subr.bf16.mxu1 %v18919_v61 }
0x17a5   : > { %v12598_v3 = vpop.f32.mrb[77].mxu0  ;;  %v7166_v9 = vadd.f32 %v18046_v25, %v18054_v58 }
0x17a6   : > { %v7090_v52 = vsel %vm7088_vm6, %v7078_v0, %v7089_v21 }
0x17a7   : > { %12610 = vmatpush3.msra.mxu0 %v7090_v52  ;;  %14491 = vmatpush3.bf16.msk.msra.mxu1 %vm19046_vm4, %v18807_v59 }
0x17a8   : > { %v7236_v41 = vpop.f32.mrb[78].mxu0  ;;  %12612 = vmatmul.mubr.msk.f32.vlgmr.msra.gmra.mrb[80].mxu0 %vm19071_vm3, %v5513_v16  ;;  %14492 = vmatprep.subr.bf16.mxu1 %v18919_v61  ;;  %v19082_v16 = vld [vmem:[#allocation13_spill] sm:$0xff]  ;;  %vm19085_vm3 = vnez %v19084_v1 }
0x17a9   : > { %14504 = vmatprep.subr.bf16.mxu0 %v18919_v61  ;;  %v12603_v44 = vpop.f32.mrb[79].mxu0  ;;  %12681 = vmatprep.mubr.msk.f32.mxu0 %vm18928_vm13, %v18927_v43  ;;  %v7237_v24 = vadd.f32 %v7236_v41, %v18054_v58  ;;  %vm19083_vm6 = vnez %v19082_v16 }
0x17aa   : > { %14506 = vmatpush3.bf16.msk.msra.mxu0 %vm19056_vm5, %v18807_v59 }
0x17ab   : > { %14494 = vmatpush3.bf16.msk.msra.mxu1 %vm19009_vm11, %v18807_v59  ;;  %14507 = vmatprep.subr.bf16.mxu0 %v18919_v61  ;;  %v7240_v63 = vsel %vm19075_vm15, %v7237_v24, 0.0  ;;  %vm19087_vm15 = vnez %v19086_v47 }
0x17ac   : > { %14495 = vmatprep.subr.bf16.mxu1 %v18919_v61  ;;  %v7384_v51 = vadd.f32 %v7240_v63, %v17414_v28 }
0x17ae   : > { %14509 = vmatpush3.bf16.msk.msra.mxu0 %vm19044_vm10, %v18807_v59  ;;  %v7393_v30 = vmul.f32 0.01, %v7384_v51  ;;  %vm7392_vm12 = vcmp.gt.f32.partialorder %v7384_v51, 0.0 }
0x17af   : > { %14497 = vmatpush3.bf16.msk.msra.mxu1 %vm19010_vm1, %v18807_v59  ;;  %14510 = vmatprep.subr.bf16.mxu0 %v18919_v61 }
0x17b0   : > { %14498 = vmatprep.subr.bf16.mxu1 %v18919_v61  ;;  %v18095_v28 = vsel %vm7392_vm12, %v7384_v51, %v7393_v30  ;;  %vm19089_vm12 = vnez %v19088_v11 }
0x17b2   : > { %14512 = vmatpush3.bf16.msk.msra.mxu0 %vm19045_vm8, %v18807_v59 }
0x17b3   : > { %14500 = vmatpush3.bf16.msk.msra.mxu1 %vm19011_vm2, %v18807_v59  ;;  %14513 = vmatprep.subr.bf16.mxu0 %v18919_v61 }
0x17b4   : > { %14501 = vmatprep.subr.bf16.mxu1 %v18919_v61 }
0x17b6   : > { %14515 = vmatpush3.bf16.msk.msra.mxu0 %vm19046_vm4, %v18807_v59 }
0x17b7   : > { %14503 = vmatpush3.bf16.msk.msra.mxu1 %vm19012_vm14, %v18807_v59  ;;  %14516 = vmatprep.subr.bf16.mxu0 %v18919_v61 }
0x17b8   : > { %14528 = vmatprep.subr.bf16.mxu1 %v18919_v61 }
0x17ba   : > { %12647 = vmatmul.mubr.f32.vlgmr.msra.gmra.mrb[82].mxu1 %v18095_v28  ;;  %14518 = vmatpush3.bf16.msk.msra.mxu0 %vm19009_vm11, %v18807_v59 }
0x17bb   : > { %14530 = vmatpush3.bf16.msk.msra.mxu1 %vm19056_vm5, %v18807_v59  ;;  %14519 = vmatprep.subr.bf16.mxu0 %v18919_v61  ;;  %vm19080_vm5 = vnez %v18696_v22 }
0x17bc   : > { %14531 = vmatprep.subr.bf16.mxu1 %v18919_v61  ;;  %12716 = vmatprep.mubr.msk.f32.mxu1 %vm18928_vm13, %v18927_v43 }
0x17be   : > { %14521 = vmatpush3.bf16.msk.msra.mxu0 %vm19010_vm1, %v18807_v59 }
0x17bf   : > { %14533 = vmatpush3.bf16.msk.msra.mxu1 %vm19044_vm10, %v18807_v59  ;;  %14522 = vmatprep.subr.bf16.mxu0 %v18919_v61  ;;  %vm19079_vm10 = vcmask 457728  }
0x17c0   : > { %14534 = vmatprep.subr.bf16.mxu1 %v18919_v61 }
0x17c2   : > { %14524 = vmatpush3.bf16.msk.msra.mxu0 %vm19011_vm2, %v18807_v59 }
0x17c3   : > { %14536 = vmatpush3.bf16.msk.msra.mxu1 %vm19045_vm8, %v18807_v59  ;;  %14525 = vmatprep.subr.bf16.mxu0 %v18919_v61 }
0x17c4   : > { %14537 = vmatprep.subr.bf16.mxu1 %v18919_v61 }
0x17c6   : > { %14527 = vmatpush3.bf16.msk.msra.mxu0 %vm19012_vm14, %v18807_v59 }
0x17c7   : > { %14539 = vmatpush3.bf16.msk.msra.mxu1 %vm19046_vm4, %v18807_v59  ;;  %14552 = vmatprep.subr.bf16.mxu0 %v18919_v61 }
0x17c8   : > { %14540 = vmatprep.subr.bf16.mxu1 %v18919_v61 }
0x17cb   : > { %14542 = vmatpush3.bf16.msk.msra.mxu1 %vm19009_vm11, %v18807_v59  ;;  %vm19076_vm11 = vmmov %vm19074_vm9 }
0x17cc   : > { %14543 = vmatprep.subr.bf16.mxu1 %v18919_v61 }
0x17cf   : > { %14545 = vmatpush3.bf16.msk.msra.mxu1 %vm19010_vm1, %v18807_v59 }
0x17d0   : > { %14546 = vmatprep.subr.bf16.mxu1 %v18919_v61 }
0x17d3   : > { %14548 = vmatpush3.bf16.msk.msra.mxu1 %vm19011_vm2, %v18807_v59  ;;  %vm19077_vm2 = vmmov %vm19074_vm9  ;;  %vm19081_vm9 = vnez %v18700_v26 }
0x17d4   : > { %14549 = vmatprep.subr.bf16.mxu1 %v18919_v61  ;;  %vm19078_vm4 = vmmov %vm19077_vm2 }
0x17d7   : > { %14551 = vmatpush3.bf16.msk.msra.mxu1 %vm19012_vm14, %v18807_v59 }
0x17d8   : > { %14585 = vmatprep.subr.bf16.mxu1 %v18919_v61 }
0x186d   : > { %v7307_v12 = vpop.f32.mrb[80].mxu1 }
0x186e   : > { %v7308_v14 = vadd.f32 %v7307_v12, %v18054_v58  ;;  %v12608_v19 = vpop.f32.mrb[81].mxu1 }
0x1870   : > { %v7311_v23 = vsel %vm19076_vm11, %v7308_v14, 0.0  ;;  %vm19090_vm11 = vmmov %vm19077_vm2 }
0x1871   : > { %v7385_v27 = vadd.f32 %v7311_v23, %v17300_v20 }
0x1873   : > { %vm7395_vm1 = vcmp.gt.f32.partialorder %v7385_v27, 0.0  ;;  %v7396_v31 = vmul.f32 0.01, %v7385_v27 }
0x1875   : > { %v18152_v35 = vsel %vm7395_vm1, %v7385_v27, %v7396_v31  ;;  %vm19091_vm1 = vmmov %vm19079_vm10 }
0x1876   : > { %12682 = vmatmul.mubr.f32.vlgmr.msra.gmra.mrb[82].mxu0 %v18152_v35  ;;  %v14559_v60 = vpack.c.bf16 %v18152_v35, %v18095_v28 }
0x1877   : > { %12733 = vmatprep.mubr.msk.f32.mxu0 %vm18928_vm13, %v18927_v43 }
0x187b   : > { %v7378_v37 = vpop.f32.mrb[80].mxu0 }
0x187c   : > { %v7379_v34 = vadd.f32 %v7378_v37, %v18054_v58  ;;  %v12613_v36 = vpop.f32.mrb[81].mxu0 }
0x187e   : > { %v7382_v57 = vsel %vm19077_vm2, %v7379_v34, 0.0 }
0x187f   : > { %v7386_v46 = vadd.f32 %v7382_v57, %v17373_v6  ;;  %v7169_v6 = vsel %vm19078_vm4, %v7166_v9, 0.0 }
0x1880   : > { %v7383_v32 = vadd.f32 %v7169_v6, %v17533_v17 }
0x1881   : > { %vm7398_vm14 = vcmp.gt.f32.partialorder %v7386_v46, 0.0  ;;  %v7399_v20 = vmul.f32 0.01, %v7386_v46 }
0x1882   : > { %v7390_v56 = vmul.f32 0.01, %v7383_v32  ;;  %vm7389_vm8 = vcmp.gt.f32.partialorder %v7383_v32, 0.0 }
0x1883   : > { %v18161_v50 = vsel %vm7398_vm14, %v7386_v46, %v7399_v20  ;;  %vm19092_vm14 = vmmov %vm19091_vm1 }
0x1884   : > { %12717 = vmatmul.mubr.f32.vlgmr.msra.gmra.mrb[84].mxu1 %v18161_v50  ;;  %v7391_v7 = vsel %vm7389_vm8, %v7383_v32, %v7390_v56  ;;  %v18184_v17 = vpack.c.bf16 %v18161_v50, %v18152_v35 }
0x1885   : > { %12785 = vmatprep.mubr.msk.f32.mxu1 %vm18928_vm13, %v18927_v43  ;;  %v18175_v39 = vpack.c.bf16 %v18095_v28, %v7391_v7 }
0x188d   : > { %v7467_v13 = vpop.f32.mrb[82].mxu1 }
0x188e   : > { %v12648_v45 = vpop.f32.mrb[83].mxu1 }
0x1949   : > { %v7537_v48 = vpop.f32.mrb[82].mxu0 }
0x194a   : > { %v14553_v38 = vpack.c.bf16 %v7537_v48, %v7467_v13  ;;  %v12683_v55 = vpop.f32.mrb[83].mxu0 }
0x194c   : > { %14554 = vmatpush3.bf16.msra.mxu0 %v14553_v38 }
0x194d   : > { %14555 = vmatprep.subr.bf16.mxu0 %v18919_v61 }
0x1957   : > { %v7607_v10 = vpop.f32.mrb[84].mxu1 }
0x1958   : > { %v14556_v40 = vpack.c.bf16 %v7391_v7, %v7607_v10  ;;  %v14586_v5 = vpack.c.bf16 %v7607_v10, %v7537_v48  ;;  %v12718_v42 = vpop.f32.mrb[85].mxu1 }
0x195a   : > { %14557 = vmatpush3.bf16.msra.mxu0 %v14556_v40  ;;  %14587 = vmatpush3.bf16.msra.mxu1 %v14586_v5 }
0x195b   : > { %14558 = vmatprep.subr.bf16.mxu0 %v18919_v61  ;;  %14588 = vmatprep.subr.bf16.mxu1 %v18919_v61 }
0x195e   : > { %14560 = vmatpush3.bf16.msra.mxu0 %v14559_v60  ;;  %14590 = vmatpush3.bf16.msra.mxu1 %v18175_v39 }
0x195f   : > { %12731 = vmatprep.subr.mxu0 %v18927_v43  ;;  %14591 = vmatprep.subr.bf16.mxu1 %v18919_v61 }
0x1962   : > { %12732 = vmatpush3.msra.mxu0 %v18161_v50  ;;  %14593 = vmatpush3.bf16.msra.mxu1 %v18184_v17 }
0x1963   : > { %12734 = vmatmul.mubr.msk.f32.vlgmr.msra.gmra.mrb[84].mxu0 %vm19079_vm10, %v18189_v8  ;;  %14561 = vmatprep.subr.bf16.mxu0 %v18919_v61 }
0x1964   : > { %14563 = vmatpush3.bf16.msk.msra.mxu0 %vm18930_vm7, %v18807_v59  ;;  %12768 = vmatprep.mubr.msk.f32.mxu0 %vm18928_vm13, %v18927_v43 }
0x1965   : > { %14564 = vmatprep.subr.bf16.mxu0 %v18919_v61  ;;  %12783 = vmatprep.subr.mxu1 %v18927_v43 }
0x1968   : > { %14566 = vmatpush3.bf16.msk.msra.mxu0 %vm18931_vm0, %v18807_v59 }
0x1969   : > { %14567 = vmatprep.subr.bf16.mxu0 %v18919_v61 }
0x196c   : > { %14569 = vmatpush3.bf16.msk.msra.mxu0 %vm19080_vm5, %v18807_v59 }
0x196d   : > { %14570 = vmatprep.subr.bf16.mxu0 %v18919_v61 }
0x1970   : > { %14572 = vmatpush3.bf16.msk.msra.mxu0 %vm19081_vm9, %v18807_v59 }
0x1971   : > { %14573 = vmatprep.subr.bf16.mxu0 %v18919_v61 }
0x1974   : > { %14575 = vmatpush3.bf16.msk.msra.mxu0 %vm19083_vm6, %v18807_v59 }
0x1975   : > { %14576 = vmatprep.subr.bf16.mxu0 %v18919_v61 }
0x1978   : > { %14578 = vmatpush3.bf16.msk.msra.mxu0 %vm19085_vm3, %v18807_v59 }
0x1979   : > { %14579 = vmatprep.subr.bf16.mxu0 %v18919_v61 }
0x197c   : > { %14581 = vmatpush3.bf16.msk.msra.mxu0 %vm19087_vm15, %v18807_v59 }
0x197d   : > { %14582 = vmatprep.subr.bf16.mxu0 %v18919_v61 }
0x1980   : > { %14584 = vmatpush3.bf16.msk.msra.mxu0 %vm19089_vm12, %v18807_v59 }
0x1981   : > { %14618 = vmatprep.subr.bf16.mxu0 %v18919_v61 }
0x1983   : > { %12769 = vmatmul.mubr.f32.vlgmr.msra.gmra.mrb[86].mxu0 %v7391_v7 }
0x1984   : > { %14620 = vmatpush3.bf16.msra.mxu0 %v14556_v40  ;;  %12837 = vmatprep.mubr.msk.f32.mxu0 %vm18928_vm13, %v18927_v43 }
0x1985   : > { %14621 = vmatprep.subr.bf16.mxu0 %v18919_v61 }
0x1988   : > { %14623 = vmatpush3.bf16.msra.mxu0 %v14559_v60 }
0x1989   : > { %14624 = vmatprep.subr.bf16.mxu0 %v18919_v61 }
0x1a36   : > { %v7685_v53 = vpop.f32.mrb[84].mxu0 }
0x1a37   : > { %v7686_v29 = vadd.f32 %v7685_v53, %v18235_v62  ;;  %v12735_v33 = vpop.f32.mrb[85].mxu0 }
0x1a39   : > { %v7689_v4 = vsel %vm19090_vm11, %v7686_v29, 0.0 }
0x1a3a   : > { %v8113_v54 = vsub.f32 0.0, %v7689_v4 }
0x1a3c   : > { %v8114_v49 = vmul.f32 1.442695, %v8113_v54 }
0x1a3e   : > { %14708 = vpow2.f32 %v8114_v49 }
0x1a48   : > { %v14709_v0 = vpop.eup %14708 }
0x1a49   : > { %v8116_v21 = vadd.f32 1.0, %v14709_v0 }
0x1a4b   : > { %14710 = vrcp.f32 %v8116_v21 }
0x1a55   : > { %v14711_v25 = vpop.eup %14710 }
0x1a56   : > { %v8120_v3 = vrot.slane %v14711_v25, 2  ;;  %v7756_v52 = vpop.f32.mrb[86].mxu0 }
0x1a57   : > { %v14625_v41 = vpack.c.bf16 %v7756_v52, %v18161_v50  ;;  %v12770_v58 = vpop.f32.mrb[87].mxu0  ;;  %12784 = vmatpush3.msra.mxu1 %v7756_v52 }
0x1a58   : > { %v8122_v44 = vmul.f32 %v8120_v3, %v7689_v4  ;;  %12786 = vmatmul.mubr.msk.f32.vlgmr.msra.gmra.mrb[86].mxu1 %vm19091_vm1, %v18189_v8  ;;  %14594 = vmatprep.subr.bf16.mxu1 %v18919_v61 }
0x1a59   : > { %14596 = vmatpush3.bf16.msk.msra.mxu1 %vm18930_vm7, %v18807_v59  ;;  %14626 = vmatpush3.bf16.msra.mxu0 %v14625_v41 }
0x1a5a   : > { %8153 = vst [vmem:[%s18250_s6] sm:$0x3] %v8122_v44  ;;  %14597 = vmatprep.subr.bf16.mxu1 %v18919_v61  ;;  %12820 = vmatprep.mubr.msk.f32.mxu1 %vm18928_vm13, %v18927_v43 }
0x1a5b   : > { %12835 = vmatprep.subr.mxu0 %v18927_v43 }
0x1a5d   : > { %14599 = vmatpush3.bf16.msk.msra.mxu1 %vm18931_vm0, %v18807_v59 }
0x1a5e   : > { %14600 = vmatprep.subr.bf16.mxu1 %v18919_v61 }
0x1a61   : > { %14602 = vmatpush3.bf16.msk.msra.mxu1 %vm19080_vm5, %v18807_v59 }
0x1a62   : > { %14603 = vmatprep.subr.bf16.mxu1 %v18919_v61 }
0x1a65   : > { %14605 = vmatpush3.bf16.msk.msra.mxu1 %vm19081_vm9, %v18807_v59 }
0x1a66   : > { %14606 = vmatprep.subr.bf16.mxu1 %v18919_v61 }
0x1a69   : > { %14608 = vmatpush3.bf16.msk.msra.mxu1 %vm19083_vm6, %v18807_v59 }
0x1a6a   : > { %14609 = vmatprep.subr.bf16.mxu1 %v18919_v61 }
0x1a6d   : > { %14611 = vmatpush3.bf16.msk.msra.mxu1 %vm19085_vm3, %v18807_v59 }
0x1a6e   : > { %14612 = vmatprep.subr.bf16.mxu1 %v18919_v61 }
0x1a71   : > { %14614 = vmatpush3.bf16.msk.msra.mxu1 %vm19087_vm15, %v18807_v59 }
0x1a72   : > { %14615 = vmatprep.subr.bf16.mxu1 %v18919_v61 }
0x1a75   : > { %14617 = vmatpush3.bf16.msk.msra.mxu1 %vm19089_vm12, %v18807_v59 }
0x1a76   : > { %14651 = vmatprep.subr.bf16.mxu1 %v18919_v61 }
0x1a78   : > { %12821 = vmatmul.mubr.f32.vlgmr.msra.gmra.mrb[88].mxu1 %v18095_v28 }
0x1a79   : > { %14653 = vmatpush3.bf16.msra.mxu1 %v18175_v39  ;;  %12889 = vmatprep.mubr.msk.f32.mxu1 %vm18928_vm13, %v18927_v43 }
0x1a7a   : > { %14654 = vmatprep.subr.bf16.mxu1 %v18919_v61 }
0x1a7d   : > { %14656 = vmatpush3.bf16.msra.mxu1 %v18184_v17 }
0x1a7e   : > { %14657 = vmatprep.subr.bf16.mxu1 %v18919_v61 }
0x1b2b   : > { %v7826_v24 = vpop.f32.mrb[86].mxu1 }
0x1b2c   : > { %v7827_v63 = vadd.f32 %v7826_v24, %v18235_v62  ;;  %v12787_v51 = vpop.f32.mrb[87].mxu1 }
0x1b2e   : > { %v7830_v30 = vsel %vm19077_vm2, %v7827_v63, 0.0 }
0x1b2f   : > { %v8123_v12 = vsub.f32 0.0, %v7830_v30 }
0x1b31   : > { %v8124_v28 = vmul.f32 1.442695, %v8123_v12 }
0x1b33   : > { %14712 = vpow2.f32 %v8124_v28 }
0x1b3d   : > { %v14713_v14 = vpop.eup %14712 }
0x1b3e   : > { %v8126_v19 = vadd.f32 1.0, %v14713_v14 }
0x1b40   : > { %14714 = vrcp.f32 %v8126_v19 }
0x1b4a   : > { %v14715_v23 = vpop.eup %14714 }
0x1b4b   : > { %v8130_v27 = vrot.slane %v14715_v23, 2  ;;  %v7897_v31 = vpop.f32.mrb[88].mxu1 }
0x1b4c   : > { %v14658_v37 = vpack.c.bf16 %v7897_v31, %v7756_v52  ;;  %v12822_v34 = vpop.f32.mrb[89].mxu1  ;;  %12836 = vmatpush3.msra.mxu0 %v7897_v31 }
0x1b4d   : > { %v8132_v36 = vmul.f32 %v8130_v27, %v7830_v30  ;;  %12838 = vmatmul.mubr.msk.f32.vlgmr.msra.gmra.mrb[88].mxu0 %vm19092_vm14, %v18189_v8  ;;  %14627 = vmatprep.subr.bf16.mxu0 %v18919_v61 }
0x1b4e   : > { %14629 = vmatpush3.bf16.msk.msra.mxu0 %vm18930_vm7, %v18807_v59  ;;  %14659 = vmatpush3.bf16.msra.mxu1 %v14658_v37  ;;  %vm19095_vm7 = vmmov %vm19091_vm1 }
0x1b4f   : > { %9314 = vst [vmem:[%s18250_s6 + $0x2] sm:$0x3] %v8132_v36  ;;  %14630 = vmatprep.subr.bf16.mxu0 %v18919_v61  ;;  %12872 = vmatprep.mubr.msk.f32.mxu0 %vm18928_vm13, %v18927_v43  ;;  %vm19093_vm13 = vmmov %vm19077_vm2 }
0x1b50   : > { %12887 = vmatprep.subr.mxu1 %v18927_v43 }
0x1b52   : > { %14632 = vmatpush3.bf16.msk.msra.mxu0 %vm18931_vm0, %v18807_v59  ;;  %vm19096_vm0 = vmmov %vm19077_vm2 }
0x1b53   : > { %14633 = vmatprep.subr.bf16.mxu0 %v18919_v61 }
0x1b56   : > { %14635 = vmatpush3.bf16.msk.msra.mxu0 %vm19080_vm5, %v18807_v59 }
0x1b57   : > { %14636 = vmatprep.subr.bf16.mxu0 %v18919_v61 }
0x1b5a   : > { %14638 = vmatpush3.bf16.msk.msra.mxu0 %vm19081_vm9, %v18807_v59 }
0x1b5b   : > { %14639 = vmatprep.subr.bf16.mxu0 %v18919_v61 }
0x1b5e   : > { %14641 = vmatpush3.bf16.msk.msra.mxu0 %vm19083_vm6, %v18807_v59 }
0x1b5f   : > { %14642 = vmatprep.subr.bf16.mxu0 %v18919_v61 }
0x1b62   : > { %14644 = vmatpush3.bf16.msk.msra.mxu0 %vm19085_vm3, %v18807_v59 }
0x1b63   : > { %14645 = vmatprep.subr.bf16.mxu0 %v18919_v61 }
0x1b66   : > { %14647 = vmatpush3.bf16.msk.msra.mxu0 %vm19087_vm15, %v18807_v59 }
0x1b67   : > { %14648 = vmatprep.subr.bf16.mxu0 %v18919_v61 }
0x1b6a   : > { %14650 = vmatpush3.bf16.msk.msra.mxu0 %vm19089_vm12, %v18807_v59 }
0x1b6d   : > { %12873 = vmatmul.mubr.f32.vlgmr.msra.gmra.mrb[90].mxu0 %v18152_v35 }
0x1c20   : > { %v7967_v15 = vpop.f32.mrb[88].mxu0 }
0x1c21   : > { %v7968_v18 = vadd.f32 %v7967_v15, %v18235_v62  ;;  %v12839_v22 = vpop.f32.mrb[89].mxu0 }
0x1c23   : > { %v7971_v26 = vsel %vm19093_vm13, %v7968_v18, 0.0 }
0x1c24   : > { %v8133_v43 = vsub.f32 0.0, %v7971_v26 }
0x1c26   : > { %v8134_v57 = vmul.f32 1.442695, %v8133_v43 }
0x1c28   : > { %14716 = vpow2.f32 %v8134_v57 }
0x1c32   : > { %v14717_v46 = vpop.eup %14716 }
0x1c33   : > { %v8136_v20 = vadd.f32 1.0, %v14717_v46 }
0x1c35   : > { %14718 = vrcp.f32 %v8136_v20 }
0x1c3f   : > { %v14719_v61 = vpop.eup %14718 }
0x1c40   : > { %v8140_v50 = vrot.slane %v14719_v61, 2  ;;  %v8038_v13 = vpop.f32.mrb[90].mxu0 }
0x1c41   : > { %v12874_v59 = vpop.f32.mrb[91].mxu0  ;;  %12888 = vmatpush3.msra.mxu1 %v8038_v13 }
0x1c42   : > { %v8142_v35 = vmul.f32 %v8140_v50, %v7971_v26  ;;  %12890 = vmatmul.mubr.msk.f32.vlgmr.msra.gmra.mrb[90].mxu1 %vm19095_vm7, %v18189_v8 }
0x1c44   : > { %9315 = vst [vmem:[%s18250_s6 + $0x4] sm:$0x3] %v8142_v35 }
0x1d15   : > { %v8108_v45 = vpop.f32.mrb[90].mxu1 }
0x1d16   : > { %v8109_v9 = vadd.f32 %v8108_v45, %v18235_v62  ;;  %v12891_v48 = vpop.f32.mrb[91].mxu1 }
0x1d18   : > { %v8112_v38 = vsel %vm19096_vm0, %v8109_v9, 0.0 }
0x1d19   : > { %v8143_v55 = vsub.f32 0.0, %v8112_v38 }
0x1d1b   : > { %v8144_v6 = vmul.f32 1.442695, %v8143_v55 }
0x1d1d   : > { %14720 = vpow2.f32 %v8144_v6 }
0x1d27   : > { %v14721_v32 = vpop.eup %14720 }
0x1d28   : > { %v8146_v56 = vadd.f32 1.0, %v14721_v32 }
0x1d2a   : > { %14722 = vrcp.f32 %v8146_v56 }
0x1d34   : > { %v14723_v7 = vpop.eup %14722 }
0x1d35   : > { %v8150_v10 = vrot.slane %v14723_v7, 2 }
0x1d37   : > { %v8152_v40 = vmul.f32 %v8150_v10, %v8112_v38 }
0x1d39   : > { %9316 = vst [vmem:[%s18250_s6 + $0x6] sm:$0x3] %v8152_v40 }
0x1d3a   : > { %14737 = shalt.err (!%p14734_p3)
}
0x1d3b   : > { %s14738_s0 = scalar_lea.hbm %s18350_s3, 128  ;;  %s14742_s6 = scalar_lea.hbm %s19098_s1, 256 }
0x1d3c   : > { %p14739_p4 = scmp.ne.s32.totalorder %s18350_s3, %s14738_s0  ;;  %p14743_p9 = scmp.lt.u32.totalorder %s18350_s3, %s19098_s1 }
0x1d3d   : > { %p14744_p10 = scmp.lt.u32.totalorder %s14742_s6, %s14738_s0  ;;  %p14746_p12 = scmp.lt.u32.totalorder %s14738_s0, %s18350_s3 }
0x1d3e   : > { %p14740_p7 = pnand %p14739_p4, %p14964_p5 }
0x1d3f   : > { %p14745_p11 = por %p14744_p10, %p14743_p9 }
0x1d40   : > { %p14741_p8 = pneg %p14740_p7 }
0x1d41   : > { %p14747_p13 = por %p14746_p12, %p14745_p11 }
0x1d43   : > { %p14748_p0 = pnand %p14747_p13, %p14741_p8 }
0x1d45   : > { %14751 = shalt.err (!%p14748_p0)
}
0x1d46   : > { %s14794_s10 = smov 32   ;;  %s14795_s12 = smov 2  }
0x1d47   : > { %14660 = dma.vmem_to_hbm [thread:$0]  (%p14964_p5), %s18345_s9, 128, %s18350_s3, %s18355_s8, %s14794_s10, %s14794_s10, %s14795_s12  }
0x1d48 PF: > { %s19100_s30 = sld [smem:[#allocation7_spill]]  ;;  %s19101_s4 = sld [smem:[#allocation5_spill]] }
0x1d4e   : > { %p14666_p1 = scmp.ge.s32.totalorder %s19100_s30, 2  ;;  %s8189_s29 = sand.u32 1, %s19101_s4  }
0x1d4f   : > { %s8190_s0 = scalar_lea.sflag [#allocation3], %s8189_s29 }
0x1d50   : > { %p14663_p2 = pnand %p14666_p1, %p14968_p6 }
0x1d52   : > { %14769 = dma.done.wait (!%p14663_p2), %s8190_s0, 128  }
0x1d53   : > { %14771 = vsyncadd (!%p14663_p2), %s8190_s0, 4294967168  ;;  %s19103_s30 = sld [smem:[#allocation9_spill]]  ;;  %s19104_s6 = sld [smem:[#allocation6_spill]] }
0x1d54   : > { %s19105_s11 = sld [smem:[#allocation10_spill]]  ;;  %s19106_s29 = smov %s14778_s2 }
0x1d59   : > { %p35_p3 = scmp.ge.s32.totalorder %s19103_s30, 4   ;;  %s19107_s2 = smov %s19104_s6 }
0x1d5a   : > { %s19108_s6 = smov %s19105_s11 }
0x1d5b   :  { %37 = sbr.rel (!%p35_p3) target bundleno = 18 (0x12), region = 158 }
0x1d62   :  { %8195 = vsyncpa [#allocation3], 1 }
0x1d63   :  { %8197 = vsyncpa [#allocation3 + $0x1], 1 }

</bundles_post_ra>
